<compile_context>
chip_gen: v7x
topology: tpu7x:2x2x1
jax: 0.10.0
libtpu: 0.0.40
codegen_flags: <defaults>
</compile_context>

<pallas_src>
import functools

import jax
import jax.numpy as jnp
from jax.experimental import pallas as pl
from jax.experimental.pallas import tpu as pltpu

NEG_SLOPE = 0.2
BN_EPS = 1e-5


# ----------------------------------------------------------------------------
# Glue (plain JAX): knn + graph-feature gather (data-dependent gather).
# At toy sizes (N=32) the materialized feature tensor is ~40 KB.
# ----------------------------------------------------------------------------
def knn_idx(x, k):
    # x: (B, C, N)
    inner = -2.0 * jnp.einsum("bcn,bcm->bnm", x, x)
    xx = jnp.sum(x * x, axis=1, keepdims=True)                  # (B, 1, N)
    pairwise = -xx - inner - jnp.transpose(xx, (0, 2, 1))       # (B, N, N)
    return jax.lax.top_k(pairwise, k)[1]                        # (B, N, k)


def graph_feature(x, idx):
    # x: (B, C, N), idx: (B, N, k) -> (B, k, N, 2C) channels-last
    xt = jnp.transpose(x, (0, 2, 1))                            # (B, N, C)
    nbr = jax.vmap(lambda pts, ii: pts[ii])(xt, idx)            # (B, N, k, C)
    center = jnp.broadcast_to(xt[:, :, None, :], nbr.shape)     # (B, N, k, C)
    feat = jnp.concatenate([nbr - center, center], axis=-1)     # (B, N, k, 2C)
    return jnp.transpose(feat, (0, 2, 1, 3))                    # (B, k, N, 2C)


# ----------------------------------------------------------------------------
# Kernel A (fused, single grid step): edge conv (Conv2d 1x1 + folded BN + LReLU)
# + max over k neighbors + exit1_conv (Conv1d 1x1 + folded BN + LReLU)
# + global max/avg pool. Output (B, 512), lane-dense.
# ----------------------------------------------------------------------------
def edge_conv_pool_kernel(feat_ref, w1_ref, b1_ref, w2_ref, b2_ref, out_ref,
                          *, B, K, N):
    cout = out_ref.shape[1] // 2                                            # 256

    f = feat_ref[...]                                                       # (B*K*N, 8)
    h = jnp.dot(f, w1_ref[...], preferred_element_type=jnp.float32)
    h = h + b1_ref[...]
    h = jnp.where(h > 0, h, NEG_SLOPE * h)                                  # (B*K*N, 64)

    # max over the K neighbor groups per batch, unrolled (B, K static; N mult of 8).
    ms = []
    for b in range(B):
        base = b * K * N
        m = h[base:base + N, :]
        for kk in range(1, K):
            m = jnp.maximum(m, h[base + kk * N:base + (kk + 1) * N, :])     # (N, 64)
        ms.append(m)
    m_all = ms[0] if B == 1 else jnp.concatenate(ms, axis=0)                # (B*N, 64)

    g = jnp.dot(m_all, w2_ref[...], preferred_element_type=jnp.float32)
    g = g + b2_ref[...]
    g = jnp.where(g > 0, g, NEG_SLOPE * g)                                  # (B*N, 256)

    # per-batch global max / avg pool; two lane-aligned slice stores per row.
    for b in range(B):
        gb = g[b * N:(b + 1) * N, :]
        out_ref[b:b + 1, 0:cout] = jnp.max(gb, axis=0, keepdims=True)       # (1, 256)
        out_ref[b:b + 1, cout:2 * cout] = jnp.mean(gb, axis=0, keepdims=True)


def edge_conv_pool(feat, w1f, b1f, w2f, b2f):
    # feat: (B, K, N, 2C); w1f/w2f already BN-folded, b1f/b2f are (1, D) rows.
    B, K, N, C2 = feat.shape
    C2P = 8                                  # pad contraction dim 6 -> 8 (sublane aligned)
    feat = jnp.pad(feat, ((0, 0), (0, 0), (0, 0), (0, C2P - C2)))
    feat = feat.reshape(B * K * N, C2P)
    w1p = jnp.pad(w1f, ((0, C2P - C2), (0, 0)))
    Cmid = w1f.shape[1]                      # 64
    Cout = w2f.shape[1]                      # 256

    return pl.pallas_call(
        functools.partial(edge_conv_pool_kernel, B=B, K=K, N=N),
        out_shape=jax.ShapeDtypeStruct((B, 2 * Cout), jnp.float32),
        grid=(1,),
        in_specs=[
            pl.BlockSpec((B * K * N, C2P), lambda i: (0, 0)),
            pl.BlockSpec((C2P, Cmid), lambda i: (0, 0)),
            pl.BlockSpec((1, Cmid), lambda i: (0, 0)),
            pl.BlockSpec((Cmid, Cout), lambda i: (0, 0)),
            pl.BlockSpec((1, Cout), lambda i: (0, 0)),
        ],
        out_specs=pl.BlockSpec((B, 2 * Cout), lambda i: (0, 0)),
        compiler_params=pltpu.CompilerParams(
            dimension_semantics=("arbitrary",)),
    )(feat, w1p, b1f, w2f, b2f)


# ----------------------------------------------------------------------------
# Kernel B: exit1_fc2 + awgn_channel + exit1_predict (fused MLP head).
# grid = (1,), whole-batch blocks (tiny B; weight-streaming / HBM bound).
# All weights arrive pre-folded (BN absorbed) and pre-cast to bf16; the MXU
# consumes bf16 directly with f32 accumulation (no in-kernel weight upcast).
# ----------------------------------------------------------------------------
def head_kernel(noise_factor, x_ref, noise_ref,
                wf_ref, bf_ref, w1_ref, b1_ref, w2_ref, b2_ref,
                w3_ref, b3_ref, w4_ref, b4_ref, out_ref):

    def lin_lrelu(h, w_ref, b_ref):
        h = jnp.dot(h.astype(jnp.bfloat16), w_ref[...],
                    preferred_element_type=jnp.float32) + b_ref[...]
        return jnp.where(h > 0, h, NEG_SLOPE * h)

    h = x_ref[...]                                                        # (B, 512)
    h = lin_lrelu(h, wf_ref, bf_ref)                                      # fc2 -> (B, 1536)

    # awgn_channel: F.normalize(p=2, dim=1, eps=1e-12) + randn * noise_factor
    ss = jnp.sum(h * h, axis=1, keepdims=True)
    h = h * jax.lax.rsqrt(jnp.maximum(ss, 1e-24))
    h = h + noise_ref[...] * noise_factor

    # exit1_predict (Dropout layers are identity in eval mode)
    h = lin_lrelu(h, w1_ref, b1_ref)                                      # (B, 512)
    h = lin_lrelu(h, w2_ref, b2_ref)                                      # (B, 256)
    h = lin_lrelu(h, w3_ref, b3_ref)                                      # (B, 128)
    h = lin_lrelu(h, w4_ref, b4_ref)                                      # (B, 40)
    out_ref[...] = h


def head(x, noise, head_params, noise_factor):
    # head_params: list of (w_bf16 (Din,Dout), b_f32 (1,Dout)) already folded + cast.
    B = x.shape[0]
    flat = []
    for w, b in head_params:
        flat += [w, b]
    args = [x, noise] + flat

    def full_spec(a):
        nd = a.ndim
        return pl.BlockSpec(a.shape, lambda i, nd=nd: (0,) * nd)

    return pl.pallas_call(
        functools.partial(head_kernel, noise_factor),
        out_shape=jax.ShapeDtypeStruct((B, 40), jnp.float32),
        grid=(1,),
        in_specs=[full_spec(a) for a in args],
        out_specs=pl.BlockSpec((B, 40), lambda i: (0, 0)),
        compiler_params=pltpu.CompilerParams(
            vmem_limit_bytes=32 * 1024 * 1024),
    )(*args)


# ----------------------------------------------------------------------------
# Parameter preparation (done ONCE, outside the per-call path):
#   - fold BatchNorm (inference form) into weights / biases in f32 (exact),
#   - cast all head weight matrices to bf16 for streaming.
# ----------------------------------------------------------------------------
def fold_bn_into_linear(w, b, gamma, beta, mean, var, eps=BN_EPS):
    # y = ((x @ w + b) - mean) * s + beta  ==  x @ (w * s) + ((b - mean) * s + beta)
    s = gamma / jnp.sqrt(var + eps)
    wf = w * s[None, :]
    b0 = b if b is not None else jnp.zeros_like(mean)
    bf = (b0 - mean) * s + beta
    return wf, bf


def prepare_params(conv1, exit1_conv, head_raw):
    (w1, bn1), (w2, bn2) = conv1, exit1_conv
    w1f, b1f = fold_bn_into_linear(w1, None, *bn1)
    w2f, b2f = fold_bn_into_linear(w2, None, *bn2)

    head_folded = []
    for (w, b, bn) in head_raw:
        wf, bf = fold_bn_into_linear(w, b, *bn)           # fold in f32 (exact)
        head_folded.append((wf.astype(jnp.bfloat16),      # stream all head weights bf16
                            bf.reshape(1, -1)))
    return (w1f, b1f.reshape(1, -1), w2f, b2f.reshape(1, -1), head_folded)


# ----------------------------------------------------------------------------
# Full forward
# ----------------------------------------------------------------------------
def dgcnn_exit1_forward(x, params, noise, k, noise_factor):
    w1f, b1f, w2f, b2f, head_params = params
    idx = knn_idx(x, k)                                           # glue: topk
    feat = graph_feature(x, idx)                                  # glue: gather (B,K,N,2C)
    pooled = edge_conv_pool(feat, w1f, b1f, w2f, b2f)             # (B, 512)
    return head(pooled, noise, head_params, noise_factor)         # (B, 40)


# ----------------------------------------------------------------------------
# Deterministic parameter construction
# ----------------------------------------------------------------------------
def init_bn(key, dim):
    k1, k2, k3, k4 = jax.random.split(key, 4)
    gamma = 1.0 + 0.1 * jax.random.normal(k1, (dim,), dtype=jnp.float32)
    beta = 0.1 * jax.random.normal(k2, (dim,), dtype=jnp.float32)
    mean = 0.1 * jax.random.normal(k3, (dim,), dtype=jnp.float32)
    var = 0.5 + jax.random.uniform(k4, (dim,), dtype=jnp.float32)
    return (gamma, beta, mean, var)


def init_linear(key, din, dout, bias=True):
    k1, k2 = jax.random.split(key)
    lim = 1.0 / (din ** 0.5)
    w = jax.random.uniform(k1, (din, dout), minval=-lim, maxval=lim,
                           dtype=jnp.float32)
    b = (jax.random.uniform(k2, (dout,), minval=-lim, maxval=lim,
                            dtype=jnp.float32) if bias else None)
    return w, b


if __name__ == "__main__":
    B, C, N, K = 2, 3, 32, 20
    key = jax.random.PRNGKey(0)
    kx, knoise, kp = jax.random.split(key, 3)

    x = jax.random.normal(kx, (B, C, N), dtype=jnp.float32)       # point cloud (B, 3, N)
    noise = jax.random.normal(knoise, (B, 1536), dtype=jnp.float32)

    pk = jax.random.split(kp, 14)
    # DGCNN.conv1: Conv2d(6, 64, 1, bias=False) + BN2d(64)
    w1, _ = init_linear(pk[0], 2 * C, 64, bias=False)
    bn1 = init_bn(pk[1], 64)
    # exit1_conv: Conv1d(64, 256, 1, bias=False) + BN1d(256)
    w2, _ = init_linear(pk[2], 64, 256, bias=False)
    bn2 = init_bn(pk[3], 256)
    # exit1_fc2: Linear(512, 1536) + BN1d(1536)
    wf, bf = init_linear(pk[4], 512, 1536); bnf = init_bn(pk[5], 1536)
    # exit1_predict
    wp1, bp1 = init_linear(pk[6], 1536, 512); bnp1 = init_bn(pk[7], 512)
    wp2, bp2 = init_linear(pk[8], 512, 256);  bnp2 = init_bn(pk[9], 256)
    wp3, bp3 = init_linear(pk[10], 256, 128); bnp3 = init_bn(pk[11], 128)
    wp4, bp4 = init_linear(pk[12], 128, 40);  bnp4 = init_bn(pk[13], 40)

    head_raw = [
        (wf, bf, bnf),
        (wp1, bp1, bnp1),
        (wp2, bp2, bnp2),
        (wp3, bp3, bnp3),
        (wp4, bp4, bnp4),
    ]
    # BN folding + bf16 weight cast done once, outside the per-call path.
    params = prepare_params((w1, bn1), (w2, bn2), head_raw)

    fwd = jax.jit(functools.partial(dgcnn_exit1_forward, k=K, noise_factor=0.1))
    out = fwd(x, params, noise)
    out = jax.block_until_ready(out)
    assert out.shape == (B, 40) and out.dtype == jnp.float32
    print("KERNEL_OK")
</pallas_src>

<mosaic_0001>
module attributes {stable_mosaic.version = 11 : i64} {
  func.func @edge_conv_pool_kernel(%arg0: i32, %arg1: memref<1280x8xf32, #tpu.memory_space<vmem>>, %arg2: memref<8x64xf32, #tpu.memory_space<vmem>>, %arg3: memref<1x64xf32, #tpu.memory_space<vmem>>, %arg4: memref<64x256xf32, #tpu.memory_space<vmem>>, %arg5: memref<1x256xf32, #tpu.memory_space<vmem>>, %arg6: memref<2x512xf32, #tpu.memory_space<vmem>>) attributes {dimension_semantics = [#tpu.dimension_semantics<arbitrary>], iteration_bounds = array<i64: 1>, scalar_prefetch = 0 : i64, scratch_operands = 0 : i64, tpu.core_type = #tpu.core_type<tc>, window_params = [{pipeline_mode = #tpu.pipeline_mode<synchronous>, transform_indices = @transform_0, window_bounds = array<i64: 1280, 8>}, {pipeline_mode = #tpu.pipeline_mode<synchronous>, transform_indices = @transform_1, window_bounds = array<i64: 8, 64>}, {pipeline_mode = #tpu.pipeline_mode<synchronous>, transform_indices = @transform_2, window_bounds = array<i64: 1, 64>}, {pipeline_mode = #tpu.pipeline_mode<synchronous>, transform_indices = @transform_3, window_bounds = array<i64: 64, 256>}, {pipeline_mode = #tpu.pipeline_mode<synchronous>, transform_indices = @transform_4, window_bounds = array<i64: 1, 256>}, {pipeline_mode = #tpu.pipeline_mode<synchronous>, transform_indices = @transform_5, window_bounds = array<i64: 2, 512>}]} {
    %c0 = arith.constant 0 : index
    %c0_0 = arith.constant 0 : index
    %0 = vector.load %arg1[%c0, %c0_0] : memref<1280x8xf32, #tpu.memory_space<vmem>>, vector<1280x8xf32>
    %c0_1 = arith.constant 0 : index
    %c0_2 = arith.constant 0 : index
    %1 = vector.load %arg2[%c0_1, %c0_2] : memref<8x64xf32, #tpu.memory_space<vmem>>, vector<8x64xf32>
    %cst = arith.constant dense<0.000000e+00> : vector<1280x64xf32>
    %2 = tpu.matmul %0, %1, %cst {dimension_numbers = #tpu.dot_dimension_numbers<[1], [0], [0], [1], [0, 0, 1, 1], [], []>} : vector<1280x8xf32>, vector<8x64xf32>, vector<1280x64xf32> -> vector<1280x64xf32>
    %c0_3 = arith.constant 0 : index
    %c0_4 = arith.constant 0 : index
    %3 = vector.load %arg3[%c0_3, %c0_4] : memref<1x64xf32, #tpu.memory_space<vmem>>, vector<1x64xf32>
    %4 = vector.broadcast %3 : vector<1x64xf32> to vector<1280x64xf32>
    %5 = arith.addf %2, %4 : vector<1280x64xf32>
    %cst_5 = arith.constant 0.000000e+00 : f32
    %6 = vector.broadcast %cst_5 : f32 to vector<1280x64xf32>
    %7 = arith.cmpf ogt, %5, %6 : vector<1280x64xf32>
    %cst_6 = arith.constant 2.000000e-01 : f32
    %8 = vector.broadcast %cst_6 : f32 to vector<1280x64xf32>
    %9 = arith.mulf %8, %5 : vector<1280x64xf32>
    %10 = arith.select %7, %5, %9 : vector<1280x64xi1>, vector<1280x64xf32>
    %11 = vector.extract_strided_slice %10 {offsets = [0, 0], sizes = [32, 64], strides = [1, 1]} : vector<1280x64xf32> to vector<32x64xf32>
    %12 = vector.extract_strided_slice %10 {offsets = [32, 0], sizes = [32, 64], strides = [1, 1]} : vector<1280x64xf32> to vector<32x64xf32>
    %13 = arith.maximumf %11, %12 : vector<32x64xf32>
    %14 = vector.extract_strided_slice %10 {offsets = [64, 0], sizes = [32, 64], strides = [1, 1]} : vector<1280x64xf32> to vector<32x64xf32>
    %15 = arith.maximumf %13, %14 : vector<32x64xf32>
    %16 = vector.extract_strided_slice %10 {offsets = [96, 0], sizes = [32, 64], strides = [1, 1]} : vector<1280x64xf32> to vector<32x64xf32>
    %17 = arith.maximumf %15, %16 : vector<32x64xf32>
    %18 = vector.extract_strided_slice %10 {offsets = [128, 0], sizes = [32, 64], strides = [1, 1]} : vector<1280x64xf32> to vector<32x64xf32>
    %19 = arith.maximumf %17, %18 : vector<32x64xf32>
    %20 = vector.extract_strided_slice %10 {offsets = [160, 0], sizes = [32, 64], strides = [1, 1]} : vector<1280x64xf32> to vector<32x64xf32>
    %21 = arith.maximumf %19, %20 : vector<32x64xf32>
    %22 = vector.extract_strided_slice %10 {offsets = [192, 0], sizes = [32, 64], strides = [1, 1]} : vector<1280x64xf32> to vector<32x64xf32>
    %23 = arith.maximumf %21, %22 : vector<32x64xf32>
    %24 = vector.extract_strided_slice %10 {offsets = [224, 0], sizes = [32, 64], strides = [1, 1]} : vector<1280x64xf32> to vector<32x64xf32>
    %25 = arith.maximumf %23, %24 : vector<32x64xf32>
    %26 = vector.extract_strided_slice %10 {offsets = [256, 0], sizes = [32, 64], strides = [1, 1]} : vector<1280x64xf32> to vector<32x64xf32>
    %27 = arith.maximumf %25, %26 : vector<32x64xf32>
    %28 = vector.extract_strided_slice %10 {offsets = [288, 0], sizes = [32, 64], strides = [1, 1]} : vector<1280x64xf32> to vector<32x64xf32>
    %29 = arith.maximumf %27, %28 : vector<32x64xf32>
    %30 = vector.extract_strided_slice %10 {offsets = [320, 0], sizes = [32, 64], strides = [1, 1]} : vector<1280x64xf32> to vector<32x64xf32>
    %31 = arith.maximumf %29, %30 : vector<32x64xf32>
    %32 = vector.extract_strided_slice %10 {offsets = [352, 0], sizes = [32, 64], strides = [1, 1]} : vector<1280x64xf32> to vector<32x64xf32>
    %33 = arith.maximumf %31, %32 : vector<32x64xf32>
    %34 = vector.extract_strided_slice %10 {offsets = [384, 0], sizes = [32, 64], strides = [1, 1]} : vector<1280x64xf32> to vector<32x64xf32>
    %35 = arith.maximumf %33, %34 : vector<32x64xf32>
    %36 = vector.extract_strided_slice %10 {offsets = [416, 0], sizes = [32, 64], strides = [1, 1]} : vector<1280x64xf32> to vector<32x64xf32>
    %37 = arith.maximumf %35, %36 : vector<32x64xf32>
    %38 = vector.extract_strided_slice %10 {offsets = [448, 0], sizes = [32, 64], strides = [1, 1]} : vector<1280x64xf32> to vector<32x64xf32>
    %39 = arith.maximumf %37, %38 : vector<32x64xf32>
    %40 = vector.extract_strided_slice %10 {offsets = [480, 0], sizes = [32, 64], strides = [1, 1]} : vector<1280x64xf32> to vector<32x64xf32>
    %41 = arith.maximumf %39, %40 : vector<32x64xf32>
    %42 = vector.extract_strided_slice %10 {offsets = [512, 0], sizes = [32, 64], strides = [1, 1]} : vector<1280x64xf32> to vector<32x64xf32>
    %43 = arith.maximumf %41, %42 : vector<32x64xf32>
    %44 = vector.extract_strided_slice %10 {offsets = [544, 0], sizes = [32, 64], strides = [1, 1]} : vector<1280x64xf32> to vector<32x64xf32>
    %45 = arith.maximumf %43, %44 : vector<32x64xf32>
    %46 = vector.extract_strided_slice %10 {offsets = [576, 0], sizes = [32, 64], strides = [1, 1]} : vector<1280x64xf32> to vector<32x64xf32>
    %47 = arith.maximumf %45, %46 : vector<32x64xf32>
    %48 = vector.extract_strided_slice %10 {offsets = [608, 0], sizes = [32, 64], strides = [1, 1]} : vector<1280x64xf32> to vector<32x64xf32>
    %49 = arith.maximumf %47, %48 : vector<32x64xf32>
    %50 = vector.extract_strided_slice %10 {offsets = [640, 0], sizes = [32, 64], strides = [1, 1]} : vector<1280x64xf32> to vector<32x64xf32>
    %51 = vector.extract_strided_slice %10 {offsets = [672, 0], sizes = [32, 64], strides = [1, 1]} : vector<1280x64xf32> to vector<32x64xf32>
    %52 = arith.maximumf %50, %51 : vector<32x64xf32>
    %53 = vector.extract_strided_slice %10 {offsets = [704, 0], sizes = [32, 64], strides = [1, 1]} : vector<1280x64xf32> to vector<32x64xf32>
    %54 = arith.maximumf %52, %53 : vector<32x64xf32>
    %55 = vector.extract_strided_slice %10 {offsets = [736, 0], sizes = [32, 64], strides = [1, 1]} : vector<1280x64xf32> to vector<32x64xf32>
    %56 = arith.maximumf %54, %55 : vector<32x64xf32>
    %57 = vector.extract_strided_slice %10 {offsets = [768, 0], sizes = [32, 64], strides = [1, 1]} : vector<1280x64xf32> to vector<32x64xf32>
    %58 = arith.maximumf %56, %57 : vector<32x64xf32>
    %59 = vector.extract_strided_slice %10 {offsets = [800, 0], sizes = [32, 64], strides = [1, 1]} : vector<1280x64xf32> to vector<32x64xf32>
    %60 = arith.maximumf %58, %59 : vector<32x64xf32>
    %61 = vector.extract_strided_slice %10 {offsets = [832, 0], sizes = [32, 64], strides = [1, 1]} : vector<1280x64xf32> to vector<32x64xf32>
    %62 = arith.maximumf %60, %61 : vector<32x64xf32>
    %63 = vector.extract_strided_slice %10 {offsets = [864, 0], sizes = [32, 64], strides = [1, 1]} : vector<1280x64xf32> to vector<32x64xf32>
    %64 = arith.maximumf %62, %63 : vector<32x64xf32>
    %65 = vector.extract_strided_slice %10 {offsets = [896, 0], sizes = [32, 64], strides = [1, 1]} : vector<1280x64xf32> to vector<32x64xf32>
    %66 = arith.maximumf %64, %65 : vector<32x64xf32>
    %67 = vector.extract_strided_slice %10 {offsets = [928, 0], sizes = [32, 64], strides = [1, 1]} : vector<1280x64xf32> to vector<32x64xf32>
    %68 = arith.maximumf %66, %67 : vector<32x64xf32>
    %69 = vector.extract_strided_slice %10 {offsets = [960, 0], sizes = [32, 64], strides = [1, 1]} : vector<1280x64xf32> to vector<32x64xf32>
    %70 = arith.maximumf %68, %69 : vector<32x64xf32>
    %71 = vector.extract_strided_slice %10 {offsets = [992, 0], sizes = [32, 64], strides = [1, 1]} : vector<1280x64xf32> to vector<32x64xf32>
    %72 = arith.maximumf %70, %71 : vector<32x64xf32>
    %73 = vector.extract_strided_slice %10 {offsets = [1024, 0], sizes = [32, 64], strides = [1, 1]} : vector<1280x64xf32> to vector<32x64xf32>
    %74 = arith.maximumf %72, %73 : vector<32x64xf32>
    %75 = vector.extract_strided_slice %10 {offsets = [1056, 0], sizes = [32, 64], strides = [1, 1]} : vector<1280x64xf32> to vector<32x64xf32>
    %76 = arith.maximumf %74, %75 : vector<32x64xf32>
    %77 = vector.extract_strided_slice %10 {offsets = [1088, 0], sizes = [32, 64], strides = [1, 1]} : vector<1280x64xf32> to vector<32x64xf32>
    %78 = arith.maximumf %76, %77 : vector<32x64xf32>
    %79 = vector.extract_strided_slice %10 {offsets = [1120, 0], sizes = [32, 64], strides = [1, 1]} : vector<1280x64xf32> to vector<32x64xf32>
    %80 = arith.maximumf %78, %79 : vector<32x64xf32>
    %81 = vector.extract_strided_slice %10 {offsets = [1152, 0], sizes = [32, 64], strides = [1, 1]} : vector<1280x64xf32> to vector<32x64xf32>
    %82 = arith.maximumf %80, %81 : vector<32x64xf32>
    %83 = vector.extract_strided_slice %10 {offsets = [1184, 0], sizes = [32, 64], strides = [1, 1]} : vector<1280x64xf32> to vector<32x64xf32>
    %84 = arith.maximumf %82, %83 : vector<32x64xf32>
    %85 = vector.extract_strided_slice %10 {offsets = [1216, 0], sizes = [32, 64], strides = [1, 1]} : vector<1280x64xf32> to vector<32x64xf32>
    %86 = arith.maximumf %84, %85 : vector<32x64xf32>
    %87 = vector.extract_strided_slice %10 {offsets = [1248, 0], sizes = [32, 64], strides = [1, 1]} : vector<1280x64xf32> to vector<32x64xf32>
    %88 = arith.maximumf %86, %87 : vector<32x64xf32>
    %89 = tpu.concatenate %49, %88 in 0 : vector<32x64xf32>, vector<32x64xf32> -> vector<64x64xf32>
    %c0_7 = arith.constant 0 : index
    %c0_8 = arith.constant 0 : index
    %90 = vector.load %arg4[%c0_7, %c0_8] : memref<64x256xf32, #tpu.memory_space<vmem>>, vector<64x256xf32>
    %cst_9 = arith.constant dense<0.000000e+00> : vector<64x256xf32>
    %91 = tpu.matmul %89, %90, %cst_9 {dimension_numbers = #tpu.dot_dimension_numbers<[1], [0], [0], [1], [0, 0, 1, 1], [], []>} : vector<64x64xf32>, vector<64x256xf32>, vector<64x256xf32> -> vector<64x256xf32>
    %c0_10 = arith.constant 0 : index
    %c0_11 = arith.constant 0 : index
    %92 = vector.load %arg5[%c0_10, %c0_11] : memref<1x256xf32, #tpu.memory_space<vmem>>, vector<1x256xf32>
    %93 = vector.broadcast %92 : vector<1x256xf32> to vector<64x256xf32>
    %94 = arith.addf %91, %93 : vector<64x256xf32>
    %cst_12 = arith.constant 0.000000e+00 : f32
    %95 = vector.broadcast %cst_12 : f32 to vector<64x256xf32>
    %96 = arith.cmpf ogt, %94, %95 : vector<64x256xf32>
    %cst_13 = arith.constant 2.000000e-01 : f32
    %97 = vector.broadcast %cst_13 : f32 to vector<64x256xf32>
    %98 = arith.mulf %97, %94 : vector<64x256xf32>
    %99 = arith.select %96, %94, %98 : vector<64x256xi1>, vector<64x256xf32>
    %100 = vector.extract_strided_slice %99 {offsets = [0, 0], sizes = [32, 256], strides = [1, 1]} : vector<64x256xf32> to vector<32x256xf32>
    %cst_14 = arith.constant dense<0xFF800000> : vector<256xf32>
    %101 = vector.multi_reduction <maximumf>, %100, %cst_14 [0] : vector<32x256xf32> to vector<256xf32>
    %102 = vector.shape_cast %101 : vector<256xf32> to vector<1x256xf32>
    %c0_15 = arith.constant 0 : index
    %c0_16 = arith.constant 0 : index
    %103 = vector.load %arg6[%c0_15, %c0_16] : memref<2x512xf32, #tpu.memory_space<vmem>>, vector<1x256xf32>
    tpu.vector_store %arg6[%c0_15, %c0_16], %102 {strides = array<i32>} : memref<2x512xf32, #tpu.memory_space<vmem>>, vector<1x256xf32>,
    %cst_17 = arith.constant dense<0.000000e+00> : vector<256xf32>
    %104 = vector.multi_reduction <add>, %100, %cst_17 [0] : vector<32x256xf32> to vector<256xf32>
    %105 = vector.shape_cast %104 : vector<256xf32> to vector<1x256xf32>
    %cst_18 = arith.constant 3.200000e+01 : f32
    %106 = vector.broadcast %cst_18 : f32 to vector<1x256xf32>
    %107 = arith.divf %105, %106 : vector<1x256xf32>
    %c0_19 = arith.constant 0 : index
    %c256 = arith.constant 256 : index
    %108 = vector.load %arg6[%c0_19, %c256] : memref<2x512xf32, #tpu.memory_space<vmem>>, vector<1x256xf32>
    tpu.vector_store %arg6[%c0_19, %c256], %107 {strides = array<i32>} : memref<2x512xf32, #tpu.memory_space<vmem>>, vector<1x256xf32>,
    %109 = vector.extract_strided_slice %99 {offsets = [32, 0], sizes = [32, 256], strides = [1, 1]} : vector<64x256xf32> to vector<32x256xf32>
    %cst_20 = arith.constant dense<0xFF800000> : vector<256xf32>
    %110 = vector.multi_reduction <maximumf>, %109, %cst_20 [0] : vector<32x256xf32> to vector<256xf32>
    %111 = vector.shape_cast %110 : vector<256xf32> to vector<1x256xf32>
    %c1 = arith.constant 1 : index
    %c0_21 = arith.constant 0 : index
    %112 = vector.load %arg6[%c1, %c0_21] : memref<2x512xf32, #tpu.memory_space<vmem>>, vector<1x256xf32>
    tpu.vector_store %arg6[%c1, %c0_21], %111 {strides = array<i32>} : memref<2x512xf32, #tpu.memory_space<vmem>>, vector<1x256xf32>,
    %cst_22 = arith.constant dense<0.000000e+00> : vector<256xf32>
    %113 = vector.multi_reduction <add>, %109, %cst_22 [0] : vector<32x256xf32> to vector<256xf32>
    %114 = vector.shape_cast %113 : vector<256xf32> to vector<1x256xf32>
    %cst_23 = arith.constant 3.200000e+01 : f32
    %115 = vector.broadcast %cst_23 : f32 to vector<1x256xf32>
    %116 = arith.divf %114, %115 : vector<1x256xf32>
    %c1_24 = arith.constant 1 : index
    %c256_25 = arith.constant 256 : index
    %117 = vector.load %arg6[%c1_24, %c256_25] : memref<2x512xf32, #tpu.memory_space<vmem>>, vector<1x256xf32>
    tpu.vector_store %arg6[%c1_24, %c256_25], %116 {strides = array<i32>} : memref<2x512xf32, #tpu.memory_space<vmem>>, vector<1x256xf32>,
    return
  }
  func.func @transform_0(%arg0: i32) -> (i32, i32) {
    %c0_i32 = arith.constant 0 : i32
    %c0_i32_0 = arith.constant 0 : i32
    %c0_i32_1 = arith.constant 0 : i32
    return %c0_i32, %c0_i32_0 : i32, i32
  }
  func.func @transform_1(%arg0: i32) -> (i32, i32) {
    %c0_i32 = arith.constant 0 : i32
    %c0_i32_0 = arith.constant 0 : i32
    %c0_i32_1 = arith.constant 0 : i32
    return %c0_i32, %c0_i32_0 : i32, i32
  }
  func.func @transform_2(%arg0: i32) -> (i32, i32) {
    %c0_i32 = arith.constant 0 : i32
    %c0_i32_0 = arith.constant 0 : i32
    %c0_i32_1 = arith.constant 0 : i32
    return %c0_i32, %c0_i32_0 : i32, i32
  }
  func.func @transform_3(%arg0: i32) -> (i32, i32) {
    %c0_i32 = arith.constant 0 : i32
    %c0_i32_0 = arith.constant 0 : i32
    %c0_i32_1 = arith.constant 0 : i32
    return %c0_i32, %c0_i32_0 : i32, i32
  }
  func.func @transform_4(%arg0: i32) -> (i32, i32) {
    %c0_i32 = arith.constant 0 : i32
    %c0_i32_0 = arith.constant 0 : i32
    %c0_i32_1 = arith.constant 0 : i32
    return %c0_i32, %c0_i32_0 : i32, i32
  }
  func.func @transform_5(%arg0: i32) -> (i32, i32) {
    %c0_i32 = arith.constant 0 : i32
    %c0_i32_0 = arith.constant 0 : i32
    %c0_i32_1 = arith.constant 0 : i32
    return %c0_i32, %c0_i32_0 : i32, i32
  }
}

module attributes {stable_mosaic.version = 11 : i64} {
  func.func @head_kernel(%arg0: i32, %arg1: memref<2x512xf32, #tpu.memory_space<vmem>>, %arg2: memref<2x1536xf32, #tpu.memory_space<vmem>>, %arg3: memref<512x1536xbf16, #tpu.memory_space<vmem>>, %arg4: memref<1x1536xf32, #tpu.memory_space<vmem>>, %arg5: memref<1536x512xbf16, #tpu.memory_space<vmem>>, %arg6: memref<1x512xf32, #tpu.memory_space<vmem>>, %arg7: memref<512x256xbf16, #tpu.memory_space<vmem>>, %arg8: memref<1x256xf32, #tpu.memory_space<vmem>>, %arg9: memref<256x128xbf16, #tpu.memory_space<vmem>>, %arg10: memref<1x128xf32, #tpu.memory_space<vmem>>, %arg11: memref<128x40xbf16, #tpu.memory_space<vmem>>, %arg12: memref<1x40xf32, #tpu.memory_space<vmem>>, %arg13: memref<2x40xf32, #tpu.memory_space<vmem>>) attributes {dimension_semantics = [#tpu.dimension_semantics<arbitrary>], iteration_bounds = array<i64: 1>, scalar_prefetch = 0 : i64, scratch_operands = 0 : i64, tpu.core_type = #tpu.core_type<tc>, window_params = [{pipeline_mode = #tpu.pipeline_mode<synchronous>, transform_indices = @transform_0, window_bounds = array<i64: 2, 512>}, {pipeline_mode = #tpu.pipeline_mode<synchronous>, transform_indices = @transform_1, window_bounds = array<i64: 2, 1536>}, {pipeline_mode = #tpu.pipeline_mode<synchronous>, transform_indices = @transform_2, window_bounds = array<i64: 512, 1536>}, {pipeline_mode = #tpu.pipeline_mode<synchronous>, transform_indices = @transform_3, window_bounds = array<i64: 1, 1536>}, {pipeline_mode = #tpu.pipeline_mode<synchronous>, transform_indices = @transform_4, window_bounds = array<i64: 1536, 512>}, {pipeline_mode = #tpu.pipeline_mode<synchronous>, transform_indices = @transform_5, window_bounds = array<i64: 1, 512>}, {pipeline_mode = #tpu.pipeline_mode<synchronous>, transform_indices = @transform_6, window_bounds = array<i64: 512, 256>}, {pipeline_mode = #tpu.pipeline_mode<synchronous>, transform_indices = @transform_7, window_bounds = array<i64: 1, 256>}, {pipeline_mode = #tpu.pipeline_mode<synchronous>, transform_indices = @transform_8, window_bounds = array<i64: 256, 128>}, {pipeline_mode = #tpu.pipeline_mode<synchronous>, transform_indices = @transform_9, window_bounds = array<i64: 1, 128>}, {pipeline_mode = #tpu.pipeline_mode<synchronous>, transform_indices = @transform_10, window_bounds = array<i64: 128, 40>}, {pipeline_mode = #tpu.pipeline_mode<synchronous>, transform_indices = @transform_11, window_bounds = array<i64: 1, 40>}, {pipeline_mode = #tpu.pipeline_mode<synchronous>, transform_indices = @transform_12, window_bounds = array<i64: 2, 40>}]} {
    %c0 = arith.constant 0 : index
    %c0_0 = arith.constant 0 : index
    %0 = vector.load %arg1[%c0, %c0_0] : memref<2x512xf32, #tpu.memory_space<vmem>>, vector<2x512xf32>
    %1 = arith.truncf %0 : vector<2x512xf32> to vector<2x512xbf16>
    %c0_1 = arith.constant 0 : index
    %c0_2 = arith.constant 0 : index
    %2 = vector.load %arg3[%c0_1, %c0_2] : memref<512x1536xbf16, #tpu.memory_space<vmem>>, vector<512x1536xbf16>
    %cst = arith.constant dense<0.000000e+00> : vector<2x1536xf32>
    %3 = tpu.matmul %1, %2, %cst {dimension_numbers = #tpu.dot_dimension_numbers<[1], [0], [0], [1], [0, 0, 1, 1], [], []>} : vector<2x512xbf16>, vector<512x1536xbf16>, vector<2x1536xf32> -> vector<2x1536xf32>
    %c0_3 = arith.constant 0 : index
    %c0_4 = arith.constant 0 : index
    %4 = vector.load %arg4[%c0_3, %c0_4] : memref<1x1536xf32, #tpu.memory_space<vmem>>, vector<1x1536xf32>
    %5 = vector.broadcast %4 : vector<1x1536xf32> to vector<2x1536xf32>
    %6 = arith.addf %3, %5 : vector<2x1536xf32>
    %cst_5 = arith.constant 0.000000e+00 : f32
    %7 = vector.broadcast %cst_5 : f32 to vector<2x1536xf32>
    %8 = arith.cmpf ogt, %6, %7 : vector<2x1536xf32>
    %cst_6 = arith.constant 2.000000e-01 : f32
    %9 = vector.broadcast %cst_6 : f32 to vector<2x1536xf32>
    %10 = arith.mulf %9, %6 : vector<2x1536xf32>
    %11 = arith.select %8, %6, %10 : vector<2x1536xi1>, vector<2x1536xf32>
    %12 = arith.mulf %11, %11 : vector<2x1536xf32>
    %cst_7 = arith.constant dense<0.000000e+00> : vector<2xf32>
    %13 = vector.multi_reduction <add>, %12, %cst_7 [1] : vector<2x1536xf32> to vector<2xf32>
    %14 = vector.shape_cast %13 : vector<2xf32> to vector<2x1xf32>
    %cst_8 = arith.constant 1.000000e-24 : f32
    %15 = vector.broadcast %cst_8 : f32 to vector<2x1xf32>
    %16 = arith.maximumf %14, %15 : vector<2x1xf32>
    %17 = math.rsqrt %16 : vector<2x1xf32>
    %18 = vector.broadcast %17 : vector<2x1xf32> to vector<2x1536xf32>
    %19 = arith.mulf %11, %18 : vector<2x1536xf32>
    %c0_9 = arith.constant 0 : index
    %c0_10 = arith.constant 0 : index
    %20 = vector.load %arg2[%c0_9, %c0_10] : memref<2x1536xf32, #tpu.memory_space<vmem>>, vector<2x1536xf32>
    %cst_11 = arith.constant 1.000000e-01 : f32
    %21 = vector.broadcast %cst_11 : f32 to vector<2x1536xf32>
    %22 = arith.mulf %20, %21 : vector<2x1536xf32>
    %23 = arith.addf %19, %22 : vector<2x1536xf32>
    %24 = arith.truncf %23 : vector<2x1536xf32> to vector<2x1536xbf16>
    %c0_12 = arith.constant 0 : index
    %c0_13 = arith.constant 0 : index
    %25 = vector.load %arg5[%c0_12, %c0_13] : memref<1536x512xbf16, #tpu.memory_space<vmem>>, vector<1536x512xbf16>
    %cst_14 = arith.constant dense<0.000000e+00> : vector<2x512xf32>
    %26 = tpu.matmul %24, %25, %cst_14 {dimension_numbers = #tpu.dot_dimension_numbers<[1], [0], [0], [1], [0, 0, 1, 1], [], []>} : vector<2x1536xbf16>, vector<1536x512xbf16>, vector<2x512xf32> -> vector<2x512xf32>
    %c0_15 = arith.constant 0 : index
    %c0_16 = arith.constant 0 : index
    %27 = vector.load %arg6[%c0_15, %c0_16] : memref<1x512xf32, #tpu.memory_space<vmem>>, vector<1x512xf32>
    %28 = vector.broadcast %27 : vector<1x512xf32> to vector<2x512xf32>
    %29 = arith.addf %26, %28 : vector<2x512xf32>
    %cst_17 = arith.constant 0.000000e+00 : f32
    %30 = vector.broadcast %cst_17 : f32 to vector<2x512xf32>
    %31 = arith.cmpf ogt, %29, %30 : vector<2x512xf32>
    %cst_18 = arith.constant 2.000000e-01 : f32
    %32 = vector.broadcast %cst_18 : f32 to vector<2x512xf32>
    %33 = arith.mulf %32, %29 : vector<2x512xf32>
    %34 = arith.select %31, %29, %33 : vector<2x512xi1>, vector<2x512xf32>
    %35 = arith.truncf %34 : vector<2x512xf32> to vector<2x512xbf16>
    %c0_19 = arith.constant 0 : index
    %c0_20 = arith.constant 0 : index
    %36 = vector.load %arg7[%c0_19, %c0_20] : memref<512x256xbf16, #tpu.memory_space<vmem>>, vector<512x256xbf16>
    %cst_21 = arith.constant dense<0.000000e+00> : vector<2x256xf32>
    %37 = tpu.matmul %35, %36, %cst_21 {dimension_numbers = #tpu.dot_dimension_numbers<[1], [0], [0], [1], [0, 0, 1, 1], [], []>} : vector<2x512xbf16>, vector<512x256xbf16>, vector<2x256xf32> -> vector<2x256xf32>
    %c0_22 = arith.constant 0 : index
    %c0_23 = arith.constant 0 : index
    %38 = vector.load %arg8[%c0_22, %c0_23] : memref<1x256xf32, #tpu.memory_space<vmem>>, vector<1x256xf32>
    %39 = vector.broadcast %38 : vector<1x256xf32> to vector<2x256xf32>
    %40 = arith.addf %37, %39 : vector<2x256xf32>
    %cst_24 = arith.constant 0.000000e+00 : f32
    %41 = vector.broadcast %cst_24 : f32 to vector<2x256xf32>
    %42 = arith.cmpf ogt, %40, %41 : vector<2x256xf32>
    %cst_25 = arith.constant 2.000000e-01 : f32
    %43 = vector.broadcast %cst_25 : f32 to vector<2x256xf32>
    %44 = arith.mulf %43, %40 : vector<2x256xf32>
    %45 = arith.select %42, %40, %44 : vector<2x256xi1>, vector<2x256xf32>
    %46 = arith.truncf %45 : vector<2x256xf32> to vector<2x256xbf16>
    %c0_26 = arith.constant 0 : index
    %c0_27 = arith.constant 0 : index
    %47 = vector.load %arg9[%c0_26, %c0_27] : memref<256x128xbf16, #tpu.memory_space<vmem>>, vector<256x128xbf16>
    %cst_28 = arith.constant dense<0.000000e+00> : vector<2x128xf32>
    %48 = tpu.matmul %46, %47, %cst_28 {dimension_numbers = #tpu.dot_dimension_numbers<[1], [0], [0], [1], [0, 0, 1, 1], [], []>} : vector<2x256xbf16>, vector<256x128xbf16>, vector<2x128xf32> -> vector<2x128xf32>
    %c0_29 = arith.constant 0 : index
    %c0_30 = arith.constant 0 : index
    %49 = vector.load %arg10[%c0_29, %c0_30] : memref<1x128xf32, #tpu.memory_space<vmem>>, vector<1x128xf32>
    %50 = vector.broadcast %49 : vector<1x128xf32> to vector<2x128xf32>
    %51 = arith.addf %48, %50 : vector<2x128xf32>
    %cst_31 = arith.constant 0.000000e+00 : f32
    %52 = vector.broadcast %cst_31 : f32 to vector<2x128xf32>
    %53 = arith.cmpf ogt, %51, %52 : vector<2x128xf32>
    %cst_32 = arith.constant 2.000000e-01 : f32
    %54 = vector.broadcast %cst_32 : f32 to vector<2x128xf32>
    %55 = arith.mulf %54, %51 : vector<2x128xf32>
    %56 = arith.select %53, %51, %55 : vector<2x128xi1>, vector<2x128xf32>
    %57 = arith.truncf %56 : vector<2x128xf32> to vector<2x128xbf16>
    %c0_33 = arith.constant 0 : index
    %c0_34 = arith.constant 0 : index
    %58 = vector.load %arg11[%c0_33, %c0_34] : memref<128x40xbf16, #tpu.memory_space<vmem>>, vector<128x40xbf16>
    %cst_35 = arith.constant dense<0.000000e+00> : vector<2x40xf32>
    %59 = tpu.matmul %57, %58, %cst_35 {dimension_numbers = #tpu.dot_dimension_numbers<[1], [0], [0], [1], [0, 0, 1, 1], [], []>} : vector<2x128xbf16>, vector<128x40xbf16>, vector<2x40xf32> -> vector<2x40xf32>
    %c0_36 = arith.constant 0 : index
    %c0_37 = arith.constant 0 : index
    %60 = vector.load %arg12[%c0_36, %c0_37] : memref<1x40xf32, #tpu.memory_space<vmem>>, vector<1x40xf32>
    %61 = vector.broadcast %60 : vector<1x40xf32> to vector<2x40xf32>
    %62 = arith.addf %59, %61 : vector<2x40xf32>
    %cst_38 = arith.constant 0.000000e+00 : f32
    %63 = vector.broadcast %cst_38 : f32 to vector<2x40xf32>
    %64 = arith.cmpf ogt, %62, %63 : vector<2x40xf32>
    %cst_39 = arith.constant 2.000000e-01 : f32
    %65 = vector.broadcast %cst_39 : f32 to vector<2x40xf32>
    %66 = arith.mulf %65, %62 : vector<2x40xf32>
    %67 = arith.select %64, %62, %66 : vector<2x40xi1>, vector<2x40xf32>
    %c0_40 = arith.constant 0 : index
    %c0_41 = arith.constant 0 : index
    %68 = vector.load %arg13[%c0_40, %c0_41] : memref<2x40xf32, #tpu.memory_space<vmem>>, vector<2x40xf32>
    tpu.vector_store %arg13[%c0_40, %c0_41], %67 {strides = array<i32>} : memref<2x40xf32, #tpu.memory_space<vmem>>, vector<2x40xf32>,
    return
  }
  func.func @transform_0(%arg0: i32) -> (i32, i32) {
    %c0_i32 = arith.constant 0 : i32
    %c0_i32_0 = arith.constant 0 : i32
    %c0_i32_1 = arith.constant 0 : i32
    return %c0_i32, %c0_i32_0 : i32, i32
  }
  func.func @transform_1(%arg0: i32) -> (i32, i32) {
    %c0_i32 = arith.constant 0 : i32
    %c0_i32_0 = arith.constant 0 : i32
    %c0_i32_1 = arith.constant 0 : i32
    return %c0_i32, %c0_i32_0 : i32, i32
  }
  func.func @transform_2(%arg0: i32) -> (i32, i32) {
    %c0_i32 = arith.constant 0 : i32
    %c0_i32_0 = arith.constant 0 : i32
    %c0_i32_1 = arith.constant 0 : i32
    return %c0_i32, %c0_i32_0 : i32, i32
  }
  func.func @transform_3(%arg0: i32) -> (i32, i32) {
    %c0_i32 = arith.constant 0 : i32
    %c0_i32_0 = arith.constant 0 : i32
    %c0_i32_1 = arith.constant 0 : i32
    return %c0_i32, %c0_i32_0 : i32, i32
  }
  func.func @transform_4(%arg0: i32) -> (i32, i32) {
    %c0_i32 = arith.constant 0 : i32
    %c0_i32_0 = arith.constant 0 : i32
    %c0_i32_1 = arith.constant 0 : i32
    return %c0_i32, %c0_i32_0 : i32, i32
  }
  func.func @transform_5(%arg0: i32) -> (i32, i32) {
    %c0_i32 = arith.constant 0 : i32
    %c0_i32_0 = arith.constant 0 : i32
    %c0_i32_1 = arith.constant 0 : i32
    return %c0_i32, %c0_i32_0 : i32, i32
  }
  func.func @transform_6(%arg0: i32) -> (i32, i32) {
    %c0_i32 = arith.constant 0 : i32
    %c0_i32_0 = arith.constant 0 : i32
    %c0_i32_1 = arith.constant 0 : i32
    return %c0_i32, %c0_i32_0 : i32, i32
  }
  func.func @transform_7(%arg0: i32) -> (i32, i32) {
    %c0_i32 = arith.constant 0 : i32
    %c0_i32_0 = arith.constant 0 : i32
    %c0_i32_1 = arith.constant 0 : i32
    return %c0_i32, %c0_i32_0 : i32, i32
  }
  func.func @transform_8(%arg0: i32) -> (i32, i32) {
    %c0_i32 = arith.constant 0 : i32
    %c0_i32_0 = arith.constant 0 : i32
    %c0_i32_1 = arith.constant 0 : i32
    return %c0_i32, %c0_i32_0 : i32, i32
  }
  func.func @transform_9(%arg0: i32) -> (i32, i32) {
    %c0_i32 = arith.constant 0 : i32
    %c0_i32_0 = arith.constant 0 : i32
    %c0_i32_1 = arith.constant 0 : i32
    return %c0_i32, %c0_i32_0 : i32, i32
  }
  func.func @transform_10(%arg0: i32) -> (i32, i32) {
    %c0_i32 = arith.constant 0 : i32
    %c0_i32_0 = arith.constant 0 : i32
    %c0_i32_1 = arith.constant 0 : i32
    return %c0_i32, %c0_i32_0 : i32, i32
  }
  func.func @transform_11(%arg0: i32) -> (i32, i32) {
    %c0_i32 = arith.constant 0 : i32
    %c0_i32_0 = arith.constant 0 : i32
    %c0_i32_1 = arith.constant 0 : i32
    return %c0_i32, %c0_i32_0 : i32, i32
  }
  func.func @transform_12(%arg0: i32) -> (i32, i32) {
    %c0_i32 = arith.constant 0 : i32
    %c0_i32_0 = arith.constant 0 : i32
    %c0_i32_1 = arith.constant 0 : i32
    return %c0_i32, %c0_i32_0 : i32, i32
  }
}

</mosaic_0001>

<bundles_post_ra>
// kernel: neg.5
= control target key start
LH: loop header
LB: loop body
LE: loop exit
PB: predicated region body
PF: predicated region fallthrough
CT: control target
= control target key end

     0   :  { %s24_s0 = inlined_call_operand.vmem [shape: f32[2,32], index: 0, kind: input, shape index: {}]   ;;  %s25_s1 = inlined_call_operand.vmem [shape: f32[2,32], index: 1, kind: output, shape index: {}]  }
   0x1   :  { %v2_v0 = vld [vmem:[%s24_s0] sm:$0x3] }
   0x2   :  { %v5_v1 = vxor.u32 2147483648, %v2_v0 }
   0x4   :  { %7 = vst [vmem:[%s25_s1] sm:$0x3] %v5_v1 }

// kernel: dgcnn_exit1_forward.2
= control target key start
LH: loop header
LB: loop body
LE: loop exit
PB: predicated region body
PF: predicated region fallthrough
CT: control target
= control target key end

     0   :  { %vm188_vm0 = vcmask 64512   ;;  %s4591_s1 = inlined_call_operand.vmem [shape: f32[8,64], index: 1, kind: input, shape index: {}]   ;;  %s4592_s0 = inlined_call_operand.vmem [shape: f32[1280,8], index: 0, kind: input, shape index: {}]   ;;  %s4593_s3 = inlined_call_operand.vmem [shape: f32[64,256], index: 3, kind: input, shape index: {}]   ;;  %s4594_s2 = inlined_call_operand.vmem [shape: f32[1,64], index: 2, kind: input, shape index: {}]   ;;  %s4595_s4 = inlined_call_operand.vmem [shape: f32[1,256], index: 4, kind: input, shape index: {}]   ;;  %s4596_s5 = inlined_call_operand.vmem [shape: f32[2,512], index: 5, kind: output, shape index: {}]  }
   0x1   :  { %v180_v0 = vld [vmem:[%s4591_s1] sm:$0xff]  ;;  %v21_v2 = vld [vmem:[%s4592_s0 + $0x8] sm:$0xff]  ;;  %v22_v3 = vld [vmem:[%s4592_s0 + $0x10] sm:$0xff] }
   0x2   :  { %v20_v1 = vld [vmem:[%s4592_s0] sm:$0xff]  ;;  %2877 = vmatprep.subr.mxu0 %v180_v0  ;;  %3135 = vmatprep.subr.mxu1 %v180_v0  ;;  %v23_v4 = vld [vmem:[%s4592_s0 + $0x18] sm:$0xff]  ;;  %v25_v6 = vld [vmem:[%s4592_s0 + $0x28] sm:$0xff] }
   0x3   :  { %2879 = vmatprep.mubr.msk.f32.mxu0 %vm188_vm0, %v20_v1  ;;  %2878 = vmatpush3.msra.mxu0 %v180_v0  ;;  %v24_v5 = vld [vmem:[%s4592_s0 + $0x20] sm:$0xff]  ;;  %v26_v7 = vld [vmem:[%s4592_s0 + $0x30] sm:$0xff]  ;;  %v27_v9 = vld [vmem:[%s4592_s0 + $0x38] sm:$0xff] }
   0x4   :  { %2880 = vmatmul.mubr.msk.f32.vlgmr.msra.gmra.mrb[0].mxu0 %vm188_vm0, %v21_v2  ;;  %3136 = vmatpush3.msra.mxu1 %v180_v0  ;;  %v108_v8 = vld [vmem:[%s4592_s0 + $0x2c0] sm:$0xff]  ;;  %v109_v10 = vld [vmem:[%s4592_s0 + $0x2c8] sm:$0xff]  ;;  %v110_v12 = vld [vmem:[%s4592_s0 + $0x2d0] sm:$0xff] }
   0x5   :  { %2882 = vmatprep.mubr.msk.f32.mxu0 %vm188_vm0, %v22_v3  ;;  %3011 = vmatprep.mubr.msk.f32.mxu1 %vm188_vm0, %v108_v8  ;;  %v28_v11 = vld [vmem:[%s4592_s0 + $0x40] sm:$0xff]  ;;  %v111_v13 = vld [vmem:[%s4592_s0 + $0x2d8] sm:$0xff]  ;;  %v29_v15 = vld [vmem:[%s4592_s0 + $0x48] sm:$0xff] }
   0x6   :  { %3012 = vmatmul.mubr.msk.f32.vlgmr.msra.gmra.mrb[0].mxu1 %vm188_vm0, %v109_v10  ;;  %v112_v14 = vld [vmem:[%s4592_s0 + $0x2e0] sm:$0xff]  ;;  %v30_v16 = vld [vmem:[%s4592_s0 + $0x50] sm:$0xff]  ;;  %v113_v17 = vld [vmem:[%s4592_s0 + $0x2e8] sm:$0xff] }
   0x7   :  { %3014 = vmatprep.mubr.msk.f32.mxu1 %vm188_vm0, %v110_v12  ;;  %v114_v18 = vld [vmem:[%s4592_s0 + $0x2f0] sm:$0xff]  ;;  %v31_v19 = vld [vmem:[%s4592_s0 + $0x58] sm:$0xff]  ;;  %v32_v20 = vld [vmem:[%s4592_s0 + $0x60] sm:$0xff] }
   0x8   :  { %2883 = vmatmul.mubr.msk.f32.gmra.mrb[2].mxu0 %vm188_vm0, %v23_v4  ;;  %v115_v21 = vld [vmem:[%s4592_s0 + $0x2f8] sm:$0xff]  ;;  %v116_v22 = vld [vmem:[%s4592_s0 + $0x300] sm:$0xff]  ;;  %v33_v23 = vld [vmem:[%s4592_s0 + $0x68] sm:$0xff] }
   0x9   :  { %2885 = vmatprep.mubr.msk.f32.mxu0 %vm188_vm0, %v24_v5  ;;  %v34_v24 = vld [vmem:[%s4592_s0 + $0x70] sm:$0xff]  ;;  %v117_v25 = vld [vmem:[%s4592_s0 + $0x308] sm:$0xff]  ;;  %v35_v27 = vld [vmem:[%s4592_s0 + $0x78] sm:$0xff] }
   0xa   :  { %3015 = vmatmul.mubr.msk.f32.gmra.mrb[2].mxu1 %vm188_vm0, %v111_v13  ;;  %v118_v26 = vld [vmem:[%s4592_s0 + $0x310] sm:$0xff]  ;;  %v36_v28 = vld [vmem:[%s4592_s0 + $0x80] sm:$0xff]  ;;  %v119_v29 = vld [vmem:[%s4592_s0 + $0x318] sm:$0xff] }
   0xb   :  { %3017 = vmatprep.mubr.msk.f32.mxu1 %vm188_vm0, %v112_v14  ;;  %v120_v30 = vld [vmem:[%s4592_s0 + $0x320] sm:$0xff]  ;;  %v37_v31 = vld [vmem:[%s4592_s0 + $0x88] sm:$0xff]  ;;  %v38_v32 = vld [vmem:[%s4592_s0 + $0x90] sm:$0xff] }
   0xc   :  { %2886 = vmatmul.mubr.msk.f32.gmra.mrb[4].mxu0 %vm188_vm0, %v25_v6  ;;  %v121_v33 = vld [vmem:[%s4592_s0 + $0x328] sm:$0xff]  ;;  %v122_v34 = vld [vmem:[%s4592_s0 + $0x330] sm:$0xff]  ;;  %v39_v35 = vld [vmem:[%s4592_s0 + $0x98] sm:$0xff] }
   0xd   :  { %2888 = vmatprep.mubr.msk.f32.mxu0 %vm188_vm0, %v26_v7  ;;  %v40_v36 = vld [vmem:[%s4592_s0 + $0xa0] sm:$0xff]  ;;  %v123_v37 = vld [vmem:[%s4592_s0 + $0x338] sm:$0xff]  ;;  %v41_v39 = vld [vmem:[%s4592_s0 + $0xa8] sm:$0xff] }
   0xe   :  { %3018 = vmatmul.mubr.msk.f32.gmra.mrb[4].mxu1 %vm188_vm0, %v113_v17  ;;  %v124_v38 = vld [vmem:[%s4592_s0 + $0x340] sm:$0xff]  ;;  %v42_v40 = vld [vmem:[%s4592_s0 + $0xb0] sm:$0xff]  ;;  %v125_v41 = vld [vmem:[%s4592_s0 + $0x348] sm:$0xff] }
   0xf   :  { %3020 = vmatprep.mubr.msk.f32.mxu1 %vm188_vm0, %v114_v18  ;;  %v126_v42 = vld [vmem:[%s4592_s0 + $0x350] sm:$0xff]  ;;  %v43_v43 = vld [vmem:[%s4592_s0 + $0xb8] sm:$0xff]  ;;  %v44_v44 = vld [vmem:[%s4592_s0 + $0xc0] sm:$0xff] }
  0x10   :  { %2889 = vmatmul.mubr.msk.f32.gmra.mrb[6].mxu0 %vm188_vm0, %v27_v9  ;;  %v127_v45 = vld [vmem:[%s4592_s0 + $0x358] sm:$0xff]  ;;  %v128_v46 = vld [vmem:[%s4592_s0 + $0x360] sm:$0xff]  ;;  %v45_v47 = vld [vmem:[%s4592_s0 + $0xc8] sm:$0xff] }
  0x11   :  { %2891 = vmatprep.mubr.msk.f32.mxu0 %vm188_vm0, %v28_v11  ;;  %v46_v48 = vld [vmem:[%s4592_s0 + $0xd0] sm:$0xff]  ;;  %v129_v49 = vld [vmem:[%s4592_s0 + $0x368] sm:$0xff]  ;;  %v47_v51 = vld [vmem:[%s4592_s0 + $0xd8] sm:$0xff] }
  0x12   :  { %3021 = vmatmul.mubr.msk.f32.gmra.mrb[6].mxu1 %vm188_vm0, %v115_v21  ;;  %v130_v50 = vld [vmem:[%s4592_s0 + $0x370] sm:$0xff]  ;;  %v48_v52 = vld [vmem:[%s4592_s0 + $0xe0] sm:$0xff]  ;;  %v131_v53 = vld [vmem:[%s4592_s0 + $0x378] sm:$0xff] }
  0x13   :  { %3023 = vmatprep.mubr.msk.f32.mxu1 %vm188_vm0, %v116_v22  ;;  %v132_v54 = vld [vmem:[%s4592_s0 + $0x380] sm:$0xff]  ;;  %v49_v55 = vld [vmem:[%s4592_s0 + $0xe8] sm:$0xff]  ;;  %v50_v56 = vld [vmem:[%s4592_s0 + $0xf0] sm:$0xff] }
  0x14   :  { %2892 = vmatmul.mubr.msk.f32.gmra.mrb[8].mxu0 %vm188_vm0, %v29_v15  ;;  %v133_v57 = vld [vmem:[%s4592_s0 + $0x388] sm:$0xff]  ;;  %v134_v58 = vld [vmem:[%s4592_s0 + $0x390] sm:$0xff]  ;;  %v51_v59 = vld [vmem:[%s4592_s0 + $0xf8] sm:$0xff] }
  0x15   :  { %2894 = vmatprep.mubr.msk.f32.mxu0 %vm188_vm0, %v30_v16  ;;  %v52_v60 = vld [vmem:[%s4592_s0 + $0x100] sm:$0xff]  ;;  %v135_v61 = vld [vmem:[%s4592_s0 + $0x398] sm:$0xff]  ;;  %v53_v63 = vld [vmem:[%s4592_s0 + $0x108] sm:$0xff] }
  0x16   :  { %3024 = vmatmul.mubr.msk.f32.gmra.mrb[8].mxu1 %vm188_vm0, %v117_v25  ;;  %v136_v62 = vld [vmem:[%s4592_s0 + $0x3a0] sm:$0xff]  ;;  %v54_v0 = vld [vmem:[%s4592_s0 + $0x110] sm:$0xff]  ;;  %v137_v1 = vld [vmem:[%s4592_s0 + $0x3a8] sm:$0xff] }
  0x17   :  { %3026 = vmatprep.mubr.msk.f32.mxu1 %vm188_vm0, %v118_v26  ;;  %v138_v2 = vld [vmem:[%s4592_s0 + $0x3b0] sm:$0xff]  ;;  %v55_v3 = vld [vmem:[%s4592_s0 + $0x118] sm:$0xff]  ;;  %v56_v4 = vld [vmem:[%s4592_s0 + $0x120] sm:$0xff] }
  0x18   :  { %2895 = vmatmul.mubr.msk.f32.gmra.mrb[10].mxu0 %vm188_vm0, %v31_v19  ;;  %v139_v5 = vld [vmem:[%s4592_s0 + $0x3b8] sm:$0xff]  ;;  %v140_v6 = vld [vmem:[%s4592_s0 + $0x3c0] sm:$0xff]  ;;  %v57_v7 = vld [vmem:[%s4592_s0 + $0x128] sm:$0xff] }
  0x19   :  { %2897 = vmatprep.mubr.msk.f32.mxu0 %vm188_vm0, %v32_v20  ;;  %v58_v8 = vld [vmem:[%s4592_s0 + $0x130] sm:$0xff]  ;;  %v141_v9 = vld [vmem:[%s4592_s0 + $0x3c8] sm:$0xff]  ;;  %v59_v11 = vld [vmem:[%s4592_s0 + $0x138] sm:$0xff] }
  0x1a   :  { %3027 = vmatmul.mubr.msk.f32.gmra.mrb[10].mxu1 %vm188_vm0, %v119_v29  ;;  %v142_v10 = vld [vmem:[%s4592_s0 + $0x3d0] sm:$0xff]  ;;  %v60_v12 = vld [vmem:[%s4592_s0 + $0x140] sm:$0xff]  ;;  %v143_v13 = vld [vmem:[%s4592_s0 + $0x3d8] sm:$0xff] }
  0x1b   :  { %3029 = vmatprep.mubr.msk.f32.mxu1 %vm188_vm0, %v120_v30  ;;  %v144_v14 = vld [vmem:[%s4592_s0 + $0x3e0] sm:$0xff]  ;;  %v61_v15 = vld [vmem:[%s4592_s0 + $0x148] sm:$0xff]  ;;  %v62_v16 = vld [vmem:[%s4592_s0 + $0x150] sm:$0xff] }
  0x1c   :  { %2898 = vmatmul.mubr.msk.f32.gmra.mrb[12].mxu0 %vm188_vm0, %v33_v23  ;;  %v145_v17 = vld [vmem:[%s4592_s0 + $0x3e8] sm:$0xff]  ;;  %v146_v18 = vld [vmem:[%s4592_s0 + $0x3f0] sm:$0xff]  ;;  %v63_v19 = vld [vmem:[%s4592_s0 + $0x158] sm:$0xff] }
  0x1d   :  { %2900 = vmatprep.mubr.msk.f32.mxu0 %vm188_vm0, %v34_v24  ;;  %v64_v20 = vld [vmem:[%s4592_s0 + $0x160] sm:$0xff]  ;;  %v147_v21 = vld [vmem:[%s4592_s0 + $0x3f8] sm:$0xff]  ;;  %v65_v23 = vld [vmem:[%s4592_s0 + $0x168] sm:$0xff] }
  0x1e   :  { %3030 = vmatmul.mubr.msk.f32.gmra.mrb[12].mxu1 %vm188_vm0, %v121_v33  ;;  %v148_v22 = vld [vmem:[%s4592_s0 + $0x400] sm:$0xff]  ;;  %v66_v24 = vld [vmem:[%s4592_s0 + $0x170] sm:$0xff]  ;;  %v149_v25 = vld [vmem:[%s4592_s0 + $0x408] sm:$0xff] }
  0x1f   :  { %3032 = vmatprep.mubr.msk.f32.mxu1 %vm188_vm0, %v122_v34  ;;  %v150_v26 = vld [vmem:[%s4592_s0 + $0x410] sm:$0xff]  ;;  %v151_v29 = vld [vmem:[%s4592_s0 + $0x418] sm:$0xff]  ;;  %v152_v30 = vld [vmem:[%s4592_s0 + $0x420] sm:$0xff] }
  0x20   :  { %2901 = vmatmul.mubr.msk.f32.gmra.mrb[14].mxu0 %vm188_vm0, %v35_v27  ;;  %v67_v27 = vld [vmem:[%s4592_s0 + $0x178] sm:$0xff]  ;;  %v153_v33 = vld [vmem:[%s4592_s0 + $0x428] sm:$0xff]  ;;  %v154_v34 = vld [vmem:[%s4592_s0 + $0x430] sm:$0xff] }
  0x21   :  { %2903 = vmatprep.mubr.msk.f32.mxu0 %vm188_vm0, %v36_v28  ;;  %v68_v28 = vld [vmem:[%s4592_s0 + $0x180] sm:$0xff] }
  0x22   :  { %3033 = vmatmul.mubr.msk.f32.gmra.mrb[14].mxu1 %vm188_vm0, %v123_v37  ;;  %v155_v37 = vld [vmem:[%s4592_s0 + $0x438] sm:$0xff] }
  0x23   :  { %3035 = vmatprep.mubr.msk.f32.mxu1 %vm188_vm0, %v124_v38  ;;  %v156_v38 = vld [vmem:[%s4592_s0 + $0x440] sm:$0xff] }
  0x24   :  { %2904 = vmatmul.mubr.msk.f32.gmra.mrb[16].mxu0 %vm188_vm0, %v37_v31  ;;  %v69_v31 = vld [vmem:[%s4592_s0 + $0x188] sm:$0xff] }
  0x25   :  { %2906 = vmatprep.mubr.msk.f32.mxu0 %vm188_vm0, %v38_v32  ;;  %v70_v32 = vld [vmem:[%s4592_s0 + $0x190] sm:$0xff] }
  0x26   :  { %3036 = vmatmul.mubr.msk.f32.gmra.mrb[16].mxu1 %vm188_vm0, %v125_v41  ;;  %v157_v41 = vld [vmem:[%s4592_s0 + $0x448] sm:$0xff] }
  0x27   :  { %3038 = vmatprep.mubr.msk.f32.mxu1 %vm188_vm0, %v126_v42  ;;  %v158_v42 = vld [vmem:[%s4592_s0 + $0x450] sm:$0xff] }
  0x28   :  { %2907 = vmatmul.mubr.msk.f32.gmra.mrb[18].mxu0 %vm188_vm0, %v39_v35  ;;  %v71_v35 = vld [vmem:[%s4592_s0 + $0x198] sm:$0xff] }
  0x29   :  { %2909 = vmatprep.mubr.msk.f32.mxu0 %vm188_vm0, %v40_v36  ;;  %v72_v36 = vld [vmem:[%s4592_s0 + $0x1a0] sm:$0xff] }
  0x2a   :  { %3039 = vmatmul.mubr.msk.f32.gmra.mrb[18].mxu1 %vm188_vm0, %v127_v45  ;;  %v159_v45 = vld [vmem:[%s4592_s0 + $0x458] sm:$0xff] }
  0x2b   :  { %3041 = vmatprep.mubr.msk.f32.mxu1 %vm188_vm0, %v128_v46  ;;  %v160_v46 = vld [vmem:[%s4592_s0 + $0x460] sm:$0xff] }
  0x2c   :  { %2910 = vmatmul.mubr.msk.f32.gmra.mrb[20].mxu0 %vm188_vm0, %v41_v39  ;;  %v73_v39 = vld [vmem:[%s4592_s0 + $0x1a8] sm:$0xff] }
  0x2d   :  { %2912 = vmatprep.mubr.msk.f32.mxu0 %vm188_vm0, %v42_v40  ;;  %v74_v40 = vld [vmem:[%s4592_s0 + $0x1b0] sm:$0xff] }
  0x2e   :  { %3042 = vmatmul.mubr.msk.f32.gmra.mrb[20].mxu1 %vm188_vm0, %v129_v49  ;;  %v161_v49 = vld [vmem:[%s4592_s0 + $0x468] sm:$0xff] }
  0x2f   :  { %3044 = vmatprep.mubr.msk.f32.mxu1 %vm188_vm0, %v130_v50  ;;  %v162_v50 = vld [vmem:[%s4592_s0 + $0x470] sm:$0xff] }
  0x30   :  { %2913 = vmatmul.mubr.msk.f32.gmra.mrb[22].mxu0 %vm188_vm0, %v43_v43  ;;  %v75_v43 = vld [vmem:[%s4592_s0 + $0x1b8] sm:$0xff] }
  0x31   :  { %2915 = vmatprep.mubr.msk.f32.mxu0 %vm188_vm0, %v44_v44  ;;  %v76_v44 = vld [vmem:[%s4592_s0 + $0x1c0] sm:$0xff] }
  0x32   :  { %3045 = vmatmul.mubr.msk.f32.gmra.mrb[22].mxu1 %vm188_vm0, %v131_v53  ;;  %v163_v53 = vld [vmem:[%s4592_s0 + $0x478] sm:$0xff] }
  0x33   :  { %3047 = vmatprep.mubr.msk.f32.mxu1 %vm188_vm0, %v132_v54  ;;  %v164_v54 = vld [vmem:[%s4592_s0 + $0x480] sm:$0xff] }
  0x34   :  { %2916 = vmatmul.mubr.msk.f32.gmra.mrb[24].mxu0 %vm188_vm0, %v45_v47  ;;  %v77_v47 = vld [vmem:[%s4592_s0 + $0x1c8] sm:$0xff] }
  0x35   :  { %2918 = vmatprep.mubr.msk.f32.mxu0 %vm188_vm0, %v46_v48  ;;  %v78_v48 = vld [vmem:[%s4592_s0 + $0x1d0] sm:$0xff] }
  0x36   :  { %3048 = vmatmul.mubr.msk.f32.gmra.mrb[24].mxu1 %vm188_vm0, %v133_v57  ;;  %v165_v57 = vld [vmem:[%s4592_s0 + $0x488] sm:$0xff] }
  0x37   :  { %3050 = vmatprep.mubr.msk.f32.mxu1 %vm188_vm0, %v134_v58  ;;  %v166_v58 = vld [vmem:[%s4592_s0 + $0x490] sm:$0xff] }
  0x38   :  { %2919 = vmatmul.mubr.msk.f32.gmra.mrb[26].mxu0 %vm188_vm0, %v47_v51  ;;  %v79_v51 = vld [vmem:[%s4592_s0 + $0x1d8] sm:$0xff] }
  0x39   :  { %2921 = vmatprep.mubr.msk.f32.mxu0 %vm188_vm0, %v48_v52  ;;  %v80_v52 = vld [vmem:[%s4592_s0 + $0x1e0] sm:$0xff] }
  0x3a   :  { %3051 = vmatmul.mubr.msk.f32.gmra.mrb[26].mxu1 %vm188_vm0, %v135_v61  ;;  %v167_v61 = vld [vmem:[%s4592_s0 + $0x498] sm:$0xff] }
  0x3b   :  { %3053 = vmatprep.mubr.msk.f32.mxu1 %vm188_vm0, %v136_v62  ;;  %v168_v62 = vld [vmem:[%s4592_s0 + $0x4a0] sm:$0xff] }
  0x3c   :  { %2922 = vmatmul.mubr.msk.f32.gmra.mrb[28].mxu0 %vm188_vm0, %v49_v55  ;;  %v81_v55 = vld [vmem:[%s4592_s0 + $0x1e8] sm:$0xff] }
  0x3d   :  { %2924 = vmatprep.mubr.msk.f32.mxu0 %vm188_vm0, %v50_v56  ;;  %v82_v56 = vld [vmem:[%s4592_s0 + $0x1f0] sm:$0xff] }
  0x3e   :  { %3054 = vmatmul.mubr.msk.f32.gmra.mrb[28].mxu1 %vm188_vm0, %v137_v1  ;;  %v169_v1 = vld [vmem:[%s4592_s0 + $0x4a8] sm:$0xff] }
  0x3f   :  { %3056 = vmatprep.mubr.msk.f32.mxu1 %vm188_vm0, %v138_v2  ;;  %v170_v2 = vld [vmem:[%s4592_s0 + $0x4b0] sm:$0xff] }
  0x40   :  { %2925 = vmatmul.mubr.msk.f32.gmra.mrb[30].mxu0 %vm188_vm0, %v51_v59  ;;  %v83_v59 = vld [vmem:[%s4592_s0 + $0x1f8] sm:$0xff] }
  0x41   :  { %2927 = vmatprep.mubr.msk.f32.mxu0 %vm188_vm0, %v52_v60  ;;  %v84_v60 = vld [vmem:[%s4592_s0 + $0x200] sm:$0xff] }
  0x42   :  { %3057 = vmatmul.mubr.msk.f32.gmra.mrb[30].mxu1 %vm188_vm0, %v139_v5  ;;  %v171_v5 = vld [vmem:[%s4592_s0 + $0x4b8] sm:$0xff] }
  0x43   :  { %3059 = vmatprep.mubr.msk.f32.mxu1 %vm188_vm0, %v140_v6  ;;  %v172_v6 = vld [vmem:[%s4592_s0 + $0x4c0] sm:$0xff] }
  0x44   :  { %2928 = vmatmul.mubr.msk.f32.gmra.mrb[32].mxu0 %vm188_vm0, %v53_v63  ;;  %v85_v63 = vld [vmem:[%s4592_s0 + $0x208] sm:$0xff] }
  0x45   :  { %2930 = vmatprep.mubr.msk.f32.mxu0 %vm188_vm0, %v54_v0  ;;  %v86_v0 = vld [vmem:[%s4592_s0 + $0x210] sm:$0xff] }
  0x46   :  { %3060 = vmatmul.mubr.msk.f32.gmra.mrb[32].mxu1 %vm188_vm0, %v141_v9  ;;  %v173_v9 = vld [vmem:[%s4592_s0 + $0x4c8] sm:$0xff] }
  0x47   :  { %3062 = vmatprep.mubr.msk.f32.mxu1 %vm188_vm0, %v142_v10  ;;  %v174_v10 = vld [vmem:[%s4592_s0 + $0x4d0] sm:$0xff] }
  0x48   :  { %2931 = vmatmul.mubr.msk.f32.gmra.mrb[34].mxu0 %vm188_vm0, %v55_v3  ;;  %v87_v3 = vld [vmem:[%s4592_s0 + $0x218] sm:$0xff] }
  0x49   :  { %2933 = vmatprep.mubr.msk.f32.mxu0 %vm188_vm0, %v56_v4  ;;  %v88_v4 = vld [vmem:[%s4592_s0 + $0x220] sm:$0xff] }
  0x4a   :  { %3063 = vmatmul.mubr.msk.f32.gmra.mrb[34].mxu1 %vm188_vm0, %v143_v13  ;;  %v175_v13 = vld [vmem:[%s4592_s0 + $0x4d8] sm:$0xff] }
  0x4b   :  { %3065 = vmatprep.mubr.msk.f32.mxu1 %vm188_vm0, %v144_v14  ;;  %v176_v14 = vld [vmem:[%s4592_s0 + $0x4e0] sm:$0xff] }
  0x4c   :  { %2934 = vmatmul.mubr.msk.f32.gmra.mrb[36].mxu0 %vm188_vm0, %v57_v7  ;;  %v89_v7 = vld [vmem:[%s4592_s0 + $0x228] sm:$0xff] }
  0x4d   :  { %2936 = vmatprep.mubr.msk.f32.mxu0 %vm188_vm0, %v58_v8  ;;  %v90_v8 = vld [vmem:[%s4592_s0 + $0x230] sm:$0xff] }
  0x4e   :  { %3066 = vmatmul.mubr.msk.f32.gmra.mrb[36].mxu1 %vm188_vm0, %v145_v17  ;;  %v2167_v17 = vld [vmem:[%s4593_s3 + $0x8] sm:$0xff] }
  0x4f   :  { %3068 = vmatprep.mubr.msk.f32.mxu1 %vm188_vm0, %v146_v18  ;;  %v2169_v18 = vld [vmem:[%s4593_s3 + $0x18] sm:$0xff] }
  0x50   :  { %2937 = vmatmul.mubr.msk.f32.gmra.mrb[38].mxu0 %vm188_vm0, %v59_v11  ;;  %v91_v11 = vld [vmem:[%s4592_s0 + $0x238] sm:$0xff] }
  0x51   :  { %2939 = vmatprep.mubr.msk.f32.mxu0 %vm188_vm0, %v60_v12  ;;  %v92_v12 = vld [vmem:[%s4592_s0 + $0x240] sm:$0xff] }
  0x52   :  { %3069 = vmatmul.mubr.msk.f32.gmra.mrb[38].mxu1 %vm188_vm0, %v147_v21  ;;  %v3119_v21 = vpack.c.bf16 %v2169_v18, %v2167_v17 }
  0x53   :  { %3071 = vmatprep.mubr.msk.f32.mxu1 %vm188_vm0, %v148_v22  ;;  %v2168_v22 = vld [vmem:[%s4593_s3 + $0x10] sm:$0xff] }
  0x54   :  { %2940 = vmatmul.mubr.msk.f32.gmra.mrb[40].mxu0 %vm188_vm0, %v61_v15  ;;  %v93_v15 = vld [vmem:[%s4592_s0 + $0x248] sm:$0xff]  ;;  %3120 = vmatprep.subr.bf16.mxu1 %v3119_v21 }
  0x55   :  { %2942 = vmatprep.mubr.msk.f32.mxu0 %vm188_vm0, %v62_v16  ;;  %v94_v16 = vld [vmem:[%s4592_s0 + $0x250] sm:$0xff] }
  0x56   :  { %3072 = vmatmul.mubr.msk.f32.gmra.mrb[40].mxu1 %vm188_vm0, %v149_v25  ;;  %v95_v25 = vld [vmem:[%s4592_s0 + $0x258] sm:$0xff] }
  0x57   :  { %3074 = vmatprep.mubr.msk.f32.mxu1 %vm188_vm0, %v150_v26  ;;  %v96_v26 = vld [vmem:[%s4592_s0 + $0x260] sm:$0xff] }
  0x58   :  { %2943 = vmatmul.mubr.msk.f32.gmra.mrb[42].mxu0 %vm188_vm0, %v63_v19  ;;  %v2166_v19 = vld [vmem:[%s4593_s3] sm:$0xff] }
  0x59   :  { %2945 = vmatprep.mubr.msk.f32.mxu0 %vm188_vm0, %v64_v20  ;;  %v177_v20 = vld [vmem:[%s4592_s0 + $0x4e8] sm:$0xff] }
  0x5a   :  { %3075 = vmatmul.mubr.msk.f32.gmra.mrb[42].mxu1 %vm188_vm0, %v151_v29  ;;  %v98_v29 = vld [vmem:[%s4592_s0 + $0x270] sm:$0xff] }
  0x5b   :  { %3077 = vmatprep.mubr.msk.f32.mxu1 %vm188_vm0, %v152_v30  ;;  %v99_v30 = vld [vmem:[%s4592_s0 + $0x278] sm:$0xff] }
  0x5c   :  { %2946 = vmatmul.mubr.msk.f32.gmra.mrb[44].mxu0 %vm188_vm0, %v65_v23  ;;  %v178_v23 = vld [vmem:[%s4592_s0 + $0x4f0] sm:$0xff] }
  0x5d   :  { %2948 = vmatprep.mubr.msk.f32.mxu0 %vm188_vm0, %v66_v24  ;;  %v3121_v24 = vpack.c.bf16 %v2168_v22, %v2166_v19 }
  0x5e   :  { %3078 = vmatmul.mubr.msk.f32.gmra.mrb[44].mxu1 %vm188_vm0, %v153_v33  ;;  %v102_v33 = vld [vmem:[%s4592_s0 + $0x290] sm:$0xff] }
  0x5f   :  { %3080 = vmatprep.mubr.msk.f32.mxu1 %vm188_vm0, %v154_v34  ;;  %3122 = vmatpush1.bf16.msra.mxu1 %v3121_v24  ;;  %v103_v34 = vld [vmem:[%s4592_s0 + $0x298] sm:$0xff] }
  0x60   :  { %2949 = vmatmul.mubr.msk.f32.gmra.mrb[46].mxu0 %vm188_vm0, %v67_v27  ;;  %v179_v27 = vld [vmem:[%s4592_s0 + $0x4f8] sm:$0xff] }
  0x61   :  { %2951 = vmatprep.mubr.msk.f32.mxu0 %vm188_vm0, %v68_v28  ;;  %v97_v28 = vld [vmem:[%s4592_s0 + $0x268] sm:$0xff] }
  0x62   :  { %3081 = vmatmul.mubr.msk.f32.gmra.mrb[46].mxu1 %vm188_vm0, %v155_v37  ;;  %v106_v37 = vld [vmem:[%s4592_s0 + $0x2b0] sm:$0xff] }
  0x63   :  { %3083 = vmatprep.mubr.msk.f32.mxu1 %vm188_vm0, %v156_v38  ;;  %v107_v38 = vld [vmem:[%s4592_s0 + $0x2b8] sm:$0xff] }
  0x64   :  { %2952 = vmatmul.mubr.msk.f32.gmra.mrb[48].mxu0 %vm188_vm0, %v69_v31  ;;  %v100_v31 = vld [vmem:[%s4592_s0 + $0x280] sm:$0xff] }
  0x65   :  { %2954 = vmatprep.mubr.msk.f32.mxu0 %vm188_vm0, %v70_v32  ;;  %v101_v32 = vld [vmem:[%s4592_s0 + $0x288] sm:$0xff] }
  0x66   :  { %3084 = vmatmul.mubr.msk.f32.gmra.mrb[48].mxu1 %vm188_vm0, %v157_v41 }
  0x67   :  { %3086 = vmatprep.mubr.msk.f32.mxu1 %vm188_vm0, %v158_v42  ;;  %v2170_v42 = vld [vmem:[%s4593_s3 + $0x20] sm:$0xff] }
  0x68   :  { %2955 = vmatmul.mubr.msk.f32.gmra.mrb[50].mxu0 %vm188_vm0, %v71_v35  ;;  %v104_v35 = vld [vmem:[%s4592_s0 + $0x2a0] sm:$0xff] }
  0x69   :  { %2957 = vmatprep.mubr.msk.f32.mxu0 %vm188_vm0, %v72_v36  ;;  %v105_v36 = vld [vmem:[%s4592_s0 + $0x2a8] sm:$0xff] }
  0x6a   :  { %3087 = vmatmul.mubr.msk.f32.gmra.mrb[50].mxu1 %vm188_vm0, %v159_v45  ;;  %v3842_v45 = vld [vmem:[%s4594_s2] ss:$0 sm:$0xff] }
  0x6b   :  { %3089 = vmatprep.mubr.msk.f32.mxu1 %vm188_vm0, %v160_v46 }
  0x6c   :  { %2958 = vmatmul.mubr.msk.f32.gmra.mrb[52].mxu0 %vm188_vm0, %v73_v39  ;;  %v2171_v39 = vld [vmem:[%s4593_s3 + $0x28] sm:$0xff] }
  0x6d   :  { %2960 = vmatprep.mubr.msk.f32.mxu0 %vm188_vm0, %v74_v40  ;;  %v2173_v40 = vld [vmem:[%s4593_s3 + $0x38] sm:$0xff] }
  0x6e   :  { %3090 = vmatmul.mubr.msk.f32.gmra.mrb[52].mxu1 %vm188_vm0, %v161_v49  ;;  %v3123_v41 = vpack.c.bf16 %v2173_v40, %v2171_v39  ;;  %v2175_v49 = vld [vmem:[%s4593_s3 + $0x48] sm:$0xff] }
  0x6f   :  { %3092 = vmatprep.mubr.msk.f32.mxu1 %vm188_vm0, %v162_v50  ;;  %v2177_v50 = vld [vmem:[%s4593_s3 + $0x58] sm:$0xff] }
  0x70   :  { %2961 = vmatmul.mubr.msk.f32.gmra.mrb[54].mxu0 %vm188_vm0, %v75_v43  ;;  %v2172_v43 = vld [vmem:[%s4593_s3 + $0x30] sm:$0xff]  ;;  %3124 = vmatprep.subr.bf16.mxu1 %v3123_v41 }
  0x71   :  { %2963 = vmatprep.mubr.msk.f32.mxu0 %vm188_vm0, %v76_v44  ;;  %v3125_v44 = vpack.c.bf16 %v2172_v43, %v2170_v42 }
  0x72   :  { %3093 = vmatmul.mubr.msk.f32.gmra.mrb[54].mxu1 %vm188_vm0, %v163_v53  ;;  %v2174_v53 = vld [vmem:[%s4593_s3 + $0x40] sm:$0xff] }
  0x73   :  { %3095 = vmatprep.mubr.msk.f32.mxu1 %vm188_vm0, %v164_v54  ;;  %3126 = vmatpush1.bf16.msra.mxu1 %v3125_v44  ;;  %v2176_v54 = vld [vmem:[%s4593_s3 + $0x50] sm:$0xff] }
  0x74   :  { %2964 = vmatmul.mubr.msk.f32.gmra.mrb[56].mxu0 %vm188_vm0, %v77_v47 }
  0x75   :  { %2966 = vmatprep.mubr.msk.f32.mxu0 %vm188_vm0, %v78_v48 }
  0x76   :  { %3096 = vmatmul.mubr.msk.f32.gmra.mrb[56].mxu1 %vm188_vm0, %v165_v57 }
  0x77   :  { %3098 = vmatprep.mubr.msk.f32.mxu1 %vm188_vm0, %v166_v58 }
  0x78   :  { %2967 = vmatmul.mubr.msk.f32.gmra.mrb[58].mxu0 %vm188_vm0, %v79_v51 }
  0x79   :  { %2969 = vmatprep.mubr.msk.f32.mxu0 %vm188_vm0, %v80_v52  ;;  %v3127_v52 = vpack.c.bf16 %v2177_v50, %v2175_v49 }
  0x7a   :  { %3099 = vmatmul.mubr.msk.f32.gmra.mrb[58].mxu1 %vm188_vm0, %v167_v61 }
  0x7b   :  { %3101 = vmatprep.mubr.msk.f32.mxu1 %vm188_vm0, %v168_v62  ;;  %3128 = vmatprep.subr.bf16.mxu1 %v3127_v52 }
  0x7c   :  { %2970 = vmatmul.mubr.msk.f32.gmra.mrb[60].mxu0 %vm188_vm0, %v81_v55 }
  0x7d   :  { %2972 = vmatprep.mubr.msk.f32.mxu0 %vm188_vm0, %v82_v56  ;;  %v3129_v56 = vpack.c.bf16 %v2176_v54, %v2174_v53 }
  0x7e   :  { %3102 = vmatmul.mubr.msk.f32.gmra.mrb[60].mxu1 %vm188_vm0, %v169_v1 }
  0x7f   :  { %3104 = vmatprep.mubr.msk.f32.mxu1 %vm188_vm0, %v170_v2  ;;  %3130 = vmatpush1.bf16.msra.mxu1 %v3129_v56 }
  0x80   :  { %2973 = vmatmul.mubr.msk.f32.gmra.mrb[62].mxu0 %vm188_vm0, %v83_v59 }
  0x81   :  { %2975 = vmatprep.mubr.msk.f32.mxu0 %vm188_vm0, %v84_v60 }
  0x82   :  { %3105 = vmatmul.mubr.msk.f32.gmra.mrb[62].mxu1 %vm188_vm0, %v171_v5 }
  0x83   :  { %3107 = vmatprep.mubr.msk.f32.mxu1 %vm188_vm0, %v172_v6 }
  0x84   :  { %2976 = vmatmul.mubr.msk.f32.gmra.mrb[64].mxu0 %vm188_vm0, %v85_v63 }
  0x85   :  { %2978 = vmatprep.mubr.msk.f32.mxu0 %vm188_vm0, %v86_v0 }
  0x86   :  { %3108 = vmatmul.mubr.msk.f32.gmra.mrb[64].mxu1 %vm188_vm0, %v173_v9 }
  0x87   :  { %3110 = vmatprep.mubr.msk.f32.mxu1 %vm188_vm0, %v174_v10 }
  0x88   :  { %2979 = vmatmul.mubr.msk.f32.gmra.mrb[66].mxu0 %vm188_vm0, %v87_v3 }
  0x89   :  { %2981 = vmatprep.mubr.msk.f32.mxu0 %vm188_vm0, %v88_v4 }
  0x8a   :  { %3111 = vmatmul.mubr.msk.f32.gmra.mrb[66].mxu1 %vm188_vm0, %v175_v13 }
  0x8b   :  { %3113 = vmatprep.mubr.msk.f32.mxu1 %vm188_vm0, %v176_v14 }
  0x8c   :  { %2982 = vmatmul.mubr.msk.f32.gmra.mrb[68].mxu0 %vm188_vm0, %v89_v7 }
  0x8d   :  { %2984 = vmatprep.mubr.msk.f32.mxu0 %vm188_vm0, %v90_v8 }
  0x8e   :  { %3114 = vmatmul.mubr.msk.f32.gmra.mrb[68].mxu1 %vm188_vm0, %v177_v20 }
  0x8f   :  { %3116 = vmatprep.mubr.msk.f32.mxu1 %vm188_vm0, %v178_v23 }
  0x90   :  { %2985 = vmatmul.mubr.msk.f32.gmra.mrb[70].mxu0 %vm188_vm0, %v91_v11 }
  0x91   :  { %2987 = vmatprep.mubr.msk.f32.mxu0 %vm188_vm0, %v92_v12 }
  0x92   :  { %3117 = vmatmul.mubr.msk.f32.gmra.mrb[70].mxu1 %vm188_vm0, %v179_v27 }
  0x94   :  { %2988 = vmatmul.mubr.msk.f32.gmra.mrb[72].mxu0 %vm188_vm0, %v93_v15 }
  0x95   :  { %2990 = vmatprep.mubr.msk.f32.mxu0 %vm188_vm0, %v94_v16 }
  0x98   :  { %2991 = vmatmul.mubr.msk.f32.gmra.mrb[74].mxu0 %vm188_vm0, %v95_v25 }
  0x99   :  { %2993 = vmatprep.mubr.msk.f32.mxu0 %vm188_vm0, %v96_v26 }
  0x9c   :  { %2994 = vmatmul.mubr.msk.f32.gmra.mrb[76].mxu0 %vm188_vm0, %v97_v28 }
  0x9d   :  { %2996 = vmatprep.mubr.msk.f32.mxu0 %vm188_vm0, %v98_v29 }
  0xa0   :  { %2997 = vmatmul.mubr.msk.f32.gmra.mrb[78].mxu0 %vm188_vm0, %v99_v30 }
  0xa1   :  { %2999 = vmatprep.mubr.msk.f32.mxu0 %vm188_vm0, %v100_v31 }
  0xa4   :  { %3000 = vmatmul.mubr.msk.f32.gmra.mrb[80].mxu0 %vm188_vm0, %v101_v32 }
  0xa5   :  { %3002 = vmatprep.mubr.msk.f32.mxu0 %vm188_vm0, %v102_v33 }
  0xa8   :  { %3003 = vmatmul.mubr.msk.f32.gmra.mrb[82].mxu0 %vm188_vm0, %v103_v34 }
  0xa9   :  { %3005 = vmatprep.mubr.msk.f32.mxu0 %vm188_vm0, %v104_v35 }
  0xac   :  { %3006 = vmatmul.mubr.msk.f32.gmra.mrb[84].mxu0 %vm188_vm0, %v105_v36 }
  0xad   :  { %3008 = vmatprep.mubr.msk.f32.mxu0 %vm188_vm0, %v106_v37 }
  0xb0   :  { %3009 = vmatmul.mubr.msk.f32.gmra.mrb[86].mxu0 %vm188_vm0, %v107_v38 }
  0xd7   :  { %v2881_v46 = vpop.f32.mrb[0].mxu0 }
  0xd8   :  { %v735_v47 = vpop.f32.mrb[1].mxu0  ;;  %v741_v48 = vadd.f32 %v2881_v46, %v3842_v45 }
  0xd9   :  { %v736_v51 = vadd.f32 %v3842_v45, %v735_v47  ;;  %v3013_v5 = vpop.f32.mrb[0].mxu1 }
  0xda   :  { %v1695_v59 = vmul.f32 0.2, %v741_v48  ;;  %vm1535_vm1 = vcmp.gt.f32.partialorder %v741_v48, 0.0  ;;  %v1181_v8 = vadd.f32 %v3013_v5, %v3842_v45  ;;  %v1175_v9 = vpop.f32.mrb[1].mxu1 }
  0xdb   :  { %v2884_v55 = vpop.f32.mrb[2].mxu0  ;;  %v1694_v61 = vmul.f32 0.2, %v736_v51  ;;  %vm1534_vm2 = vcmp.gt.f32.partialorder %v736_v51, 0.0  ;;  %v1176_v13 = vadd.f32 %v3842_v45, %v1175_v9 }
  0xdc   :  { %v751_v57 = vadd.f32 %v2884_v55, %v3842_v45  ;;  %v745_v58 = vpop.f32.mrb[3].mxu0  ;;  %v1855_v3 = vsel %vm1535_vm1, %v741_v48, %v1695_v59  ;;  %v1783_v18 = vmul.f32 0.2, %v1181_v8  ;;  %vm1623_vm7 = vcmp.gt.f32.partialorder %v1181_v8, 0.0 }
  0xdd   :  { %v746_v60 = vadd.f32 %v3842_v45, %v745_v58  ;;  %v1854_v6 = vsel %vm1534_vm2, %v736_v51, %v1694_v61  ;;  %v3016_v22 = vpop.f32.mrb[2].mxu1  ;;  %vm1622_vm9 = vcmp.gt.f32.partialorder %v1176_v13, 0.0  ;;  %v1782_v28 = vmul.f32 0.2, %v1176_v13 }
  0xde   :  { %v1697_v62 = vmul.f32 0.2, %v751_v57  ;;  %vm1537_vm3 = vcmp.gt.f32.partialorder %v751_v57, 0.0  ;;  %v1185_v25 = vpop.f32.mrb[3].mxu1  ;;  %v1191_v29 = vadd.f32 %v3016_v22, %v3842_v45  ;;  %v3872_v33 = vsel %vm1623_vm7, %v1181_v8, %v1783_v18 }
  0xdf   :  { %v2887_v63 = vpop.f32.mrb[4].mxu0  ;;  %v1696_v0 = vmul.f32 0.2, %v746_v60  ;;  %vm1536_vm4 = vcmp.gt.f32.partialorder %v746_v60, 0.0  ;;  %v1186_v34 = vadd.f32 %v3842_v45, %v1185_v25  ;;  %v3877_v38 = vsel %vm1622_vm9, %v1176_v13, %v1782_v28 }
  0xe0   :  { %v761_v1 = vadd.f32 %v2887_v63, %v3842_v45  ;;  %v755_v2 = vpop.f32.mrb[5].mxu0  ;;  %v3863_v10 = vsel %vm1537_vm3, %v751_v57, %v1697_v62  ;;  %vm1625_vm12 = vcmp.gt.f32.partialorder %v1191_v29, 0.0  ;;  %v1785_v46 = vmul.f32 0.2, %v1191_v29 }
  0xe1   :  { %v756_v4 = vadd.f32 %v3842_v45, %v755_v2  ;;  %v3866_v14 = vsel %vm1536_vm4, %v746_v60, %v1696_v0  ;;  %v3019_v39 = vpop.f32.mrb[4].mxu1  ;;  %vm1624_vm14 = vcmp.gt.f32.partialorder %v1186_v34, 0.0  ;;  %v1784_v51 = vmul.f32 0.2, %v1186_v34 }
  0xe2   :  { %vm1539_vm5 = vcmp.gt.f32.partialorder %v761_v1, 0.0  ;;  %v1699_v7 = vmul.f32 0.2, %v761_v1  ;;  %v1195_v42 = vpop.f32.mrb[5].mxu1  ;;  %v1201_v47 = vadd.f32 %v3019_v39, %v3842_v45  ;;  %v3885_v55 = vsel %vm1625_vm12, %v1191_v29, %v1785_v46 }
  0xe3   :  { %vm1538_vm6 = vcmp.gt.f32.partialorder %v756_v4, 0.0  ;;  %v1698_v11 = vmul.f32 0.2, %v756_v4  ;;  %v2890_v12 = vpop.f32.mrb[6].mxu0  ;;  %v3889_v59 = vsel %vm1624_vm14, %v1186_v34, %v1784_v51  ;;  %v1196_v63 = vadd.f32 %v3842_v45, %v1195_v42 }
  0xe4   :  { %v1859_v15 = vsel %vm1539_vm5, %v761_v1, %v1699_v7  ;;  %v771_v16 = vadd.f32 %v2890_v12, %v3842_v45  ;;  %v765_v17 = vpop.f32.mrb[7].mxu0  ;;  %vm1627_vm1 = vcmp.gt.f32.partialorder %v1201_v47, 0.0 }
  0xe5   :  { %v2015_v19 = vmax.f32 %v1855_v3, %v1859_v15  ;;  %v1858_v20 = vsel %vm1538_vm6, %v756_v4, %v1698_v11  ;;  %v766_v21 = vadd.f32 %v3842_v45, %v765_v17  ;;  %v3022_v56 = vpop.f32.mrb[6].mxu1  ;;  %v1787_v3 = vmul.f32 0.2, %v1201_v47 }
  0xe6   :  { %v2014_v23 = vmax.f32 %v1854_v6, %v1858_v20  ;;  %vm1541_vm8 = vcmp.gt.f32.partialorder %v771_v16, 0.0  ;;  %v1701_v24 = vmul.f32 0.2, %v771_v16  ;;  %v1205_v60 = vpop.f32.mrb[7].mxu1  ;;  %v1211_v4 = vadd.f32 %v3022_v56, %v3842_v45 }
  0xe7   :  { %vm1540_vm10 = vcmp.gt.f32.partialorder %v766_v21, 0.0  ;;  %v1700_v26 = vmul.f32 0.2, %v766_v21  ;;  %v2893_v27 = vpop.f32.mrb[8].mxu0  ;;  %vm1626_vm2 = vcmp.gt.f32.partialorder %v1196_v63, 0.0  ;;  %v3899_v11 = vsel %vm1627_vm1, %v1201_v47, %v1787_v3 }
  0xe8   :  { %v1861_v30 = vsel %vm1541_vm8, %v771_v16, %v1701_v24  ;;  %v781_v31 = vadd.f32 %v2893_v27, %v3842_v45  ;;  %v775_v32 = vpop.f32.mrb[9].mxu0  ;;  %v2095_v15 = vmax.f32 %v3899_v11, %v3872_v33  ;;  %v1786_v16 = vmul.f32 0.2, %v1196_v63 }
  0xe9   :  { %v2017_v35 = vmax.f32 %v3863_v10, %v1861_v30  ;;  %v1860_v36 = vsel %vm1540_vm10, %v766_v21, %v1700_v26  ;;  %v776_v37 = vadd.f32 %v3842_v45, %v775_v32  ;;  %v3025_v8 = vpop.f32.mrb[8].mxu1  ;;  %vm1629_vm5 = vcmp.gt.f32.partialorder %v1211_v4, 0.0 }
  0xea   :  { %v2016_v40 = vmax.f32 %v3866_v14, %v1860_v36  ;;  %vm1543_vm11 = vcmp.gt.f32.partialorder %v781_v31, 0.0  ;;  %v1703_v41 = vmul.f32 0.2, %v781_v31  ;;  %v1215_v12 = vpop.f32.mrb[9].mxu1  ;;  %v1789_v20 = vmul.f32 0.2, %v1211_v4 }
  0xeb   :  { %vm1542_vm13 = vcmp.gt.f32.partialorder %v776_v37, 0.0  ;;  %v1702_v43 = vmul.f32 0.2, %v776_v37  ;;  %v2896_v44 = vpop.f32.mrb[10].mxu0  ;;  %v3907_v24 = vsel %vm1626_vm2, %v1196_v63, %v1786_v16  ;;  %v1206_v33 = vadd.f32 %v3842_v45, %v1205_v60 }
  0xec   :  { %v1863_v48 = vsel %vm1543_vm11, %v781_v31, %v1703_v41  ;;  %v791_v49 = vadd.f32 %v2896_v44, %v3842_v45  ;;  %v785_v50 = vpop.f32.mrb[11].mxu0  ;;  %v2094_v28 = vmax.f32 %v3907_v24, %v3877_v38  ;;  %v3912_v32 = vsel %vm1629_vm5, %v1211_v4, %v1789_v20 }
  0xed   :  { %v3882_v52 = vmax.f32 %v2015_v19, %v1863_v48  ;;  %v1862_v53 = vsel %vm1542_vm13, %v776_v37, %v1702_v43  ;;  %v786_v54 = vadd.f32 %v3842_v45, %v785_v50  ;;  %v3028_v25 = vpop.f32.mrb[10].mxu1  ;;  %v2093_v37 = vmax.f32 %v3912_v32, %v3885_v55 }
  0xee   :  { %v3887_v57 = vmax.f32 %v2014_v23, %v1862_v53  ;;  %vm1545_vm15 = vcmp.gt.f32.partialorder %v791_v49, 0.0  ;;  %v1705_v58 = vmul.f32 0.2, %v791_v49  ;;  %v1225_v29 = vpop.f32.mrb[11].mxu1  ;;  %v1221_v39 = vadd.f32 %v3025_v8, %v3842_v45 }
  0xef   :  { %vm1544_vm0 = vcmp.gt.f32.partialorder %v786_v54, 0.0  ;;  %v1704_v61 = vmul.f32 0.2, %v786_v54  ;;  %v2899_v62 = vpop.f32.mrb[12].mxu0  ;;  %vm1628_vm8 = vcmp.gt.f32.partialorder %v1206_v33, 0.0  ;;  %v1216_v51 = vadd.f32 %v3842_v45, %v1215_v12 }
  0xf0   :  { %v1865_v0 = vsel %vm1545_vm15, %v791_v49, %v1705_v58  ;;  %v801_v1 = vadd.f32 %v2899_v62, %v3842_v45  ;;  %v795_v2 = vpop.f32.mrb[13].mxu0  ;;  %v1788_v47 = vmul.f32 0.2, %v1206_v33  ;;  %vm1631_vm11 = vcmp.gt.f32.partialorder %v1221_v39, 0.0 }
  0xf1   :  { %v3894_v5 = vmax.f32 %v2017_v35, %v1865_v0  ;;  %v1864_v6 = vsel %vm1544_vm0, %v786_v54, %v1704_v61  ;;  %v796_v7 = vadd.f32 %v3842_v45, %v795_v2  ;;  %v3921_v43 = vpop.f32.mrb[12].mxu1  ;;  %vm1630_vm14 = vcmp.gt.f32.partialorder %v1216_v51, 0.0 }
  0xf2   :  { %v3897_v9 = vmax.f32 %v2016_v40, %v1864_v6  ;;  %vm1547_vm3 = vcmp.gt.f32.partialorder %v801_v1, 0.0  ;;  %v1707_v10 = vmul.f32 0.2, %v801_v1  ;;  %v3924_v48 = vpop.f32.mrb[13].mxu1  ;;  %v1948_v56 = vsel %vm1628_vm8, %v1206_v33, %v1788_v47 }
  0xf3   :  { %vm1546_vm4 = vcmp.gt.f32.partialorder %v796_v7, 0.0  ;;  %v1706_v13 = vmul.f32 0.2, %v796_v7  ;;  %v2902_v14 = vpop.f32.mrb[14].mxu0  ;;  %v2092_v62 = vmax.f32 %v1948_v56, %v3889_v59  ;;  %v1790_v59 = vmul.f32 0.2, %v1216_v51 }
  0xf4   :  { %v1867_v17 = vsel %vm1547_vm3, %v801_v1, %v1707_v10  ;;  %v811_v18 = vadd.f32 %v2902_v14, %v3842_v45  ;;  %v805_v19 = vpop.f32.mrb[15].mxu0  ;;  %v1231_v10 = vadd.f32 %v3028_v25, %v3842_v45  ;;  %v1226_v14 = vadd.f32 %v3842_v45, %v1225_v29 }
  0xf5   :  { %v2023_v21 = vmax.f32 %v3882_v52, %v1867_v17  ;;  %v1866_v22 = vsel %vm1546_vm4, %v796_v7, %v1706_v13  ;;  %v806_v23 = vadd.f32 %v3842_v45, %v805_v19  ;;  %v3932_v63 = vpop.f32.mrb[14].mxu1  ;;  %v1236_v55 = vadd.f32 %v3842_v45, %v3924_v48 }
  0xf6   :  { %v2022_v26 = vmax.f32 %v3887_v57, %v1866_v22  ;;  %vm1549_vm6 = vcmp.gt.f32.partialorder %v811_v18, 0.0  ;;  %v1709_v27 = vmul.f32 0.2, %v811_v18  ;;  %v1791_v57 = vmul.f32 0.2, %v1221_v39  ;;  %v3936_v3 = vpop.f32.mrb[15].mxu1 }
  0xf7   :  { %vm1548_vm7 = vcmp.gt.f32.partialorder %v806_v23, 0.0  ;;  %v1708_v30 = vmul.f32 0.2, %v806_v23  ;;  %v2905_v31 = vpop.f32.mrb[16].mxu0  ;;  %vm1633_vm1 = vcmp.gt.f32.partialorder %v1231_v10, 0.0  ;;  %vm1632_vm2 = vcmp.gt.f32.partialorder %v1226_v14, 0.0 }
  0xf8   :  { %v1869_v34 = vsel %vm1549_vm6, %v811_v18, %v1709_v27  ;;  %v821_v35 = vadd.f32 %v2905_v31, %v3842_v45  ;;  %v815_v36 = vpop.f32.mrb[17].mxu0  ;;  %v1951_v2 = vsel %vm1631_vm11, %v1221_v39, %v1791_v57  ;;  %v1950_v18 = vsel %vm1630_vm14, %v1216_v51, %v1790_v59 }
  0xf9   :  { %v2025_v40 = vmax.f32 %v3894_v5, %v1869_v34  ;;  %v1868_v41 = vsel %vm1548_vm7, %v806_v23, %v1708_v30  ;;  %v816_v42 = vadd.f32 %v3842_v45, %v815_v36  ;;  %v3938_v6 = vmax.f32 %v2095_v15, %v1951_v2  ;;  %v3946_v16 = vpop.f32.mrb[16].mxu1 }
  0xfa   :  { %v2024_v44 = vmax.f32 %v3897_v9, %v1868_v41  ;;  %vm1551_vm9 = vcmp.gt.f32.partialorder %v821_v35, 0.0  ;;  %v1711_v46 = vmul.f32 0.2, %v821_v35  ;;  %v3950_v19 = vpop.f32.mrb[17].mxu1  ;;  %v3955_v22 = vmax.f32 %v2094_v28, %v1950_v18 }
  0xfb   :  { %vm1550_vm10 = vcmp.gt.f32.partialorder %v816_v42, 0.0  ;;  %v1710_v49 = vmul.f32 0.2, %v816_v42  ;;  %v2908_v50 = vpop.f32.mrb[18].mxu0  ;;  %v1793_v27 = vmul.f32 0.2, %v1231_v10 }
  0xfc   :  { %v1871_v52 = vsel %vm1551_vm9, %v821_v35, %v1711_v46  ;;  %v831_v53 = vadd.f32 %v2908_v50, %v3842_v45  ;;  %v825_v54 = vpop.f32.mrb[19].mxu0  ;;  %v1792_v33 = vmul.f32 0.2, %v1226_v14  ;;  %vm1634_vm8 = vcmp.gt.f32.partialorder %v1236_v55, 0.0 }
  0xfd   :  { %v3928_v58 = vmax.f32 %v2023_v21, %v1871_v52  ;;  %v1870_v60 = vsel %vm1550_vm10, %v816_v42, %v1710_v49  ;;  %v826_v61 = vadd.f32 %v3842_v45, %v825_v54  ;;  %v3960_v34 = vpop.f32.mrb[18].mxu1  ;;  %v1953_v24 = vsel %vm1633_vm1, %v1231_v10, %v1793_v27 }
  0xfe   :  { %v3934_v0 = vmax.f32 %v2022_v26, %v1870_v60  ;;  %vm1553_vm12 = vcmp.gt.f32.partialorder %v831_v53, 0.0  ;;  %v1713_v1 = vmul.f32 0.2, %v831_v53  ;;  %v3963_v28 = vpop.f32.mrb[19].mxu1  ;;  %v1952_v41 = vsel %vm1632_vm2, %v1226_v14, %v1792_v33 }
  0xff   :  { %vm1552_vm13 = vcmp.gt.f32.partialorder %v826_v61, 0.0  ;;  %v1712_v4 = vmul.f32 0.2, %v826_v61  ;;  %v2911_v5 = vpop.f32.mrb[20].mxu0  ;;  %v3971_v47 = vmax.f32 %v2092_v62, %v1952_v41  ;;  %v1241_v49 = vadd.f32 %v3921_v43, %v3842_v45 }
 0x100   :  { %v1873_v7 = vsel %vm1553_vm12, %v831_v53, %v1713_v1  ;;  %v841_v8 = vadd.f32 %v2911_v5, %v3842_v45  ;;  %v835_v9 = vpop.f32.mrb[21].mxu0  ;;  %v1794_v62 = vmul.f32 0.2, %v1236_v55 }
 0x101   :  { %v3942_v11 = vmax.f32 %v2025_v40, %v1873_v7  ;;  %v1872_v12 = vsel %vm1552_vm13, %v826_v61, %v1712_v4  ;;  %v836_v13 = vadd.f32 %v3842_v45, %v835_v9  ;;  %v3968_v40 = vmax.f32 %v2093_v37, %v1953_v24  ;;  %v3979_v32 = vpop.f32.mrb[20].mxu1 }
 0x102   :  { %v3948_v17 = vmax.f32 %v2024_v44, %v1872_v12  ;;  %vm1555_vm15 = vcmp.gt.f32.partialorder %v841_v8, 0.0  ;;  %v1715_v15 = vmul.f32 0.2, %v841_v8  ;;  %vm1635_vm6 = vcmp.gt.f32.partialorder %v1241_v49, 0.0  ;;  %v3982_v54 = vpop.f32.mrb[21].mxu1 }
 0x103   :  { %vm1554_vm0 = vcmp.gt.f32.partialorder %v836_v13, 0.0  ;;  %v1714_v20 = vmul.f32 0.2, %v836_v13  ;;  %v2914_v21 = vpop.f32.mrb[22].mxu0  ;;  %v1795_v57 = vmul.f32 0.2, %v1241_v49 }
 0x104   :  { %v1875_v23 = vsel %vm1555_vm15, %v841_v8, %v1715_v15  ;;  %v851_v25 = vadd.f32 %v2914_v21, %v3842_v45  ;;  %v845_v26 = vpop.f32.mrb[23].mxu0 }
 0x105   :  { %v2031_v29 = vmax.f32 %v3928_v58, %v1875_v23  ;;  %v1874_v30 = vsel %vm1554_vm0, %v836_v13, %v1714_v20  ;;  %v846_v31 = vadd.f32 %v3842_v45, %v845_v26  ;;  %v1251_v58 = vadd.f32 %v3932_v63, %v3842_v45  ;;  %v3992_v5 = vpop.f32.mrb[22].mxu1 }
 0x106   :  { %v2030_v35 = vmax.f32 %v3934_v0, %v1874_v30  ;;  %vm1557_vm3 = vcmp.gt.f32.partialorder %v851_v25, 0.0  ;;  %v1717_v38 = vmul.f32 0.2, %v851_v25  ;;  %v3990_v4 = vsel %vm1635_vm6, %v1241_v49, %v1795_v57  ;;  %v3998_v9 = vpop.f32.mrb[23].mxu1 }
 0x107   :  { %vm1556_vm4 = vcmp.gt.f32.partialorder %v846_v31, 0.0  ;;  %v1716_v36 = vmul.f32 0.2, %v846_v31  ;;  %v2917_v39 = vpop.f32.mrb[24].mxu0  ;;  %v2103_v63 = vmax.f32 %v3938_v6, %v3990_v4  ;;  %vm1637_vm11 = vcmp.gt.f32.partialorder %v1251_v58, 0.0 }
 0x108   :  { %v1877_v42 = vsel %vm1557_vm3, %v851_v25, %v1717_v38  ;;  %v861_v44 = vadd.f32 %v2917_v39, %v3842_v45  ;;  %v855_v46 = vpop.f32.mrb[25].mxu0  ;;  %v1797_v15 = vmul.f32 0.2, %v1251_v58  ;;  %v1246_v23 = vadd.f32 %v3842_v45, %v3936_v3 }
 0x109   :  { %v2033_v50 = vmax.f32 %v3942_v11, %v1877_v42  ;;  %v1876_v51 = vsel %vm1556_vm4, %v846_v31, %v1716_v36  ;;  %v856_v52 = vadd.f32 %v3842_v45, %v855_v46  ;;  %v4000_v11 = vsel %vm1634_vm8, %v1236_v55, %v1794_v62  ;;  %v4010_v25 = vpop.f32.mrb[24].mxu1 }
 0x10a   :  { %v2032_v37 = vmax.f32 %v3948_v17, %v1876_v51  ;;  %vm1559_vm5 = vcmp.gt.f32.partialorder %v861_v44, 0.0  ;;  %v1719_v53 = vmul.f32 0.2, %v861_v44  ;;  %v2102_v17 = vmax.f32 %v3955_v22, %v4000_v11  ;;  %v4016_v30 = vpop.f32.mrb[25].mxu1 }
 0x10b   :  { %vm1558_vm7 = vcmp.gt.f32.partialorder %v856_v52, 0.0  ;;  %v1718_v56 = vmul.f32 0.2, %v856_v52  ;;  %v2920_v43 = vpop.f32.mrb[26].mxu0  ;;  %vm1636_vm14 = vcmp.gt.f32.partialorder %v1246_v23, 0.0  ;;  %v1261_v36 = vadd.f32 %v3946_v16, %v3842_v45 }
 0x10c   :  { %v1879_v60 = vsel %vm1559_vm5, %v861_v44, %v1719_v53  ;;  %v871_v61 = vadd.f32 %v2920_v43, %v3842_v45  ;;  %v865_v48 = vpop.f32.mrb[27].mxu0  ;;  %v1796_v24 = vmul.f32 0.2, %v1246_v23  ;;  %v1256_v44 = vadd.f32 %v3842_v45, %v3950_v19 }
 0x10d   :  { %v3987_v0 = vmax.f32 %v2031_v29, %v1879_v60  ;;  %v1878_v1 = vsel %vm1558_vm7, %v856_v52, %v1718_v56  ;;  %v866_v2 = vadd.f32 %v3842_v45, %v865_v48  ;;  %v4014_v29 = vsel %vm1637_vm11, %v1251_v58, %v1797_v15  ;;  %v4027_v46 = vpop.f32.mrb[26].mxu1 }
 0x10e   :  { %v3994_v7 = vmax.f32 %v2030_v35, %v1878_v1  ;;  %vm1561_vm9 = vcmp.gt.f32.partialorder %v871_v61, 0.0  ;;  %v1721_v8 = vmul.f32 0.2, %v871_v61  ;;  %v2101_v33 = vmax.f32 %v3968_v40, %v4014_v29  ;;  %v4032_v52 = vpop.f32.mrb[27].mxu1 }
 0x10f   :  { %vm1560_vm10 = vcmp.gt.f32.partialorder %v866_v2, 0.0  ;;  %v1720_v59 = vmul.f32 0.2, %v866_v2  ;;  %v2923_v10 = vpop.f32.mrb[28].mxu0  ;;  %v4030_v51 = vsel %vm1636_vm14, %v1246_v23, %v1796_v24  ;;  %vm1639_vm1 = vcmp.gt.f32.partialorder %v1261_v36, 0.0 }
 0x110   :  { %v1881_v12 = vsel %vm1561_vm9, %v871_v61, %v1721_v8  ;;  %v881_v13 = vadd.f32 %v2923_v10, %v3842_v45  ;;  %v875_v14 = vpop.f32.mrb[29].mxu0  ;;  %v1799_v43 = vmul.f32 0.2, %v1261_v36  ;;  %vm1638_vm2 = vcmp.gt.f32.partialorder %v1256_v44, 0.0 }
 0x111   :  { %v4005_v18 = vmax.f32 %v2033_v50, %v1881_v12  ;;  %v1880_v20 = vsel %vm1560_vm10, %v866_v2, %v1720_v59  ;;  %v876_v21 = vadd.f32 %v3842_v45, %v875_v14  ;;  %v1798_v61 = vmul.f32 0.2, %v1256_v44  ;;  %v4039_v48 = vpop.f32.mrb[28].mxu1 }
 0x112   :  { %v4012_v26 = vmax.f32 %v2032_v37, %v1880_v20  ;;  %vm1563_vm12 = vcmp.gt.f32.partialorder %v881_v13, 0.0  ;;  %v1723_v27 = vmul.f32 0.2, %v881_v13  ;;  %v2100_v37 = vmax.f32 %v3971_v47, %v4030_v51  ;;  %v4042_v2 = vpop.f32.mrb[29].mxu1 }
 0x113   :  { %vm1562_vm13 = vcmp.gt.f32.partialorder %v876_v21, 0.0  ;;  %v1722_v22 = vmul.f32 0.2, %v876_v21  ;;  %v2926_v31 = vpop.f32.mrb[30].mxu0  ;;  %v1959_v1 = vsel %vm1639_vm1, %v1261_v36, %v1799_v43  ;;  %v1958_v10 = vsel %vm1638_vm2, %v1256_v44, %v1798_v61 }
 0x114   :  { %v1883_v35 = vsel %vm1563_vm12, %v881_v13, %v1723_v27  ;;  %v891_v3 = vadd.f32 %v2926_v31, %v3842_v45  ;;  %v885_v38 = vpop.f32.mrb[31].mxu0  ;;  %v4047_v59 = vmax.f32 %v2103_v63, %v1959_v1  ;;  %v4050_v14 = vmax.f32 %v2102_v17, %v1958_v10 }
 0x115   :  { %v2039_v39 = vmax.f32 %v3987_v0, %v1883_v35  ;;  %v1882_v41 = vsel %vm1562_vm13, %v876_v21, %v1722_v22  ;;  %v886_v42 = vadd.f32 %v3842_v45, %v885_v38  ;;  %v1271_v15 = vadd.f32 %v3960_v34, %v3842_v45  ;;  %v4059_v4 = vpop.f32.mrb[30].mxu1 }
 0x116   :  { %v2038_v49 = vmax.f32 %v3994_v7, %v1882_v41  ;;  %vm1565_vm15 = vcmp.gt.f32.partialorder %v891_v3, 0.0  ;;  %v1725_v50 = vmul.f32 0.2, %v891_v3  ;;  %v1266_v6 = vadd.f32 %v3842_v45, %v3963_v28  ;;  %v4063_v17 = vpop.f32.mrb[31].mxu1 }
 0x117   :  { %vm1564_vm0 = vcmp.gt.f32.partialorder %v886_v42, 0.0  ;;  %v1724_v16 = vmul.f32 0.2, %v886_v42  ;;  %v2929_v55 = vpop.f32.mrb[32].mxu0  ;;  %vm1641_vm6 = vcmp.gt.f32.partialorder %v1271_v15, 0.0  ;;  %v1281_v22 = vadd.f32 %v3979_v32, %v3842_v45 }
 0x118   :  { %v1885_v53 = vsel %vm1565_vm15, %v891_v3, %v1725_v50  ;;  %v901_v19 = vadd.f32 %v2929_v55, %v3842_v45  ;;  %v895_v56 = vpop.f32.mrb[33].mxu0  ;;  %v1801_v27 = vmul.f32 0.2, %v1271_v15  ;;  %vm1640_vm8 = vcmp.gt.f32.partialorder %v1266_v6, 0.0 }
 0x119   :  { %v2041_v57 = vmax.f32 %v4005_v18, %v1885_v53  ;;  %v1884_v58 = vsel %vm1564_vm0, %v886_v42, %v1724_v16  ;;  %v896_v60 = vadd.f32 %v3842_v45, %v895_v56  ;;  %v1800_v3 = vmul.f32 0.2, %v1266_v6  ;;  %v4071_v41 = vpop.f32.mrb[32].mxu1 }
 0x11a   :  { %v2040_v62 = vmax.f32 %v4012_v26, %v1884_v58  ;;  %vm1567_vm3 = vcmp.gt.f32.partialorder %v901_v19, 0.0  ;;  %v1727_v0 = vmul.f32 0.2, %v901_v19  ;;  %vm1643_vm11 = vcmp.gt.f32.partialorder %v1281_v22, 0.0 }
 0x11b   :  { %vm1566_vm4 = vcmp.gt.f32.partialorder %v896_v60, 0.0  ;;  %v1726_v7 = vmul.f32 0.2, %v896_v60  ;;  %v2932_v8 = vpop.f32.mrb[34].mxu0  ;;  %v1960_v55 = vsel %vm1640_vm8, %v1266_v6, %v1800_v3  ;;  %v1276_v58 = vadd.f32 %v3842_v45, %v3982_v54 }
 0x11c   :  { %v1887_v11 = vsel %vm1567_vm3, %v901_v19, %v1727_v0  ;;  %v911_v12 = vadd.f32 %v2932_v8, %v3842_v45  ;;  %v905_v13 = vpop.f32.mrb[35].mxu0  ;;  %v4086_v43 = vmax.f32 %v2100_v37, %v1960_v55 }
 0x11d   :  { %v4054_v18 = vmax.f32 %v2039_v39, %v1887_v11  ;;  %v1886_v20 = vsel %vm1566_vm4, %v896_v60, %v1726_v7  ;;  %v906_v21 = vadd.f32 %v3842_v45, %v905_v13  ;;  %v1961_v39 = vsel %vm1641_vm6, %v1271_v15, %v1801_v27 }
 0x11e   :  { %v4061_v63 = vmax.f32 %v2038_v49, %v1886_v20  ;;  %vm1569_vm5 = vcmp.gt.f32.partialorder %v911_v12, 0.0  ;;  %v1729_v23 = vmul.f32 0.2, %v911_v12  ;;  %v4078_v32 = vmax.f32 %v2101_v33, %v1961_v39  ;;  %v4080_v49 = vpop.f32.mrb[33].mxu1 }
 0x11f   :  { %vm1568_vm7 = vcmp.gt.f32.partialorder %v906_v21, 0.0  ;;  %v1728_v26 = vmul.f32 0.2, %v906_v21  ;;  %v2935_v34 = vpop.f32.mrb[36].mxu0  ;;  %v4092_v60 = vpop.f32.mrb[34].mxu1  ;;  %vm1642_vm14 = vcmp.gt.f32.partialorder %v1276_v58, 0.0  ;;  %v1291_v11 = vadd.f32 %v3992_v5, %v3842_v45 }
 0x120   :  { %v1889_v31 = vsel %vm1569_vm5, %v911_v12, %v1729_v23  ;;  %v921_v35 = vadd.f32 %v2935_v34, %v3842_v45  ;;  %v915_v28 = vpop.f32.mrb[37].mxu0  ;;  %v4097_v47 = vpop.f32.mrb[35].mxu1  ;;  %v1802_v10 = vmul.f32 0.2, %v1276_v58 }
 0x121   :  { %v4068_v38 = vmax.f32 %v2041_v57, %v1889_v31  ;;  %v1888_v24 = vsel %vm1568_vm7, %v906_v21, %v1728_v26  ;;  %v916_v36 = vadd.f32 %v3842_v45, %v915_v28  ;;  %v1803_v57 = vmul.f32 0.2, %v1281_v22  ;;  %v4108_v20 = vpop.f32.mrb[36].mxu1 }
 0x122   :  { %v4073_v42 = vmax.f32 %v2040_v62, %v1888_v24  ;;  %vm1571_vm9 = vcmp.gt.f32.partialorder %v921_v35, 0.0  ;;  %v1731_v44 = vmul.f32 0.2, %v921_v35  ;;  %v4113_v23 = vpop.f32.mrb[37].mxu1  ;;  %vm1645_vm1 = vcmp.gt.f32.partialorder %v1291_v11, 0.0 }
 0x123   :  { %vm1570_vm10 = vcmp.gt.f32.partialorder %v916_v36, 0.0  ;;  %v1730_v50 = vmul.f32 0.2, %v916_v36  ;;  %v2938_v16 = vpop.f32.mrb[38].mxu0  ;;  %v4095_v0 = vsel %vm1643_vm11, %v1281_v22, %v1803_v57  ;;  %v1805_v31 = vmul.f32 0.2, %v1291_v11 }
 0x124   :  { %v1891_v53 = vsel %vm1571_vm9, %v921_v35, %v1731_v44  ;;  %v931_v19 = vadd.f32 %v2938_v16, %v3842_v45  ;;  %v925_v56 = vpop.f32.mrb[39].mxu0  ;;  %v2111_v1 = vmax.f32 %v4047_v59, %v4095_v0 }
 0x125   :  { %v2047_v40 = vmax.f32 %v4054_v18, %v1891_v53  ;;  %v1890_v29 = vsel %vm1570_vm10, %v916_v36, %v1730_v50  ;;  %v926_v33 = vadd.f32 %v3842_v45, %v925_v56  ;;  %v1286_v18 = vadd.f32 %v3842_v45, %v3998_v9  ;;  %v4121_v24 = vpop.f32.mrb[38].mxu1 }
 0x126   :  { %v2046_v61 = vmax.f32 %v4061_v63, %v1890_v29  ;;  %vm1573_vm12 = vcmp.gt.f32.partialorder %v931_v19, 0.0  ;;  %v1733_v62 = vmul.f32 0.2, %v931_v19  ;;  %v4111_v63 = vsel %vm1642_vm14, %v1276_v58, %v1802_v10  ;;  %v4127_v44 = vpop.f32.mrb[39].mxu1 }
 0x127   :  { %vm1572_vm13 = vcmp.gt.f32.partialorder %v926_v33, 0.0  ;;  %v1732_v51 = vmul.f32 0.2, %v926_v33  ;;  %v2941_v37 = vpop.f32.mrb[40].mxu0  ;;  %v2110_v34 = vmax.f32 %v4050_v14, %v4111_v63  ;;  %vm1644_vm2 = vcmp.gt.f32.partialorder %v1286_v18, 0.0 }
 0x128   :  { %v1893_v7 = vsel %vm1573_vm12, %v931_v19, %v1733_v62  ;;  %v941_v54 = vadd.f32 %v2941_v37, %v3842_v45  ;;  %v935_v8 = vpop.f32.mrb[41].mxu0  ;;  %v1301_v29 = vadd.f32 %v4010_v25, %v3842_v45  ;;  %v1311_v10 = vadd.f32 %v4027_v46, %v3842_v45 }
 0x129   :  { %v2049_v12 = vmax.f32 %v4068_v38, %v1893_v7  ;;  %v1892_v13 = vsel %vm1572_vm13, %v926_v33, %v1732_v51  ;;  %v936_v15 = vadd.f32 %v3842_v45, %v935_v8  ;;  %v1804_v38 = vmul.f32 0.2, %v1286_v18  ;;  %v4143_v62 = vpop.f32.mrb[40].mxu1 }
 0x12a   :  { %v2048_v21 = vmax.f32 %v4073_v42, %v1892_v13  ;;  %vm1575_vm15 = vcmp.gt.f32.partialorder %v941_v54, 0.0  ;;  %v1735_v6 = vmul.f32 0.2, %v941_v54  ;;  %v4125_v42 = vsel %vm1645_vm1, %v1291_v11, %v1805_v31  ;;  %v4147_v7 = vpop.f32.mrb[41].mxu1 }
 0x12b   :  { %vm1574_vm0 = vcmp.gt.f32.partialorder %v936_v15, 0.0  ;;  %v1734_v5 = vmul.f32 0.2, %v936_v15  ;;  %v2944_v26 = vpop.f32.mrb[42].mxu0  ;;  %v2109_v55 = vmax.f32 %v4078_v32, %v4125_v42  ;;  %v4131_v53 = vsel %vm1644_vm2, %v1286_v18, %v1804_v38 }
 0x12c   :  { %v1895_v27 = vsel %vm1575_vm15, %v941_v54, %v1735_v6  ;;  %v951_v9 = vadd.f32 %v2944_v26, %v3842_v45  ;;  %v945_v22 = vpop.f32.mrb[43].mxu0  ;;  %v1296_v32 = vadd.f32 %v3842_v45, %v4016_v30  ;;  %vm1647_vm6 = vcmp.gt.f32.partialorder %v1301_v29, 0.0 }
 0x12d   :  { %v4118_v35 = vmax.f32 %v2047_v40, %v1895_v27  ;;  %v1894_v28 = vsel %vm1574_vm0, %v936_v15, %v1734_v5  ;;  %v946_v3 = vadd.f32 %v3842_v45, %v945_v22  ;;  %v2108_v40 = vmax.f32 %v4086_v43, %v4131_v53  ;;  %v4154_v5 = vpop.f32.mrb[42].mxu1 }
 0x12e   :  { %v4123_v36 = vmax.f32 %v2046_v61, %v1894_v28  ;;  %vm1577_vm3 = vcmp.gt.f32.partialorder %v951_v9, 0.0  ;;  %v1737_v39 = vmul.f32 0.2, %v951_v9  ;;  %v1807_v8 = vmul.f32 0.2, %v1301_v29 }
 0x12f   :  { %vm1576_vm4 = vcmp.gt.f32.partialorder %v946_v3, 0.0  ;;  %v1736_v50 = vmul.f32 0.2, %v946_v3  ;;  %v2947_v16 = vpop.f32.mrb[44].mxu0  ;;  %vm1646_vm8 = vcmp.gt.f32.partialorder %v1296_v32, 0.0  ;;  %vm1649_vm11 = vcmp.gt.f32.partialorder %v1311_v10, 0.0 }
 0x130   :  { %v1897_v19 = vsel %vm1577_vm3, %v951_v9, %v1737_v39  ;;  %v961_v56 = vadd.f32 %v2947_v16, %v3842_v45  ;;  %v955_v57 = vpop.f32.mrb[45].mxu0  ;;  %v1806_v13 = vmul.f32 0.2, %v1296_v32  ;;  %v1967_v6 = vsel %vm1647_vm6, %v1301_v29, %v1807_v8  ;;  %v4162_v9 = vpop.f32.mrb[43].mxu1 }
 0x131   :  { %v4138_v33 = vmax.f32 %v2049_v12, %v1897_v19  ;;  %v1896_v58 = vsel %vm1576_vm4, %v946_v3, %v1736_v50  ;;  %v956_v61 = vadd.f32 %v3842_v45, %v955_v57  ;;  %v4160_v46 = vmax.f32 %v2111_v1, %v1967_v6  ;;  %v4174_v50 = vpop.f32.mrb[44].mxu1 }
 0x132   :  { %v4145_v51 = vmax.f32 %v2048_v21, %v1896_v58  ;;  %vm1579_vm5 = vcmp.gt.f32.partialorder %v961_v56, 0.0  ;;  %v1739_v37 = vmul.f32 0.2, %v961_v56  ;;  %v1809_v39 = vmul.f32 0.2, %v1311_v10  ;;  %v4177_v57 = vpop.f32.mrb[45].mxu1 }
 0x133   :  { %vm1578_vm7 = vcmp.gt.f32.partialorder %v956_v61, 0.0  ;;  %v1738_v54 = vmul.f32 0.2, %v956_v61  ;;  %v2950_v25 = vpop.f32.mrb[46].mxu0  ;;  %v1306_v42 = vadd.f32 %v3842_v45, %v4032_v52 }
 0x134   :  { %v1899_v11 = vsel %vm1579_vm5, %v961_v56, %v1739_v37  ;;  %v971_v12 = vadd.f32 %v2950_v25, %v3842_v45  ;;  %v965_v30 = vpop.f32.mrb[47].mxu0  ;;  %v1969_v56 = vsel %vm1649_vm11, %v1311_v10, %v1809_v39  ;;  %v4219_v39 = vld [vmem:[%s4594_s2] ss:$0 sm:$0xff] }
 0x135   :  { %v2055_v15 = vmax.f32 %v4118_v35, %v1899_v11  ;;  %v1898_v18 = vsel %vm1578_vm7, %v956_v61, %v1738_v54  ;;  %v966_v21 = vadd.f32 %v3842_v45, %v965_v30  ;;  %v1966_v35 = vsel %vm1646_vm8, %v1296_v32, %v1806_v13  ;;  %v4189_v25 = vpop.f32.mrb[46].mxu1 }
 0x136   :  { %v2054_v26 = vmax.f32 %v4123_v36, %v1898_v18  ;;  %vm1581_vm9 = vcmp.gt.f32.partialorder %v971_v12, 0.0  ;;  %v1741_v27 = vmul.f32 0.2, %v971_v12  ;;  %v4168_v36 = vmax.f32 %v2110_v34, %v1966_v35  ;;  %v4193_v11 = vpop.f32.mrb[47].mxu1 }
 0x137   :  { %vm1580_vm10 = vcmp.gt.f32.partialorder %v966_v21, 0.0  ;;  %v1740_v22 = vmul.f32 0.2, %v966_v21  ;;  %v2953_v31 = vpop.f32.mrb[48].mxu0  ;;  %v4179_v34 = vmax.f32 %v2109_v55, %v1969_v56  ;;  %vm1648_vm14 = vcmp.gt.f32.partialorder %v1306_v42, 0.0 }
 0x138   :  { %v1901_v28 = vsel %vm1581_vm9, %v971_v12, %v1741_v27  ;;  %v981_v3 = vadd.f32 %v2953_v31, %v3842_v45  ;;  %v975_v38 = vpop.f32.mrb[49].mxu0  ;;  %v1808_v52 = vmul.f32 0.2, %v1306_v42  ;;  %v1321_v61 = vadd.f32 %v4039_v48, %v3842_v45 }
 0x139   :  { %v2057_v59 = vmax.f32 %v4138_v33, %v1901_v28  ;;  %v1900_v0 = vsel %vm1580_vm10, %v966_v21, %v1740_v22  ;;  %v976_v1 = vadd.f32 %v3842_v45, %v975_v38  ;;  %v1316_v54 = vadd.f32 %v3842_v45, %v4042_v2  ;;  %v4204_v22 = vpop.f32.mrb[48].mxu1 }
 0x13a   :  { %v2056_v16 = vmax.f32 %v4145_v51, %v1900_v0  ;;  %vm1583_vm12 = vcmp.gt.f32.partialorder %v981_v3, 0.0  ;;  %v1743_v19 = vmul.f32 0.2, %v981_v3  ;;  %v1968_v10 = vsel %vm1648_vm14, %v1306_v42, %v1808_v52 }
 0x13b   :  { %vm1582_vm13 = vcmp.gt.f32.partialorder %v976_v1, 0.0  ;;  %v1742_v14 = vmul.f32 0.2, %v976_v1  ;;  %v2956_v63 = vpop.f32.mrb[50].mxu0  ;;  %v4198_v30 = vmax.f32 %v2108_v40, %v1968_v10  ;;  %vm1651_vm1 = vcmp.gt.f32.partialorder %v1321_v61, 0.0  ;;  %v4210_v40 = vpop.f32.mrb[49].mxu1 }
 0x13c   :  { %v1903_v29 = vsel %vm1583_vm12, %v981_v3, %v1743_v19  ;;  %v991_v33 = vadd.f32 %v2956_v63, %v3842_v45  ;;  %v985_v58 = vpop.f32.mrb[51].mxu0  ;;  %v1811_v18 = vmul.f32 0.2, %v1321_v61  ;;  %vm1650_vm2 = vcmp.gt.f32.partialorder %v1316_v54, 0.0 }
 0x13d   :  { %v4184_v32 = vmax.f32 %v2055_v15, %v1903_v29  ;;  %v1902_v51 = vsel %vm1582_vm13, %v976_v1, %v1742_v14  ;;  %v986_v37 = vadd.f32 %v3842_v45, %v985_v58  ;;  %v1810_v27 = vmul.f32 0.2, %v1316_v54  ;;  %v4230_v14 = vpop.f32.mrb[50].mxu1 }
 0x13e   :  { %v4191_v55 = vmax.f32 %v2054_v26, %v1902_v51  ;;  %vm1585_vm15 = vcmp.gt.f32.partialorder %v991_v33, 0.0  ;;  %v1745_v8 = vmul.f32 0.2, %v991_v33  ;;  %v4208_v53 = vsel %vm1651_vm1, %v1321_v61, %v1811_v18 }
 0x13f   :  { %vm1584_vm0 = vcmp.gt.f32.partialorder %v986_v37, 0.0  ;;  %v1744_v12 = vmul.f32 0.2, %v986_v37  ;;  %v2959_v48 = vpop.f32.mrb[52].mxu0  ;;  %v2119_v3 = vmax.f32 %v4160_v46, %v4208_v53  ;;  %v4214_v38 = vsel %vm1650_vm2, %v1316_v54, %v1810_v27 }
 0x140   :  { %v1905_v13 = vsel %vm1585_vm15, %v991_v33, %v1745_v8  ;;  %v1001_v2 = vadd.f32 %v2959_v48, %v3842_v45  ;;  %v995_v15 = vpop.f32.mrb[53].mxu0  ;;  %v2118_v1 = vmax.f32 %v4168_v36, %v4214_v38  ;;  %v1331_v42 = vadd.f32 %v4219_v39, %v4059_v4  ;;  %v4233_v33 = vpop.f32.mrb[51].mxu1 }
 0x141   :  { %v4201_v21 = vmax.f32 %v2057_v59, %v1905_v13  ;;  %v1904_v6 = vsel %vm1584_vm0, %v986_v37, %v1744_v12  ;;  %v996_v26 = vadd.f32 %v3842_v45, %v995_v15  ;;  %v1326_v56 = vadd.f32 %v4219_v39, %v4063_v17  ;;  %v4242_v12 = vpop.f32.mrb[52].mxu1 }
 0x142   :  { %v4206_v31 = vmax.f32 %v2056_v16, %v1904_v6  ;;  %vm1587_vm3 = vcmp.gt.f32.partialorder %v1001_v2, 0.0  ;;  %v1747_v43 = vmul.f32 0.2, %v1001_v2  ;;  %vm1653_vm6 = vcmp.gt.f32.partialorder %v1331_v42, 0.0 }
 0x143   :  { %vm1586_vm4 = vcmp.gt.f32.partialorder %v996_v26, 0.0  ;;  %v1746_v35 = vmul.f32 0.2, %v996_v26  ;;  %v2962_v28 = vpop.f32.mrb[54].mxu0  ;;  %v1813_v52 = vmul.f32 0.2, %v1331_v42  ;;  %v1341_v61 = vadd.f32 %v4219_v39, %v4071_v41 }
 0x144   :  { %v1907_v45 = vsel %vm1587_vm3, %v1001_v2, %v1747_v43  ;;  %v1011_v59 = vadd.f32 %v4219_v39, %v2962_v28  ;;  %v1005_v0 = vpop.f32.mrb[55].mxu0  ;;  %vm1652_vm8 = vcmp.gt.f32.partialorder %v1326_v56, 0.0  ;;  %v1812_v37 = vmul.f32 0.2, %v1326_v56  ;;  %v4247_v2 = vpop.f32.mrb[53].mxu1 }
 0x145   :  { %v2063_v16 = vmax.f32 %v4184_v32, %v1907_v45  ;;  %v1906_v46 = vsel %vm1586_vm4, %v996_v26, %v1746_v35  ;;  %v1006_v19 = vadd.f32 %v4219_v39, %v1005_v0  ;;  %v4240_v10 = vsel %vm1653_vm6, %v1331_v42, %v1813_v52 }
 0x146   :  { %v2062_v63 = vmax.f32 %v4191_v55, %v1906_v46  ;;  %vm1589_vm5 = vcmp.gt.f32.partialorder %v1011_v59, 0.0  ;;  %v1749_v29 = vmul.f32 0.2, %v1011_v59  ;;  %v2117_v41 = vmax.f32 %v4179_v34, %v4240_v10 }
 0x147   :  { %vm1588_vm7 = vcmp.gt.f32.partialorder %v1006_v19, 0.0  ;;  %v1748_v58 = vmul.f32 0.2, %v1006_v19  ;;  %v2965_v4 = vpop.f32.mrb[56].mxu0  ;;  %vm1655_vm11 = vcmp.gt.f32.partialorder %v1341_v61, 0.0  ;;  %v1336_v45 = vadd.f32 %v4219_v39, %v4080_v49 }
 0x148   :  { %v1909_v32 = vsel %vm1589_vm5, %v1011_v59, %v1749_v29  ;;  %v1021_v51 = vadd.f32 %v4219_v39, %v2965_v4  ;;  %v1015_v17 = vpop.f32.mrb[57].mxu0  ;;  %v1815_v43 = vmul.f32 0.2, %v1341_v61  ;;  %v4259_v59 = vpop.f32.mrb[54].mxu1  ;;  %v1356_v34 = vadd.f32 %v4219_v39, %v4113_v23 }
 0x149   :  { %v2065_v54 = vmax.f32 %v4201_v21, %v1909_v32  ;;  %v1908_v55 = vsel %vm1588_vm7, %v1006_v19, %v1748_v58  ;;  %v1016_v8 = vadd.f32 %v4219_v39, %v1015_v17  ;;  %v4249_v21 = vsel %vm1652_vm8, %v1326_v56, %v1812_v37  ;;  %v4263_v19 = vpop.f32.mrb[55].mxu1 }
 0x14a   :  { %v2064_v48 = vmax.f32 %v4206_v31, %v1908_v55  ;;  %vm1591_vm9 = vcmp.gt.f32.partialorder %v1021_v51, 0.0  ;;  %v1751_v13 = vmul.f32 0.2, %v1021_v51  ;;  %v2116_v31 = vmax.f32 %v4198_v30, %v4249_v21  ;;  %v4275_v17 = vpop.f32.mrb[56].mxu1 }
 0x14b   :  { %vm1590_vm10 = vcmp.gt.f32.partialorder %v1016_v8, 0.0  ;;  %v1750_v15 = vmul.f32 0.2, %v1016_v8  ;;  %v2968_v18 = vpop.f32.mrb[58].mxu0  ;;  %v1975_v46 = vsel %vm1655_vm11, %v1341_v61, %v1815_v43  ;;  %vm1654_vm14 = vcmp.gt.f32.partialorder %v1336_v45, 0.0 }
 0x14c   :  { %v1911_v6 = vsel %vm1591_vm9, %v1021_v51, %v1751_v13  ;;  %v1031_v26 = vadd.f32 %v4219_v39, %v2968_v18  ;;  %v1025_v27 = vpop.f32.mrb[59].mxu0  ;;  %v1814_v49 = vmul.f32 0.2, %v1336_v45  ;;  %v1346_v51 = vadd.f32 %v4219_v39, %v4097_v47 }
 0x14d   :  { %v4254_v53 = vmax.f32 %v2063_v16, %v1911_v6  ;;  %v1910_v35 = vsel %vm1590_vm10, %v1016_v8, %v1750_v15  ;;  %v1026_v28 = vadd.f32 %v4219_v39, %v1025_v27  ;;  %v4265_v16 = vmax.f32 %v2119_v3, %v1975_v46  ;;  %v4279_v8 = vpop.f32.mrb[57].mxu1 }
 0x14e   :  { %v4261_v0 = vmax.f32 %v2062_v63, %v1910_v35  ;;  %vm1593_vm12 = vcmp.gt.f32.partialorder %v1031_v26, 0.0  ;;  %v1753_v42 = vmul.f32 0.2, %v1031_v26  ;;  %v1351_v63 = vadd.f32 %v4219_v39, %v4092_v60  ;;  %v4289_v43 = vpop.f32.mrb[58].mxu1 }
 0x14f   :  { %vm1592_vm13 = vcmp.gt.f32.partialorder %v1026_v28, 0.0  ;;  %v1752_v30 = vmul.f32 0.2, %v1026_v28  ;;  %v2971_v56 = vpop.f32.mrb[60].mxu0  ;;  %v1974_v55 = vsel %vm1654_vm14, %v1336_v45, %v1814_v49  ;;  %vm1656_vm2 = vcmp.gt.f32.partialorder %v1346_v51, 0.0 }
 0x150   :  { %v1913_v29 = vsel %vm1593_vm12, %v1031_v26, %v1753_v42  ;;  %v1041_v58 = vadd.f32 %v4219_v39, %v2971_v56  ;;  %v1035_v4 = vpop.f32.mrb[61].mxu0  ;;  %vm1657_vm1 = vcmp.gt.f32.partialorder %v1351_v63, 0.0  ;;  %v1816_v27 = vmul.f32 0.2, %v1346_v51 }
 0x151   :  { %v4270_v52 = vmax.f32 %v2065_v54, %v1913_v29  ;;  %v1912_v32 = vsel %vm1592_vm13, %v1026_v28, %v1752_v30  ;;  %v1036_v61 = vadd.f32 %v4219_v39, %v1035_v4  ;;  %v4284_v54 = vmax.f32 %v2118_v1, %v1974_v55  ;;  %v4292_v1 = vpop.f32.mrb[59].mxu1 }
 0x152   :  { %v4277_v3 = vmax.f32 %v2064_v48, %v1912_v32  ;;  %vm1595_vm15 = vcmp.gt.f32.partialorder %v1041_v58, 0.0  ;;  %v1755_v37 = vmul.f32 0.2, %v1041_v58  ;;  %v1817_v48 = vmul.f32 0.2, %v1351_v63  ;;  %v4308_v10 = vpop.f32.mrb[60].mxu1 }
 0x153   :  { %vm1594_vm0 = vcmp.gt.f32.partialorder %v1036_v61, 0.0  ;;  %v1754_v13 = vmul.f32 0.2, %v1036_v61  ;;  %v2974_v60 = vpop.f32.mrb[62].mxu0  ;;  %v1976_v42 = vsel %vm1656_vm2, %v1346_v51, %v1816_v27  ;;  %vm1658_vm8 = vcmp.gt.f32.partialorder %v1356_v34, 0.0 }
 0x154   :  { %v1915_v15 = vsel %vm1595_vm15, %v1041_v58, %v1755_v37  ;;  %v1051_v47 = vadd.f32 %v4219_v39, %v2974_v60  ;;  %v1045_v18 = vpop.f32.mrb[63].mxu0  ;;  %v1977_v38 = vsel %vm1657_vm1, %v1351_v63, %v1817_v48  ;;  %v4300_v29 = vmax.f32 %v2116_v31, %v1976_v42  ;;  %v4311_v31 = vpop.f32.mrb[61].mxu1 }
 0x155   :  { %v2071_v21 = vmax.f32 %v4254_v53, %v1915_v15  ;;  %v1914_v6 = vsel %vm1594_vm0, %v1036_v61, %v1754_v13  ;;  %v1046_v26 = vadd.f32 %v4219_v39, %v1045_v18  ;;  %v4297_v53 = vmax.f32 %v2117_v41, %v1977_v38 }
 0x156   :  { %v2070_v35 = vmax.f32 %v4261_v0, %v1914_v6  ;;  %vm1597_vm3 = vcmp.gt.f32.partialorder %v1051_v47, 0.0  ;;  %v1757_v36 = vmul.f32 0.2, %v1051_v47  ;;  %v1361_v0 = vadd.f32 %v4219_v39, %v4108_v20 }
 0x157   :  { %vm1596_vm4 = vcmp.gt.f32.partialorder %v1046_v26, 0.0  ;;  %v1756_v28 = vmul.f32 0.2, %v1046_v26  ;;  %v2977_v45 = vpop.f32.mrb[64].mxu0  ;;  %v1818_v55 = vmul.f32 0.2, %v1356_v34 }
 0x158   :  { %v1917_v46 = vsel %vm1597_vm3, %v1051_v47, %v1757_v36  ;;  %v1061_v30 = vadd.f32 %v4219_v39, %v2977_v45  ;;  %v1055_v56 = vpop.f32.mrb[65].mxu0  ;;  %vm1659_vm6 = vcmp.gt.f32.partialorder %v1361_v0, 0.0  ;;  %v1819_v61 = vmul.f32 0.2, %v1361_v0  ;;  %v4321_v47 = vpop.f32.mrb[62].mxu1 }
 0x159   :  { %v2073_v58 = vmax.f32 %v4270_v52, %v1917_v46  ;;  %v1916_v4 = vsel %vm1596_vm4, %v1046_v26, %v1756_v28  ;;  %v1056_v49 = vadd.f32 %v4219_v39, %v1055_v56  ;;  %v1371_v52 = vadd.f32 %v4219_v39, %v4121_v24  ;;  %v4327_v6 = vpop.f32.mrb[63].mxu1 }
 0x15a   :  { %v2072_v41 = vmax.f32 %v4277_v3, %v1916_v4  ;;  %vm1599_vm5 = vcmp.gt.f32.partialorder %v1061_v30, 0.0  ;;  %v1759_v63 = vmul.f32 0.2, %v1061_v30  ;;  %v4319_v15 = vsel %vm1659_vm6, %v1361_v0, %v1819_v61  ;;  %v4339_v0 = vpop.f32.mrb[64].mxu1 }
 0x15b   :  { %vm1598_vm7 = vcmp.gt.f32.partialorder %v1056_v49, 0.0  ;;  %v1758_v32 = vmul.f32 0.2, %v1056_v49  ;;  %v2980_v20 = vpop.f32.mrb[66].mxu0  ;;  %v2127_v24 = vmax.f32 %v4265_v16, %v4319_v15  ;;  %v4329_v27 = vsel %vm1658_vm8, %v1356_v34, %v1818_v55 }
 0x15c   :  { %v1919_v51 = vsel %vm1599_vm5, %v1061_v30, %v1759_v63  ;;  %v1071_v37 = vadd.f32 %v4219_v39, %v2980_v20  ;;  %v1065_v23 = vpop.f32.mrb[67].mxu0  ;;  %vm1661_vm11 = vcmp.gt.f32.partialorder %v1371_v52, 0.0  ;;  %v1821_v45 = vmul.f32 0.2, %v1371_v52  ;;  %v4345_v63 = vpop.f32.mrb[65].mxu1 }
 0x15d   :  { %v4316_v13 = vmax.f32 %v2071_v21, %v1919_v51  ;;  %v1918_v3 = vsel %vm1598_vm7, %v1056_v49, %v1758_v32  ;;  %v1066_v60 = vadd.f32 %v4219_v39, %v1065_v23  ;;  %v1366_v56 = vadd.f32 %v4219_v39, %v4127_v44 }
 0x15e   :  { %v4323_v18 = vmax.f32 %v2070_v35, %v1918_v3  ;;  %vm1601_vm9 = vcmp.gt.f32.partialorder %v1071_v37, 0.0  ;;  %v1761_v48 = vmul.f32 0.2, %v1071_v37  ;;  %v2126_v35 = vmax.f32 %v4284_v54, %v4329_v27  ;;  %v4356_v3 = vpop.f32.mrb[66].mxu1 }
 0x15f   :  { %vm1600_vm10 = vcmp.gt.f32.partialorder %v1066_v60, 0.0  ;;  %v1760_v26 = vmul.f32 0.2, %v1066_v60  ;;  %v2983_v21 = vpop.f32.mrb[68].mxu0  ;;  %v4343_v34 = vsel %vm1661_vm11, %v1371_v52, %v1821_v45  ;;  %vm1660_vm14 = vcmp.gt.f32.partialorder %v1366_v56, 0.0 }
 0x160   :  { %v1921_v36 = vsel %vm1601_vm9, %v1071_v37, %v1761_v48  ;;  %v1081_v38 = vadd.f32 %v4219_v39, %v2983_v21  ;;  %v1075_v28 = vpop.f32.mrb[69].mxu0  ;;  %v2125_v32 = vmax.f32 %v4297_v53, %v4343_v34  ;;  %v1820_v51 = vmul.f32 0.2, %v1366_v56  ;;  %v4359_v21 = vpop.f32.mrb[67].mxu1 }
 0x161   :  { %v4334_v42 = vmax.f32 %v2073_v58, %v1921_v36  ;;  %v1920_v46 = vsel %vm1600_vm10, %v1066_v60, %v1760_v26  ;;  %v1076_v30 = vadd.f32 %v4219_v39, %v1075_v28  ;;  %v1376_v55 = vadd.f32 %v4219_v39, %v4147_v7 }
 0x162   :  { %v4341_v4 = vmax.f32 %v2072_v41, %v1920_v46  ;;  %vm1603_vm12 = vcmp.gt.f32.partialorder %v1081_v38, 0.0  ;;  %v1763_v49 = vmul.f32 0.2, %v1081_v38  ;;  %v1381_v41 = vadd.f32 %v4219_v39, %v4143_v62 }
 0x163   :  { %vm1602_vm13 = vcmp.gt.f32.partialorder %v1076_v30, 0.0  ;;  %v1762_v54 = vmul.f32 0.2, %v1076_v30  ;;  %v2986_v58 = vpop.f32.mrb[70].mxu0  ;;  %v1980_v26 = vsel %vm1660_vm14, %v1366_v56, %v1820_v51  ;;  %vm1662_vm2 = vcmp.gt.f32.partialorder %v1376_v55, 0.0  ;;  %v4365_v56 = vpop.f32.mrb[68].mxu1 }
 0x164   :  { %v1923_v20 = vsel %vm1603_vm12, %v1081_v38, %v1763_v49  ;;  %v1091_v44 = vadd.f32 %v4219_v39, %v2986_v58  ;;  %v1085_v61 = vpop.f32.mrb[71].mxu0  ;;  %v2124_v62 = vmax.f32 %v4300_v29, %v1980_v26  ;;  %vm1663_vm1 = vcmp.gt.f32.partialorder %v1381_v41, 0.0  ;;  %v4368_v58 = vpop.f32.mrb[69].mxu1 }
 0x165   :  { %v2079_v52 = vmax.f32 %v4316_v13, %v1923_v20  ;;  %v1922_v37 = vsel %vm1602_vm13, %v1076_v30, %v1762_v54  ;;  %v1086_v23 = vadd.f32 %v4219_v39, %v1085_v61  ;;  %v1823_v7 = vmul.f32 0.2, %v1381_v41  ;;  %v4385_v15 = vpop.f32.mrb[70].mxu1 }
 0x166   :  { %v2078_v60 = vmax.f32 %v4323_v18, %v1922_v37  ;;  %vm1605_vm15 = vcmp.gt.f32.partialorder %v1091_v44, 0.0  ;;  %v1765_v48 = vmul.f32 0.2, %v1091_v44  ;;  %v1822_v30 = vmul.f32 0.2, %v1376_v55 }
 0x167   :  { %vm1604_vm0 = vcmp.gt.f32.partialorder %v1086_v23, 0.0  ;;  %v1764_v27 = vmul.f32 0.2, %v1086_v23  ;;  %v2989_v13 = vpop.f32.mrb[72].mxu0  ;;  %v1983_v54 = vsel %vm1663_vm1, %v1381_v41, %v1823_v7  ;;  %v1391_v41 = vadd.f32 %v4219_v39, %v4154_v5 }
 0x168   :  { %v1925_v36 = vsel %vm1605_vm15, %v1091_v44, %v1765_v48  ;;  %v1101_v38 = vadd.f32 %v4219_v39, %v2989_v13  ;;  %v1095_v28 = vpop.f32.mrb[73].mxu0  ;;  %v4373_v44 = vmax.f32 %v2127_v24, %v1983_v54  ;;  %v1386_v16 = vadd.f32 %v4219_v39, %v4162_v9 }
 0x169   :  { %v2081_v45 = vmax.f32 %v4334_v42, %v1925_v36  ;;  %v1924_v18 = vsel %vm1604_vm0, %v1086_v23, %v1764_v27  ;;  %v1096_v46 = vadd.f32 %v4219_v39, %v1095_v28  ;;  %v1982_v42 = vsel %vm1662_vm2, %v1376_v55, %v1822_v30  ;;  %v4389_v55 = vpop.f32.mrb[71].mxu1 }
 0x16a   :  { %v2080_v49 = vmax.f32 %v4341_v4, %v1924_v18  ;;  %vm1607_vm3 = vcmp.gt.f32.partialorder %v1101_v38, 0.0  ;;  %v1767_v29 = vmul.f32 0.2, %v1101_v38  ;;  %v4375_v37 = vmax.f32 %v2126_v35, %v1982_v42 }
 0x16b   :  { %vm1606_vm4 = vcmp.gt.f32.partialorder %v1096_v46, 0.0  ;;  %v1766_v20 = vmul.f32 0.2, %v1096_v46  ;;  %v2992_v61 = vpop.f32.mrb[74].mxu0  ;;  %vm1665_vm6 = vcmp.gt.f32.partialorder %v1391_v41, 0.0  ;;  %vm1664_vm8 = vcmp.gt.f32.partialorder %v1386_v16, 0.0 }
 0x16c   :  { %v1927_v51 = vsel %vm1607_vm3, %v1101_v38, %v1767_v29  ;;  %v1111_v23 = vadd.f32 %v4219_v39, %v2992_v61  ;;  %v1105_v4 = vpop.f32.mrb[75].mxu0  ;;  %v1825_v5 = vmul.f32 0.2, %v1391_v41  ;;  %v1824_v36 = vmul.f32 0.2, %v1386_v16 }
 0x16d   :  { %v4380_v48 = vmax.f32 %v2079_v52, %v1927_v51  ;;  %v1926_v26 = vsel %vm1606_vm4, %v1096_v46, %v1766_v20  ;;  %v1106_v27 = vadd.f32 %v4219_v39, %v1105_v4  ;;  %v1401_v28 = vadd.f32 %v4219_v39, %v4174_v50 }
 0x16e   :  { %v4387_v24 = vmax.f32 %v2078_v60, %v1926_v26  ;;  %vm1609_vm5 = vcmp.gt.f32.partialorder %v1111_v23, 0.0  ;;  %v1769_v35 = vmul.f32 0.2, %v1111_v23  ;;  %v1396_v9 = vadd.f32 %v4219_v39, %v4177_v57 }
 0x16f   :  { %vm1608_vm7 = vcmp.gt.f32.partialorder %v1106_v27, 0.0  ;;  %v1768_v13 = vmul.f32 0.2, %v1106_v27  ;;  %v2995_v38 = vpop.f32.mrb[76].mxu0  ;;  %v1985_v18 = vsel %vm1665_vm6, %v1391_v41, %v1825_v5  ;;  %v1984_v20 = vsel %vm1664_vm8, %v1386_v16, %v1824_v36  ;;  %v2181_v16 = vld [vmem:[%s4593_s3 + $0x78] sm:$0xff]  ;;  %v2178_v5 = vld [vmem:[%s4593_s3 + $0x60] sm:$0xff] }
 0x170   :  { %v1929_v52 = vsel %vm1609_vm5, %v1111_v23, %v1769_v35  ;;  %v1121_v46 = vadd.f32 %v4219_v39, %v2995_v38  ;;  %v1115_v30 = vpop.f32.mrb[77].mxu0  ;;  %v4403_v54 = vmax.f32 %v2125_v32, %v1985_v18  ;;  %v4406_v42 = vmax.f32 %v2124_v62, %v1984_v20 }
 0x171   :  { %v4395_v60 = vmax.f32 %v2081_v45, %v1929_v52  ;;  %v1928_v7 = vsel %vm1608_vm7, %v1106_v27, %v1768_v13  ;;  %v1116_v50 = vadd.f32 %v4219_v39, %v1115_v30  ;;  %vm1667_vm10 = vcmp.gt.f32.partialorder %v1401_v28, 0.0  ;;  %v2179_v27 = vld [vmem:[%s4593_s3 + $0x68] sm:$0xff]  ;;  %v2180_v52 = vld [vmem:[%s4593_s3 + $0x70] sm:$0xff] }
 0x172   :  { %v4398_v29 = vmax.f32 %v2080_v49, %v1928_v7  ;;  %vm1611_vm9 = vcmp.gt.f32.partialorder %v1121_v46, 0.0  ;;  %v1771_v57 = vmul.f32 0.2, %v1121_v46  ;;  %v1827_v51 = vmul.f32 0.2, %v1401_v28 }
 0x173   :  { %v2998_v45 = vpop.f32.mrb[78].mxu0  ;;  %vm1610_vm11 = vcmp.gt.f32.partialorder %v1116_v50, 0.0  ;;  %v1770_v61 = vmul.f32 0.2, %v1116_v50  ;;  %vm1666_vm12 = vcmp.gt.f32.partialorder %v1396_v9, 0.0  ;;  %v1411_v32 = vadd.f32 %v4219_v39, %v4189_v25 }
 0x174   :  { %v4408_v49 = vsel %vm1611_vm9, %v1121_v46, %v1771_v57  ;;  %v1826_v23 = vmul.f32 0.2, %v1396_v9  ;;  %v1131_v53 = vadd.f32 %v4219_v39, %v2998_v45  ;;  %v1125_v34 = vpop.f32.mrb[79].mxu0  ;;  %v4415_v41 = vsel %vm1667_vm10, %v1401_v28, %v1827_v51 }
 0x175   :  { %v2087_v62 = vmax.f32 %v4380_v48, %v4408_v49  ;;  %v1930_v4 = vsel %vm1610_vm11, %v1116_v50, %v1770_v61  ;;  %v1126_v26 = vadd.f32 %v4219_v39, %v1125_v34  ;;  %v2135_v25 = vmax.f32 %v4373_v44, %v4415_v41 }
 0x176   :  { %v2086_v35 = vmax.f32 %v4387_v24, %v1930_v4  ;;  %v1986_v13 = vsel %vm1666_vm12, %v1396_v9, %v1826_v23  ;;  %vm1613_vm13 = vcmp.gt.f32.partialorder %v1131_v53, 0.0  ;;  %v1773_v28 = vmul.f32 0.2, %v1131_v53 }
 0x177   :  { %v3001_v36 = vpop.f32.mrb[80].mxu0  ;;  %v2134_v38 = vmax.f32 %v4375_v37, %v1986_v13  ;;  %vm1612_vm14 = vcmp.gt.f32.partialorder %v1126_v26, 0.0  ;;  %v1772_v7 = vmul.f32 0.2, %v1126_v26  ;;  %vm1669_vm15 = vcmp.gt.f32.partialorder %v1411_v32, 0.0 }
 0x178   :  { %v1135_v24 = vpop.f32.mrb[81].mxu0  ;;  %v1829_v18 = vmul.f32 0.2, %v1411_v32  ;;  %v3131_v44 = vpack.c.bf16 %v2181_v16, %v2179_v27  ;;  %v1406_v9 = vadd.f32 %v4219_v39, %v4193_v11  ;;  %v4436_v46 = vsel %vm1613_vm13, %v1131_v53, %v1773_v28 }
 0x179   :  { %v4438_v30 = vsel %vm1612_vm14, %v1126_v26, %v1772_v7  ;;  %v3133_v20 = vpack.c.bf16 %v2180_v52, %v2178_v5  ;;  %v1141_v50 = vadd.f32 %v4219_v39, %v3001_v36  ;;  %v2089_v37 = vmax.f32 %v4395_v60, %v4436_v46 }
 0x17a   :  { %v2088_v57 = vmax.f32 %v4398_v29, %v4438_v30  ;;  %v1989_v45 = vsel %vm1669_vm15, %v1411_v32, %v1829_v18  ;;  %3132 = vmatprep.subr.bf16.mxu1 %v3131_v44  ;;  %vm1668_vm0 = vcmp.gt.f32.partialorder %v1406_v9, 0.0  ;;  %v1828_v11 = vmul.f32 0.2, %v1406_v9 }
 0x17b   :  { %v3004_v61 = vpop.f32.mrb[82].mxu0  ;;  %v2133_v51 = vmax.f32 %v4403_v54, %v1989_v45  ;;  %3134 = vmatpush1.bf16.msra.mxu1 %v3133_v20  ;;  %vm1615_vm1 = vcmp.gt.f32.partialorder %v1141_v50, 0.0  ;;  %v1775_v23 = vmul.f32 0.2, %v1141_v50  ;;  %v1136_v34 = vadd.f32 %v4219_v39, %v1135_v24 }
 0x17c   :  { %v1145_v53 = vpop.f32.mrb[83].mxu0  ;;  %v1421_v4 = vadd.f32 %v4219_v39, %v4204_v22  ;;  %vm2194_vm2 = vcmask 523264   ;;  %v1988_v41 = vsel %vm1668_vm0, %v1406_v9, %v1828_v11  ;;  %v3140_v27 = vmov 0.0  }
 0x17d   :  { %v1935_v26 = vsel %vm1615_vm1, %v1141_v50, %v1775_v23  ;;  %2283 = vmatprep.mubr.f32.mxu1 %v3140_v27  ;;  %v1416_v32 = vadd.f32 %v4219_v39, %v4210_v40  ;;  %v1151_v54 = vadd.f32 %v4219_v39, %v3004_v61  ;;  %v2132_v16 = vmax.f32 %v4406_v42, %v1988_v41 }
 0x17e   :  { %vm1614_vm3 = vcmp.gt.f32.partialorder %v1136_v34, 0.0  ;;  %v1774_v13 = vmul.f32 0.2, %v1136_v34  ;;  %vm1671_vm4 = vcmp.gt.f32.partialorder %v1421_v4, 0.0  ;;  %2705 = vmatmul.mubr.msk.f32.vlgmr.msra.gmra.mrb[72].mxu1 %vm2194_vm2, %v2086_v35  ;;  %v1831_v22 = vmul.f32 0.2, %v1421_v4 }
 0x17f   :  { %v3007_v5 = vpop.f32.mrb[84].mxu0  ;;  %vm1670_vm5 = vcmp.gt.f32.partialorder %v1416_v32, 0.0  ;;  %v1830_v52 = vmul.f32 0.2, %v1416_v32  ;;  %vm1617_vm6 = vcmp.gt.f32.partialorder %v1151_v54, 0.0  ;;  %2289 = vmatprep.mubr.f32.mxu1 %v3140_v27  ;;  %v1146_v40 = vadd.f32 %v4219_v39, %v1145_v53 }
 0x180   :  { %v1934_v36 = vsel %vm1614_vm3, %v1136_v34, %v1774_v13  ;;  %v1777_v28 = vmul.f32 0.2, %v1151_v54  ;;  %v1431_v7 = vadd.f32 %v4219_v39, %v4230_v14  ;;  %v1155_v42 = vpop.f32.mrb[85].mxu0  ;;  %v1991_v24 = vsel %vm1671_vm4, %v1421_v4, %v1831_v22 }
 0x181   :  { %v1990_v18 = vsel %vm1670_vm5, %v1416_v32, %v1830_v52  ;;  %v1426_v35 = vadd.f32 %v4219_v39, %v4233_v33  ;;  %v1161_v44 = vadd.f32 %v4219_v39, %v3007_v5  ;;  %v2139_v9 = vmax.f32 %v2135_v25, %v1991_v24 }
 0x182   :  { %v2138_v20 = vmax.f32 %v2134_v38, %v1990_v18  ;;  %v1937_v50 = vsel %vm1617_vm6, %v1151_v54, %v1777_v28  ;;  %vm1616_vm7 = vcmp.gt.f32.partialorder %v1146_v40, 0.0  ;;  %2706 = vmatmul.mubr.msk.f32.gmra.mrb[74].mxu1 %vm2194_vm2, %v2087_v62  ;;  %v1776_v14 = vmul.f32 0.2, %v1146_v40 }
 0x183   :  { %v3010_v45 = vpop.f32.mrb[86].mxu0  ;;  %v2137_v61 = vmax.f32 %v2133_v51, %v1937_v50  ;;  %vm1673_vm8 = vcmp.gt.f32.partialorder %v1431_v7, 0.0  ;;  %v1833_v11 = vmul.f32 0.2, %v1431_v7  ;;  %2295 = vmatprep.mubr.f32.mxu1 %v3140_v27  ;;  %vm1672_vm9 = vcmp.gt.f32.partialorder %v1426_v35, 0.0 }
 0x184   :  { %v1165_v23 = vpop.f32.mrb[87].mxu0  ;;  %v1832_v33 = vmul.f32 0.2, %v1426_v35  ;;  %vm1619_vm10 = vcmp.gt.f32.partialorder %v1161_v44, 0.0  ;;  %v1779_v25 = vmul.f32 0.2, %v1161_v44  ;;  %v1936_v38 = vsel %vm1616_vm7, %v1146_v40, %v1776_v14 }
 0x185   :  { %v1993_v53 = vsel %vm1673_vm8, %v1431_v7, %v1833_v11  ;;  %v1156_v34 = vadd.f32 %v4219_v39, %v1155_v42  ;;  %v1441_v48 = vadd.f32 %v4219_v39, %v4242_v12  ;;  %v2136_v49 = vmax.f32 %v2132_v16, %v1936_v38 }
 0x186   :  { %v2141_v62 = vmax.f32 %v2137_v61, %v1993_v53  ;;  %v1992_v51 = vsel %vm1672_vm9, %v1426_v35, %v1832_v33  ;;  %v1939_v4 = vsel %vm1619_vm10, %v1161_v44, %v1779_v25  ;;  %2707 = vmatmul.mubr.msk.f32.gmra.mrb[76].mxu1 %vm2194_vm2, %v2088_v57  ;;  %v1436_v12 = vadd.f32 %v4219_v39, %v4247_v2 }
 0x187   :  { %v2091_v41 = vmax.f32 %v1935_v26, %v1939_v4  ;;  %vm1618_vm11 = vcmp.gt.f32.partialorder %v1156_v34, 0.0  ;;  %v1778_v32 = vmul.f32 0.2, %v1156_v34  ;;  %vm1675_vm12 = vcmp.gt.f32.partialorder %v1441_v48, 0.0  ;;  %2301 = vmatprep.mubr.f32.mxu1 %v3140_v27 }
 0x188   :  { %v2140_v54 = vmax.f32 %v2136_v49, %v1992_v51  ;;  %v1835_v13 = vmul.f32 0.2, %v1441_v48  ;;  %v1171_v16 = vadd.f32 %v4219_v39, %v3010_v45  ;;  %v1166_v52 = vadd.f32 %v4219_v39, %v1165_v23 }
 0x189   :  { %v2143_v5 = vmax.f32 %v2139_v9, %v2091_v41  ;;  %v1938_v22 = vsel %vm1618_vm11, %v1156_v34, %v1778_v32  ;;  %v1451_v29 = vadd.f32 %v4219_v39, %v4259_v59  ;;  %vm1674_vm13 = vcmp.gt.f32.partialorder %v1436_v12, 0.0 }
 0x18a   :  { %v2090_v30 = vmax.f32 %v1934_v36, %v1938_v22  ;;  %v1995_v57 = vsel %vm1675_vm12, %v1441_v48, %v1835_v13  ;;  %v1834_v26 = vmul.f32 0.2, %v1436_v12  ;;  %2708 = vmatmul.mubr.msk.f32.gmra.mrb[78].mxu1 %vm2194_vm2, %v2089_v37  ;;  %vm1621_vm14 = vcmp.gt.f32.partialorder %v1171_v16, 0.0 }
 0x18b   :  { %v2147_v28 = vmax.f32 %v2143_v5, %v1995_v57  ;;  %v1781_v2 = vmul.f32 0.2, %v1171_v16  ;;  %vm1620_vm15 = vcmp.gt.f32.partialorder %v1166_v52, 0.0  ;;  %2307 = vmatprep.mubr.f32.mxu1 %v3140_v27  ;;  %v1780_v42 = vmul.f32 0.2, %v1166_v52 }
 0x18c   :  { %v2142_v40 = vmax.f32 %v2138_v20, %v2090_v30  ;;  %v1994_v7 = vsel %vm1674_vm13, %v1436_v12, %v1834_v26  ;;  %vm1677_vm0 = vcmp.gt.f32.partialorder %v1451_v29, 0.0  ;;  %v1837_v36 = vmul.f32 0.2, %v1451_v29 }
 0x18d   :  { %v1941_v59 = vsel %vm1621_vm14, %v1171_v16, %v1781_v2  ;;  %v1446_v24 = vadd.f32 %v4219_v39, %v4263_v19  ;;  %v1461_v60 = vadd.f32 %v4219_v39, %v4275_v17  ;;  %v1940_v18 = vsel %vm1620_vm15, %v1166_v52, %v1780_v42 }
 0x18e   :  { %v2146_v46 = vmax.f32 %v2142_v40, %v1994_v7  ;;  %v2145_v37 = vmax.f32 %v2141_v62, %v1941_v59  ;;  %v1456_v35 = vadd.f32 %v4219_v39, %v4279_v8  ;;  %v2144_v44 = vmax.f32 %v2140_v54, %v1940_v18 }
 0x18f   :  { %v1997_v9 = vsel %vm1677_vm0, %v1451_v29, %v1837_v36  ;;  %vm1676_vm1 = vcmp.gt.f32.partialorder %v1446_v24, 0.0  ;;  %v1836_v20 = vmul.f32 0.2, %v1446_v24  ;;  %vm1679_vm3 = vcmp.gt.f32.partialorder %v1461_v60, 0.0 }
 0x190   :  { %v2149_v50 = vmax.f32 %v2145_v37, %v1997_v9  ;;  %v1839_v45 = vmul.f32 0.2, %v1461_v60  ;;  %vm1678_vm4 = vcmp.gt.f32.partialorder %v1456_v35, 0.0  ;;  %v1838_v14 = vmul.f32 0.2, %v1456_v35 }
 0x191   :  { %v1996_v61 = vsel %vm1676_vm1, %v1446_v24, %v1836_v20  ;;  %v1471_v19 = vadd.f32 %v4219_v39, %v4289_v43  ;;  %v1466_v17 = vadd.f32 %v4219_v39, %v4292_v1  ;;  %v1481_v8 = vadd.f32 %v4219_v39, %v4308_v10 }
 0x192   :  { %v2148_v11 = vmax.f32 %v2144_v44, %v1996_v61  ;;  %v1999_v23 = vsel %vm1679_vm3, %v1461_v60, %v1839_v45  ;;  %v1476_v33 = vadd.f32 %v4219_v39, %v4311_v31  ;;  %v1998_v38 = vsel %vm1678_vm4, %v1456_v35, %v1838_v14 }
 0x193   :  { %v2151_v25 = vmax.f32 %v2147_v28, %v1999_v23  ;;  %vm1681_vm5 = vcmp.gt.f32.partialorder %v1471_v19, 0.0  ;;  %v1841_v53 = vmul.f32 0.2, %v1471_v19  ;;  %v2150_v34 = vmax.f32 %v2146_v46, %v1998_v38 }
 0x194   :  { %vm1680_vm6 = vcmp.gt.f32.partialorder %v1466_v17, 0.0  ;;  %v1840_v48 = vmul.f32 0.2, %v1466_v17  ;;  %vm1683_vm7 = vcmp.gt.f32.partialorder %v1481_v8, 0.0  ;;  %v1843_v49 = vmul.f32 0.2, %v1481_v8 }
 0x195   :  { %v2001_v43 = vsel %vm1681_vm5, %v1471_v19, %v1841_v53  ;;  %vm1682_vm8 = vcmp.gt.f32.partialorder %v1476_v33, 0.0  ;;  %v1842_v1 = vmul.f32 0.2, %v1476_v33  ;;  %v1491_v10 = vadd.f32 %v4219_v39, %v4321_v47 }
 0x196   :  { %v2153_v62 = vmax.f32 %v2149_v50, %v2001_v43  ;;  %v2000_v51 = vsel %vm1680_vm6, %v1466_v17, %v1840_v48  ;;  %v1486_v31 = vadd.f32 %v4219_v39, %v4327_v6  ;;  %v2003_v41 = vsel %vm1683_vm7, %v1481_v8, %v1843_v49  ;;  %v2182_v17 = vld [vmem:[%s4595_s4] sm:$0x3] }
 0x197   :  { %v2152_v4 = vmax.f32 %v2148_v11, %v2000_v51  ;;  %v2002_v32 = vsel %vm1682_vm8, %v1476_v33, %v1842_v1  ;;  %v1501_v54 = vadd.f32 %v4219_v39, %v4339_v0  ;;  %v2155_v13 = vmax.f32 %v2151_v25, %v2003_v41 }
 0x198   :  { %v2154_v12 = vmax.f32 %v2150_v34, %v2002_v32  ;;  %vm1685_vm9 = vcmp.gt.f32.partialorder %v1491_v10, 0.0  ;;  %v1845_v16 = vmul.f32 0.2, %v1491_v10  ;;  %vm1684_vm10 = vcmp.gt.f32.partialorder %v1486_v31, 0.0 }
 0x199   :  { %v1844_v5 = vmul.f32 0.2, %v1486_v31  ;;  %vm1687_vm11 = vcmp.gt.f32.partialorder %v1501_v54, 0.0  ;;  %v1847_v22 = vmul.f32 0.2, %v1501_v54  ;;  %v1496_v47 = vadd.f32 %v4219_v39, %v4345_v63 }
 0x19a   :  { %v2005_v52 = vsel %vm1685_vm9, %v1491_v10, %v1845_v16  ;;  %v1511_v6 = vadd.f32 %v4219_v39, %v4356_v3  ;;  %v1506_v29 = vadd.f32 %v4219_v39, %v4359_v21  ;;  %v1521_v26 = vadd.f32 %v4219_v39, %v4365_v56 }
 0x19b   :  { %v2157_v30 = vmax.f32 %v2153_v62, %v2005_v52  ;;  %v2004_v0 = vsel %vm1684_vm10, %v1486_v31, %v1844_v5  ;;  %v2007_v57 = vsel %vm1687_vm11, %v1501_v54, %v1847_v22  ;;  %vm1686_vm12 = vcmp.gt.f32.partialorder %v1496_v47, 0.0 }
 0x19c   :  { %v2156_v28 = vmax.f32 %v2152_v4, %v2004_v0  ;;  %v2159_v2 = vmax.f32 %v2155_v13, %v2007_v57  ;;  %v1846_v40 = vmul.f32 0.2, %v1496_v47  ;;  %vm1689_vm13 = vcmp.gt.f32.partialorder %v1511_v6, 0.0 }
 0x19d   :  { %v1849_v7 = vmul.f32 0.2, %v1511_v6  ;;  %vm1688_vm14 = vcmp.gt.f32.partialorder %v1506_v29, 0.0  ;;  %v1848_v63 = vmul.f32 0.2, %v1506_v29  ;;  %vm1691_vm15 = vcmp.gt.f32.partialorder %v1521_v26, 0.0 }
 0x19e   :  { %v2006_v42 = vsel %vm1686_vm12, %v1496_v47, %v1846_v40  ;;  %v1851_v3 = vmul.f32 0.2, %v1521_v26  ;;  %v1516_v21 = vadd.f32 %v4219_v39, %v4368_v58  ;;  %v1531_v56 = vadd.f32 %v4219_v39, %v4385_v15 }
 0x19f   :  { %v2158_v59 = vmax.f32 %v2154_v12, %v2006_v42  ;;  %v2009_v36 = vsel %vm1689_vm13, %v1511_v6, %v1849_v7  ;;  %v2008_v24 = vsel %vm1688_vm14, %v1506_v29, %v1848_v63  ;;  %v1526_v9 = vadd.f32 %v4219_v39, %v4389_v55 }
 0x1a0   :  { %v2161_v60 = vmax.f32 %v2157_v30, %v2009_v36  ;;  %v2160_v46 = vmax.f32 %v2156_v28, %v2008_v24  ;;  %v2011_v37 = vsel %vm1691_vm15, %v1521_v26, %v1851_v3  ;;  %vm1690_vm0 = vcmp.gt.f32.partialorder %v1516_v21, 0.0 }
 0x1a1   :  { %v2163_v18 = vmax.f32 %v2159_v2, %v2011_v37  ;;  %v1850_v35 = vmul.f32 0.2, %v1516_v21  ;;  %vm1693_vm1 = vcmp.gt.f32.partialorder %v1531_v56, 0.0  ;;  %v1853_v44 = vmul.f32 0.2, %v1531_v56 }
 0x1a2   :  { %vm1692_vm3 = vcmp.gt.f32.partialorder %v1526_v9, 0.0  ;;  %v1852_v61 = vmul.f32 0.2, %v1526_v9  ;;  %v2184_v39 = vlaneseq }
 0x1a3   :  { %v2010_v20 = vsel %vm1690_vm0, %v1516_v21, %v1850_v35  ;;  %v2013_v50 = vsel %vm1693_vm1, %v1531_v56, %v1853_v44 }
 0x1a4   :  { %v2162_v58 = vmax.f32 %v2158_v59, %v2010_v20  ;;  %v2165_v45 = vmax.f32 %v2161_v60, %v2013_v50  ;;  %v2012_v14 = vsel %vm1692_vm3, %v1526_v9, %v1852_v61  ;;  %v4528_v55 = vshrl.u32 %v2184_v39, 7 }
 0x1a5   :  { %v2164_v15 = vmax.f32 %v2160_v46, %v2012_v14  ;;  %vm4553_vm11 = vcmp.lt.s32.totalorder %v2184_v39, 256 }
 0x1a6   :  { %2709 = vmatmul.mubr.msk.f32.gmra.mrb[80].mxu1 %vm2194_vm2, %v2162_v58  ;;  %v2186_v19 = vsub.s32 0, %v4528_v55  ;;  %v2190_v11 = vsub.s32 1, %v4528_v55  ;;  %v3141_v58 = vmov 1966171168  }
 0x1a7   :  { %2313 = vmatprep.mubr.f32.mxu1 %v3140_v27 }
 0x1a8   :  { %v4535_v23 = vrot.slane %v2182_v17, %v2186_v19  ;;  %v4537_v8 = vrot.slane %v2182_v17, %v2190_v11 }
 0x1aa   :  { %2710 = vmatmul.mubr.msk.f32.gmra.mrb[82].mxu1 %vm2194_vm2, %v2163_v18 }
 0x1ab   :  { %2319 = vmatprep.mubr.f32.mxu1 %v3140_v27 }
 0x1ae   :  { %2711 = vmatmul.mubr.msk.f32.gmra.mrb[84].mxu1 %vm2194_vm2, %v2164_v15 }
 0x1af   :  { %2325 = vmatprep.mubr.f32.mxu1 %v3140_v27 }
 0x1b2   :  { %2712 = vmatmul.mubr.msk.f32.gmra.mrb[86].mxu1 %vm2194_vm2, %v2165_v45  ;;  %v2402_v45 = vunpack.c.l.s4 %v3141_v58 }
 0x251   :  { %v2285_v33 = vpop.f32.mrb[72].mxu1 }
 0x252   :  { %v2286_v27 = vadd.f32 %v2285_v33, %v4535_v23  ;;  %v2287_v25 = vpop.f32.mrb[73].mxu1 }
 0x253   :  { %v2288_v38 = vadd.f32 %v2287_v25, %v4537_v8  ;;  %v2403_v25 = vunpack.c.0.s8 %v2402_v45 }
 0x254   :  { %v2348_v34 = vmul.f32 0.2, %v2286_v27  ;;  %vm2332_vm2 = vcmp.gt.f32.partialorder %v2286_v27, 0.0 }
 0x255   :  { %v2291_v53 = vpop.f32.mrb[74].mxu1  ;;  %v2349_v49 = vmul.f32 0.2, %v2288_v38  ;;  %vm2333_vm4 = vcmp.gt.f32.partialorder %v2288_v38, 0.0 }
 0x256   :  { %v2292_v48 = vadd.f32 %v2291_v53, %v4535_v23  ;;  %v2293_v43 = vpop.f32.mrb[75].mxu1  ;;  %v2364_v31 = vsel %vm2332_vm2, %v2286_v27, %v2348_v34 }
 0x257   :  { %v2294_v1 = vadd.f32 %v2293_v43, %v4537_v8  ;;  %v2365_v54 = vsel %vm2333_vm4, %v2288_v38, %v2349_v49 }
 0x258   :  { %vm2334_vm5 = vcmp.gt.f32.partialorder %v2292_v48, 0.0  ;;  %v2350_v62 = vmul.f32 0.2, %v2292_v48 }
 0x259   :  { %vm2335_vm6 = vcmp.gt.f32.partialorder %v2294_v1, 0.0  ;;  %v2351_v51 = vmul.f32 0.2, %v2294_v1  ;;  %v2297_v10 = vpop.f32.mrb[76].mxu1 }
 0x25a   :  { %v2366_v4 = vsel %vm2334_vm5, %v2292_v48, %v2350_v62  ;;  %v2298_v41 = vadd.f32 %v2297_v10, %v4535_v23  ;;  %v2299_v32 = vpop.f32.mrb[77].mxu1 }
 0x25b   :  { %v2421_v13 = vadd.f32 %v2366_v4, %v2364_v31  ;;  %v2367_v12 = vsel %vm2335_vm6, %v2294_v1, %v2351_v51  ;;  %v2300_v16 = vadd.f32 %v2299_v32, %v4537_v8  ;;  %v4548_v51 = vsub.s32 %v2403_v25, %v4528_v55 }
 0x25c   :  { %v2430_v5 = vadd.f32 %v2367_v12, %v2365_v54  ;;  %vm2336_vm7 = vcmp.gt.f32.partialorder %v2298_v41, 0.0  ;;  %v2352_v22 = vmul.f32 0.2, %v2298_v41 }
 0x25d   :  { %vm2337_vm8 = vcmp.gt.f32.partialorder %v2300_v16, 0.0  ;;  %v2353_v52 = vmul.f32 0.2, %v2300_v16  ;;  %v2303_v47 = vpop.f32.mrb[78].mxu1 }
 0x25e   :  { %v2368_v6 = vsel %vm2336_vm7, %v2298_v41, %v2352_v22  ;;  %v2304_v29 = vadd.f32 %v2303_v47, %v4535_v23  ;;  %v2305_v30 = vpop.f32.mrb[79].mxu1 }
 0x25f   :  { %v2380_v0 = vmax.f32 %v2364_v31, %v2368_v6  ;;  %v2422_v57 = vadd.f32 %v2421_v13, %v2368_v6  ;;  %v2369_v26 = vsel %vm2337_vm8, %v2300_v16, %v2353_v52  ;;  %v2306_v28 = vadd.f32 %v2305_v30, %v4537_v8 }
 0x260   :  { %v2389_v2 = vmax.f32 %v2365_v54, %v2369_v26  ;;  %v2431_v40 = vadd.f32 %v2430_v5, %v2369_v26  ;;  %vm2338_vm9 = vcmp.gt.f32.partialorder %v2304_v29, 0.0  ;;  %v2354_v7 = vmul.f32 0.2, %v2304_v29 }
 0x261   :  { %vm2339_vm10 = vcmp.gt.f32.partialorder %v2306_v28, 0.0  ;;  %v2355_v63 = vmul.f32 0.2, %v2306_v28 }
 0x262   :  { %v2370_v42 = vsel %vm2338_vm9, %v2304_v29, %v2354_v7 }
 0x263   :  { %v2381_v3 = vmax.f32 %v2366_v4, %v2370_v42  ;;  %v2423_v21 = vadd.f32 %v2422_v57, %v2370_v42  ;;  %v2371_v59 = vsel %vm2339_vm10, %v2306_v28, %v2355_v63 }
 0x264   :  { %v2390_v36 = vmax.f32 %v2367_v12, %v2371_v59  ;;  %v2432_v24 = vadd.f32 %v2431_v40, %v2371_v59 }
 0x265   :  { %v2382_v56 = vmax.f32 %v2380_v0, %v2381_v3  ;;  %v2424_v60 = vrot.slane %v2423_v21, 4 }
 0x266   :  { %v2391_v46 = vmax.f32 %v2389_v2, %v2390_v36  ;;  %v2433_v37 = vrot.slane %v2432_v24, 4 }
 0x267   :  { %v2383_v18 = vrot.slane %v2382_v56, 4  ;;  %v2425_v35 = vadd.f32 %v2424_v60, %v2423_v21 }
 0x268   :  { %v2392_v44 = vrot.slane %v2391_v46, 4  ;;  %v2434_v9 = vadd.f32 %v2433_v37, %v2432_v24 }
 0x269   :  { %v2384_v20 = vmax.f32 %v2382_v56, %v2383_v18  ;;  %v2426_v50 = vrot.slane %v2425_v35, 2 }
 0x26a   :  { %v2393_v61 = vmax.f32 %v2391_v46, %v2392_v44  ;;  %v2435_v14 = vrot.slane %v2434_v9, 2 }
 0x26b   :  { %v2385_v15 = vrot.slane %v2384_v20, 2  ;;  %v2427_v19 = vadd.f32 %v2426_v50, %v2425_v35 }
 0x26c   :  { %v2394_v17 = vrot.slane %v2393_v61, 2  ;;  %v2436_v11 = vadd.f32 %v2435_v14, %v2434_v9 }
 0x26d   :  { %v2386_v33 = vmax.f32 %v2384_v20, %v2385_v15  ;;  %v2428_v27 = vrot.slane %v2427_v19, 1 }
 0x26e   :  { %v2395_v38 = vmax.f32 %v2393_v61, %v2394_v17  ;;  %v2437_v53 = vrot.slane %v2436_v11, 1 }
 0x26f   :  { %v2387_v34 = vrot.slane %v2386_v33, 1  ;;  %v2429_v48 = vadd.f32 %v2428_v27, %v2427_v19 }
 0x270   :  { %v2396_v43 = vrot.slane %v2395_v38, 1  ;;  %v2438_v49 = vadd.f32 %v2437_v53, %v2436_v11 }
 0x271   :  { %v2388_v1 = vmax.f32 %v2386_v33, %v2387_v34  ;;  %v2440_v62 = vmul.f32 0.03125, %v2429_v48 }
 0x272   :  { %v2397_v10 = vmax.f32 %v2395_v38, %v2396_v43  ;;  %v2441_v31 = vmul.f32 0.03125, %v2438_v49 }
 0x274   :  { %v2400_v4 = vcombine.low %v2388_v1, %v2397_v10  ;;  %v2444_v41 = vcombine.low %v2440_v62, %v2441_v31 }
 0x276   :  { %v2407_v32 = vrot.slane %v2400_v4, %v4548_v51  ;;  %v2451_v54 = vrot.slane %v2444_v41, %v4548_v51 }
 0x278   :  { %v2414_v12 = vrot.slane %v2407_v32, %v4548_v51  ;;  %v2458_v16 = vrot.slane %v2451_v54, %v4548_v51 }
 0x279   :  { %v2309_v5 = vpop.f32.mrb[80].mxu1 }
 0x27a   :  { %2420 = vst.msk [vmem:[%s4596_s5] ss:$2 sm:$0x3] %vm4553_vm11, %v2414_v12  ;;  %2713 = vst.msk [vmem:[%s4596_s5 + $0x4] ss:$2 sm:$0x3] %vm4553_vm11, %v2458_v16  ;;  %v2310_v39 = vadd.f32 %v2309_v5, %v4535_v23 }
 0x27b   :  { %v2311_v55 = vpop.f32.mrb[81].mxu1 }
 0x27c   :  { %v2312_v22 = vadd.f32 %v2311_v55, %v4537_v8  ;;  %v2356_v47 = vmul.f32 0.2, %v2310_v39  ;;  %vm2340_vm12 = vcmp.gt.f32.partialorder %v2310_v39, 0.0 }
 0x27d   :  { %v2315_v52 = vpop.f32.mrb[82].mxu1 }
 0x27e   :  { %v2316_v6 = vadd.f32 %v2315_v52, %v4535_v23  ;;  %v2317_v29 = vpop.f32.mrb[83].mxu1  ;;  %v2357_v30 = vmul.f32 0.2, %v2312_v22  ;;  %vm2341_vm13 = vcmp.gt.f32.partialorder %v2312_v22, 0.0  ;;  %v2372_v2 = vsel %vm2340_vm12, %v2310_v39, %v2356_v47 }
 0x27f   :  { %v2318_v0 = vadd.f32 %v2317_v29, %v4537_v8 }
 0x280   :  { %vm2342_vm14 = vcmp.gt.f32.partialorder %v2316_v6, 0.0  ;;  %v2358_v57 = vmul.f32 0.2, %v2316_v6  ;;  %v2373_v42 = vsel %vm2341_vm13, %v2312_v22, %v2357_v30 }
 0x281   :  { %vm2343_vm15 = vcmp.gt.f32.partialorder %v2318_v0, 0.0  ;;  %v2359_v26 = vmul.f32 0.2, %v2318_v0  ;;  %v2321_v28 = vpop.f32.mrb[84].mxu1 }
 0x282   :  { %v2374_v40 = vsel %vm2342_vm14, %v2316_v6, %v2358_v57  ;;  %v2322_v7 = vadd.f32 %v2321_v28, %v4535_v23  ;;  %v2323_v63 = vpop.f32.mrb[85].mxu1 }
 0x283   :  { %v2500_v3 = vadd.f32 %v2374_v40, %v2372_v2  ;;  %v2375_v21 = vsel %vm2343_vm15, %v2318_v0, %v2359_v26  ;;  %v2324_v59 = vadd.f32 %v2323_v63, %v4537_v8 }
 0x284   :  { %v2509_v36 = vadd.f32 %v2375_v21, %v2373_v42  ;;  %vm2344_vm0 = vcmp.gt.f32.partialorder %v2322_v7, 0.0  ;;  %v2360_v24 = vmul.f32 0.2, %v2322_v7 }
 0x285   :  { %vm2345_vm1 = vcmp.gt.f32.partialorder %v2324_v59, 0.0  ;;  %v2361_v56 = vmul.f32 0.2, %v2324_v59  ;;  %v2327_v60 = vpop.f32.mrb[86].mxu1 }
 0x286   :  { %v2376_v46 = vsel %vm2344_vm0, %v2322_v7, %v2360_v24  ;;  %v2328_v37 = vadd.f32 %v2327_v60, %v4535_v23  ;;  %v2329_v18 = vpop.f32.mrb[87].mxu1 }
 0x287   :  { %v2462_v35 = vmax.f32 %v2372_v2, %v2376_v46  ;;  %v2501_v44 = vadd.f32 %v2500_v3, %v2376_v46  ;;  %v2377_v9 = vsel %vm2345_vm1, %v2324_v59, %v2361_v56  ;;  %v2330_v20 = vadd.f32 %v2329_v18, %v4537_v8 }
 0x288   :  { %v2471_v50 = vmax.f32 %v2373_v42, %v2377_v9  ;;  %v2510_v58 = vadd.f32 %v2509_v36, %v2377_v9  ;;  %vm2346_vm3 = vcmp.gt.f32.partialorder %v2328_v37, 0.0  ;;  %v2362_v45 = vmul.f32 0.2, %v2328_v37 }
 0x289   :  { %vm2347_vm2 = vcmp.gt.f32.partialorder %v2330_v20, 0.0  ;;  %v2363_v61 = vmul.f32 0.2, %v2330_v20 }
 0x28a   :  { %v2378_v14 = vsel %vm2346_vm3, %v2328_v37, %v2362_v45 }
 0x28b   :  { %v2463_v15 = vmax.f32 %v2374_v40, %v2378_v14  ;;  %v2502_v19 = vadd.f32 %v2501_v44, %v2378_v14  ;;  %v2379_v17 = vsel %vm2347_vm2, %v2330_v20, %v2363_v61 }
 0x28c   :  { %v2472_v11 = vmax.f32 %v2375_v21, %v2379_v17  ;;  %v2511_v33 = vadd.f32 %v2510_v58, %v2379_v17 }
 0x28d   :  { %v2464_v27 = vmax.f32 %v2462_v35, %v2463_v15  ;;  %v2503_v23 = vrot.slane %v2502_v19, 4 }
 0x28e   :  { %v2473_v25 = vmax.f32 %v2471_v50, %v2472_v11  ;;  %v2512_v38 = vrot.slane %v2511_v33, 4 }
 0x28f   :  { %v2465_v53 = vrot.slane %v2464_v27, 4  ;;  %v2504_v34 = vadd.f32 %v2503_v23, %v2502_v19 }
 0x290   :  { %v2474_v48 = vrot.slane %v2473_v25, 4  ;;  %v2513_v8 = vadd.f32 %v2512_v38, %v2511_v33 }
 0x291   :  { %v2466_v43 = vmax.f32 %v2464_v27, %v2465_v53  ;;  %v2505_v49 = vrot.slane %v2504_v34, 2 }
 0x292   :  { %v2475_v1 = vmax.f32 %v2473_v25, %v2474_v48  ;;  %v2514_v62 = vrot.slane %v2513_v8, 2 }
 0x293   :  { %v2467_v10 = vrot.slane %v2466_v43, 2  ;;  %v2506_v31 = vadd.f32 %v2505_v49, %v2504_v34 }
 0x294   :  { %v2476_v4 = vrot.slane %v2475_v1, 2  ;;  %v2515_v41 = vadd.f32 %v2514_v62, %v2513_v8 }
 0x295   :  { %v2468_v32 = vmax.f32 %v2466_v43, %v2467_v10  ;;  %v2507_v54 = vrot.slane %v2506_v31, 1 }
 0x296   :  { %v2477_v12 = vmax.f32 %v2475_v1, %v2476_v4  ;;  %v2516_v16 = vrot.slane %v2515_v41, 1 }
 0x297   :  { %v2469_v5 = vrot.slane %v2468_v32, 1  ;;  %v2508_v39 = vadd.f32 %v2507_v54, %v2506_v31 }
 0x298   :  { %v2478_v55 = vrot.slane %v2477_v12, 1  ;;  %v2517_v22 = vadd.f32 %v2516_v16, %v2515_v41 }
 0x299   :  { %v2470_v52 = vmax.f32 %v2468_v32, %v2469_v5  ;;  %v2518_v47 = vmul.f32 0.03125, %v2508_v39 }
 0x29a   :  { %v2479_v6 = vmax.f32 %v2477_v12, %v2478_v55  ;;  %v2519_v29 = vmul.f32 0.03125, %v2517_v22 }
 0x29c   :  { %v2482_v30 = vcombine.low %v2470_v52, %v2479_v6  ;;  %v2522_v0 = vcombine.low %v2518_v47, %v2519_v29 }
 0x29e   :  { %v2489_v57 = vrot.slane %v2482_v30, %v4548_v51  ;;  %v2529_v26 = vrot.slane %v2522_v0, %v4548_v51 }
 0x2a0   :  { %v2496_v28 = vrot.slane %v2489_v57, %v4548_v51  ;;  %v2536_v2 = vrot.slane %v2529_v26, %v4548_v51 }
 0x2a2   :  { %2714 = vst.msk [vmem:[%s4596_s5 + $0x1] ss:$2 sm:$0x3] %vm4553_vm11, %v2496_v28  ;;  %2715 = vst.msk [vmem:[%s4596_s5 + $0x5] ss:$2 sm:$0x3] %vm4553_vm11, %v2536_v2 }

// kernel: dgcnn_exit1_forward.3
= control target key start
LH: loop header
LB: loop body
LE: loop exit
PB: predicated region body
PF: predicated region fallthrough
CT: control target
= control target key end

     0   :  { %v9041_v36 = vmov 1983009808   ;;  %v49_v38 = vlaneseq  ;;  %s11960_s0 = inlined_call_operand.vmem [shape: f32[2,512], index: 0, kind: input, shape index: {}]   ;;  %s11961_s1 = inlined_call_operand.vmem [shape: f32[2,1536], index: 1, kind: input, shape index: {}]   ;;  %s11962_s2 = inlined_call_operand.vmem [shape: bf16[512,1536], index: 2, kind: input, shape index: {}]   ;;  %s11963_s3 = inlined_call_operand.vmem [shape: f32[1,1536], index: 3, kind: input, shape index: {}]   ;;  %s11964_s4 = inlined_call_operand.vmem [shape: bf16[1536,512], index: 4, kind: input, shape index: {}]   ;;  %s11965_s5 = inlined_call_operand.vmem [shape: f32[1,512], index: 5, kind: input, shape index: {}]   ;;  %s11966_s6 = inlined_call_operand.vmem [shape: bf16[512,256], index: 6, kind: input, shape index: {}]   ;;  %s11967_s7 = inlined_call_operand.vmem [shape: f32[1,256], index: 7, kind: input, shape index: {}]   ;;  %s11968_s8 = inlined_call_operand.vmem [shape: bf16[256,128], index: 8, kind: input, shape index: {}]   ;;  %s11969_s9 = inlined_call_operand.vmem [shape: f32[1,128], index: 9, kind: input, shape index: {}]   ;;  %s11970_s10 = inlined_call_operand.vmem [shape: bf16[128,40], index: 10, kind: input, shape index: {}]   ;;  %s11971_s11 = inlined_call_operand.vmem [shape: f32[1,40], index: 11, kind: input, shape index: {}]   ;;  %s11972_s12 = inlined_call_operand.hbm [shape: f32[2,40], index: 12, kind: output, shape index: {}]  }
   0x1   :  { %v7742_v0 = vld [vmem:[%s11962_s2 + $0x4] ss:$48 sps:$4 sm:$0xff]   ;;  %v7744_v1 = vld [vmem:[%s11962_s2 + $0xc] ss:$48 sps:$4 sm:$0xff]   ;;  %v7746_v2 = vld [vmem:[%s11962_s2] ss:$48 sps:$4 sm:$0xff]   ;;  %v47_v37 = vunpack.c.l.s4 %v9041_v36 }
   0x2   :  { %2438 = vmatprep.subr.bf16.mxu0 %v7742_v0  ;;  %v7747_v3 = vld [vmem:[%s11962_s2 + $0x8] ss:$48 sps:$4 sm:$0xff]   ;;  %2520 = vmatprep.subr.bf16.mxu1 %v7744_v1  ;;  %v7748_v4 = vld [vmem:[%s11962_s2 + $0x64] ss:$48 sps:$4 sm:$0xff]   ;;  %v7750_v5 = vld [vmem:[%s11962_s2 + $0x6c] ss:$48 sps:$4 sm:$0xff]  }
   0x3   :  { %2439 = vmatpush1.bf16.msra.mxu0 %v7746_v2  ;;  %2521 = vmatpush1.bf16.msra.mxu1 %v7747_v3  ;;  %v7752_v6 = vld [vmem:[%s11962_s2 + $0x60] ss:$48 sps:$4 sm:$0xff]   ;;  %v7753_v7 = vld [vmem:[%s11962_s2 + $0x68] ss:$48 sps:$4 sm:$0xff]   ;;  %v7754_v8 = vld [vmem:[%s11962_s2 + $0xc4] ss:$48 sps:$4 sm:$0xff]   ;;  %v48_v42 = vunpack.c.0.s8 %v47_v37 }
   0x4   :  { %2440 = vmatprep.subr.bf16.mxu0 %v7748_v4  ;;  %2522 = vmatprep.subr.bf16.mxu1 %v7750_v5  ;;  %v7756_v9 = vld [vmem:[%s11962_s2 + $0xcc] ss:$48 sps:$4 sm:$0xff]   ;;  %v7758_v10 = vld [vmem:[%s11962_s2 + $0xc0] ss:$48 sps:$4 sm:$0xff]   ;;  %v7759_v11 = vld [vmem:[%s11962_s2 + $0xc8] ss:$48 sps:$4 sm:$0xff]  }
   0x5   :  { %v7760_v12 = vld [vmem:[%s11962_s2 + $0x124] ss:$48 sps:$4 sm:$0xff]   ;;  %v7762_v13 = vld [vmem:[%s11962_s2 + $0x12c] ss:$48 sps:$4 sm:$0xff]   ;;  %v7764_v14 = vld [vmem:[%s11962_s2 + $0x120] ss:$48 sps:$4 sm:$0xff]  }
   0x6   :  { %v7765_v15 = vld [vmem:[%s11962_s2 + $0x128] ss:$48 sps:$4 sm:$0xff]   ;;  %v7766_v16 = vld [vmem:[%s11962_s2 + $0x184] ss:$48 sps:$4 sm:$0xff]   ;;  %v7768_v17 = vld [vmem:[%s11962_s2 + $0x18c] ss:$48 sps:$4 sm:$0xff]  }
   0x7   :  { %2441 = vmatpush1.bf16.msra.mxu0 %v7752_v6  ;;  %2523 = vmatpush1.bf16.msra.mxu1 %v7753_v7  ;;  %v7770_v18 = vld [vmem:[%s11962_s2 + $0x180] ss:$48 sps:$4 sm:$0xff]   ;;  %v7771_v19 = vld [vmem:[%s11962_s2 + $0x188] ss:$48 sps:$4 sm:$0xff]   ;;  %v7772_v20 = vld [vmem:[%s11962_s2 + $0x1e4] ss:$48 sps:$4 sm:$0xff]  }
   0x8   :  { %2442 = vmatprep.subr.bf16.mxu0 %v7754_v8  ;;  %2524 = vmatprep.subr.bf16.mxu1 %v7756_v9  ;;  %v7774_v21 = vld [vmem:[%s11962_s2 + $0x1ec] ss:$48 sps:$4 sm:$0xff]   ;;  %v7776_v22 = vld [vmem:[%s11962_s2 + $0x1e0] ss:$48 sps:$4 sm:$0xff]   ;;  %v7777_v23 = vld [vmem:[%s11962_s2 + $0x1e8] ss:$48 sps:$4 sm:$0xff]  }
   0x9   :  { %v7778_v24 = vld [vmem:[%s11962_s2 + $0x244] ss:$48 sps:$4 sm:$0xff]   ;;  %v7780_v25 = vld [vmem:[%s11962_s2 + $0x24c] ss:$48 sps:$4 sm:$0xff]   ;;  %v7782_v26 = vld [vmem:[%s11962_s2 + $0x240] ss:$48 sps:$4 sm:$0xff]  }
   0xa   :  { %v7783_v27 = vld [vmem:[%s11962_s2 + $0x248] ss:$48 sps:$4 sm:$0xff]   ;;  %v7784_v28 = vld [vmem:[%s11962_s2 + $0x2a4] ss:$48 sps:$4 sm:$0xff]   ;;  %v7786_v29 = vld [vmem:[%s11962_s2 + $0x2ac] ss:$48 sps:$4 sm:$0xff]  }
   0xb   :  { %2443 = vmatpush1.bf16.msra.mxu0 %v7758_v10  ;;  %2525 = vmatpush1.bf16.msra.mxu1 %v7759_v11  ;;  %v7788_v30 = vld [vmem:[%s11962_s2 + $0x2a0] ss:$48 sps:$4 sm:$0xff]   ;;  %v7789_v31 = vld [vmem:[%s11962_s2 + $0x2a8] ss:$48 sps:$4 sm:$0xff]   ;;  %v7790_v32 = vld [vmem:[%s11962_s2 + $0x304] ss:$48 sps:$4 sm:$0xff]  }
   0xc   :  { %2444 = vmatprep.subr.bf16.mxu0 %v7760_v12  ;;  %2526 = vmatprep.subr.bf16.mxu1 %v7762_v13  ;;  %v7792_v33 = vld [vmem:[%s11962_s2 + $0x30c] ss:$48 sps:$4 sm:$0xff]   ;;  %v7794_v34 = vld [vmem:[%s11962_s2 + $0x300] ss:$48 sps:$4 sm:$0xff]   ;;  %v7795_v35 = vld [vmem:[%s11962_s2 + $0x308] ss:$48 sps:$4 sm:$0xff]  }
   0xd   :  { %v7796_v39 = vld [vmem:[%s11962_s2 + $0x364] ss:$48 sps:$4 sm:$0xff]   ;;  %v7798_v40 = vld [vmem:[%s11962_s2 + $0x36c] ss:$48 sps:$4 sm:$0xff]   ;;  %v7800_v41 = vld [vmem:[%s11962_s2 + $0x360] ss:$48 sps:$4 sm:$0xff]  }
   0xe   :  { %v9227_v43 = vshrl.u32 %v49_v38, 7  ;;  %v7801_v44 = vld [vmem:[%s11962_s2 + $0x368] ss:$48 sps:$4 sm:$0xff]   ;;  %v7802_v45 = vld [vmem:[%s11962_s2 + $0x3c4] ss:$48 sps:$4 sm:$0xff]  }
   0xf   :  { %2445 = vmatpush1.bf16.msra.mxu0 %v7764_v14  ;;  %2527 = vmatpush1.bf16.msra.mxu1 %v7765_v15  ;;  %v7804_v46 = vld [vmem:[%s11962_s2 + $0x3cc] ss:$48 sps:$4 sm:$0xff]   ;;  %v7806_v47 = vld [vmem:[%s11962_s2 + $0x3c0] ss:$48 sps:$4 sm:$0xff]   ;;  %v7807_v48 = vld [vmem:[%s11962_s2 + $0x3c8] ss:$48 sps:$4 sm:$0xff]  }
  0x10   :  { %2446 = vmatprep.subr.bf16.mxu0 %v7766_v16  ;;  %2528 = vmatprep.subr.bf16.mxu1 %v7768_v17  ;;  %v9245_v49 = vsub.s32 %v48_v42, %v9227_v43  ;;  %v7808_v50 = vld [vmem:[%s11962_s2 + $0x424] ss:$48 sps:$4 sm:$0xff]   ;;  %v7810_v51 = vld [vmem:[%s11962_s2 + $0x42c] ss:$48 sps:$4 sm:$0xff]   ;;  %v7812_v53 = vld [vmem:[%s11962_s2 + $0x420] ss:$48 sps:$4 sm:$0xff]  }
  0x11   :  { %v43_v52 = vld [vmem:[%s11960_s0] sm:$0xff]  ;;  %v7813_v55 = vld [vmem:[%s11962_s2 + $0x428] ss:$48 sps:$4 sm:$0xff]   ;;  %v7816_v57 = vld [vmem:[%s11962_s2 + $0x48c] ss:$48 sps:$4 sm:$0xff]  }
  0x12   :  { %v52_v54 = vrot.slane %v43_v52, %v9245_v49  ;;  %v7814_v56 = vld [vmem:[%s11962_s2 + $0x484] ss:$48 sps:$4 sm:$0xff]   ;;  %v7818_v59 = vld [vmem:[%s11962_s2 + $0x480] ss:$48 sps:$4 sm:$0xff]   ;;  %v7819_v61 = vld [vmem:[%s11962_s2 + $0x488] ss:$48 sps:$4 sm:$0xff]   ;;  %v45_v4 = vcombine.high %v43_v52, %v43_v52 }
  0x13   :  { %2447 = vmatpush1.bf16.msra.mxu0 %v7770_v18  ;;  %2529 = vmatpush1.bf16.msra.mxu1 %v7771_v19  ;;  %v7820_v62 = vld [vmem:[%s11962_s2 + $0x4e4] ss:$48 sps:$4 sm:$0xff]   ;;  %v7822_v63 = vld [vmem:[%s11962_s2 + $0x4ec] ss:$48 sps:$4 sm:$0xff]   ;;  %v7824_v0 = vld [vmem:[%s11962_s2 + $0x4e0] ss:$48 sps:$4 sm:$0xff]  }
  0x14   :  { %2448 = vmatprep.subr.bf16.mxu0 %v7772_v20  ;;  %2530 = vmatprep.subr.bf16.mxu1 %v7774_v21  ;;  %v60_v58 = vcombine.high %v52_v54, %v52_v54  ;;  %v7825_v1 = vld [vmem:[%s11962_s2 + $0x4e8] ss:$48 sps:$4 sm:$0xff]   ;;  %v7826_v2 = vld [vmem:[%s11962_s2 + $0x544] ss:$48 sps:$4 sm:$0xff]   ;;  %v7828_v3 = vld [vmem:[%s11962_s2 + $0x54c] ss:$48 sps:$4 sm:$0xff]   ;;  %v9310_v9 = vrot.slane %v45_v4, %v9245_v49  ;;  %v9329_v16 = vpack.c.bf16 %v52_v54, %v52_v54 }
  0x15   :  { %v7830_v5 = vld [vmem:[%s11962_s2 + $0x540] ss:$48 sps:$4 sm:$0xff]   ;;  %v7831_v6 = vld [vmem:[%s11962_s2 + $0x548] ss:$48 sps:$4 sm:$0xff]   ;;  %v7832_v7 = vld [vmem:[%s11962_s2 + $0x5a4] ss:$48 sps:$4 sm:$0xff]  }
  0x16   :  { %v9272_v60 = vpack.c.bf16 %v60_v58, %v60_v58  ;;  %v7834_v8 = vld [vmem:[%s11962_s2 + $0x5ac] ss:$48 sps:$4 sm:$0xff]   ;;  %v7836_v10 = vld [vmem:[%s11962_s2 + $0x5a0] ss:$48 sps:$4 sm:$0xff]   ;;  %v7837_v11 = vld [vmem:[%s11962_s2 + $0x5a8] ss:$48 sps:$4 sm:$0xff]   ;;  %v61_v14 = vcombine.high %v9310_v9, %v9310_v9 }
  0x17   :  { %2449 = vmatpush1.bf16.msra.mxu0 %v7776_v22  ;;  %2531 = vmatpush1.bf16.msra.mxu1 %v7777_v23  ;;  %v7840_v12 = vld [vmem:[%s11962_s2 + $0x604] ss:$48 sps:$4 sm:$0xff]   ;;  %v7843_v13 = vld [vmem:[%s11962_s2 + $0x60c] ss:$48 sps:$4 sm:$0xff]   ;;  %v7838_v15 = vld [vmem:[%s11962_s2 + $0x600] ss:$48 sps:$4 sm:$0xff]  }
  0x18   :  { %2450 = vmatprep.subr.bf16.mxu0 %v7778_v24  ;;  %2532 = vmatprep.subr.bf16.mxu1 %v7780_v25  ;;  %v7841_v17 = vld [vmem:[%s11962_s2 + $0x608] ss:$48 sps:$4 sm:$0xff]   ;;  %v7846_v18 = vld [vmem:[%s11962_s2 + $0x664] ss:$48 sps:$4 sm:$0xff]   ;;  %v7849_v19 = vld [vmem:[%s11962_s2 + $0x66c] ss:$48 sps:$4 sm:$0xff]   ;;  %v9340_v20 = vpack.c.bf16 %v61_v14, %v61_v14 }
  0x19   :  { %2470 = vmatprep.mubr.bf16.mxu0 %v9272_v60  ;;  %2552 = vmatprep.mubr.bf16.mxu1 %v9272_v60  ;;  %v7844_v21 = vld [vmem:[%s11962_s2 + $0x660] ss:$48 sps:$4 sm:$0xff]   ;;  %v7847_v22 = vld [vmem:[%s11962_s2 + $0x668] ss:$48 sps:$4 sm:$0xff]   ;;  %v7852_v23 = vld [vmem:[%s11962_s2 + $0x6c4] ss:$48 sps:$4 sm:$0xff]  }
  0x1a   :  { %v7855_v24 = vld [vmem:[%s11962_s2 + $0x6cc] ss:$48 sps:$4 sm:$0xff]   ;;  %v7850_v25 = vld [vmem:[%s11962_s2 + $0x6c0] ss:$48 sps:$4 sm:$0xff]   ;;  %v7871_v38 = vld [vmem:[%s11962_s2 + $0x7e8] ss:$48 sps:$4 sm:$0xff]  }
  0x1b   :  { %2451 = vmatpush1.bf16.msra.mxu0 %v7782_v26  ;;  %2533 = vmatpush1.bf16.msra.mxu1 %v7783_v27  ;;  %v7853_v26 = vld [vmem:[%s11962_s2 + $0x6c8] ss:$48 sps:$4 sm:$0xff]   ;;  %v7858_v27 = vld [vmem:[%s11962_s2 + $0x724] ss:$48 sps:$4 sm:$0xff]   ;;  %v7873_v36 = vld [vmem:[%s11962_s2 + $0x7ec] ss:$48 sps:$4 sm:$0xff]  }
  0x1c   :  { %2452 = vmatprep.subr.bf16.mxu0 %v7784_v28  ;;  %2534 = vmatprep.subr.bf16.mxu1 %v7786_v29  ;;  %v7861_v28 = vld [vmem:[%s11962_s2 + $0x72c] ss:$48 sps:$4 sm:$0xff]   ;;  %v7856_v29 = vld [vmem:[%s11962_s2 + $0x720] ss:$48 sps:$4 sm:$0xff]   ;;  %v7877_v42 = vld [vmem:[%s11962_s2 + $0x848] ss:$48 sps:$4 sm:$0xff]  }
  0x1d   :  { %v7868_v37 = vld [vmem:[%s11962_s2 + $0x7e0] ss:$48 sps:$4 sm:$0xff]   ;;  %v7889_v52 = vld [vmem:[%s11962_s2 + $0x908] ss:$48 sps:$4 sm:$0xff]   ;;  %v7897_v54 = vld [vmem:[%s11962_s2 + $0x96c] ss:$48 sps:$4 sm:$0xff]  }
  0x1e   :  { %v7903_v58 = vld [vmem:[%s11962_s2 + $0x9cc] ss:$48 sps:$4 sm:$0xff]   ;;  %v7910_v4 = vld [vmem:[%s11962_s2 + $0xa80] ss:$48 sps:$4 sm:$0xff]   ;;  %v7925_v14 = vld [vmem:[%s11962_s2 + $0xb48] ss:$48 sps:$4 sm:$0xff]  }
  0x1f   :  { %2453 = vmatpush1.bf16.msra.mxu0 %v7788_v30  ;;  %2535 = vmatpush1.bf16.msra.mxu1 %v7789_v31  ;;  %v7859_v30 = vld [vmem:[%s11962_s2 + $0x728] ss:$48 sps:$4 sm:$0xff]   ;;  %v7864_v31 = vld [vmem:[%s11962_s2 + $0x784] ss:$48 sps:$4 sm:$0xff]  }
  0x20   :  { %2454 = vmatprep.subr.bf16.mxu0 %v7790_v32  ;;  %2536 = vmatprep.subr.bf16.mxu1 %v7792_v33  ;;  %v7867_v32 = vld [vmem:[%s11962_s2 + $0x78c] ss:$48 sps:$4 sm:$0xff]   ;;  %v7862_v33 = vld [vmem:[%s11962_s2 + $0x780] ss:$48 sps:$4 sm:$0xff]  }
  0x23   :  { %2455 = vmatpush1.bf16.msra.mxu0 %v7794_v34  ;;  %2537 = vmatpush1.bf16.msra.mxu1 %v7795_v35  ;;  %v7865_v34 = vld [vmem:[%s11962_s2 + $0x788] ss:$48 sps:$4 sm:$0xff]   ;;  %v7870_v35 = vld [vmem:[%s11962_s2 + $0x7e4] ss:$48 sps:$4 sm:$0xff]  }
  0x24   :  { %2456 = vmatprep.subr.bf16.mxu0 %v7796_v39  ;;  %2538 = vmatprep.subr.bf16.mxu1 %v7798_v40  ;;  %v7876_v39 = vld [vmem:[%s11962_s2 + $0x844] ss:$48 sps:$4 sm:$0xff]   ;;  %v7879_v40 = vld [vmem:[%s11962_s2 + $0x84c] ss:$48 sps:$4 sm:$0xff]  }
  0x27   :  { %2457 = vmatpush1.bf16.msra.mxu0 %v7800_v41  ;;  %2539 = vmatpush1.bf16.msra.mxu1 %v7801_v44  ;;  %v7874_v41 = vld [vmem:[%s11962_s2 + $0x840] ss:$48 sps:$4 sm:$0xff]   ;;  %v7882_v44 = vld [vmem:[%s11962_s2 + $0x8a4] ss:$48 sps:$4 sm:$0xff]  }
  0x28   :  { %2458 = vmatprep.subr.bf16.mxu0 %v7802_v45  ;;  %2540 = vmatprep.subr.bf16.mxu1 %v7804_v46  ;;  %v7885_v45 = vld [vmem:[%s11962_s2 + $0x8ac] ss:$48 sps:$4 sm:$0xff]   ;;  %v7880_v46 = vld [vmem:[%s11962_s2 + $0x8a0] ss:$48 sps:$4 sm:$0xff]  }
  0x2b   :  { %2459 = vmatpush1.bf16.msra.mxu0 %v7806_v47  ;;  %2541 = vmatpush1.bf16.msra.mxu1 %v7807_v48  ;;  %v7883_v47 = vld [vmem:[%s11962_s2 + $0x8a8] ss:$48 sps:$4 sm:$0xff]   ;;  %v7888_v48 = vld [vmem:[%s11962_s2 + $0x904] ss:$48 sps:$4 sm:$0xff]  }
  0x2c   :  { %2460 = vmatprep.subr.bf16.mxu0 %v7808_v50  ;;  %2542 = vmatprep.subr.bf16.mxu1 %v7810_v51  ;;  %v7891_v50 = vld [vmem:[%s11962_s2 + $0x90c] ss:$48 sps:$4 sm:$0xff]   ;;  %v7886_v51 = vld [vmem:[%s11962_s2 + $0x900] ss:$48 sps:$4 sm:$0xff]  }
  0x2f   :  { %2461 = vmatpush1.bf16.msra.mxu0 %v7812_v53  ;;  %2543 = vmatpush1.bf16.msra.mxu1 %v7813_v55  ;;  %v7894_v53 = vld [vmem:[%s11962_s2 + $0x964] ss:$48 sps:$4 sm:$0xff]   ;;  %v7892_v55 = vld [vmem:[%s11962_s2 + $0x960] ss:$48 sps:$4 sm:$0xff]  }
  0x30   :  { %2462 = vmatprep.subr.bf16.mxu0 %v7814_v56  ;;  %2544 = vmatprep.subr.bf16.mxu1 %v7816_v57  ;;  %v7895_v56 = vld [vmem:[%s11962_s2 + $0x968] ss:$48 sps:$4 sm:$0xff]   ;;  %v7900_v57 = vld [vmem:[%s11962_s2 + $0x9c4] ss:$48 sps:$4 sm:$0xff]  }
  0x33   :  { %2463 = vmatpush1.bf16.msra.mxu0 %v7818_v59  ;;  %2545 = vmatpush1.bf16.msra.mxu1 %v7819_v61  ;;  %v7898_v59 = vld [vmem:[%s11962_s2 + $0x9c0] ss:$48 sps:$4 sm:$0xff]   ;;  %v7901_v61 = vld [vmem:[%s11962_s2 + $0x9c8] ss:$48 sps:$4 sm:$0xff]  }
  0x34   :  { %2464 = vmatprep.subr.bf16.mxu0 %v7820_v62  ;;  %2546 = vmatprep.subr.bf16.mxu1 %v7822_v63  ;;  %v7906_v62 = vld [vmem:[%s11962_s2 + $0xa24] ss:$48 sps:$4 sm:$0xff]   ;;  %v7909_v63 = vld [vmem:[%s11962_s2 + $0xa2c] ss:$48 sps:$4 sm:$0xff]  }
  0x37   :  { %2465 = vmatpush1.bf16.msra.mxu0 %v7824_v0  ;;  %2547 = vmatpush1.bf16.msra.mxu1 %v7825_v1  ;;  %v7904_v0 = vld [vmem:[%s11962_s2 + $0xa20] ss:$48 sps:$4 sm:$0xff]   ;;  %v7907_v1 = vld [vmem:[%s11962_s2 + $0xa28] ss:$48 sps:$4 sm:$0xff]  }
  0x38   :  { %2466 = vmatprep.subr.bf16.mxu0 %v7826_v2  ;;  %2548 = vmatprep.subr.bf16.mxu1 %v7828_v3  ;;  %v7912_v2 = vld [vmem:[%s11962_s2 + $0xa84] ss:$48 sps:$4 sm:$0xff]   ;;  %v7915_v3 = vld [vmem:[%s11962_s2 + $0xa8c] ss:$48 sps:$4 sm:$0xff]  }
  0x3b   :  { %2467 = vmatpush1.bf16.msra.mxu0 %v7830_v5  ;;  %2549 = vmatpush1.bf16.msra.mxu1 %v7831_v6  ;;  %v7913_v5 = vld [vmem:[%s11962_s2 + $0xa88] ss:$48 sps:$4 sm:$0xff]   ;;  %v7918_v6 = vld [vmem:[%s11962_s2 + $0xae4] ss:$48 sps:$4 sm:$0xff]  }
  0x3c   :  { %2468 = vmatprep.subr.bf16.mxu0 %v7832_v7  ;;  %2550 = vmatprep.subr.bf16.mxu1 %v7834_v8  ;;  %v7921_v7 = vld [vmem:[%s11962_s2 + $0xaec] ss:$48 sps:$4 sm:$0xff]   ;;  %v7916_v8 = vld [vmem:[%s11962_s2 + $0xae0] ss:$48 sps:$4 sm:$0xff]  }
  0x3f   :  { %2469 = vmatpush1.bf16.msra.mxu0 %v7836_v10  ;;  %2551 = vmatpush1.bf16.msra.mxu1 %v7837_v11  ;;  %v7919_v10 = vld [vmem:[%s11962_s2 + $0xae8] ss:$48 sps:$4 sm:$0xff]   ;;  %v7924_v11 = vld [vmem:[%s11962_s2 + $0xb44] ss:$48 sps:$4 sm:$0xff]  }
  0x40   :  { %2479 = vmatprep.subr.bf16.mxu0 %v7840_v12  ;;  %2561 = vmatprep.subr.bf16.mxu1 %v7843_v13  ;;  %v7927_v12 = vld [vmem:[%s11962_s2 + $0xb4c] ss:$48 sps:$4 sm:$0xff]   ;;  %v7922_v13 = vld [vmem:[%s11962_s2 + $0xb40] ss:$48 sps:$4 sm:$0xff]  }
  0x42   :  { %2471 = vmatmul.mubr.bf16.vlgmr.msra.gmra.mrb[0].mxu0 %v9329_v16  ;;  %2553 = vmatmul.mubr.bf16.vlgmr.msra.gmra.mrb[0].mxu1 %v9329_v16 }
  0x43   :  { %2480 = vmatpush1.bf16.msra.mxu0 %v7838_v15  ;;  %2562 = vmatpush1.bf16.msra.mxu1 %v7841_v17  ;;  %v7930_v15 = vld [vmem:[%s11962_s2 + $0xba4] ss:$48 sps:$4 sm:$0xff]   ;;  %v7933_v17 = vld [vmem:[%s11962_s2 + $0xbac] ss:$48 sps:$4 sm:$0xff]  }
  0x44   :  { %2481 = vmatprep.subr.bf16.mxu0 %v7846_v18  ;;  %2563 = vmatprep.subr.bf16.mxu1 %v7849_v19  ;;  %v7928_v18 = vld [vmem:[%s11962_s2 + $0xba0] ss:$48 sps:$4 sm:$0xff]   ;;  %v7931_v19 = vld [vmem:[%s11962_s2 + $0xba8] ss:$48 sps:$4 sm:$0xff]  }
  0x45   :  { %2511 = vmatprep.mubr.bf16.mxu0 %v9340_v20  ;;  %2593 = vmatprep.mubr.bf16.mxu1 %v9340_v20 }
  0x47   :  { %2482 = vmatpush1.bf16.msra.mxu0 %v7844_v21  ;;  %2564 = vmatpush1.bf16.msra.mxu1 %v7847_v22  ;;  %v7937_v21 = vld [vmem:[%s11962_s2 + $0x14] ss:$48 sps:$4 sm:$0xff]   ;;  %v7940_v22 = vld [vmem:[%s11962_s2 + $0x1c] ss:$48 sps:$4 sm:$0xff]  }
  0x48   :  { %2483 = vmatprep.subr.bf16.mxu0 %v7852_v23  ;;  %2565 = vmatprep.subr.bf16.mxu1 %v7855_v24  ;;  %v9528_v23 = vpack.c.bf16 %v9310_v9, %v9310_v9  ;;  %v7935_v24 = vld [vmem:[%s11962_s2 + $0x10] ss:$48 sps:$4 sm:$0xff]   ;;  %v7946_v9 = vld [vmem:[%s11962_s2 + $0x7c] ss:$48 sps:$4 sm:$0xff]  }
  0x4b   :  { %2484 = vmatpush1.bf16.msra.mxu0 %v7850_v25  ;;  %2566 = vmatpush1.bf16.msra.mxu1 %v7853_v26  ;;  %v7938_v25 = vld [vmem:[%s11962_s2 + $0x18] ss:$48 sps:$4 sm:$0xff]   ;;  %v7943_v26 = vld [vmem:[%s11962_s2 + $0x74] ss:$48 sps:$4 sm:$0xff]  }
  0x4c   :  { %2485 = vmatprep.subr.bf16.mxu0 %v7858_v27  ;;  %2567 = vmatprep.subr.bf16.mxu1 %v7861_v28  ;;  %v7941_v27 = vld [vmem:[%s11962_s2 + $0x70] ss:$48 sps:$4 sm:$0xff]   ;;  %v7944_v28 = vld [vmem:[%s11962_s2 + $0x78] ss:$48 sps:$4 sm:$0xff]  }
  0x4f   :  { %2486 = vmatpush1.bf16.msra.mxu0 %v7856_v29  ;;  %2568 = vmatpush1.bf16.msra.mxu1 %v7859_v30  ;;  %v7949_v29 = vld [vmem:[%s11962_s2 + $0xd4] ss:$48 sps:$4 sm:$0xff]   ;;  %v7952_v30 = vld [vmem:[%s11962_s2 + $0xdc] ss:$48 sps:$4 sm:$0xff]  }
  0x50   :  { %2487 = vmatprep.subr.bf16.mxu0 %v7864_v31  ;;  %2569 = vmatprep.subr.bf16.mxu1 %v7867_v32  ;;  %v7947_v31 = vld [vmem:[%s11962_s2 + $0xd0] ss:$48 sps:$4 sm:$0xff]   ;;  %v7950_v32 = vld [vmem:[%s11962_s2 + $0xd8] ss:$48 sps:$4 sm:$0xff]  }
  0x53   :  { %2488 = vmatpush1.bf16.msra.mxu0 %v7862_v33  ;;  %2570 = vmatpush1.bf16.msra.mxu1 %v7865_v34  ;;  %v7955_v33 = vld [vmem:[%s11962_s2 + $0x134] ss:$48 sps:$4 sm:$0xff]   ;;  %v7958_v34 = vld [vmem:[%s11962_s2 + $0x13c] ss:$48 sps:$4 sm:$0xff]  }
  0x54   :  { %2489 = vmatprep.subr.bf16.mxu0 %v7870_v35  ;;  %2571 = vmatprep.subr.bf16.mxu1 %v7873_v36  ;;  %v7953_v35 = vld [vmem:[%s11962_s2 + $0x130] ss:$48 sps:$4 sm:$0xff]   ;;  %v7956_v36 = vld [vmem:[%s11962_s2 + $0x138] ss:$48 sps:$4 sm:$0xff]  }
  0x57   :  { %2490 = vmatpush1.bf16.msra.mxu0 %v7868_v37  ;;  %2572 = vmatpush1.bf16.msra.mxu1 %v7871_v38  ;;  %v7961_v37 = vld [vmem:[%s11962_s2 + $0x194] ss:$48 sps:$4 sm:$0xff]   ;;  %v7964_v38 = vld [vmem:[%s11962_s2 + $0x19c] ss:$48 sps:$4 sm:$0xff]  }
  0x58   :  { %2491 = vmatprep.subr.bf16.mxu0 %v7876_v39  ;;  %2573 = vmatprep.subr.bf16.mxu1 %v7879_v40  ;;  %v7959_v39 = vld [vmem:[%s11962_s2 + $0x190] ss:$48 sps:$4 sm:$0xff]   ;;  %v7962_v40 = vld [vmem:[%s11962_s2 + $0x198] ss:$48 sps:$4 sm:$0xff]  }
  0x5b   :  { %2492 = vmatpush1.bf16.msra.mxu0 %v7874_v41  ;;  %2574 = vmatpush1.bf16.msra.mxu1 %v7877_v42  ;;  %v7967_v41 = vld [vmem:[%s11962_s2 + $0x1f4] ss:$48 sps:$4 sm:$0xff]   ;;  %v7970_v42 = vld [vmem:[%s11962_s2 + $0x1fc] ss:$48 sps:$4 sm:$0xff]  }
  0x5c   :  { %2493 = vmatprep.subr.bf16.mxu0 %v7882_v44  ;;  %2575 = vmatprep.subr.bf16.mxu1 %v7885_v45  ;;  %v7965_v44 = vld [vmem:[%s11962_s2 + $0x1f0] ss:$48 sps:$4 sm:$0xff]   ;;  %v7968_v45 = vld [vmem:[%s11962_s2 + $0x1f8] ss:$48 sps:$4 sm:$0xff]  }
  0x5f   :  { %2494 = vmatpush1.bf16.msra.mxu0 %v7880_v46  ;;  %2576 = vmatpush1.bf16.msra.mxu1 %v7883_v47  ;;  %v7973_v46 = vld [vmem:[%s11962_s2 + $0x254] ss:$48 sps:$4 sm:$0xff]   ;;  %v7976_v47 = vld [vmem:[%s11962_s2 + $0x25c] ss:$48 sps:$4 sm:$0xff]  }
  0x60   :  { %2495 = vmatprep.subr.bf16.mxu0 %v7888_v48  ;;  %2577 = vmatprep.subr.bf16.mxu1 %v7891_v50  ;;  %v7971_v48 = vld [vmem:[%s11962_s2 + $0x250] ss:$48 sps:$4 sm:$0xff]   ;;  %v7974_v50 = vld [vmem:[%s11962_s2 + $0x258] ss:$48 sps:$4 sm:$0xff]  }
  0x63   :  { %2496 = vmatpush1.bf16.msra.mxu0 %v7886_v51  ;;  %2578 = vmatpush1.bf16.msra.mxu1 %v7889_v52  ;;  %v7979_v51 = vld [vmem:[%s11962_s2 + $0x2b4] ss:$48 sps:$4 sm:$0xff]   ;;  %v7982_v52 = vld [vmem:[%s11962_s2 + $0x2bc] ss:$48 sps:$4 sm:$0xff]  }
  0x64   :  { %2497 = vmatprep.subr.bf16.mxu0 %v7894_v53  ;;  %2579 = vmatprep.subr.bf16.mxu1 %v7897_v54  ;;  %v7977_v53 = vld [vmem:[%s11962_s2 + $0x2b0] ss:$48 sps:$4 sm:$0xff]   ;;  %v7980_v54 = vld [vmem:[%s11962_s2 + $0x2b8] ss:$48 sps:$4 sm:$0xff]  }
  0x67   :  { %2498 = vmatpush1.bf16.msra.mxu0 %v7892_v55  ;;  %2580 = vmatpush1.bf16.msra.mxu1 %v7895_v56  ;;  %v7985_v55 = vld [vmem:[%s11962_s2 + $0x314] ss:$48 sps:$4 sm:$0xff]   ;;  %v7988_v56 = vld [vmem:[%s11962_s2 + $0x31c] ss:$48 sps:$4 sm:$0xff]  }
  0x68   :  { %2499 = vmatprep.subr.bf16.mxu0 %v7900_v57  ;;  %2581 = vmatprep.subr.bf16.mxu1 %v7903_v58  ;;  %v7983_v57 = vld [vmem:[%s11962_s2 + $0x310] ss:$48 sps:$4 sm:$0xff]   ;;  %v7986_v58 = vld [vmem:[%s11962_s2 + $0x318] ss:$48 sps:$4 sm:$0xff]  }
  0x6b   :  { %2500 = vmatpush1.bf16.msra.mxu0 %v7898_v59  ;;  %2582 = vmatpush1.bf16.msra.mxu1 %v7901_v61  ;;  %v7991_v59 = vld [vmem:[%s11962_s2 + $0x374] ss:$48 sps:$4 sm:$0xff]   ;;  %v7994_v61 = vld [vmem:[%s11962_s2 + $0x37c] ss:$48 sps:$4 sm:$0xff]  }
  0x6c   :  { %2501 = vmatprep.subr.bf16.mxu0 %v7906_v62  ;;  %2583 = vmatprep.subr.bf16.mxu1 %v7909_v63  ;;  %v7989_v62 = vld [vmem:[%s11962_s2 + $0x370] ss:$48 sps:$4 sm:$0xff]   ;;  %v7992_v63 = vld [vmem:[%s11962_s2 + $0x378] ss:$48 sps:$4 sm:$0xff]  }
  0x6f   :  { %2502 = vmatpush1.bf16.msra.mxu0 %v7904_v0  ;;  %2584 = vmatpush1.bf16.msra.mxu1 %v7907_v1  ;;  %v7997_v0 = vld [vmem:[%s11962_s2 + $0x3d4] ss:$48 sps:$4 sm:$0xff]   ;;  %v8000_v1 = vld [vmem:[%s11962_s2 + $0x3dc] ss:$48 sps:$4 sm:$0xff]  }
  0x70   :  { %2503 = vmatprep.subr.bf16.mxu0 %v7912_v2  ;;  %2585 = vmatprep.subr.bf16.mxu1 %v7915_v3  ;;  %v7995_v2 = vld [vmem:[%s11962_s2 + $0x3d0] ss:$48 sps:$4 sm:$0xff]   ;;  %v7998_v3 = vld [vmem:[%s11962_s2 + $0x3d8] ss:$48 sps:$4 sm:$0xff]  }
  0x73   :  { %2504 = vmatpush1.bf16.msra.mxu0 %v7910_v4  ;;  %2586 = vmatpush1.bf16.msra.mxu1 %v7913_v5  ;;  %v8003_v4 = vld [vmem:[%s11962_s2 + $0x434] ss:$48 sps:$4 sm:$0xff]   ;;  %v8006_v5 = vld [vmem:[%s11962_s2 + $0x43c] ss:$48 sps:$4 sm:$0xff]  }
  0x74   :  { %2505 = vmatprep.subr.bf16.mxu0 %v7918_v6  ;;  %2587 = vmatprep.subr.bf16.mxu1 %v7921_v7  ;;  %v8001_v6 = vld [vmem:[%s11962_s2 + $0x430] ss:$48 sps:$4 sm:$0xff]   ;;  %v8004_v7 = vld [vmem:[%s11962_s2 + $0x438] ss:$48 sps:$4 sm:$0xff]  }
  0x77   :  { %2506 = vmatpush1.bf16.msra.mxu0 %v7916_v8  ;;  %2588 = vmatpush1.bf16.msra.mxu1 %v7919_v10  ;;  %v8009_v8 = vld [vmem:[%s11962_s2 + $0x494] ss:$48 sps:$4 sm:$0xff]   ;;  %v8012_v10 = vld [vmem:[%s11962_s2 + $0x49c] ss:$48 sps:$4 sm:$0xff]  }
  0x78   :  { %2507 = vmatprep.subr.bf16.mxu0 %v7924_v11  ;;  %2589 = vmatprep.subr.bf16.mxu1 %v7927_v12  ;;  %v8007_v11 = vld [vmem:[%s11962_s2 + $0x490] ss:$48 sps:$4 sm:$0xff]   ;;  %v8010_v12 = vld [vmem:[%s11962_s2 + $0x498] ss:$48 sps:$4 sm:$0xff]  }
  0x7b   :  { %2508 = vmatpush1.bf16.msra.mxu0 %v7922_v13  ;;  %2590 = vmatpush1.bf16.msra.mxu1 %v7925_v14  ;;  %v8015_v13 = vld [vmem:[%s11962_s2 + $0x4f4] ss:$48 sps:$4 sm:$0xff]   ;;  %v8018_v14 = vld [vmem:[%s11962_s2 + $0x4fc] ss:$48 sps:$4 sm:$0xff]  }
  0x7c   :  { %2509 = vmatprep.subr.bf16.mxu0 %v7930_v15  ;;  %2591 = vmatprep.subr.bf16.mxu1 %v7933_v17  ;;  %v8013_v15 = vld [vmem:[%s11962_s2 + $0x4f0] ss:$48 sps:$4 sm:$0xff]   ;;  %v8016_v17 = vld [vmem:[%s11962_s2 + $0x4f8] ss:$48 sps:$4 sm:$0xff]  }
  0x7f   :  { %2510 = vmatpush1.bf16.msra.mxu0 %v7928_v18  ;;  %2592 = vmatpush1.bf16.msra.mxu1 %v7931_v19  ;;  %v8021_v18 = vld [vmem:[%s11962_s2 + $0x554] ss:$48 sps:$4 sm:$0xff]   ;;  %v8024_v19 = vld [vmem:[%s11962_s2 + $0x55c] ss:$48 sps:$4 sm:$0xff]  }
  0x80   :  { %2602 = vmatprep.subr.bf16.mxu0 %v7937_v21  ;;  %2684 = vmatprep.subr.bf16.mxu1 %v7940_v22  ;;  %v8019_v21 = vld [vmem:[%s11962_s2 + $0x550] ss:$48 sps:$4 sm:$0xff]   ;;  %v8022_v22 = vld [vmem:[%s11962_s2 + $0x558] ss:$48 sps:$4 sm:$0xff]  }
  0x82   :  { %2512 = vmatmul.mubr.bf16.vlgmr.msra.gmra.mrb[0].mxu0 %v9528_v23  ;;  %2594 = vmatmul.mubr.bf16.vlgmr.msra.gmra.mrb[0].mxu1 %v9528_v23 }
  0x83   :  { %2603 = vmatpush1.bf16.msra.mxu0 %v7935_v24  ;;  %2685 = vmatpush1.bf16.msra.mxu1 %v7938_v25  ;;  %v8027_v24 = vld [vmem:[%s11962_s2 + $0x5b4] ss:$48 sps:$4 sm:$0xff]   ;;  %v8030_v25 = vld [vmem:[%s11962_s2 + $0x5bc] ss:$48 sps:$4 sm:$0xff]  }
  0x84   :  { %2604 = vmatprep.subr.bf16.mxu0 %v7943_v26  ;;  %2686 = vmatprep.subr.bf16.mxu1 %v7946_v9  ;;  %v8025_v26 = vld [vmem:[%s11962_s2 + $0x5b0] ss:$48 sps:$4 sm:$0xff]   ;;  %v8028_v9 = vld [vmem:[%s11962_s2 + $0x5b8] ss:$48 sps:$4 sm:$0xff]  }
  0x85   :  { %2634 = vmatprep.mubr.bf16.mxu0 %v9272_v60  ;;  %2716 = vmatprep.mubr.bf16.mxu1 %v9272_v60 }
  0x87   :  { %2605 = vmatpush1.bf16.msra.mxu0 %v7941_v27  ;;  %2687 = vmatpush1.bf16.msra.mxu1 %v7944_v28  ;;  %v8033_v27 = vld [vmem:[%s11962_s2 + $0x614] ss:$48 sps:$4 sm:$0xff]   ;;  %v8036_v28 = vld [vmem:[%s11962_s2 + $0x61c] ss:$48 sps:$4 sm:$0xff]  }
  0x88   :  { %2606 = vmatprep.subr.bf16.mxu0 %v7949_v29  ;;  %2688 = vmatprep.subr.bf16.mxu1 %v7952_v30  ;;  %v8031_v29 = vld [vmem:[%s11962_s2 + $0x610] ss:$48 sps:$4 sm:$0xff]   ;;  %v8034_v30 = vld [vmem:[%s11962_s2 + $0x618] ss:$48 sps:$4 sm:$0xff]  }
  0x8b   :  { %2607 = vmatpush1.bf16.msra.mxu0 %v7947_v31  ;;  %2689 = vmatpush1.bf16.msra.mxu1 %v7950_v32  ;;  %v8039_v31 = vld [vmem:[%s11962_s2 + $0x674] ss:$48 sps:$4 sm:$0xff]   ;;  %v8042_v32 = vld [vmem:[%s11962_s2 + $0x67c] ss:$48 sps:$4 sm:$0xff]  }
  0x8c   :  { %2608 = vmatprep.subr.bf16.mxu0 %v7955_v33  ;;  %2690 = vmatprep.subr.bf16.mxu1 %v7958_v34  ;;  %v8037_v33 = vld [vmem:[%s11962_s2 + $0x670] ss:$48 sps:$4 sm:$0xff]   ;;  %v8040_v34 = vld [vmem:[%s11962_s2 + $0x678] ss:$48 sps:$4 sm:$0xff]  }
  0x8f   :  { %2609 = vmatpush1.bf16.msra.mxu0 %v7953_v35  ;;  %2691 = vmatpush1.bf16.msra.mxu1 %v7956_v36  ;;  %v8045_v35 = vld [vmem:[%s11962_s2 + $0x6d4] ss:$48 sps:$4 sm:$0xff]   ;;  %v8048_v36 = vld [vmem:[%s11962_s2 + $0x6dc] ss:$48 sps:$4 sm:$0xff]  }
  0x90   :  { %2610 = vmatprep.subr.bf16.mxu0 %v7961_v37  ;;  %2692 = vmatprep.subr.bf16.mxu1 %v7964_v38  ;;  %v8043_v37 = vld [vmem:[%s11962_s2 + $0x6d0] ss:$48 sps:$4 sm:$0xff]   ;;  %v8046_v38 = vld [vmem:[%s11962_s2 + $0x6d8] ss:$48 sps:$4 sm:$0xff]  }
  0x93   :  { %2611 = vmatpush1.bf16.msra.mxu0 %v7959_v39  ;;  %2693 = vmatpush1.bf16.msra.mxu1 %v7962_v40  ;;  %v8051_v39 = vld [vmem:[%s11962_s2 + $0x734] ss:$48 sps:$4 sm:$0xff]   ;;  %v8054_v40 = vld [vmem:[%s11962_s2 + $0x73c] ss:$48 sps:$4 sm:$0xff]  }
  0x94   :  { %2612 = vmatprep.subr.bf16.mxu0 %v7967_v41  ;;  %2694 = vmatprep.subr.bf16.mxu1 %v7970_v42  ;;  %v8049_v41 = vld [vmem:[%s11962_s2 + $0x730] ss:$48 sps:$4 sm:$0xff]   ;;  %v8052_v42 = vld [vmem:[%s11962_s2 + $0x738] ss:$48 sps:$4 sm:$0xff]  }
  0x97   :  { %2613 = vmatpush1.bf16.msra.mxu0 %v7965_v44  ;;  %2695 = vmatpush1.bf16.msra.mxu1 %v7968_v45  ;;  %v8057_v44 = vld [vmem:[%s11962_s2 + $0x794] ss:$48 sps:$4 sm:$0xff]   ;;  %v8060_v45 = vld [vmem:[%s11962_s2 + $0x79c] ss:$48 sps:$4 sm:$0xff]  }
  0x98   :  { %2614 = vmatprep.subr.bf16.mxu0 %v7973_v46  ;;  %2696 = vmatprep.subr.bf16.mxu1 %v7976_v47  ;;  %v8055_v46 = vld [vmem:[%s11962_s2 + $0x790] ss:$48 sps:$4 sm:$0xff]   ;;  %v8058_v47 = vld [vmem:[%s11962_s2 + $0x798] ss:$48 sps:$4 sm:$0xff]  }
  0x9b   :  { %2615 = vmatpush1.bf16.msra.mxu0 %v7971_v48  ;;  %2697 = vmatpush1.bf16.msra.mxu1 %v7974_v50  ;;  %v8063_v48 = vld [vmem:[%s11962_s2 + $0x7f4] ss:$48 sps:$4 sm:$0xff]   ;;  %v8066_v50 = vld [vmem:[%s11962_s2 + $0x7fc] ss:$48 sps:$4 sm:$0xff]  }
  0x9c   :  { %2616 = vmatprep.subr.bf16.mxu0 %v7979_v51  ;;  %2698 = vmatprep.subr.bf16.mxu1 %v7982_v52  ;;  %v8061_v51 = vld [vmem:[%s11962_s2 + $0x7f0] ss:$48 sps:$4 sm:$0xff]   ;;  %v8064_v52 = vld [vmem:[%s11962_s2 + $0x7f8] ss:$48 sps:$4 sm:$0xff]  }
  0x9f   :  { %2617 = vmatpush1.bf16.msra.mxu0 %v7977_v53  ;;  %2699 = vmatpush1.bf16.msra.mxu1 %v7980_v54  ;;  %v8069_v53 = vld [vmem:[%s11962_s2 + $0x854] ss:$48 sps:$4 sm:$0xff]   ;;  %v8072_v54 = vld [vmem:[%s11962_s2 + $0x85c] ss:$48 sps:$4 sm:$0xff]  }
  0xa0   :  { %2618 = vmatprep.subr.bf16.mxu0 %v7985_v55  ;;  %2700 = vmatprep.subr.bf16.mxu1 %v7988_v56  ;;  %v8067_v55 = vld [vmem:[%s11962_s2 + $0x850] ss:$48 sps:$4 sm:$0xff]   ;;  %v8070_v56 = vld [vmem:[%s11962_s2 + $0x858] ss:$48 sps:$4 sm:$0xff]  }
  0xa3   :  { %2619 = vmatpush1.bf16.msra.mxu0 %v7983_v57  ;;  %2701 = vmatpush1.bf16.msra.mxu1 %v7986_v58  ;;  %v8075_v57 = vld [vmem:[%s11962_s2 + $0x8b4] ss:$48 sps:$4 sm:$0xff]   ;;  %v8078_v58 = vld [vmem:[%s11962_s2 + $0x8bc] ss:$48 sps:$4 sm:$0xff]  }
  0xa4   :  { %2620 = vmatprep.subr.bf16.mxu0 %v7991_v59  ;;  %2702 = vmatprep.subr.bf16.mxu1 %v7994_v61  ;;  %v8073_v59 = vld [vmem:[%s11962_s2 + $0x8b0] ss:$48 sps:$4 sm:$0xff]   ;;  %v8076_v61 = vld [vmem:[%s11962_s2 + $0x8b8] ss:$48 sps:$4 sm:$0xff]  }
  0xa7   :  { %2621 = vmatpush1.bf16.msra.mxu0 %v7989_v62  ;;  %2703 = vmatpush1.bf16.msra.mxu1 %v7992_v63  ;;  %v8081_v62 = vld [vmem:[%s11962_s2 + $0x914] ss:$48 sps:$4 sm:$0xff]   ;;  %v8084_v63 = vld [vmem:[%s11962_s2 + $0x91c] ss:$48 sps:$4 sm:$0xff]  }
  0xa8   :  { %2622 = vmatprep.subr.bf16.mxu0 %v7997_v0  ;;  %2704 = vmatprep.subr.bf16.mxu1 %v8000_v1  ;;  %v8079_v0 = vld [vmem:[%s11962_s2 + $0x910] ss:$48 sps:$4 sm:$0xff]   ;;  %v8082_v1 = vld [vmem:[%s11962_s2 + $0x918] ss:$48 sps:$4 sm:$0xff]  }
  0xab   :  { %2623 = vmatpush1.bf16.msra.mxu0 %v7995_v2  ;;  %2705 = vmatpush1.bf16.msra.mxu1 %v7998_v3  ;;  %v8087_v2 = vld [vmem:[%s11962_s2 + $0x974] ss:$48 sps:$4 sm:$0xff]   ;;  %v8090_v3 = vld [vmem:[%s11962_s2 + $0x97c] ss:$48 sps:$4 sm:$0xff]  }
  0xac   :  { %2624 = vmatprep.subr.bf16.mxu0 %v8003_v4  ;;  %2706 = vmatprep.subr.bf16.mxu1 %v8006_v5  ;;  %v8085_v4 = vld [vmem:[%s11962_s2 + $0x970] ss:$48 sps:$4 sm:$0xff]   ;;  %v8088_v5 = vld [vmem:[%s11962_s2 + $0x978] ss:$48 sps:$4 sm:$0xff]  }
  0xaf   :  { %2625 = vmatpush1.bf16.msra.mxu0 %v8001_v6  ;;  %2707 = vmatpush1.bf16.msra.mxu1 %v8004_v7  ;;  %v8093_v6 = vld [vmem:[%s11962_s2 + $0x9d4] ss:$48 sps:$4 sm:$0xff]   ;;  %v8096_v7 = vld [vmem:[%s11962_s2 + $0x9dc] ss:$48 sps:$4 sm:$0xff]  }
  0xb0   :  { %2626 = vmatprep.subr.bf16.mxu0 %v8009_v8  ;;  %2708 = vmatprep.subr.bf16.mxu1 %v8012_v10  ;;  %v8091_v8 = vld [vmem:[%s11962_s2 + $0x9d0] ss:$48 sps:$4 sm:$0xff]   ;;  %v8094_v10 = vld [vmem:[%s11962_s2 + $0x9d8] ss:$48 sps:$4 sm:$0xff]  }
  0xb3   :  { %2627 = vmatpush1.bf16.msra.mxu0 %v8007_v11  ;;  %2709 = vmatpush1.bf16.msra.mxu1 %v8010_v12  ;;  %v8099_v11 = vld [vmem:[%s11962_s2 + $0xa34] ss:$48 sps:$4 sm:$0xff]   ;;  %v8102_v12 = vld [vmem:[%s11962_s2 + $0xa3c] ss:$48 sps:$4 sm:$0xff]  }
  0xb4   :  { %2628 = vmatprep.subr.bf16.mxu0 %v8015_v13  ;;  %2710 = vmatprep.subr.bf16.mxu1 %v8018_v14  ;;  %v8097_v13 = vld [vmem:[%s11962_s2 + $0xa30] ss:$48 sps:$4 sm:$0xff]   ;;  %v8100_v14 = vld [vmem:[%s11962_s2 + $0xa38] ss:$48 sps:$4 sm:$0xff]  }
  0xb7   :  { %2629 = vmatpush1.bf16.msra.mxu0 %v8013_v15  ;;  %2711 = vmatpush1.bf16.msra.mxu1 %v8016_v17  ;;  %v8105_v15 = vld [vmem:[%s11962_s2 + $0xa94] ss:$48 sps:$4 sm:$0xff]   ;;  %v8108_v17 = vld [vmem:[%s11962_s2 + $0xa9c] ss:$48 sps:$4 sm:$0xff]  }
  0xb8   :  { %2630 = vmatprep.subr.bf16.mxu0 %v8021_v18  ;;  %2712 = vmatprep.subr.bf16.mxu1 %v8024_v19  ;;  %v8103_v18 = vld [vmem:[%s11962_s2 + $0xa90] ss:$48 sps:$4 sm:$0xff]   ;;  %v8106_v19 = vld [vmem:[%s11962_s2 + $0xa98] ss:$48 sps:$4 sm:$0xff]  }
  0xbb   :  { %2631 = vmatpush1.bf16.msra.mxu0 %v8019_v21  ;;  %2713 = vmatpush1.bf16.msra.mxu1 %v8022_v22  ;;  %v8111_v21 = vld [vmem:[%s11962_s2 + $0xaf4] ss:$48 sps:$4 sm:$0xff]   ;;  %v8114_v22 = vld [vmem:[%s11962_s2 + $0xafc] ss:$48 sps:$4 sm:$0xff]  }
  0xbc   :  { %2632 = vmatprep.subr.bf16.mxu0 %v8027_v24  ;;  %2714 = vmatprep.subr.bf16.mxu1 %v8030_v25  ;;  %v8109_v24 = vld [vmem:[%s11962_s2 + $0xaf0] ss:$48 sps:$4 sm:$0xff]   ;;  %v8112_v25 = vld [vmem:[%s11962_s2 + $0xaf8] ss:$48 sps:$4 sm:$0xff]  }
  0xbf   :  { %2633 = vmatpush1.bf16.msra.mxu0 %v8025_v26  ;;  %2715 = vmatpush1.bf16.msra.mxu1 %v8028_v9  ;;  %v8117_v26 = vld [vmem:[%s11962_s2 + $0xb54] ss:$48 sps:$4 sm:$0xff]   ;;  %v8120_v9 = vld [vmem:[%s11962_s2 + $0xb5c] ss:$48 sps:$4 sm:$0xff]  }
  0xc0   :  { %2643 = vmatprep.subr.bf16.mxu0 %v8033_v27  ;;  %2725 = vmatprep.subr.bf16.mxu1 %v8036_v28  ;;  %v8115_v27 = vld [vmem:[%s11962_s2 + $0xb50] ss:$48 sps:$4 sm:$0xff]   ;;  %v8118_v28 = vld [vmem:[%s11962_s2 + $0xb58] ss:$48 sps:$4 sm:$0xff]  }
  0xc2   :  { %2635 = vmatmul.mubr.bf16.vlgmr.msra.gmra.mrb[4].mxu0 %v9329_v16  ;;  %2717 = vmatmul.mubr.bf16.vlgmr.msra.gmra.mrb[4].mxu1 %v9329_v16 }
  0xc3   :  { %2644 = vmatpush1.bf16.msra.mxu0 %v8031_v29  ;;  %2726 = vmatpush1.bf16.msra.mxu1 %v8034_v30  ;;  %v8123_v29 = vld [vmem:[%s11962_s2 + $0xbb4] ss:$48 sps:$4 sm:$0xff]   ;;  %v8126_v30 = vld [vmem:[%s11962_s2 + $0xbbc] ss:$48 sps:$4 sm:$0xff]  }
  0xc4   :  { %2645 = vmatprep.subr.bf16.mxu0 %v8039_v31  ;;  %2727 = vmatprep.subr.bf16.mxu1 %v8042_v32  ;;  %v8121_v31 = vld [vmem:[%s11962_s2 + $0xbb0] ss:$48 sps:$4 sm:$0xff]   ;;  %v8124_v32 = vld [vmem:[%s11962_s2 + $0xbb8] ss:$48 sps:$4 sm:$0xff]  }
  0xc5   :  { %2675 = vmatprep.mubr.bf16.mxu0 %v9340_v20  ;;  %2757 = vmatprep.mubr.bf16.mxu1 %v9340_v20 }
  0xc7   :  { %2646 = vmatpush1.bf16.msra.mxu0 %v8037_v33  ;;  %2728 = vmatpush1.bf16.msra.mxu1 %v8040_v34  ;;  %v8129_v33 = vld [vmem:[%s11962_s2 + $0x24] ss:$48 sps:$4 sm:$0xff]   ;;  %v8132_v34 = vld [vmem:[%s11962_s2 + $0x2c] ss:$48 sps:$4 sm:$0xff]  }
  0xc8   :  { %2647 = vmatprep.subr.bf16.mxu0 %v8045_v35  ;;  %2729 = vmatprep.subr.bf16.mxu1 %v8048_v36  ;;  %v8127_v35 = vld [vmem:[%s11962_s2 + $0x20] ss:$48 sps:$4 sm:$0xff]   ;;  %v8130_v36 = vld [vmem:[%s11962_s2 + $0x28] ss:$48 sps:$4 sm:$0xff]  }
  0xcb   :  { %2648 = vmatpush1.bf16.msra.mxu0 %v8043_v37  ;;  %2730 = vmatpush1.bf16.msra.mxu1 %v8046_v38  ;;  %v8135_v37 = vld [vmem:[%s11962_s2 + $0x84] ss:$48 sps:$4 sm:$0xff]   ;;  %v8138_v38 = vld [vmem:[%s11962_s2 + $0x8c] ss:$48 sps:$4 sm:$0xff]  }
  0xcc   :  { %2649 = vmatprep.subr.bf16.mxu0 %v8051_v39  ;;  %2731 = vmatprep.subr.bf16.mxu1 %v8054_v40  ;;  %v8133_v39 = vld [vmem:[%s11962_s2 + $0x80] ss:$48 sps:$4 sm:$0xff]   ;;  %v8136_v40 = vld [vmem:[%s11962_s2 + $0x88] ss:$48 sps:$4 sm:$0xff]  }
  0xcf   :  { %2650 = vmatpush1.bf16.msra.mxu0 %v8049_v41  ;;  %2732 = vmatpush1.bf16.msra.mxu1 %v8052_v42  ;;  %v8141_v41 = vld [vmem:[%s11962_s2 + $0xe4] ss:$48 sps:$4 sm:$0xff]   ;;  %v8144_v42 = vld [vmem:[%s11962_s2 + $0xec] ss:$48 sps:$4 sm:$0xff]  }
  0xd0   :  { %2651 = vmatprep.subr.bf16.mxu0 %v8057_v44  ;;  %2733 = vmatprep.subr.bf16.mxu1 %v8060_v45  ;;  %v8139_v44 = vld [vmem:[%s11962_s2 + $0xe0] ss:$48 sps:$4 sm:$0xff]   ;;  %v8142_v45 = vld [vmem:[%s11962_s2 + $0xe8] ss:$48 sps:$4 sm:$0xff]  }
  0xd3   :  { %2652 = vmatpush1.bf16.msra.mxu0 %v8055_v46  ;;  %2734 = vmatpush1.bf16.msra.mxu1 %v8058_v47  ;;  %v8147_v46 = vld [vmem:[%s11962_s2 + $0x144] ss:$48 sps:$4 sm:$0xff]   ;;  %v8150_v47 = vld [vmem:[%s11962_s2 + $0x14c] ss:$48 sps:$4 sm:$0xff]  }
  0xd4   :  { %2653 = vmatprep.subr.bf16.mxu0 %v8063_v48  ;;  %2735 = vmatprep.subr.bf16.mxu1 %v8066_v50  ;;  %v8145_v48 = vld [vmem:[%s11962_s2 + $0x140] ss:$48 sps:$4 sm:$0xff]   ;;  %v8153_v50 = vld [vmem:[%s11962_s2 + $0x1a4] ss:$48 sps:$4 sm:$0xff]  }
  0xd7   :  { %2654 = vmatpush1.bf16.msra.mxu0 %v8061_v51  ;;  %2736 = vmatpush1.bf16.msra.mxu1 %v8064_v52  ;;  %v8156_v51 = vld [vmem:[%s11962_s2 + $0x1ac] ss:$48 sps:$4 sm:$0xff]   ;;  %v8151_v52 = vld [vmem:[%s11962_s2 + $0x1a0] ss:$48 sps:$4 sm:$0xff]  }
  0xd8   :  { %2655 = vmatprep.subr.bf16.mxu0 %v8069_v53  ;;  %2737 = vmatprep.subr.bf16.mxu1 %v8072_v54  ;;  %v8154_v53 = vld [vmem:[%s11962_s2 + $0x1a8] ss:$48 sps:$4 sm:$0xff]   ;;  %v8159_v54 = vld [vmem:[%s11962_s2 + $0x204] ss:$48 sps:$4 sm:$0xff]  }
  0xdb   :  { %2656 = vmatpush1.bf16.msra.mxu0 %v8067_v55  ;;  %2738 = vmatpush1.bf16.msra.mxu1 %v8070_v56  ;;  %v8162_v55 = vld [vmem:[%s11962_s2 + $0x20c] ss:$48 sps:$4 sm:$0xff]   ;;  %v8157_v56 = vld [vmem:[%s11962_s2 + $0x200] ss:$48 sps:$4 sm:$0xff]  }
  0xdc   :  { %2657 = vmatprep.subr.bf16.mxu0 %v8075_v57  ;;  %2739 = vmatprep.subr.bf16.mxu1 %v8078_v58  ;;  %v8160_v57 = vld [vmem:[%s11962_s2 + $0x208] ss:$48 sps:$4 sm:$0xff]   ;;  %v8165_v58 = vld [vmem:[%s11962_s2 + $0x264] ss:$48 sps:$4 sm:$0xff]  }
  0xdf   :  { %2658 = vmatpush1.bf16.msra.mxu0 %v8073_v59  ;;  %2740 = vmatpush1.bf16.msra.mxu1 %v8076_v61  ;;  %v8168_v59 = vld [vmem:[%s11962_s2 + $0x26c] ss:$48 sps:$4 sm:$0xff]   ;;  %v8163_v61 = vld [vmem:[%s11962_s2 + $0x260] ss:$48 sps:$4 sm:$0xff]  }
  0xe0   :  { %2659 = vmatprep.subr.bf16.mxu0 %v8081_v62  ;;  %2741 = vmatprep.subr.bf16.mxu1 %v8084_v63  ;;  %v8166_v62 = vld [vmem:[%s11962_s2 + $0x268] ss:$48 sps:$4 sm:$0xff]   ;;  %v8171_v63 = vld [vmem:[%s11962_s2 + $0x2c4] ss:$48 sps:$4 sm:$0xff]  }
  0xe3   :  { %2660 = vmatpush1.bf16.msra.mxu0 %v8079_v0  ;;  %2742 = vmatpush1.bf16.msra.mxu1 %v8082_v1  ;;  %v8174_v0 = vld [vmem:[%s11962_s2 + $0x2cc] ss:$48 sps:$4 sm:$0xff]   ;;  %v8169_v1 = vld [vmem:[%s11962_s2 + $0x2c0] ss:$48 sps:$4 sm:$0xff]  }
  0xe4   :  { %2661 = vmatprep.subr.bf16.mxu0 %v8087_v2  ;;  %2743 = vmatprep.subr.bf16.mxu1 %v8090_v3  ;;  %v8172_v2 = vld [vmem:[%s11962_s2 + $0x2c8] ss:$48 sps:$4 sm:$0xff]   ;;  %v8177_v3 = vld [vmem:[%s11962_s2 + $0x324] ss:$48 sps:$4 sm:$0xff]  }
  0xe7   :  { %2662 = vmatpush1.bf16.msra.mxu0 %v8085_v4  ;;  %2744 = vmatpush1.bf16.msra.mxu1 %v8088_v5  ;;  %v8180_v4 = vld [vmem:[%s11962_s2 + $0x32c] ss:$48 sps:$4 sm:$0xff]   ;;  %v8175_v5 = vld [vmem:[%s11962_s2 + $0x320] ss:$48 sps:$4 sm:$0xff]  }
  0xe8   :  { %2663 = vmatprep.subr.bf16.mxu0 %v8093_v6  ;;  %2745 = vmatprep.subr.bf16.mxu1 %v8096_v7  ;;  %v8178_v6 = vld [vmem:[%s11962_s2 + $0x328] ss:$48 sps:$4 sm:$0xff]   ;;  %v8183_v7 = vld [vmem:[%s11962_s2 + $0x384] ss:$48 sps:$4 sm:$0xff]  }
  0xeb   :  { %2664 = vmatpush1.bf16.msra.mxu0 %v8091_v8  ;;  %2746 = vmatpush1.bf16.msra.mxu1 %v8094_v10  ;;  %v8186_v8 = vld [vmem:[%s11962_s2 + $0x38c] ss:$48 sps:$4 sm:$0xff]   ;;  %v8181_v10 = vld [vmem:[%s11962_s2 + $0x380] ss:$48 sps:$4 sm:$0xff]  }
  0xec   :  { %2665 = vmatprep.subr.bf16.mxu0 %v8099_v11  ;;  %2747 = vmatprep.subr.bf16.mxu1 %v8102_v12  ;;  %v8184_v11 = vld [vmem:[%s11962_s2 + $0x388] ss:$48 sps:$4 sm:$0xff]   ;;  %v8189_v12 = vld [vmem:[%s11962_s2 + $0x3e4] ss:$48 sps:$4 sm:$0xff]  }
  0xef   :  { %2666 = vmatpush1.bf16.msra.mxu0 %v8097_v13  ;;  %2748 = vmatpush1.bf16.msra.mxu1 %v8100_v14  ;;  %v8192_v13 = vld [vmem:[%s11962_s2 + $0x3ec] ss:$48 sps:$4 sm:$0xff]   ;;  %v8187_v14 = vld [vmem:[%s11962_s2 + $0x3e0] ss:$48 sps:$4 sm:$0xff]  }
  0xf0   :  { %2667 = vmatprep.subr.bf16.mxu0 %v8105_v15  ;;  %2749 = vmatprep.subr.bf16.mxu1 %v8108_v17  ;;  %v8190_v15 = vld [vmem:[%s11962_s2 + $0x3e8] ss:$48 sps:$4 sm:$0xff]   ;;  %v8195_v17 = vld [vmem:[%s11962_s2 + $0x444] ss:$48 sps:$4 sm:$0xff]  }
  0xf3   :  { %2668 = vmatpush1.bf16.msra.mxu0 %v8103_v18  ;;  %2750 = vmatpush1.bf16.msra.mxu1 %v8106_v19  ;;  %v8198_v18 = vld [vmem:[%s11962_s2 + $0x44c] ss:$48 sps:$4 sm:$0xff]   ;;  %v8193_v19 = vld [vmem:[%s11962_s2 + $0x440] ss:$48 sps:$4 sm:$0xff]  }
  0xf4   :  { %2669 = vmatprep.subr.bf16.mxu0 %v8111_v21  ;;  %2751 = vmatprep.subr.bf16.mxu1 %v8114_v22  ;;  %v8196_v21 = vld [vmem:[%s11962_s2 + $0x448] ss:$48 sps:$4 sm:$0xff]   ;;  %v8201_v22 = vld [vmem:[%s11962_s2 + $0x4a4] ss:$48 sps:$4 sm:$0xff]  }
  0xf7   :  { %2670 = vmatpush1.bf16.msra.mxu0 %v8109_v24  ;;  %2752 = vmatpush1.bf16.msra.mxu1 %v8112_v25  ;;  %v8204_v24 = vld [vmem:[%s11962_s2 + $0x4ac] ss:$48 sps:$4 sm:$0xff]   ;;  %v8199_v25 = vld [vmem:[%s11962_s2 + $0x4a0] ss:$48 sps:$4 sm:$0xff]  }
  0xf8   :  { %2671 = vmatprep.subr.bf16.mxu0 %v8117_v26  ;;  %2753 = vmatprep.subr.bf16.mxu1 %v8120_v9  ;;  %v8202_v26 = vld [vmem:[%s11962_s2 + $0x4a8] ss:$48 sps:$4 sm:$0xff]   ;;  %v8207_v9 = vld [vmem:[%s11962_s2 + $0x504] ss:$48 sps:$4 sm:$0xff]  }
  0xfb   :  { %2672 = vmatpush1.bf16.msra.mxu0 %v8115_v27  ;;  %2754 = vmatpush1.bf16.msra.mxu1 %v8118_v28  ;;  %v8210_v27 = vld [vmem:[%s11962_s2 + $0x50c] ss:$48 sps:$4 sm:$0xff]   ;;  %v8205_v28 = vld [vmem:[%s11962_s2 + $0x500] ss:$48 sps:$4 sm:$0xff]  }
  0xfc   :  { %2673 = vmatprep.subr.bf16.mxu0 %v8123_v29  ;;  %2755 = vmatprep.subr.bf16.mxu1 %v8126_v30  ;;  %v8208_v29 = vld [vmem:[%s11962_s2 + $0x508] ss:$48 sps:$4 sm:$0xff]   ;;  %v8213_v30 = vld [vmem:[%s11962_s2 + $0x564] ss:$48 sps:$4 sm:$0xff]  }
  0xff   :  { %2674 = vmatpush1.bf16.msra.mxu0 %v8121_v31  ;;  %2756 = vmatpush1.bf16.msra.mxu1 %v8124_v32  ;;  %v8216_v31 = vld [vmem:[%s11962_s2 + $0x56c] ss:$48 sps:$4 sm:$0xff]   ;;  %v8211_v32 = vld [vmem:[%s11962_s2 + $0x560] ss:$48 sps:$4 sm:$0xff]  }
 0x100   :  { %2766 = vmatprep.subr.bf16.mxu0 %v8129_v33  ;;  %2848 = vmatprep.subr.bf16.mxu1 %v8132_v34  ;;  %v8214_v33 = vld [vmem:[%s11962_s2 + $0x568] ss:$48 sps:$4 sm:$0xff]   ;;  %v8219_v34 = vld [vmem:[%s11962_s2 + $0x5c4] ss:$48 sps:$4 sm:$0xff]  }
 0x102   :  { %2676 = vmatmul.mubr.bf16.vlgmr.msra.gmra.mrb[4].mxu0 %v9528_v23  ;;  %2758 = vmatmul.mubr.bf16.vlgmr.msra.gmra.mrb[4].mxu1 %v9528_v23 }
 0x103   :  { %2767 = vmatpush1.bf16.msra.mxu0 %v8127_v35  ;;  %2849 = vmatpush1.bf16.msra.mxu1 %v8130_v36  ;;  %v8222_v35 = vld [vmem:[%s11962_s2 + $0x5cc] ss:$48 sps:$4 sm:$0xff]   ;;  %v8217_v36 = vld [vmem:[%s11962_s2 + $0x5c0] ss:$48 sps:$4 sm:$0xff]  }
 0x104   :  { %2768 = vmatprep.subr.bf16.mxu0 %v8135_v37  ;;  %2850 = vmatprep.subr.bf16.mxu1 %v8138_v38  ;;  %v8220_v37 = vld [vmem:[%s11962_s2 + $0x5c8] ss:$48 sps:$4 sm:$0xff]   ;;  %v8225_v38 = vld [vmem:[%s11962_s2 + $0x624] ss:$48 sps:$4 sm:$0xff]  }
 0x105   :  { %2798 = vmatprep.mubr.bf16.mxu0 %v9272_v60  ;;  %2880 = vmatprep.mubr.bf16.mxu1 %v9272_v60  ;;  %v8148_v60 = vld [vmem:[%s11962_s2 + $0x148] ss:$48 sps:$4 sm:$0xff]  }
 0x107   :  { %2769 = vmatpush1.bf16.msra.mxu0 %v8133_v39  ;;  %2851 = vmatpush1.bf16.msra.mxu1 %v8136_v40  ;;  %v8228_v39 = vld [vmem:[%s11962_s2 + $0x62c] ss:$48 sps:$4 sm:$0xff]   ;;  %v8223_v40 = vld [vmem:[%s11962_s2 + $0x620] ss:$48 sps:$4 sm:$0xff]  }
 0x108   :  { %2770 = vmatprep.subr.bf16.mxu0 %v8141_v41  ;;  %2852 = vmatprep.subr.bf16.mxu1 %v8144_v42  ;;  %v8226_v41 = vld [vmem:[%s11962_s2 + $0x628] ss:$48 sps:$4 sm:$0xff]   ;;  %v8231_v42 = vld [vmem:[%s11962_s2 + $0x684] ss:$48 sps:$4 sm:$0xff]  }
 0x10b   :  { %2771 = vmatpush1.bf16.msra.mxu0 %v8139_v44  ;;  %2853 = vmatpush1.bf16.msra.mxu1 %v8142_v45  ;;  %v8234_v44 = vld [vmem:[%s11962_s2 + $0x68c] ss:$48 sps:$4 sm:$0xff]   ;;  %v8229_v45 = vld [vmem:[%s11962_s2 + $0x680] ss:$48 sps:$4 sm:$0xff]  }
 0x10c   :  { %2772 = vmatprep.subr.bf16.mxu0 %v8147_v46  ;;  %2854 = vmatprep.subr.bf16.mxu1 %v8150_v47  ;;  %v8232_v46 = vld [vmem:[%s11962_s2 + $0x688] ss:$48 sps:$4 sm:$0xff]   ;;  %v8237_v47 = vld [vmem:[%s11962_s2 + $0x6e4] ss:$48 sps:$4 sm:$0xff]  }
 0x10f   :  { %2773 = vmatpush1.bf16.msra.mxu0 %v8145_v48  ;;  %2855 = vmatpush1.bf16.msra.mxu1 %v8148_v60  ;;  %v8240_v48 = vld [vmem:[%s11962_s2 + $0x6ec] ss:$48 sps:$4 sm:$0xff]   ;;  %v8235_v60 = vld [vmem:[%s11962_s2 + $0x6e0] ss:$48 sps:$4 sm:$0xff]  }
 0x110   :  { %2774 = vmatprep.subr.bf16.mxu0 %v8153_v50  ;;  %2856 = vmatprep.subr.bf16.mxu1 %v8156_v51  ;;  %v8243_v50 = vld [vmem:[%s11962_s2 + $0x744] ss:$48 sps:$4 sm:$0xff]   ;;  %v8246_v51 = vld [vmem:[%s11962_s2 + $0x74c] ss:$48 sps:$4 sm:$0xff]  }
 0x113   :  { %2775 = vmatpush1.bf16.msra.mxu0 %v8151_v52  ;;  %2857 = vmatpush1.bf16.msra.mxu1 %v8154_v53  ;;  %v8241_v52 = vld [vmem:[%s11962_s2 + $0x740] ss:$48 sps:$4 sm:$0xff]   ;;  %v8249_v53 = vld [vmem:[%s11962_s2 + $0x7a4] ss:$48 sps:$4 sm:$0xff]  }
 0x114   :  { %2776 = vmatprep.subr.bf16.mxu0 %v8159_v54  ;;  %2858 = vmatprep.subr.bf16.mxu1 %v8162_v55  ;;  %v8252_v54 = vld [vmem:[%s11962_s2 + $0x7ac] ss:$48 sps:$4 sm:$0xff]   ;;  %v8247_v55 = vld [vmem:[%s11962_s2 + $0x7a0] ss:$48 sps:$4 sm:$0xff]  }
 0x117   :  { %2777 = vmatpush1.bf16.msra.mxu0 %v8157_v56  ;;  %2859 = vmatpush1.bf16.msra.mxu1 %v8160_v57  ;;  %v8250_v56 = vld [vmem:[%s11962_s2 + $0x7a8] ss:$48 sps:$4 sm:$0xff]   ;;  %v8255_v57 = vld [vmem:[%s11962_s2 + $0x804] ss:$48 sps:$4 sm:$0xff]  }
 0x118   :  { %2778 = vmatprep.subr.bf16.mxu0 %v8165_v58  ;;  %2860 = vmatprep.subr.bf16.mxu1 %v8168_v59  ;;  %v8258_v58 = vld [vmem:[%s11962_s2 + $0x80c] ss:$48 sps:$4 sm:$0xff]   ;;  %v8253_v59 = vld [vmem:[%s11962_s2 + $0x800] ss:$48 sps:$4 sm:$0xff]  }
 0x11b   :  { %2779 = vmatpush1.bf16.msra.mxu0 %v8163_v61  ;;  %2861 = vmatpush1.bf16.msra.mxu1 %v8166_v62  ;;  %v8256_v61 = vld [vmem:[%s11962_s2 + $0x808] ss:$48 sps:$4 sm:$0xff]   ;;  %v8261_v62 = vld [vmem:[%s11962_s2 + $0x864] ss:$48 sps:$4 sm:$0xff]  }
 0x11c   :  { %2780 = vmatprep.subr.bf16.mxu0 %v8171_v63  ;;  %2862 = vmatprep.subr.bf16.mxu1 %v8174_v0  ;;  %v8264_v63 = vld [vmem:[%s11962_s2 + $0x86c] ss:$48 sps:$4 sm:$0xff]  }
 0x11f   :  { %2781 = vmatpush1.bf16.msra.mxu0 %v8169_v1  ;;  %2863 = vmatpush1.bf16.msra.mxu1 %v8172_v2  ;;  %v8259_v2 = vld [vmem:[%s11962_s2 + $0x860] ss:$48 sps:$4 sm:$0xff]  }
 0x120   :  { %2782 = vmatprep.subr.bf16.mxu0 %v8177_v3  ;;  %2864 = vmatprep.subr.bf16.mxu1 %v8180_v4 }
 0x123   :  { %2783 = vmatpush1.bf16.msra.mxu0 %v8175_v5  ;;  %2865 = vmatpush1.bf16.msra.mxu1 %v8178_v6 }
 0x124   :  { %2784 = vmatprep.subr.bf16.mxu0 %v8183_v7  ;;  %2866 = vmatprep.subr.bf16.mxu1 %v8186_v8  ;;  %v8262_v7 = vld [vmem:[%s11962_s2 + $0x868] ss:$48 sps:$4 sm:$0xff]   ;;  %v8267_v8 = vld [vmem:[%s11962_s2 + $0x8c4] ss:$48 sps:$4 sm:$0xff]  }
 0x127   :  { %2785 = vmatpush1.bf16.msra.mxu0 %v8181_v10  ;;  %2867 = vmatpush1.bf16.msra.mxu1 %v8184_v11  ;;  %v8265_v10 = vld [vmem:[%s11962_s2 + $0x8c0] ss:$48 sps:$4 sm:$0xff]   ;;  %v8270_v11 = vld [vmem:[%s11962_s2 + $0x8cc] ss:$48 sps:$4 sm:$0xff]  }
 0x128   :  { %2786 = vmatprep.subr.bf16.mxu0 %v8189_v12  ;;  %2868 = vmatprep.subr.bf16.mxu1 %v8192_v13 }
 0x12b   :  { %2787 = vmatpush1.bf16.msra.mxu0 %v8187_v14  ;;  %2869 = vmatpush1.bf16.msra.mxu1 %v8190_v15  ;;  %v8268_v14 = vld [vmem:[%s11962_s2 + $0x8c8] ss:$48 sps:$4 sm:$0xff]   ;;  %v8273_v15 = vld [vmem:[%s11962_s2 + $0x924] ss:$48 sps:$4 sm:$0xff]  }
 0x12c   :  { %2788 = vmatprep.subr.bf16.mxu0 %v8195_v17  ;;  %2870 = vmatprep.subr.bf16.mxu1 %v8198_v18  ;;  %v8276_v17 = vld [vmem:[%s11962_s2 + $0x92c] ss:$48 sps:$4 sm:$0xff]   ;;  %v8271_v18 = vld [vmem:[%s11962_s2 + $0x920] ss:$48 sps:$4 sm:$0xff]  }
 0x12f   :  { %2789 = vmatpush1.bf16.msra.mxu0 %v8193_v19  ;;  %2871 = vmatpush1.bf16.msra.mxu1 %v8196_v21  ;;  %v8274_v19 = vld [vmem:[%s11962_s2 + $0x928] ss:$48 sps:$4 sm:$0xff]   ;;  %v8279_v21 = vld [vmem:[%s11962_s2 + $0x984] ss:$48 sps:$4 sm:$0xff]  }
 0x130   :  { %2790 = vmatprep.subr.bf16.mxu0 %v8201_v22  ;;  %2872 = vmatprep.subr.bf16.mxu1 %v8204_v24  ;;  %v8282_v22 = vld [vmem:[%s11962_s2 + $0x98c] ss:$48 sps:$4 sm:$0xff]   ;;  %v8277_v24 = vld [vmem:[%s11962_s2 + $0x980] ss:$48 sps:$4 sm:$0xff]  }
 0x133   :  { %2791 = vmatpush1.bf16.msra.mxu0 %v8199_v25  ;;  %2873 = vmatpush1.bf16.msra.mxu1 %v8202_v26  ;;  %v8280_v25 = vld [vmem:[%s11962_s2 + $0x988] ss:$48 sps:$4 sm:$0xff]   ;;  %v8285_v26 = vld [vmem:[%s11962_s2 + $0x9e4] ss:$48 sps:$4 sm:$0xff]  }
 0x134   :  { %2792 = vmatprep.subr.bf16.mxu0 %v8207_v9  ;;  %2874 = vmatprep.subr.bf16.mxu1 %v8210_v27  ;;  %v8288_v9 = vld [vmem:[%s11962_s2 + $0x9ec] ss:$48 sps:$4 sm:$0xff]   ;;  %v8283_v27 = vld [vmem:[%s11962_s2 + $0x9e0] ss:$48 sps:$4 sm:$0xff]  }
 0x137   :  { %2793 = vmatpush1.bf16.msra.mxu0 %v8205_v28  ;;  %2875 = vmatpush1.bf16.msra.mxu1 %v8208_v29  ;;  %v8286_v28 = vld [vmem:[%s11962_s2 + $0x9e8] ss:$48 sps:$4 sm:$0xff]   ;;  %v8291_v29 = vld [vmem:[%s11962_s2 + $0xa44] ss:$48 sps:$4 sm:$0xff]  }
 0x138   :  { %2794 = vmatprep.subr.bf16.mxu0 %v8213_v30  ;;  %2876 = vmatprep.subr.bf16.mxu1 %v8216_v31  ;;  %v8294_v30 = vld [vmem:[%s11962_s2 + $0xa4c] ss:$48 sps:$4 sm:$0xff]   ;;  %v8289_v31 = vld [vmem:[%s11962_s2 + $0xa40] ss:$48 sps:$4 sm:$0xff]  }
 0x13b   :  { %2795 = vmatpush1.bf16.msra.mxu0 %v8211_v32  ;;  %2877 = vmatpush1.bf16.msra.mxu1 %v8214_v33  ;;  %v8292_v32 = vld [vmem:[%s11962_s2 + $0xa48] ss:$48 sps:$4 sm:$0xff]   ;;  %v8297_v33 = vld [vmem:[%s11962_s2 + $0xaa4] ss:$48 sps:$4 sm:$0xff]  }
 0x13c   :  { %2796 = vmatprep.subr.bf16.mxu0 %v8219_v34  ;;  %2878 = vmatprep.subr.bf16.mxu1 %v8222_v35  ;;  %v8300_v34 = vld [vmem:[%s11962_s2 + $0xaac] ss:$48 sps:$4 sm:$0xff]   ;;  %v8295_v35 = vld [vmem:[%s11962_s2 + $0xaa0] ss:$48 sps:$4 sm:$0xff]  }
 0x13f   :  { %2797 = vmatpush1.bf16.msra.mxu0 %v8217_v36  ;;  %2879 = vmatpush1.bf16.msra.mxu1 %v8220_v37  ;;  %v8298_v36 = vld [vmem:[%s11962_s2 + $0xaa8] ss:$48 sps:$4 sm:$0xff]   ;;  %v8303_v37 = vld [vmem:[%s11962_s2 + $0xb04] ss:$48 sps:$4 sm:$0xff]  }
 0x140   :  { %2807 = vmatprep.subr.bf16.mxu0 %v8225_v38  ;;  %2889 = vmatprep.subr.bf16.mxu1 %v8228_v39  ;;  %v8306_v38 = vld [vmem:[%s11962_s2 + $0xb0c] ss:$48 sps:$4 sm:$0xff]   ;;  %v8301_v39 = vld [vmem:[%s11962_s2 + $0xb00] ss:$48 sps:$4 sm:$0xff]  }
 0x142   :  { %2799 = vmatmul.mubr.bf16.vlgmr.msra.gmra.mrb[8].mxu0 %v9329_v16  ;;  %2881 = vmatmul.mubr.bf16.vlgmr.msra.gmra.mrb[8].mxu1 %v9329_v16  ;;  %v8238_v16 = vld [vmem:[%s11962_s2 + $0x6e8] ss:$48 sps:$4 sm:$0xff]  }
 0x143   :  { %2808 = vmatpush1.bf16.msra.mxu0 %v8223_v40  ;;  %2890 = vmatpush1.bf16.msra.mxu1 %v8226_v41  ;;  %v8304_v40 = vld [vmem:[%s11962_s2 + $0xb08] ss:$48 sps:$4 sm:$0xff]   ;;  %v8309_v41 = vld [vmem:[%s11962_s2 + $0xb64] ss:$48 sps:$4 sm:$0xff]  }
 0x144   :  { %2809 = vmatprep.subr.bf16.mxu0 %v8231_v42  ;;  %2891 = vmatprep.subr.bf16.mxu1 %v8234_v44  ;;  %v8312_v42 = vld [vmem:[%s11962_s2 + $0xb6c] ss:$48 sps:$4 sm:$0xff]   ;;  %v8307_v44 = vld [vmem:[%s11962_s2 + $0xb60] ss:$48 sps:$4 sm:$0xff]  }
 0x145   :  { %2839 = vmatprep.mubr.bf16.mxu0 %v9340_v20  ;;  %2921 = vmatprep.mubr.bf16.mxu1 %v9340_v20  ;;  %v8244_v20 = vld [vmem:[%s11962_s2 + $0x748] ss:$48 sps:$4 sm:$0xff]  }
 0x147   :  { %2810 = vmatpush1.bf16.msra.mxu0 %v8229_v45  ;;  %2892 = vmatpush1.bf16.msra.mxu1 %v8232_v46  ;;  %v8310_v45 = vld [vmem:[%s11962_s2 + $0xb68] ss:$48 sps:$4 sm:$0xff]   ;;  %v8315_v46 = vld [vmem:[%s11962_s2 + $0xbc4] ss:$48 sps:$4 sm:$0xff]  }
 0x148   :  { %2811 = vmatprep.subr.bf16.mxu0 %v8237_v47  ;;  %2893 = vmatprep.subr.bf16.mxu1 %v8240_v48  ;;  %v8318_v47 = vld [vmem:[%s11962_s2 + $0xbcc] ss:$48 sps:$4 sm:$0xff]   ;;  %v8313_v48 = vld [vmem:[%s11962_s2 + $0xbc0] ss:$48 sps:$4 sm:$0xff]  }
 0x14b   :  { %2812 = vmatpush1.bf16.msra.mxu0 %v8235_v60  ;;  %2894 = vmatpush1.bf16.msra.mxu1 %v8238_v16  ;;  %v8316_v60 = vld [vmem:[%s11962_s2 + $0xbc8] ss:$48 sps:$4 sm:$0xff]  }
 0x14c   :  { %2813 = vmatprep.subr.bf16.mxu0 %v8243_v50  ;;  %2895 = vmatprep.subr.bf16.mxu1 %v8246_v51 }
 0x14f   :  { %2814 = vmatpush1.bf16.msra.mxu0 %v8241_v52  ;;  %2896 = vmatpush1.bf16.msra.mxu1 %v8244_v20 }
 0x150   :  { %2815 = vmatprep.subr.bf16.mxu0 %v8249_v53  ;;  %2897 = vmatprep.subr.bf16.mxu1 %v8252_v54 }
 0x153   :  { %2816 = vmatpush1.bf16.msra.mxu0 %v8247_v55  ;;  %2898 = vmatpush1.bf16.msra.mxu1 %v8250_v56 }
 0x154   :  { %2817 = vmatprep.subr.bf16.mxu0 %v8255_v57  ;;  %2899 = vmatprep.subr.bf16.mxu1 %v8258_v58 }
 0x155   :  { %v10194_v0 = vpop.f32.mrb[0].mxu0  ;;  %v10196_v1 = vpop.f32.mrb[0].mxu1 }
 0x156   :  { %v10201_v3 = vpop.f32.mrb[1].mxu0  ;;  %v10203_v4 = vpop.f32.mrb[1].mxu1 }
 0x157   :  { %v2517_v5 = vpop.f32.mrb[2].mxu0  ;;  %v2599_v6 = vpop.f32.mrb[2].mxu1  ;;  %2818 = vmatpush1.bf16.msra.mxu0 %v8253_v59  ;;  %2900 = vmatpush1.bf16.msra.mxu1 %v8256_v61 }
 0x158   :  { %2819 = vmatprep.subr.bf16.mxu0 %v8261_v62  ;;  %2901 = vmatprep.subr.bf16.mxu1 %v8264_v63  ;;  %v2518_v12 = vpop.f32.mrb[3].mxu0  ;;  %v2600_v13 = vpop.f32.mrb[3].mxu1 }
 0x15b   :  { %2820 = vmatpush1.bf16.msra.mxu0 %v8259_v2  ;;  %2902 = vmatpush1.bf16.msra.mxu1 %v8262_v7 }
 0x15c   :  { %2821 = vmatprep.subr.bf16.mxu0 %v8267_v8  ;;  %2903 = vmatprep.subr.bf16.mxu1 %v8270_v11 }
 0x15f   :  { %2822 = vmatpush1.bf16.msra.mxu0 %v8265_v10  ;;  %2904 = vmatpush1.bf16.msra.mxu1 %v8268_v14 }
 0x160   :  { %2823 = vmatprep.subr.bf16.mxu0 %v8273_v15  ;;  %2905 = vmatprep.subr.bf16.mxu1 %v8276_v17 }
 0x163   :  { %2824 = vmatpush1.bf16.msra.mxu0 %v8271_v18  ;;  %2906 = vmatpush1.bf16.msra.mxu1 %v8274_v19 }
 0x164   :  { %2825 = vmatprep.subr.bf16.mxu0 %v8279_v21  ;;  %2907 = vmatprep.subr.bf16.mxu1 %v8282_v22 }
 0x167   :  { %2826 = vmatpush1.bf16.msra.mxu0 %v8277_v24  ;;  %2908 = vmatpush1.bf16.msra.mxu1 %v8280_v25 }
 0x168   :  { %2827 = vmatprep.subr.bf16.mxu0 %v8285_v26  ;;  %2909 = vmatprep.subr.bf16.mxu1 %v8288_v9 }
 0x16b   :  { %2828 = vmatpush1.bf16.msra.mxu0 %v8283_v27  ;;  %2910 = vmatpush1.bf16.msra.mxu1 %v8286_v28 }
 0x16c   :  { %2829 = vmatprep.subr.bf16.mxu0 %v8291_v29  ;;  %2911 = vmatprep.subr.bf16.mxu1 %v8294_v30 }
 0x16f   :  { %2830 = vmatpush1.bf16.msra.mxu0 %v8289_v31  ;;  %2912 = vmatpush1.bf16.msra.mxu1 %v8292_v32 }
 0x170   :  { %2831 = vmatprep.subr.bf16.mxu0 %v8297_v33  ;;  %2913 = vmatprep.subr.bf16.mxu1 %v8300_v34 }
 0x173   :  { %2832 = vmatpush1.bf16.msra.mxu0 %v8295_v35  ;;  %2914 = vmatpush1.bf16.msra.mxu1 %v8298_v36 }
 0x174   :  { %2833 = vmatprep.subr.bf16.mxu0 %v8303_v37  ;;  %2915 = vmatprep.subr.bf16.mxu1 %v8306_v38 }
 0x177   :  { %2834 = vmatpush1.bf16.msra.mxu0 %v8301_v39  ;;  %2916 = vmatpush1.bf16.msra.mxu1 %v8304_v40 }
 0x178   :  { %2835 = vmatprep.subr.bf16.mxu0 %v8309_v41  ;;  %2917 = vmatprep.subr.bf16.mxu1 %v8312_v42 }
 0x17b   :  { %2836 = vmatpush1.bf16.msra.mxu0 %v8307_v44  ;;  %2918 = vmatpush1.bf16.msra.mxu1 %v8310_v45 }
 0x17c   :  { %2837 = vmatprep.subr.bf16.mxu0 %v8315_v46  ;;  %2919 = vmatprep.subr.bf16.mxu1 %v8318_v47 }
 0x17f   :  { %2838 = vmatpush1.bf16.msra.mxu0 %v8313_v48  ;;  %2920 = vmatpush1.bf16.msra.mxu1 %v8316_v60 }
 0x182   :  { %2840 = vmatmul.mubr.bf16.vlgmr.msra.gmra.mrb[8].mxu0 %v9528_v23  ;;  %2922 = vmatmul.mubr.bf16.vlgmr.msra.gmra.mrb[8].mxu1 %v9528_v23 }
 0x183   :  { %17 = vsyncpa [#allocation3], 0  ;;  %v8319_v56 = vld [vmem:[%s11964_s4] ss:$16 sps:$4 sm:$0xff]   ;;  %v8321_v23 = vld [vmem:[%s11964_s4 + $0x4] ss:$16 sps:$4 sm:$0xff]  }
 0x184   :  { %v8322_v57 = vld [vmem:[%s11964_s4 + $0x8] ss:$16 sps:$4 sm:$0xff]   ;;  %v8324_v58 = vld [vmem:[%s11964_s4 + $0xc] ss:$16 sps:$4 sm:$0xff]   ;;  %v8327_v59 = vld [vmem:[%s11964_s4 + $0x24] ss:$16 sps:$4 sm:$0xff]   ;;  %5440 = vmatprep.subr.bf16.mxu0 %v8321_v23 }
 0x185   :  { %v8330_v61 = vld [vmem:[%s11964_s4 + $0x2c] ss:$16 sps:$4 sm:$0xff]   ;;  %5686 = vmatprep.subr.bf16.mxu1 %v8324_v58  ;;  %5441 = vmatpush1.bf16.msra.mxu0 %v8319_v56  ;;  %v8325_v62 = vld [vmem:[%s11964_s4 + $0x20] ss:$16 sps:$4 sm:$0xff]   ;;  %v8328_v63 = vld [vmem:[%s11964_s4 + $0x28] ss:$16 sps:$4 sm:$0xff]  }
 0x186   :  { %5687 = vmatpush1.bf16.msra.mxu1 %v8322_v57  ;;  %5442 = vmatprep.subr.bf16.mxu0 %v8327_v59  ;;  %v8333_v2 = vld [vmem:[%s11964_s4 + $0x44] ss:$16 sps:$4 sm:$0xff]   ;;  %v8336_v5 = vld [vmem:[%s11964_s4 + $0x4c] ss:$16 sps:$4 sm:$0xff]   ;;  %v8331_v6 = vld [vmem:[%s11964_s4 + $0x40] ss:$16 sps:$4 sm:$0xff]  }
 0x187   :  { %5688 = vmatprep.subr.bf16.mxu1 %v8330_v61  ;;  %v8334_v7 = vld [vmem:[%s11964_s4 + $0x48] ss:$16 sps:$4 sm:$0xff]   ;;  %v8339_v8 = vld [vmem:[%s11964_s4 + $0x64] ss:$16 sps:$4 sm:$0xff]   ;;  %v8342_v10 = vld [vmem:[%s11964_s4 + $0x6c] ss:$16 sps:$4 sm:$0xff]  }
 0x188   :  { %v8337_v11 = vld [vmem:[%s11964_s4 + $0x60] ss:$16 sps:$4 sm:$0xff]   ;;  %v8340_v12 = vld [vmem:[%s11964_s4 + $0x68] ss:$16 sps:$4 sm:$0xff]   ;;  %v8345_v13 = vld [vmem:[%s11964_s4 + $0x84] ss:$16 sps:$4 sm:$0xff]  }
 0x189   :  { %5443 = vmatpush1.bf16.msra.mxu0 %v8325_v62  ;;  %v8348_v14 = vld [vmem:[%s11964_s4 + $0x8c] ss:$16 sps:$4 sm:$0xff]   ;;  %v8343_v15 = vld [vmem:[%s11964_s4 + $0x80] ss:$16 sps:$4 sm:$0xff]   ;;  %v8346_v17 = vld [vmem:[%s11964_s4 + $0x88] ss:$16 sps:$4 sm:$0xff]  }
 0x18a   :  { %5689 = vmatpush1.bf16.msra.mxu1 %v8328_v63  ;;  %5444 = vmatprep.subr.bf16.mxu0 %v8333_v2  ;;  %v8351_v18 = vld [vmem:[%s11964_s4 + $0xa4] ss:$16 sps:$4 sm:$0xff]   ;;  %v8354_v19 = vld [vmem:[%s11964_s4 + $0xac] ss:$16 sps:$4 sm:$0xff]   ;;  %v8349_v21 = vld [vmem:[%s11964_s4 + $0xa0] ss:$16 sps:$4 sm:$0xff]  }
 0x18b   :  { %5690 = vmatprep.subr.bf16.mxu1 %v8336_v5  ;;  %v8352_v22 = vld [vmem:[%s11964_s4 + $0xa8] ss:$16 sps:$4 sm:$0xff]   ;;  %v8357_v24 = vld [vmem:[%s11964_s4 + $0xc4] ss:$16 sps:$4 sm:$0xff]   ;;  %v8360_v25 = vld [vmem:[%s11964_s4 + $0xcc] ss:$16 sps:$4 sm:$0xff]  }
 0x18c   :  { %v8355_v26 = vld [vmem:[%s11964_s4 + $0xc0] ss:$16 sps:$4 sm:$0xff]   ;;  %v8358_v9 = vld [vmem:[%s11964_s4 + $0xc8] ss:$16 sps:$4 sm:$0xff]   ;;  %v8363_v27 = vld [vmem:[%s11964_s4 + $0xe4] ss:$16 sps:$4 sm:$0xff]  }
 0x18d   :  { %5445 = vmatpush1.bf16.msra.mxu0 %v8331_v6  ;;  %v8366_v28 = vld [vmem:[%s11964_s4 + $0xec] ss:$16 sps:$4 sm:$0xff]   ;;  %v8361_v29 = vld [vmem:[%s11964_s4 + $0xe0] ss:$16 sps:$4 sm:$0xff]   ;;  %v8364_v30 = vld [vmem:[%s11964_s4 + $0xe8] ss:$16 sps:$4 sm:$0xff]  }
 0x18e   :  { %5691 = vmatpush1.bf16.msra.mxu1 %v8334_v7  ;;  %5446 = vmatprep.subr.bf16.mxu0 %v8339_v8  ;;  %v8369_v31 = vld [vmem:[%s11964_s4 + $0x104] ss:$16 sps:$4 sm:$0xff]   ;;  %v8372_v32 = vld [vmem:[%s11964_s4 + $0x10c] ss:$16 sps:$4 sm:$0xff]   ;;  %v8367_v33 = vld [vmem:[%s11964_s4 + $0x100] ss:$16 sps:$4 sm:$0xff]  }
 0x18f   :  { %5692 = vmatprep.subr.bf16.mxu1 %v8342_v10  ;;  %v8370_v34 = vld [vmem:[%s11964_s4 + $0x108] ss:$16 sps:$4 sm:$0xff]   ;;  %v8375_v35 = vld [vmem:[%s11964_s4 + $0x124] ss:$16 sps:$4 sm:$0xff]   ;;  %v8378_v36 = vld [vmem:[%s11964_s4 + $0x12c] ss:$16 sps:$4 sm:$0xff]  }
 0x190   :  { %v8373_v37 = vld [vmem:[%s11964_s4 + $0x120] ss:$16 sps:$4 sm:$0xff]   ;;  %v8376_v38 = vld [vmem:[%s11964_s4 + $0x128] ss:$16 sps:$4 sm:$0xff]   ;;  %v8381_v39 = vld [vmem:[%s11964_s4 + $0x144] ss:$16 sps:$4 sm:$0xff]  }
 0x191   :  { %5447 = vmatpush1.bf16.msra.mxu0 %v8337_v11  ;;  %v8384_v40 = vld [vmem:[%s11964_s4 + $0x14c] ss:$16 sps:$4 sm:$0xff]   ;;  %v8379_v41 = vld [vmem:[%s11964_s4 + $0x140] ss:$16 sps:$4 sm:$0xff]   ;;  %v8382_v42 = vld [vmem:[%s11964_s4 + $0x148] ss:$16 sps:$4 sm:$0xff]  }
 0x192   :  { %5693 = vmatpush1.bf16.msra.mxu1 %v8340_v12  ;;  %5448 = vmatprep.subr.bf16.mxu0 %v8345_v13  ;;  %v10459_v44 = vsub.s32 0, %v9227_v43  ;;  %v10462_v45 = vsub.s32 1, %v9227_v43  ;;  %v454_v46 = vld [vmem:[%s11963_s3] sm:$0xff]  ;;  %v10470_v60 = vsub.s32 2, %v9227_v43  ;;  %v476_v56 = vsub.s32 4, %v9227_v43  ;;  %s9044_s26 = smov [#allocation2]  }
 0x193   :  { %5694 = vmatprep.subr.bf16.mxu1 %v8348_v14  ;;  %vm2978_vm3 = vcmask 1041408   ;;  %v484_v8 = vsub.s32 6, %v9227_v43  ;;  %s6735_s27 = sshll.u32 %s9044_s26, 4  ;;  %s6736_s27 = int_to_ptr.vmem [resolvable:$true] %s6735_s27 }
 0x194   :  { %v461_v47 = vrot.slane %v454_v46, %v10459_v44  ;;  %v465_v48 = vrot.slane %v454_v46, %v10462_v45  ;;  %v477_v61 = vrot.slane %v454_v46, %v476_v56  ;;  %p9022_p1 = scmp.lt.s32.totalorder %s6736_s27, %s6736_s27 }
 0x195   :  { %5449 = vmatpush1.bf16.msra.mxu0 %v8343_v15  ;;  %v485_v14 = vrot.slane %v454_v46, %v484_v8  ;;  %v488_v15 = vsub.s32 7, %v9227_v43 }
 0x196   :  { %5695 = vmatpush1.bf16.msra.mxu1 %v8346_v17  ;;  %5450 = vmatprep.subr.bf16.mxu0 %v8351_v18 }
 0x197   :  { %5696 = vmatprep.subr.bf16.mxu1 %v8354_v19 }
 0x199   :  { %5451 = vmatpush1.bf16.msra.mxu0 %v8349_v21 }
 0x19a   :  { %5697 = vmatpush1.bf16.msra.mxu1 %v8352_v22  ;;  %5452 = vmatprep.subr.bf16.mxu0 %v8357_v24  ;;  %v489_v24 = vrot.slane %v454_v46, %v488_v15 }
 0x19b   :  { %5698 = vmatprep.subr.bf16.mxu1 %v8360_v25 }
 0x19d   :  { %5453 = vmatpush1.bf16.msra.mxu0 %v8355_v26 }
 0x19e   :  { %5699 = vmatpush1.bf16.msra.mxu1 %v8358_v9  ;;  %5454 = vmatprep.subr.bf16.mxu0 %v8363_v27 }
 0x19f   :  { %5700 = vmatprep.subr.bf16.mxu1 %v8366_v28 }
 0x1a1   :  { %5455 = vmatpush1.bf16.msra.mxu0 %v8361_v29 }
 0x1a2   :  { %5701 = vmatpush1.bf16.msra.mxu1 %v8364_v30  ;;  %5456 = vmatprep.subr.bf16.mxu0 %v8369_v31 }
 0x1a3   :  { %5702 = vmatprep.subr.bf16.mxu1 %v8372_v32 }
 0x1a5   :  { %5457 = vmatpush1.bf16.msra.mxu0 %v8367_v33  ;;  %v455_v33 = vld [vmem:[%s11963_s3 + $0x8] sm:$0xf] }
 0x1a6   :  { %5703 = vmatpush1.bf16.msra.mxu1 %v8370_v34  ;;  %5458 = vmatprep.subr.bf16.mxu0 %v8375_v35 }
 0x1a7   :  { %5704 = vmatprep.subr.bf16.mxu1 %v8378_v36 }
 0x1a9   :  { %5459 = vmatpush1.bf16.msra.mxu0 %v8373_v37 }
 0x1aa   :  { %5705 = vmatpush1.bf16.msra.mxu1 %v8376_v38  ;;  %5460 = vmatprep.subr.bf16.mxu0 %v8381_v39  ;;  %v501_v39 = vrot.slane %v455_v33, %v10470_v60 }
 0x1ab   :  { %5706 = vmatprep.subr.bf16.mxu1 %v8384_v40  ;;  %v497_v40 = vrot.slane %v455_v33, %v10462_v45 }
 0x1ad   :  { %5461 = vmatpush1.bf16.msra.mxu0 %v8379_v41 }
 0x1ae   :  { %5707 = vmatpush1.bf16.msra.mxu1 %v8382_v42 }
 0x1d5   :  { %v10318_v16 = vpop.f32.mrb[4].mxu0  ;;  %v10320_v50 = vpop.f32.mrb[4].mxu1 }
 0x1d6   :  { %v10322_v51 = vpop.f32.mrb[5].mxu0  ;;  %v10324_v52 = vpop.f32.mrb[5].mxu1  ;;  %v7656_v5 = vadd.f32 %v10318_v16, %v477_v61 }
 0x1d7   :  { %v2681_v20 = vpop.f32.mrb[6].mxu0  ;;  %v2763_v53 = vpop.f32.mrb[6].mxu1  ;;  %v7659_v29 = vadd.f32 %v10324_v52, %v489_v24  ;;  %v493_v52 = vrot.slane %v455_v33, %v10459_v44 }
 0x1d8   :  { %v2682_v54 = vpop.f32.mrb[7].mxu0  ;;  %v2764_v55 = vpop.f32.mrb[7].mxu1  ;;  %v7652_v20 = vadd.f32 %v10194_v0, %v461_v47  ;;  %v7653_v53 = vadd.f32 %v10201_v3, %v465_v48  ;;  %v480_v0 = vsub.s32 5, %v9227_v43  ;;  %v2946_v12 = vmul.f32 0.2, %v7656_v5 }
 0x1d9   :  { %v469_v54 = vrot.slane %v454_v46, %v10470_v60  ;;  %v10476_v55 = vsub.s32 3, %v9227_v43  ;;  %vm2934_vm5 = vcmp.gt.f32.partialorder %v7656_v5, 0.0  ;;  %v2949_v36 = vmul.f32 0.2, %v7659_v29 }
 0x1da   :  { %v2942_v23 = vmul.f32 0.2, %v7652_v20  ;;  %v2943_v57 = vmul.f32 0.2, %v7653_v53  ;;  %vm2930_vm0 = vcmp.gt.f32.partialorder %v7652_v20, 0.0  ;;  %vm2931_vm1 = vcmp.gt.f32.partialorder %v7653_v53, 0.0 }
 0x1db   :  { %v7654_v58 = vadd.f32 %v10196_v1, %v469_v54  ;;  %v473_v59 = vrot.slane %v454_v46, %v10476_v55  ;;  %v481_v6 = vrot.slane %v454_v46, %v480_v0  ;;  %v10503_v21 = vsel %vm2934_vm5, %v7656_v5, %v2946_v12 }
 0x1dc   :  { %v10482_v62 = vsel %vm2930_vm0, %v7652_v20, %v2942_v23  ;;  %v10484_v3 = vsel %vm2931_vm1, %v7653_v53, %v2943_v57  ;;  %v2970_v43 = vmul.f32 %v10503_v21, %v10503_v21  ;;  %vm2937_vm8 = vcmp.gt.f32.partialorder %v7659_v29, 0.0 }
 0x1dd   :  { %v2944_v63 = vmul.f32 0.2, %v7654_v58  ;;  %v7655_v2 = vadd.f32 %v10203_v4, %v473_v59  ;;  %v2966_v7 = vmul.f32 %v10482_v62, %v10482_v62  ;;  %vm2932_vm2 = vcmp.gt.f32.partialorder %v7654_v58, 0.0 }
 0x1de   :  { %v2967_v1 = vmul.f32 %v10484_v3, %v10484_v3  ;;  %v7657_v13 = vadd.f32 %v10322_v51, %v481_v6  ;;  %v7658_v51 = vadd.f32 %v10320_v50, %v485_v14  ;;  %v2986_v31 = vsel %vm2978_vm3, %v2970_v43, 0.0 }
 0x1df   :  { %v10493_v10 = vsel %vm2932_vm2, %v7654_v58, %v2944_v63  ;;  %v2945_v11 = vmul.f32 0.2, %v7655_v2  ;;  %v2979_v4 = vsel %vm2978_vm3, %v2966_v7, 0.0  ;;  %vm2933_vm4 = vcmp.gt.f32.partialorder %v7655_v2, 0.0 }
 0x1e0   :  { %v2980_v16 = vsel %vm2978_vm3, %v2967_v1, 0.0  ;;  %v2968_v17 = vmul.f32 %v10493_v10, %v10493_v10  ;;  %v2947_v22 = vmul.f32 0.2, %v7657_v13  ;;  %vm2935_vm6 = vcmp.gt.f32.partialorder %v7657_v13, 0.0 }
 0x1e1   :  { %v2981_v18 = vadd.f32 %v2980_v16, %v2979_v4  ;;  %v10501_v19 = vsel %vm2933_vm4, %v7655_v2, %v2945_v11  ;;  %v2948_v28 = vmul.f32 0.2, %v7658_v51  ;;  %vm2936_vm7 = vcmp.gt.f32.partialorder %v7658_v51, 0.0 }
 0x1e2   :  { %v2982_v25 = vsel %vm2978_vm3, %v2968_v17, 0.0  ;;  %v2969_v26 = vmul.f32 %v10501_v19, %v10501_v19  ;;  %v10511_v27 = vsel %vm2935_vm6, %v7657_v13, %v2947_v22  ;;  %v10529_v42 = vsel %vm2937_vm8, %v7659_v29, %v2949_v36  ;;  %v8394_v36 = vld [vmem:[%s11964_s4 + $0x188] ss:$16 sps:$4 sm:$0xff]  }
 0x1e3   :  { %v2983_v9 = vadd.f32 %v2982_v25, %v2981_v18  ;;  %v2971_v50 = vmul.f32 %v10511_v27, %v10511_v27  ;;  %v10521_v35 = vsel %vm2936_vm7, %v7658_v51, %v2948_v28  ;;  %v505_v46 = vrot.slane %v455_v33, %v10476_v55  ;;  %v8391_v33 = vld [vmem:[%s11964_s4 + $0x180] ss:$16 sps:$4 sm:$0xff]  }
 0x1e4   :  { %v2984_v30 = vsel %vm2978_vm3, %v2969_v26, 0.0  ;;  %v2972_v38 = vmul.f32 %v10521_v35, %v10521_v35  ;;  %v2973_v56 = vmul.f32 %v10529_v42, %v10529_v42  ;;  %vm6727_vm6 = vcmask 320512  }
 0x1e5   :  { %v2985_v32 = vadd.f32 %v2984_v30, %v2983_v9  ;;  %v2988_v37 = vsel %vm2978_vm3, %v2971_v50, 0.0  ;;  %v8387_v30 = vld [vmem:[%s11964_s4 + $0x164] ss:$16 sps:$4 sm:$0xff]   ;;  %v8385_v50 = vld [vmem:[%s11964_s4 + $0x160] ss:$16 sps:$4 sm:$0xff]  }
 0x1e6   :  { %v2990_v54 = vsel %vm2978_vm3, %v2972_v38, 0.0  ;;  %v2992_v12 = vsel %vm2978_vm3, %v2973_v56, 0.0  ;;  %5462 = vmatprep.subr.bf16.mxu0 %v8387_v30  ;;  %v8402_v38 = vld [vmem:[%s11964_s4 + $0x1ac] ss:$16 sps:$4 sm:$0xff]   ;;  %v8412_v56 = vld [vmem:[%s11964_s4 + $0x1e8] ss:$16 sps:$4 sm:$0xff]  }
 0x1e7   :  { %v2987_v34 = vadd.f32 %v2986_v31, %v2985_v32  ;;  %v8390_v31 = vld [vmem:[%s11964_s4 + $0x16c] ss:$16 sps:$4 sm:$0xff]   ;;  %v8388_v32 = vld [vmem:[%s11964_s4 + $0x168] ss:$16 sps:$4 sm:$0xff]   ;;  %5463 = vmatpush1.bf16.msra.mxu0 %v8385_v50 }
 0x1e8   :  { %5708 = vmatprep.subr.bf16.mxu1 %v8390_v31 }
 0x1e9   :  { %v2989_v41 = vadd.f32 %v2988_v37, %v2987_v34  ;;  %5709 = vmatpush1.bf16.msra.mxu1 %v8388_v32  ;;  %v8393_v34 = vld [vmem:[%s11964_s4 + $0x184] ss:$16 sps:$4 sm:$0xff]   ;;  %v8396_v37 = vld [vmem:[%s11964_s4 + $0x18c] ss:$16 sps:$4 sm:$0xff]  }
 0x1ea   :  { %5464 = vmatprep.subr.bf16.mxu0 %v8393_v34  ;;  %5710 = vmatprep.subr.bf16.mxu1 %v8396_v37  ;;  %v8423_v32 = vld [vmem:[%s11964_s4 + $0x224] ss:$16 sps:$4 sm:$0xff]  }
 0x1eb   :  { %v2991_v5 = vadd.f32 %v2990_v54, %v2989_v41  ;;  %5465 = vmatpush1.bf16.msra.mxu0 %v8391_v33  ;;  %v8405_v41 = vld [vmem:[%s11964_s4 + $0x1c4] ss:$16 sps:$4 sm:$0xff]   ;;  %v8409_v54 = vld [vmem:[%s11964_s4 + $0x1e0] ss:$16 sps:$4 sm:$0xff]   ;;  %v8426_v33 = vld [vmem:[%s11964_s4 + $0x22c] ss:$16 sps:$4 sm:$0xff]  }
 0x1ed   :  { %v2993_v17 = vadd.f32 %v2992_v12, %v2991_v5  ;;  %5711 = vmatpush1.bf16.msra.mxu1 %v8394_v36  ;;  %v3020_v12 = vld [vmem:[%s11961_s1 + $0x10] sm:$0xff] }
 0x1ee   :  { %5712 = vmatprep.subr.bf16.mxu1 %v8402_v38 }
 0x255   :  { %v2841_v47 = vpop.f32.mrb[8].mxu0  ;;  %v2923_v20 = vpop.f32.mrb[8].mxu1 }
 0x256   :  { %v7660_v48 = vadd.f32 %v2841_v47, %v493_v52  ;;  %v2843_v53 = vpop.f32.mrb[9].mxu0  ;;  %v7662_v23 = vadd.f32 %v2923_v20, %v501_v39  ;;  %v2925_v58 = vpop.f32.mrb[9].mxu1  ;;  %v8399_v52 = vld [vmem:[%s11964_s4 + $0x1a4] ss:$16 sps:$4 sm:$0xff]   ;;  %v8397_v39 = vld [vmem:[%s11964_s4 + $0x1a0] ss:$16 sps:$4 sm:$0xff]  }
 0x257   :  { %v7661_v57 = vadd.f32 %v2843_v53, %v497_v40  ;;  %v2845_v59 = vpop.f32.mrb[10].mxu0  ;;  %v7663_v0 = vadd.f32 %v2925_v58, %v505_v46  ;;  %v2927_v63 = vpop.f32.mrb[10].mxu1  ;;  %v8400_v40 = vld [vmem:[%s11964_s4 + $0x1a8] ss:$16 sps:$4 sm:$0xff]   ;;  %5466 = vmatprep.subr.bf16.mxu0 %v8399_v52  ;;  %v8408_v46 = vld [vmem:[%s11964_s4 + $0x1cc] ss:$16 sps:$4 sm:$0xff]  }
 0x258   :  { %vm2938_vm9 = vcmp.gt.f32.partialorder %v7660_v48, 0.0  ;;  %v2950_v61 = vmul.f32 0.2, %v7660_v48  ;;  %v2846_v2 = vpop.f32.mrb[11].mxu0  ;;  %vm2940_vm10 = vcmp.gt.f32.partialorder %v7662_v23, 0.0  ;;  %v2928_v11 = vpop.f32.mrb[11].mxu1  ;;  %5467 = vmatpush1.bf16.msra.mxu0 %v8397_v39  ;;  %5713 = vmatpush1.bf16.msra.mxu1 %v8400_v40 }
 0x259   :  { %v2952_v6 = vmul.f32 0.2, %v7662_v23  ;;  %vm2939_vm11 = vcmp.gt.f32.partialorder %v7661_v57, 0.0  ;;  %v2951_v7 = vmul.f32 0.2, %v7661_v57  ;;  %vm2941_vm12 = vcmp.gt.f32.partialorder %v7663_v0, 0.0  ;;  %5468 = vmatprep.subr.bf16.mxu0 %v8405_v41  ;;  %5714 = vmatprep.subr.bf16.mxu1 %v8408_v46 }
 0x25a   :  { %v10535_v1 = vsel %vm2938_vm9, %v7660_v48, %v2950_v61  ;;  %v2953_v8 = vmul.f32 0.2, %v7663_v0  ;;  %v8403_v47 = vld [vmem:[%s11964_s4 + $0x1c0] ss:$16 sps:$4 sm:$0xff]   ;;  %v8406_v48 = vld [vmem:[%s11964_s4 + $0x1c8] ss:$16 sps:$4 sm:$0xff]  }
 0x25b   :  { %v2974_v13 = vmul.f32 %v10535_v1, %v10535_v1  ;;  %v10540_v4 = vsel %vm2940_vm10, %v7662_v23, %v2952_v6  ;;  %v10542_v16 = vsel %vm2939_vm11, %v7661_v57, %v2951_v7  ;;  %v8411_v20 = vld [vmem:[%s11964_s4 + $0x1e4] ss:$16 sps:$4 sm:$0xff]   ;;  %v8414_v53 = vld [vmem:[%s11964_s4 + $0x1ec] ss:$16 sps:$4 sm:$0xff]   ;;  %v8421_v39 = vld [vmem:[%s11964_s4 + $0x220] ss:$16 sps:$4 sm:$0xff]  }
 0x25c   :  { %v2975_v14 = vmul.f32 %v10542_v16, %v10542_v16  ;;  %v10546_v15 = vsel %vm2941_vm12, %v7663_v0, %v2953_v8  ;;  %v2976_v18 = vmul.f32 %v10540_v4, %v10540_v4  ;;  %5469 = vmatpush1.bf16.msra.mxu0 %v8403_v47  ;;  %5715 = vmatpush1.bf16.msra.mxu1 %v8406_v48  ;;  %v8417_v23 = vld [vmem:[%s11964_s4 + $0x204] ss:$16 sps:$4 sm:$0xff]   ;;  %v8420_v57 = vld [vmem:[%s11964_s4 + $0x20c] ss:$16 sps:$4 sm:$0xff]   ;;  %v8424_v40 = vld [vmem:[%s11964_s4 + $0x228] ss:$16 sps:$4 sm:$0xff]  }
 0x25d   :  { %v2994_v22 = vsel %vm2978_vm3, %v2974_v13, 0.0  ;;  %v2977_v25 = vmul.f32 %v10546_v15, %v10546_v15  ;;  %5470 = vmatprep.subr.bf16.mxu0 %v8411_v20  ;;  %5716 = vmatprep.subr.bf16.mxu1 %v8414_v53  ;;  %v3018_v58 = vld [vmem:[%s11961_s1] sm:$0xff]  ;;  %v3019_v59 = vld [vmem:[%s11961_s1 + $0x8] sm:$0xff] }
 0x25e   :  { %v2995_v51 = vadd.f32 %v2994_v22, %v2993_v17  ;;  %v2996_v24 = vsel %vm2978_vm3, %v2975_v14, 0.0  ;;  %v2998_v43 = vsel %vm2978_vm3, %v2976_v18, 0.0  ;;  %v3021_v63 = vmul.f32 0.1, %v3018_v58  ;;  %v8429_v41 = vld [vmem:[%s11964_s4 + $0x244] ss:$16 sps:$4 sm:$0xff]  }
 0x25f   :  { %v3000_v28 = vsel %vm2978_vm3, %v2977_v25, 0.0  ;;  %v10628_v2 = vmul.f32 0.1, %v3019_v59  ;;  %v3023_v22 = vmul.f32 0.1, %v3020_v12  ;;  %vm9043_vm3 = vmmov 0  }
 0x260   :  { %v2997_v26 = vadd.f32 %v2996_v24, %v2995_v51  ;;  %5471 = vmatpush1.bf16.msra.mxu0 %v8409_v54  ;;  %5717 = vmatpush1.bf16.msra.mxu1 %v8412_v56  ;;  %v3027_v5 = vcombine.high %v3021_v63, %v3021_v63  ;;  %v3034_v7 = vrot.slane %v3021_v63, %v9245_v49  ;;  %v8427_v47 = vld [vmem:[%s11964_s4 + $0x240] ss:$16 sps:$4 sm:$0xff]   ;;  %v8430_v48 = vld [vmem:[%s11964_s4 + $0x248] ss:$16 sps:$4 sm:$0xff]   ;;  %v8435_v20 = vld [vmem:[%s11964_s4 + $0x264] ss:$16 sps:$4 sm:$0xff]  }
 0x261   :  { %5481 = vmatprep.subr.bf16.mxu0 %v8417_v23  ;;  %5727 = vmatprep.subr.bf16.mxu1 %v8420_v57  ;;  %v3044_v6 = vcombine.high %v10628_v2, %v10628_v2  ;;  %v3061_v50 = vcombine.high %v3023_v22, %v3023_v22  ;;  %v10671_v34 = vrot.slane %v3023_v22, %v9245_v49  ;;  %v8438_v53 = vld [vmem:[%s11964_s4 + $0x26c] ss:$16 sps:$4 sm:$0xff]   ;;  %v8433_v54 = vld [vmem:[%s11964_s4 + $0x260] ss:$16 sps:$4 sm:$0xff]   ;;  %v8436_v56 = vld [vmem:[%s11964_s4 + $0x268] ss:$16 sps:$4 sm:$0xff]  }
 0x262   :  { %v2999_v9 = vadd.f32 %v2998_v43, %v2997_v26  ;;  %v3041_v8 = vrot.slane %v3027_v5, %v9245_v49  ;;  %v3042_v13 = vcombine.high %v3034_v7, %v3034_v7  ;;  %v8441_v23 = vld [vmem:[%s11964_s4 + $0x284] ss:$16 sps:$4 sm:$0xff]   ;;  %v8444_v57 = vld [vmem:[%s11964_s4 + $0x28c] ss:$16 sps:$4 sm:$0xff]   ;;  %v8439_v58 = vld [vmem:[%s11964_s4 + $0x280] ss:$16 sps:$4 sm:$0xff]  }
 0x263   :  { %v3058_v11 = vrot.slane %v3044_v6, %v9245_v49  ;;  %v10676_v52 = vrot.slane %v3061_v50, %v9245_v49  ;;  %v8442_v59 = vld [vmem:[%s11964_s4 + $0x288] ss:$16 sps:$4 sm:$0xff]   ;;  %v8445_v63 = vld [vmem:[%s11964_s4 + $0x2a0] ss:$16 sps:$4 sm:$0xff]   ;;  %v8453_v6 = vld [vmem:[%s11964_s4 + $0x2c4] ss:$16 sps:$4 sm:$0xff]  }
 0x264   :  { %v3001_v29 = vadd.f32 %v3000_v28, %v2999_v9  ;;  %v3043_v17 = vcombine.high %v3041_v8, %v3041_v8  ;;  %v8448_v5 = vld [vmem:[%s11964_s4 + $0x2a8] ss:$16 sps:$4 sm:$0xff]   ;;  %v8459_v12 = vld [vmem:[%s11964_s4 + $0x2e4] ss:$16 sps:$4 sm:$0xff]   ;;  %v8475_v50 = vld [vmem:[%s11964_s4 + $0x340] ss:$16 sps:$4 sm:$0xff]  }
 0x265   :  { %v3060_v18 = vcombine.high %v3058_v11, %v3058_v11  ;;  %v8465_v22 = vld [vmem:[%s11964_s4 + $0x304] ss:$16 sps:$4 sm:$0xff]  }
 0x266   :  { %3002 = vadd.xlane.f32.xlu0 %v3001_v29 }
 0x2f3   :  { %v3003_v61 = vpop.xlane.xlu0 %3002 }
 0x2f4   :  { %v3004_v0 = vmax.f32 %v3003_v61, 1e-24  ;;  %v8447_v61 = vld [vmem:[%s11964_s4 + $0x2a4] ss:$16 sps:$4 sm:$0xff]  }
 0x2f6   :  { %9015 = vrsqrt.f32 %v3004_v0  ;;  %v8450_v0 = vld [vmem:[%s11964_s4 + $0x2ac] ss:$16 sps:$4 sm:$0xff]  }
 0x300   :  { %v10638_v14 = vpop.eup %9015 }
 0x301   :  { %v3007_v51 = vmul.f32 %v10638_v14, %v10484_v3  ;;  %v3006_v24 = vmul.f32 %v10638_v14, %v10482_v62  ;;  %v3009_v25 = vmul.f32 %v10638_v14, %v10501_v19  ;;  %v3008_v26 = vmul.f32 %v10638_v14, %v10493_v10  ;;  %v8415_v10 = vld [vmem:[%s11964_s4 + $0x200] ss:$16 sps:$4 sm:$0xff]  }
 0x302   :  { %v3013_v43 = vmul.f32 %v10638_v14, %v10529_v42  ;;  %v3012_v9 = vmul.f32 %v10638_v14, %v10521_v35  ;;  %v8418_v42 = vld [vmem:[%s11964_s4 + $0x208] ss:$16 sps:$4 sm:$0xff]   ;;  %v3014_v36 = vmul.f32 %v10638_v14, %v10535_v1  ;;  %v3016_v38 = vmul.f32 %v10638_v14, %v10540_v4  ;;  %v8432_v4 = vld [vmem:[%s11964_s4 + $0x24c] ss:$16 sps:$4 sm:$0xff]  }
 0x303   :  { %v3091_v28 = vadd.f32 %v3042_v13, %v3007_v51  ;;  %v3090_v29 = vadd.f32 %v3034_v7, %v3006_v24  ;;  %v10652_v30 = vadd.f32 %v3041_v8, %v3008_v26  ;;  %v3093_v3 = vadd.f32 %v3043_v17, %v3009_v25  ;;  %v8456_v7 = vld [vmem:[%s11964_s4 + $0x2cc] ss:$16 sps:$4 sm:$0xff]   ;;  %v8451_v8 = vld [vmem:[%s11964_s4 + $0x2c0] ss:$16 sps:$4 sm:$0xff]   ;;  %v8466_v25 = vld [vmem:[%s11964_s4 + $0x308] ss:$16 sps:$4 sm:$0xff]  }
 0x304   :  { %v10654_v31 = vadd.f32 %v3060_v18, %v3013_v43  ;;  %v10656_v62 = vadd.f32 %v3058_v11, %v3012_v9  ;;  %v10687_v1 = vadd.f32 %v10671_v34, %v3014_v36  ;;  %v10696_v46 = vadd.f32 %v10676_v52, %v3016_v38  ;;  %v8454_v11 = vld [vmem:[%s11964_s4 + $0x2c8] ss:$16 sps:$4 sm:$0xff]   ;;  %v8462_v13 = vld [vmem:[%s11964_s4 + $0x2ec] ss:$16 sps:$4 sm:$0xff]   ;;  %v8457_v17 = vld [vmem:[%s11964_s4 + $0x2e0] ss:$16 sps:$4 sm:$0xff]  }
 0x305   :  { %v3103_v19 = vpack.c.bf16 %v3091_v28, %v3091_v28  ;;  %v3102_v35 = vpack.c.bf16 %v3090_v29, %v3090_v29  ;;  %v3105_v37 = vpack.c.bf16 %v3093_v3, %v3093_v3  ;;  %v8460_v18 = vld [vmem:[%s11964_s4 + $0x2e8] ss:$16 sps:$4 sm:$0xff]   ;;  %v8468_v51 = vld [vmem:[%s11964_s4 + $0x30c] ss:$16 sps:$4 sm:$0xff]   ;;  %v8463_v24 = vld [vmem:[%s11964_s4 + $0x300] ss:$16 sps:$4 sm:$0xff]  }
 0x306   :  { %v8471_v26 = vld [vmem:[%s11964_s4 + $0x324] ss:$16 sps:$4 sm:$0xff]   ;;  %v8474_v43 = vld [vmem:[%s11964_s4 + $0x32c] ss:$16 sps:$4 sm:$0xff]   ;;  %v8469_v9 = vld [vmem:[%s11964_s4 + $0x320] ss:$16 sps:$4 sm:$0xff]  }
 0x307   :  { %5472 = vmatprep.mubr.bf16.mxu0 %v3103_v19  ;;  %5718 = vmatprep.mubr.bf16.mxu1 %v3103_v19  ;;  %v8472_v28 = vld [vmem:[%s11964_s4 + $0x328] ss:$16 sps:$4 sm:$0xff]   ;;  %v8477_v29 = vld [vmem:[%s11964_s4 + $0x344] ss:$16 sps:$4 sm:$0xff]   ;;  %v8480_v3 = vld [vmem:[%s11964_s4 + $0x34c] ss:$16 sps:$4 sm:$0xff]  }
 0x308   :  { %5473 = vmatmul.mubr.bf16.vlgmr.msra.gmra.mrb[12].mxu0 %v3102_v35  ;;  %5719 = vmatmul.mubr.bf16.vlgmr.msra.gmra.mrb[12].mxu1 %v3102_v35  ;;  %v8478_v19 = vld [vmem:[%s11964_s4 + $0x348] ss:$16 sps:$4 sm:$0xff]   ;;  %v8481_v35 = vld [vmem:[%s11964_s4 + $0x360] ss:$16 sps:$4 sm:$0xff]   ;;  %v8492_v36 = vld [vmem:[%s11964_s4 + $0x38c] ss:$16 sps:$4 sm:$0xff]  }
 0x309   :  { %5482 = vmatpush1.bf16.msra.mxu0 %v8415_v10  ;;  %5728 = vmatpush1.bf16.msra.mxu1 %v8418_v42  ;;  %v8483_v10 = vld [vmem:[%s11964_s4 + $0x364] ss:$16 sps:$4 sm:$0xff]   ;;  %v8486_v42 = vld [vmem:[%s11964_s4 + $0x36c] ss:$16 sps:$4 sm:$0xff]   ;;  %v8490_v38 = vld [vmem:[%s11964_s4 + $0x388] ss:$16 sps:$4 sm:$0xff]  }
 0x30a   :  { %5513 = vmatprep.mubr.bf16.mxu0 %v3105_v37  ;;  %5759 = vmatprep.mubr.bf16.mxu1 %v3105_v37  ;;  %v8487_v37 = vld [vmem:[%s11964_s4 + $0x380] ss:$16 sps:$4 sm:$0xff]  }
 0x30b   :  { %5483 = vmatprep.subr.bf16.mxu0 %v8423_v32  ;;  %5729 = vmatprep.subr.bf16.mxu1 %v8426_v33  ;;  %v8484_v32 = vld [vmem:[%s11964_s4 + $0x368] ss:$16 sps:$4 sm:$0xff]   ;;  %v8489_v33 = vld [vmem:[%s11964_s4 + $0x384] ss:$16 sps:$4 sm:$0xff]  }
 0x30d   :  { %5484 = vmatpush1.bf16.msra.mxu0 %v8421_v39  ;;  %5730 = vmatpush1.bf16.msra.mxu1 %v8424_v40  ;;  %v8495_v39 = vld [vmem:[%s11964_s4 + $0x3a4] ss:$16 sps:$4 sm:$0xff]   ;;  %v8498_v40 = vld [vmem:[%s11964_s4 + $0x3ac] ss:$16 sps:$4 sm:$0xff]  }
 0x30e   :  { %5485 = vmatprep.subr.bf16.mxu0 %v8429_v41  ;;  %5731 = vmatprep.subr.bf16.mxu1 %v8432_v4  ;;  %v8493_v41 = vld [vmem:[%s11964_s4 + $0x3a0] ss:$16 sps:$4 sm:$0xff]   ;;  %v8496_v4 = vld [vmem:[%s11964_s4 + $0x3a8] ss:$16 sps:$4 sm:$0xff]  }
 0x311   :  { %5486 = vmatpush1.bf16.msra.mxu0 %v8427_v47  ;;  %5732 = vmatpush1.bf16.msra.mxu1 %v8430_v48  ;;  %v8501_v47 = vld [vmem:[%s11964_s4 + $0x3c4] ss:$16 sps:$4 sm:$0xff]   ;;  %v8504_v48 = vld [vmem:[%s11964_s4 + $0x3cc] ss:$16 sps:$4 sm:$0xff]  }
 0x312   :  { %5487 = vmatprep.subr.bf16.mxu0 %v8435_v20  ;;  %5733 = vmatprep.subr.bf16.mxu1 %v8438_v53  ;;  %v10844_v20 = vrot.slane %v10628_v2, %v9245_v49  ;;  %v8499_v53 = vld [vmem:[%s11964_s4 + $0x3c0] ss:$16 sps:$4 sm:$0xff]   ;;  %v8510_v49 = vld [vmem:[%s11964_s4 + $0x3ec] ss:$16 sps:$4 sm:$0xff]   ;;  %v3011_v2 = vmul.f32 %v10638_v14, %v10511_v27 }
 0x313   :  { %v8516_v27 = vld [vmem:[%s11964_s4 + $0x40c] ss:$16 sps:$4 sm:$0xff]  }
 0x315   :  { %5488 = vmatpush1.bf16.msra.mxu0 %v8433_v54  ;;  %5734 = vmatpush1.bf16.msra.mxu1 %v8436_v56  ;;  %v8502_v54 = vld [vmem:[%s11964_s4 + $0x3c8] ss:$16 sps:$4 sm:$0xff]   ;;  %v8507_v56 = vld [vmem:[%s11964_s4 + $0x3e4] ss:$16 sps:$4 sm:$0xff]  }
 0x316   :  { %5489 = vmatprep.subr.bf16.mxu0 %v8441_v23  ;;  %5735 = vmatprep.subr.bf16.mxu1 %v8444_v57  ;;  %v3059_v23 = vcombine.high %v10844_v20, %v10844_v20  ;;  %v8505_v57 = vld [vmem:[%s11964_s4 + $0x3e0] ss:$16 sps:$4 sm:$0xff]  }
 0x319   :  { %5490 = vmatpush1.bf16.msra.mxu0 %v8439_v58  ;;  %5736 = vmatpush1.bf16.msra.mxu1 %v8442_v59  ;;  %v8508_v58 = vld [vmem:[%s11964_s4 + $0x3e8] ss:$16 sps:$4 sm:$0xff]   ;;  %v8513_v59 = vld [vmem:[%s11964_s4 + $0x404] ss:$16 sps:$4 sm:$0xff]  }
 0x31a   :  { %5491 = vmatprep.subr.bf16.mxu0 %v8447_v61  ;;  %5737 = vmatprep.subr.bf16.mxu1 %v8450_v0  ;;  %v3095_v61 = vadd.f32 %v3059_v23, %v3011_v2  ;;  %v8511_v0 = vld [vmem:[%s11964_s4 + $0x400] ss:$16 sps:$4 sm:$0xff]   ;;  %v8574_v23 = vld [vmem:[%s11964_s4 + $0x548] ss:$16 sps:$4 sm:$0xff]  }
 0x31b   :  { %v8571_v2 = vld [vmem:[%s11964_s4 + $0x540] ss:$16 sps:$4 sm:$0xff]  }
 0x31d   :  { %5492 = vmatpush1.bf16.msra.mxu0 %v8445_v63  ;;  %5738 = vmatpush1.bf16.msra.mxu1 %v8448_v5  ;;  %v3104_v63 = vpack.c.bf16 %v10652_v30, %v10652_v30  ;;  %v8514_v5 = vld [vmem:[%s11964_s4 + $0x408] ss:$16 sps:$4 sm:$0xff]   ;;  %v8517_v30 = vld [vmem:[%s11964_s4 + $0x420] ss:$16 sps:$4 sm:$0xff]  }
 0x31e   :  { %5493 = vmatprep.subr.bf16.mxu0 %v8453_v6  ;;  %5739 = vmatprep.subr.bf16.mxu1 %v8456_v7  ;;  %v3107_v6 = vpack.c.bf16 %v3095_v61, %v3095_v61  ;;  %v8519_v7 = vld [vmem:[%s11964_s4 + $0x424] ss:$16 sps:$4 sm:$0xff]  }
 0x31f   :  { %v8585_v61 = vld [vmem:[%s11964_s4 + $0x584] ss:$16 sps:$4 sm:$0xff]  }
 0x321   :  { %5494 = vmatpush1.bf16.msra.mxu0 %v8451_v8  ;;  %5740 = vmatpush1.bf16.msra.mxu1 %v8454_v11  ;;  %v8522_v8 = vld [vmem:[%s11964_s4 + $0x42c] ss:$16 sps:$4 sm:$0xff]   ;;  %v8520_v11 = vld [vmem:[%s11964_s4 + $0x428] ss:$16 sps:$4 sm:$0xff]  }
 0x322   :  { %5495 = vmatprep.subr.bf16.mxu0 %v8459_v12  ;;  %5741 = vmatprep.subr.bf16.mxu1 %v8462_v13  ;;  %v8525_v12 = vld [vmem:[%s11964_s4 + $0x444] ss:$16 sps:$4 sm:$0xff]   ;;  %v8528_v13 = vld [vmem:[%s11964_s4 + $0x44c] ss:$16 sps:$4 sm:$0xff]  }
 0x325   :  { %5496 = vmatpush1.bf16.msra.mxu0 %v8457_v17  ;;  %5742 = vmatpush1.bf16.msra.mxu1 %v8460_v18  ;;  %v8523_v17 = vld [vmem:[%s11964_s4 + $0x440] ss:$16 sps:$4 sm:$0xff]   ;;  %v8526_v18 = vld [vmem:[%s11964_s4 + $0x448] ss:$16 sps:$4 sm:$0xff]  }
 0x326   :  { %5497 = vmatprep.subr.bf16.mxu0 %v8465_v22  ;;  %5743 = vmatprep.subr.bf16.mxu1 %v8468_v51  ;;  %v8531_v22 = vld [vmem:[%s11964_s4 + $0x464] ss:$16 sps:$4 sm:$0xff]   ;;  %v8534_v51 = vld [vmem:[%s11964_s4 + $0x46c] ss:$16 sps:$4 sm:$0xff]  }
 0x329   :  { %5498 = vmatpush1.bf16.msra.mxu0 %v8463_v24  ;;  %5744 = vmatpush1.bf16.msra.mxu1 %v8466_v25  ;;  %v8529_v24 = vld [vmem:[%s11964_s4 + $0x460] ss:$16 sps:$4 sm:$0xff]   ;;  %v8532_v25 = vld [vmem:[%s11964_s4 + $0x468] ss:$16 sps:$4 sm:$0xff]  }
 0x32a   :  { %5499 = vmatprep.subr.bf16.mxu0 %v8471_v26  ;;  %5745 = vmatprep.subr.bf16.mxu1 %v8474_v43  ;;  %v8537_v26 = vld [vmem:[%s11964_s4 + $0x484] ss:$16 sps:$4 sm:$0xff]   ;;  %v8540_v43 = vld [vmem:[%s11964_s4 + $0x48c] ss:$16 sps:$4 sm:$0xff]  }
 0x32d   :  { %5500 = vmatpush1.bf16.msra.mxu0 %v8469_v9  ;;  %5746 = vmatpush1.bf16.msra.mxu1 %v8472_v28  ;;  %v8535_v9 = vld [vmem:[%s11964_s4 + $0x480] ss:$16 sps:$4 sm:$0xff]   ;;  %v8538_v28 = vld [vmem:[%s11964_s4 + $0x488] ss:$16 sps:$4 sm:$0xff]  }
 0x32e   :  { %5501 = vmatprep.subr.bf16.mxu0 %v8477_v29  ;;  %5747 = vmatprep.subr.bf16.mxu1 %v8480_v3  ;;  %v8543_v29 = vld [vmem:[%s11964_s4 + $0x4a4] ss:$16 sps:$4 sm:$0xff]   ;;  %v8546_v3 = vld [vmem:[%s11964_s4 + $0x4ac] ss:$16 sps:$4 sm:$0xff]  }
 0x331   :  { %5502 = vmatpush1.bf16.msra.mxu0 %v8475_v50  ;;  %5748 = vmatpush1.bf16.msra.mxu1 %v8478_v19  ;;  %v8541_v50 = vld [vmem:[%s11964_s4 + $0x4a0] ss:$16 sps:$4 sm:$0xff]   ;;  %v8544_v19 = vld [vmem:[%s11964_s4 + $0x4a8] ss:$16 sps:$4 sm:$0xff]  }
 0x332   :  { %5503 = vmatprep.subr.bf16.mxu0 %v8483_v10  ;;  %5749 = vmatprep.subr.bf16.mxu1 %v8486_v42  ;;  %v8549_v10 = vld [vmem:[%s11964_s4 + $0x4c4] ss:$16 sps:$4 sm:$0xff]   ;;  %v8552_v42 = vld [vmem:[%s11964_s4 + $0x4cc] ss:$16 sps:$4 sm:$0xff]  }
 0x335   :  { %5504 = vmatpush1.bf16.msra.mxu0 %v8481_v35  ;;  %5750 = vmatpush1.bf16.msra.mxu1 %v8484_v32  ;;  %v8547_v35 = vld [vmem:[%s11964_s4 + $0x4c0] ss:$16 sps:$4 sm:$0xff]   ;;  %v8550_v32 = vld [vmem:[%s11964_s4 + $0x4c8] ss:$16 sps:$4 sm:$0xff]  }
 0x336   :  { %5505 = vmatprep.subr.bf16.mxu0 %v8489_v33  ;;  %5751 = vmatprep.subr.bf16.mxu1 %v8492_v36  ;;  %v8555_v33 = vld [vmem:[%s11964_s4 + $0x4e4] ss:$16 sps:$4 sm:$0xff]   ;;  %v8558_v36 = vld [vmem:[%s11964_s4 + $0x4ec] ss:$16 sps:$4 sm:$0xff]  }
 0x339   :  { %5506 = vmatpush1.bf16.msra.mxu0 %v8487_v37  ;;  %5752 = vmatpush1.bf16.msra.mxu1 %v8490_v38  ;;  %v8553_v37 = vld [vmem:[%s11964_s4 + $0x4e0] ss:$16 sps:$4 sm:$0xff]   ;;  %v8556_v38 = vld [vmem:[%s11964_s4 + $0x4e8] ss:$16 sps:$4 sm:$0xff]  }
 0x33a   :  { %5507 = vmatprep.subr.bf16.mxu0 %v8495_v39  ;;  %5753 = vmatprep.subr.bf16.mxu1 %v8498_v40  ;;  %v8561_v39 = vld [vmem:[%s11964_s4 + $0x504] ss:$16 sps:$4 sm:$0xff]   ;;  %v8564_v40 = vld [vmem:[%s11964_s4 + $0x50c] ss:$16 sps:$4 sm:$0xff]  }
 0x33d   :  { %5508 = vmatpush1.bf16.msra.mxu0 %v8493_v41  ;;  %5754 = vmatpush1.bf16.msra.mxu1 %v8496_v4  ;;  %v8559_v41 = vld [vmem:[%s11964_s4 + $0x500] ss:$16 sps:$4 sm:$0xff]   ;;  %v8562_v4 = vld [vmem:[%s11964_s4 + $0x508] ss:$16 sps:$4 sm:$0xff]  }
 0x33e   :  { %5509 = vmatprep.subr.bf16.mxu0 %v8501_v47  ;;  %5755 = vmatprep.subr.bf16.mxu1 %v8504_v48  ;;  %v8567_v47 = vld [vmem:[%s11964_s4 + $0x524] ss:$16 sps:$4 sm:$0xff]   ;;  %v8570_v48 = vld [vmem:[%s11964_s4 + $0x52c] ss:$16 sps:$4 sm:$0xff]  }
 0x341   :  { %5510 = vmatpush1.bf16.msra.mxu0 %v8499_v53  ;;  %5756 = vmatpush1.bf16.msra.mxu1 %v8502_v54  ;;  %v8565_v53 = vld [vmem:[%s11964_s4 + $0x520] ss:$16 sps:$4 sm:$0xff]   ;;  %v8568_v54 = vld [vmem:[%s11964_s4 + $0x528] ss:$16 sps:$4 sm:$0xff]  }
 0x342   :  { %5511 = vmatprep.subr.bf16.mxu0 %v8507_v56  ;;  %5757 = vmatprep.subr.bf16.mxu1 %v8510_v49  ;;  %v8573_v56 = vld [vmem:[%s11964_s4 + $0x544] ss:$16 sps:$4 sm:$0xff]   ;;  %v8576_v49 = vld [vmem:[%s11964_s4 + $0x54c] ss:$16 sps:$4 sm:$0xff]  }
 0x345   :  { %5512 = vmatpush1.bf16.msra.mxu0 %v8505_v57  ;;  %5758 = vmatpush1.bf16.msra.mxu1 %v8508_v58  ;;  %v8579_v57 = vld [vmem:[%s11964_s4 + $0x564] ss:$16 sps:$4 sm:$0xff]   ;;  %v8582_v58 = vld [vmem:[%s11964_s4 + $0x56c] ss:$16 sps:$4 sm:$0xff]  }
 0x346   :  { %5522 = vmatprep.subr.bf16.mxu0 %v8513_v59  ;;  %5768 = vmatprep.subr.bf16.mxu1 %v8516_v27  ;;  %v8577_v59 = vld [vmem:[%s11964_s4 + $0x560] ss:$16 sps:$4 sm:$0xff]   ;;  %v8580_v27 = vld [vmem:[%s11964_s4 + $0x568] ss:$16 sps:$4 sm:$0xff]  }
 0x348   :  { %5514 = vmatmul.mubr.bf16.vlgmr.msra.gmra.mrb[12].mxu0 %v3104_v63  ;;  %5760 = vmatmul.mubr.bf16.vlgmr.msra.gmra.mrb[12].mxu1 %v3104_v63  ;;  %v8583_v63 = vld [vmem:[%s11964_s4 + $0x580] ss:$16 sps:$4 sm:$0xff]  }
 0x349   :  { %5523 = vmatpush1.bf16.msra.mxu0 %v8511_v0  ;;  %5554 = vmatprep.mubr.bf16.mxu0 %v3107_v6  ;;  %v8588_v0 = vld [vmem:[%s11964_s4 + $0x58c] ss:$16 sps:$4 sm:$0xff]  }
 0x34a   :  { %5769 = vmatpush1.bf16.msra.mxu1 %v8514_v5  ;;  %5800 = vmatprep.mubr.bf16.mxu1 %v3107_v6  ;;  %v8586_v5 = vld [vmem:[%s11964_s4 + $0x588] ss:$16 sps:$4 sm:$0xff]   ;;  %v8591_v6 = vld [vmem:[%s11964_s4 + $0x5a4] ss:$16 sps:$4 sm:$0xff]  }
 0x34b   :  { %5524 = vmatprep.subr.bf16.mxu0 %v8519_v7  ;;  %5770 = vmatprep.subr.bf16.mxu1 %v8522_v8  ;;  %v8594_v7 = vld [vmem:[%s11964_s4 + $0x5ac] ss:$16 sps:$4 sm:$0xff]   ;;  %v8589_v8 = vld [vmem:[%s11964_s4 + $0x5a0] ss:$16 sps:$4 sm:$0xff]  }
 0x34d   :  { %5525 = vmatpush1.bf16.msra.mxu0 %v8517_v30  ;;  %v8592_v30 = vld [vmem:[%s11964_s4 + $0x5a8] ss:$16 sps:$4 sm:$0xff]  }
 0x34e   :  { %5771 = vmatpush1.bf16.msra.mxu1 %v8520_v11  ;;  %5526 = vmatprep.subr.bf16.mxu0 %v8525_v12  ;;  %v8597_v11 = vld [vmem:[%s11964_s4 + $0x5c4] ss:$16 sps:$4 sm:$0xff]   ;;  %v8600_v12 = vld [vmem:[%s11964_s4 + $0x5cc] ss:$16 sps:$4 sm:$0xff]  }
 0x34f   :  { %5772 = vmatprep.subr.bf16.mxu1 %v8528_v13  ;;  %v8595_v13 = vld [vmem:[%s11964_s4 + $0x5c0] ss:$16 sps:$4 sm:$0xff]  }
 0x351   :  { %5527 = vmatpush1.bf16.msra.mxu0 %v8523_v17  ;;  %v8598_v17 = vld [vmem:[%s11964_s4 + $0x5c8] ss:$16 sps:$4 sm:$0xff]  }
 0x352   :  { %5773 = vmatpush1.bf16.msra.mxu1 %v8526_v18  ;;  %5528 = vmatprep.subr.bf16.mxu0 %v8531_v22  ;;  %v8603_v18 = vld [vmem:[%s11964_s4 + $0x5e4] ss:$16 sps:$4 sm:$0xff]   ;;  %v3010_v22 = vmul.f32 %v10638_v14, %v10503_v21 }
 0x353   :  { %5774 = vmatprep.subr.bf16.mxu1 %v8534_v51  ;;  %v8606_v51 = vld [vmem:[%s11964_s4 + $0x5ec] ss:$16 sps:$4 sm:$0xff]   ;;  %v8609_v21 = vld [vmem:[%s11964_s4 + $0x604] ss:$16 sps:$4 sm:$0xff]  }
 0x355   :  { %5529 = vmatpush1.bf16.msra.mxu0 %v8529_v24  ;;  %v8601_v24 = vld [vmem:[%s11964_s4 + $0x5e0] ss:$16 sps:$4 sm:$0xff]  }
 0x356   :  { %5775 = vmatpush1.bf16.msra.mxu1 %v8532_v25  ;;  %5530 = vmatprep.subr.bf16.mxu0 %v8537_v26  ;;  %v8604_v25 = vld [vmem:[%s11964_s4 + $0x5e8] ss:$16 sps:$4 sm:$0xff]   ;;  %v3094_v26 = vadd.f32 %v10844_v20, %v3010_v22  ;;  %v8678_v22 = vld [vmem:[%s11964_s4 + $0x76c] ss:$16 sps:$4 sm:$0xff]  }
 0x357   :  { %5776 = vmatprep.subr.bf16.mxu1 %v8540_v43  ;;  %v8612_v43 = vld [vmem:[%s11964_s4 + $0x60c] ss:$16 sps:$4 sm:$0xff]   ;;  %v8610_v20 = vld [vmem:[%s11964_s4 + $0x608] ss:$16 sps:$4 sm:$0xff]  }
 0x359   :  { %5531 = vmatpush1.bf16.msra.mxu0 %v8535_v9  ;;  %v8607_v9 = vld [vmem:[%s11964_s4 + $0x600] ss:$16 sps:$4 sm:$0xff]  }
 0x35a   :  { %5777 = vmatpush1.bf16.msra.mxu1 %v8538_v28  ;;  %5532 = vmatprep.subr.bf16.mxu0 %v8543_v29  ;;  %v3106_v28 = vpack.c.bf16 %v3094_v26, %v3094_v26  ;;  %v8615_v29 = vld [vmem:[%s11964_s4 + $0x624] ss:$16 sps:$4 sm:$0xff]   ;;  %v8684_v26 = vld [vmem:[%s11964_s4 + $0x78c] ss:$16 sps:$4 sm:$0xff]  }
 0x35b   :  { %5778 = vmatprep.subr.bf16.mxu1 %v8546_v3  ;;  %v3109_v3 = vpack.c.bf16 %v10654_v31, %v10654_v31  ;;  %v8621_v31 = vld [vmem:[%s11964_s4 + $0x644] ss:$16 sps:$4 sm:$0xff]  }
 0x35d   :  { %5533 = vmatpush1.bf16.msra.mxu0 %v8541_v50  ;;  %v8618_v50 = vld [vmem:[%s11964_s4 + $0x62c] ss:$16 sps:$4 sm:$0xff]  }
 0x35e   :  { %5779 = vmatpush1.bf16.msra.mxu1 %v8544_v19  ;;  %5534 = vmatprep.subr.bf16.mxu0 %v8549_v10  ;;  %v8613_v19 = vld [vmem:[%s11964_s4 + $0x620] ss:$16 sps:$4 sm:$0xff]   ;;  %v8616_v10 = vld [vmem:[%s11964_s4 + $0x628] ss:$16 sps:$4 sm:$0xff]  }
 0x35f   :  { %5780 = vmatprep.subr.bf16.mxu1 %v8552_v42  ;;  %v8624_v42 = vld [vmem:[%s11964_s4 + $0x64c] ss:$16 sps:$4 sm:$0xff]  }
 0x361   :  { %5535 = vmatpush1.bf16.msra.mxu0 %v8547_v35  ;;  %v8619_v35 = vld [vmem:[%s11964_s4 + $0x640] ss:$16 sps:$4 sm:$0xff]  }
 0x362   :  { %5781 = vmatpush1.bf16.msra.mxu1 %v8550_v32  ;;  %5536 = vmatprep.subr.bf16.mxu0 %v8555_v33  ;;  %v8622_v32 = vld [vmem:[%s11964_s4 + $0x648] ss:$16 sps:$4 sm:$0xff]   ;;  %v8627_v33 = vld [vmem:[%s11964_s4 + $0x664] ss:$16 sps:$4 sm:$0xff]  }
 0x363   :  { %5782 = vmatprep.subr.bf16.mxu1 %v8558_v36  ;;  %v8630_v36 = vld [vmem:[%s11964_s4 + $0x66c] ss:$16 sps:$4 sm:$0xff]  }
 0x365   :  { %5537 = vmatpush1.bf16.msra.mxu0 %v8553_v37  ;;  %v8625_v37 = vld [vmem:[%s11964_s4 + $0x660] ss:$16 sps:$4 sm:$0xff]  }
 0x366   :  { %5783 = vmatpush1.bf16.msra.mxu1 %v8556_v38  ;;  %5538 = vmatprep.subr.bf16.mxu0 %v8561_v39  ;;  %v8628_v38 = vld [vmem:[%s11964_s4 + $0x668] ss:$16 sps:$4 sm:$0xff]   ;;  %v8633_v39 = vld [vmem:[%s11964_s4 + $0x684] ss:$16 sps:$4 sm:$0xff]  }
 0x367   :  { %5784 = vmatprep.subr.bf16.mxu1 %v8564_v40  ;;  %v8636_v40 = vld [vmem:[%s11964_s4 + $0x68c] ss:$16 sps:$4 sm:$0xff]  }
 0x369   :  { %5539 = vmatpush1.bf16.msra.mxu0 %v8559_v41  ;;  %v8631_v41 = vld [vmem:[%s11964_s4 + $0x680] ss:$16 sps:$4 sm:$0xff]  }
 0x36a   :  { %5785 = vmatpush1.bf16.msra.mxu1 %v8562_v4  ;;  %5540 = vmatprep.subr.bf16.mxu0 %v8567_v47  ;;  %v8634_v4 = vld [vmem:[%s11964_s4 + $0x688] ss:$16 sps:$4 sm:$0xff]   ;;  %v8639_v47 = vld [vmem:[%s11964_s4 + $0x6a4] ss:$16 sps:$4 sm:$0xff]  }
 0x36b   :  { %5786 = vmatprep.subr.bf16.mxu1 %v8570_v48  ;;  %v8642_v48 = vld [vmem:[%s11964_s4 + $0x6ac] ss:$16 sps:$4 sm:$0xff]  }
 0x36d   :  { %5541 = vmatpush1.bf16.msra.mxu0 %v8565_v53  ;;  %v8637_v53 = vld [vmem:[%s11964_s4 + $0x6a0] ss:$16 sps:$4 sm:$0xff]  }
 0x36e   :  { %5787 = vmatpush1.bf16.msra.mxu1 %v8568_v54  ;;  %5542 = vmatprep.subr.bf16.mxu0 %v8573_v56  ;;  %v8640_v54 = vld [vmem:[%s11964_s4 + $0x6a8] ss:$16 sps:$4 sm:$0xff]   ;;  %v8645_v56 = vld [vmem:[%s11964_s4 + $0x6c4] ss:$16 sps:$4 sm:$0xff]  }
 0x36f   :  { %5788 = vmatprep.subr.bf16.mxu1 %v8576_v49  ;;  %v8648_v49 = vld [vmem:[%s11964_s4 + $0x6cc] ss:$16 sps:$4 sm:$0xff]  }
 0x371   :  { %5543 = vmatpush1.bf16.msra.mxu0 %v8571_v2  ;;  %v8643_v2 = vld [vmem:[%s11964_s4 + $0x6c0] ss:$16 sps:$4 sm:$0xff]  }
 0x372   :  { %5789 = vmatpush1.bf16.msra.mxu1 %v8574_v23  ;;  %5544 = vmatprep.subr.bf16.mxu0 %v8579_v57  ;;  %v8646_v23 = vld [vmem:[%s11964_s4 + $0x6c8] ss:$16 sps:$4 sm:$0xff]   ;;  %v8651_v57 = vld [vmem:[%s11964_s4 + $0x6e4] ss:$16 sps:$4 sm:$0xff]  }
 0x373   :  { %5790 = vmatprep.subr.bf16.mxu1 %v8582_v58  ;;  %v8654_v58 = vld [vmem:[%s11964_s4 + $0x6ec] ss:$16 sps:$4 sm:$0xff]  }
 0x375   :  { %5545 = vmatpush1.bf16.msra.mxu0 %v8577_v59  ;;  %v8649_v59 = vld [vmem:[%s11964_s4 + $0x6e0] ss:$16 sps:$4 sm:$0xff]  }
 0x376   :  { %5791 = vmatpush1.bf16.msra.mxu1 %v8580_v27  ;;  %5546 = vmatprep.subr.bf16.mxu0 %v8585_v61  ;;  %v8652_v27 = vld [vmem:[%s11964_s4 + $0x6e8] ss:$16 sps:$4 sm:$0xff]   ;;  %v8657_v61 = vld [vmem:[%s11964_s4 + $0x704] ss:$16 sps:$4 sm:$0xff]  }
 0x377   :  { %5792 = vmatprep.subr.bf16.mxu1 %v8588_v0  ;;  %v8660_v0 = vld [vmem:[%s11964_s4 + $0x70c] ss:$16 sps:$4 sm:$0xff]  }
 0x379   :  { %5547 = vmatpush1.bf16.msra.mxu0 %v8583_v63  ;;  %v8655_v63 = vld [vmem:[%s11964_s4 + $0x700] ss:$16 sps:$4 sm:$0xff]  }
 0x37a   :  { %5793 = vmatpush1.bf16.msra.mxu1 %v8586_v5  ;;  %5548 = vmatprep.subr.bf16.mxu0 %v8591_v6  ;;  %v8658_v5 = vld [vmem:[%s11964_s4 + $0x708] ss:$16 sps:$4 sm:$0xff]   ;;  %v8663_v6 = vld [vmem:[%s11964_s4 + $0x724] ss:$16 sps:$4 sm:$0xff]  }
 0x37b   :  { %5794 = vmatprep.subr.bf16.mxu1 %v8594_v7  ;;  %v8666_v7 = vld [vmem:[%s11964_s4 + $0x72c] ss:$16 sps:$4 sm:$0xff]  }
 0x37d   :  { %5549 = vmatpush1.bf16.msra.mxu0 %v8589_v8  ;;  %v8661_v8 = vld [vmem:[%s11964_s4 + $0x720] ss:$16 sps:$4 sm:$0xff]  }
 0x37e   :  { %5795 = vmatpush1.bf16.msra.mxu1 %v8592_v30  ;;  %5550 = vmatprep.subr.bf16.mxu0 %v8597_v11  ;;  %v8664_v30 = vld [vmem:[%s11964_s4 + $0x728] ss:$16 sps:$4 sm:$0xff]   ;;  %v8669_v11 = vld [vmem:[%s11964_s4 + $0x744] ss:$16 sps:$4 sm:$0xff]  }
 0x37f   :  { %5796 = vmatprep.subr.bf16.mxu1 %v8600_v12  ;;  %v8672_v12 = vld [vmem:[%s11964_s4 + $0x74c] ss:$16 sps:$4 sm:$0xff]  }
 0x381   :  { %5551 = vmatpush1.bf16.msra.mxu0 %v8595_v13  ;;  %v8667_v13 = vld [vmem:[%s11964_s4 + $0x740] ss:$16 sps:$4 sm:$0xff]  }
 0x382   :  { %5797 = vmatpush1.bf16.msra.mxu1 %v8598_v17  ;;  %5552 = vmatprep.subr.bf16.mxu0 %v8603_v18  ;;  %v8670_v17 = vld [vmem:[%s11964_s4 + $0x748] ss:$16 sps:$4 sm:$0xff]   ;;  %v8675_v18 = vld [vmem:[%s11964_s4 + $0x764] ss:$16 sps:$4 sm:$0xff]  }
 0x383   :  { %5798 = vmatprep.subr.bf16.mxu1 %v8606_v51  ;;  %v8673_v51 = vld [vmem:[%s11964_s4 + $0x760] ss:$16 sps:$4 sm:$0xff]  }
 0x385   :  { %5553 = vmatpush1.bf16.msra.mxu0 %v8601_v24  ;;  %v8676_v24 = vld [vmem:[%s11964_s4 + $0x768] ss:$16 sps:$4 sm:$0xff]  }
 0x386   :  { %5799 = vmatpush1.bf16.msra.mxu1 %v8604_v25  ;;  %5563 = vmatprep.subr.bf16.mxu0 %v8609_v21  ;;  %v8681_v25 = vld [vmem:[%s11964_s4 + $0x784] ss:$16 sps:$4 sm:$0xff]   ;;  %v8679_v21 = vld [vmem:[%s11964_s4 + $0x780] ss:$16 sps:$4 sm:$0xff]  }
 0x387   :  { %5809 = vmatprep.subr.bf16.mxu1 %v8612_v43  ;;  %v8682_v43 = vld [vmem:[%s11964_s4 + $0x788] ss:$16 sps:$4 sm:$0xff]  }
 0x388   :  { %5555 = vmatmul.mubr.bf16.vlgmr.msra.gmra.mrb[12].mxu0 %v3106_v28 }
 0x389   :  { %5801 = vmatmul.mubr.bf16.vlgmr.msra.gmra.mrb[12].mxu1 %v3106_v28  ;;  %5564 = vmatpush1.bf16.msra.mxu0 %v8607_v9  ;;  %v8687_v9 = vld [vmem:[%s11964_s4 + $0x7a4] ss:$16 sps:$4 sm:$0xff]   ;;  %v8690_v28 = vld [vmem:[%s11964_s4 + $0x7ac] ss:$16 sps:$4 sm:$0xff]  }
 0x38a   :  { %5595 = vmatprep.mubr.bf16.mxu0 %v3109_v3  ;;  %5810 = vmatpush1.bf16.msra.mxu1 %v8610_v20  ;;  %v8685_v20 = vld [vmem:[%s11964_s4 + $0x7a0] ss:$16 sps:$4 sm:$0xff]  }
 0x38b   :  { %5841 = vmatprep.mubr.bf16.mxu1 %v3109_v3  ;;  %5565 = vmatprep.subr.bf16.mxu0 %v8615_v29  ;;  %v8688_v29 = vld [vmem:[%s11964_s4 + $0x7a8] ss:$16 sps:$4 sm:$0xff]   ;;  %v8693_v3 = vld [vmem:[%s11964_s4 + $0x7c4] ss:$16 sps:$4 sm:$0xff]  }
 0x38c   :  { %5811 = vmatprep.subr.bf16.mxu1 %v8618_v50  ;;  %v8696_v50 = vld [vmem:[%s11964_s4 + $0x7cc] ss:$16 sps:$4 sm:$0xff]  }
 0x38d   :  { %5566 = vmatpush1.bf16.msra.mxu0 %v8613_v19  ;;  %v8691_v19 = vld [vmem:[%s11964_s4 + $0x7c0] ss:$16 sps:$4 sm:$0xff]  }
 0x38e   :  { %5812 = vmatpush1.bf16.msra.mxu1 %v8616_v10  ;;  %5567 = vmatprep.subr.bf16.mxu0 %v8621_v31  ;;  %v8694_v10 = vld [vmem:[%s11964_s4 + $0x7c8] ss:$16 sps:$4 sm:$0xff]   ;;  %v8699_v31 = vld [vmem:[%s11964_s4 + $0x7e4] ss:$16 sps:$4 sm:$0xff]  }
 0x38f   :  { %5813 = vmatprep.subr.bf16.mxu1 %v8624_v42  ;;  %v8702_v42 = vld [vmem:[%s11964_s4 + $0x7ec] ss:$16 sps:$4 sm:$0xff]  }
 0x391   :  { %5568 = vmatpush1.bf16.msra.mxu0 %v8619_v35  ;;  %v3015_v35 = vmul.f32 %v10638_v14, %v10542_v16  ;;  %v8708_v16 = vld [vmem:[%s11964_s4 + $0x80c] ss:$16 sps:$4 sm:$0xff]  }
 0x392   :  { %5814 = vmatpush1.bf16.msra.mxu1 %v8622_v32  ;;  %5569 = vmatprep.subr.bf16.mxu0 %v8627_v33  ;;  %v3076_v32 = vcombine.high %v10671_v34, %v10671_v34  ;;  %v8697_v33 = vld [vmem:[%s11964_s4 + $0x7e0] ss:$16 sps:$4 sm:$0xff]  }
 0x393   :  { %5815 = vmatprep.subr.bf16.mxu1 %v8630_v36  ;;  %v8700_v36 = vld [vmem:[%s11964_s4 + $0x7e8] ss:$16 sps:$4 sm:$0xff]  }
 0x394   :  { %v3099_v34 = vadd.f32 %v3076_v32, %v3015_v35  ;;  %v8777_v35 = vld [vmem:[%s11964_s4 + $0x984] ss:$16 sps:$4 sm:$0xff]   ;;  %v8780_v32 = vld [vmem:[%s11964_s4 + $0x98c] ss:$16 sps:$4 sm:$0xff]  }
 0x395   :  { %5570 = vmatpush1.bf16.msra.mxu0 %v8625_v37  ;;  %v8705_v37 = vld [vmem:[%s11964_s4 + $0x804] ss:$16 sps:$4 sm:$0xff]  }
 0x396   :  { %5816 = vmatpush1.bf16.msra.mxu1 %v8628_v38  ;;  %5571 = vmatprep.subr.bf16.mxu0 %v8633_v39  ;;  %v8703_v38 = vld [vmem:[%s11964_s4 + $0x800] ss:$16 sps:$4 sm:$0xff]   ;;  %v3108_v39 = vpack.c.bf16 %v10656_v62, %v10656_v62 }
 0x397   :  { %5817 = vmatprep.subr.bf16.mxu1 %v8636_v40  ;;  %v8706_v40 = vld [vmem:[%s11964_s4 + $0x808] ss:$16 sps:$4 sm:$0xff]   ;;  %v8709_v62 = vld [vmem:[%s11964_s4 + $0x820] ss:$16 sps:$4 sm:$0xff]  }
 0x399   :  { %5572 = vmatpush1.bf16.msra.mxu0 %v8631_v41  ;;  %v8711_v41 = vld [vmem:[%s11964_s4 + $0x824] ss:$16 sps:$4 sm:$0xff]  }
 0x39a   :  { %5818 = vmatpush1.bf16.msra.mxu1 %v8634_v4  ;;  %5573 = vmatprep.subr.bf16.mxu0 %v8639_v47  ;;  %v3111_v4 = vpack.c.bf16 %v3099_v34, %v3099_v34  ;;  %v8714_v47 = vld [vmem:[%s11964_s4 + $0x82c] ss:$16 sps:$4 sm:$0xff]   ;;  %v8781_v34 = vld [vmem:[%s11964_s4 + $0x9a0] ss:$16 sps:$4 sm:$0xff]  }
 0x39b   :  { %5819 = vmatprep.subr.bf16.mxu1 %v8642_v48  ;;  %v8712_v48 = vld [vmem:[%s11964_s4 + $0x828] ss:$16 sps:$4 sm:$0xff]  }
 0x39d   :  { %5574 = vmatpush1.bf16.msra.mxu0 %v8637_v53  ;;  %v8717_v53 = vld [vmem:[%s11964_s4 + $0x844] ss:$16 sps:$4 sm:$0xff]  }
 0x39e   :  { %5820 = vmatpush1.bf16.msra.mxu1 %v8640_v54  ;;  %5575 = vmatprep.subr.bf16.mxu0 %v8645_v56  ;;  %v8720_v54 = vld [vmem:[%s11964_s4 + $0x84c] ss:$16 sps:$4 sm:$0xff]   ;;  %v8715_v56 = vld [vmem:[%s11964_s4 + $0x840] ss:$16 sps:$4 sm:$0xff]  }
 0x39f   :  { %5821 = vmatprep.subr.bf16.mxu1 %v8648_v49  ;;  %v8718_v49 = vld [vmem:[%s11964_s4 + $0x848] ss:$16 sps:$4 sm:$0xff]  }
 0x3a1   :  { %5576 = vmatpush1.bf16.msra.mxu0 %v8643_v2  ;;  %v8723_v2 = vld [vmem:[%s11964_s4 + $0x864] ss:$16 sps:$4 sm:$0xff]  }
 0x3a2   :  { %5822 = vmatpush1.bf16.msra.mxu1 %v8646_v23  ;;  %5577 = vmatprep.subr.bf16.mxu0 %v8651_v57  ;;  %v8726_v23 = vld [vmem:[%s11964_s4 + $0x86c] ss:$16 sps:$4 sm:$0xff]   ;;  %v8721_v57 = vld [vmem:[%s11964_s4 + $0x860] ss:$16 sps:$4 sm:$0xff]  }
 0x3a3   :  { %5823 = vmatprep.subr.bf16.mxu1 %v8654_v58  ;;  %v8724_v58 = vld [vmem:[%s11964_s4 + $0x868] ss:$16 sps:$4 sm:$0xff]  }
 0x3a5   :  { %5578 = vmatpush1.bf16.msra.mxu0 %v8649_v59  ;;  %v8729_v59 = vld [vmem:[%s11964_s4 + $0x884] ss:$16 sps:$4 sm:$0xff]  }
 0x3a6   :  { %5824 = vmatpush1.bf16.msra.mxu1 %v8652_v27  ;;  %5579 = vmatprep.subr.bf16.mxu0 %v8657_v61  ;;  %v8732_v27 = vld [vmem:[%s11964_s4 + $0x88c] ss:$16 sps:$4 sm:$0xff]   ;;  %v8727_v61 = vld [vmem:[%s11964_s4 + $0x880] ss:$16 sps:$4 sm:$0xff]  }
 0x3a7   :  { %5825 = vmatprep.subr.bf16.mxu1 %v8660_v0  ;;  %v8730_v0 = vld [vmem:[%s11964_s4 + $0x888] ss:$16 sps:$4 sm:$0xff]  }
 0x3a9   :  { %5580 = vmatpush1.bf16.msra.mxu0 %v8655_v63  ;;  %v8735_v63 = vld [vmem:[%s11964_s4 + $0x8a4] ss:$16 sps:$4 sm:$0xff]  }
 0x3aa   :  { %5826 = vmatpush1.bf16.msra.mxu1 %v8658_v5  ;;  %5581 = vmatprep.subr.bf16.mxu0 %v8663_v6  ;;  %v8738_v5 = vld [vmem:[%s11964_s4 + $0x8ac] ss:$16 sps:$4 sm:$0xff]   ;;  %v8733_v6 = vld [vmem:[%s11964_s4 + $0x8a0] ss:$16 sps:$4 sm:$0xff]  }
 0x3ab   :  { %5827 = vmatprep.subr.bf16.mxu1 %v8666_v7  ;;  %v8736_v7 = vld [vmem:[%s11964_s4 + $0x8a8] ss:$16 sps:$4 sm:$0xff]  }
 0x3ad   :  { %5582 = vmatpush1.bf16.msra.mxu0 %v8661_v8  ;;  %v8741_v8 = vld [vmem:[%s11964_s4 + $0x8c4] ss:$16 sps:$4 sm:$0xff]  }
 0x3ae   :  { %5828 = vmatpush1.bf16.msra.mxu1 %v8664_v30  ;;  %5583 = vmatprep.subr.bf16.mxu0 %v8669_v11  ;;  %v8744_v30 = vld [vmem:[%s11964_s4 + $0x8cc] ss:$16 sps:$4 sm:$0xff]   ;;  %v8739_v11 = vld [vmem:[%s11964_s4 + $0x8c0] ss:$16 sps:$4 sm:$0xff]  }
 0x3af   :  { %5829 = vmatprep.subr.bf16.mxu1 %v8672_v12  ;;  %v8742_v12 = vld [vmem:[%s11964_s4 + $0x8c8] ss:$16 sps:$4 sm:$0xff]  }
 0x3b1   :  { %5584 = vmatpush1.bf16.msra.mxu0 %v8667_v13  ;;  %v8747_v13 = vld [vmem:[%s11964_s4 + $0x8e4] ss:$16 sps:$4 sm:$0xff]  }
 0x3b2   :  { %5830 = vmatpush1.bf16.msra.mxu1 %v8670_v17  ;;  %5585 = vmatprep.subr.bf16.mxu0 %v8675_v18  ;;  %v8750_v17 = vld [vmem:[%s11964_s4 + $0x8ec] ss:$16 sps:$4 sm:$0xff]   ;;  %v8745_v18 = vld [vmem:[%s11964_s4 + $0x8e0] ss:$16 sps:$4 sm:$0xff]  }
 0x3b3   :  { %5831 = vmatprep.subr.bf16.mxu1 %v8678_v22  ;;  %v8748_v22 = vld [vmem:[%s11964_s4 + $0x8e8] ss:$16 sps:$4 sm:$0xff]  }
 0x3b5   :  { %5586 = vmatpush1.bf16.msra.mxu0 %v8673_v51  ;;  %v8753_v51 = vld [vmem:[%s11964_s4 + $0x904] ss:$16 sps:$4 sm:$0xff]  }
 0x3b6   :  { %5832 = vmatpush1.bf16.msra.mxu1 %v8676_v24  ;;  %5587 = vmatprep.subr.bf16.mxu0 %v8681_v25  ;;  %v8756_v24 = vld [vmem:[%s11964_s4 + $0x90c] ss:$16 sps:$4 sm:$0xff]   ;;  %v8751_v25 = vld [vmem:[%s11964_s4 + $0x900] ss:$16 sps:$4 sm:$0xff]  }
 0x3b7   :  { %5833 = vmatprep.subr.bf16.mxu1 %v8684_v26  ;;  %v8754_v26 = vld [vmem:[%s11964_s4 + $0x908] ss:$16 sps:$4 sm:$0xff]  }
 0x3b9   :  { %5588 = vmatpush1.bf16.msra.mxu0 %v8679_v21  ;;  %v8759_v21 = vld [vmem:[%s11964_s4 + $0x924] ss:$16 sps:$4 sm:$0xff]  }
 0x3ba   :  { %5834 = vmatpush1.bf16.msra.mxu1 %v8682_v43  ;;  %5589 = vmatprep.subr.bf16.mxu0 %v8687_v9  ;;  %v8762_v43 = vld [vmem:[%s11964_s4 + $0x92c] ss:$16 sps:$4 sm:$0xff]   ;;  %v8757_v9 = vld [vmem:[%s11964_s4 + $0x920] ss:$16 sps:$4 sm:$0xff]  }
 0x3bb   :  { %5835 = vmatprep.subr.bf16.mxu1 %v8690_v28  ;;  %v8760_v28 = vld [vmem:[%s11964_s4 + $0x928] ss:$16 sps:$4 sm:$0xff]  }
 0x3bd   :  { %5590 = vmatpush1.bf16.msra.mxu0 %v8685_v20  ;;  %v8765_v20 = vld [vmem:[%s11964_s4 + $0x944] ss:$16 sps:$4 sm:$0xff]  }
 0x3be   :  { %5836 = vmatpush1.bf16.msra.mxu1 %v8688_v29  ;;  %5591 = vmatprep.subr.bf16.mxu0 %v8693_v3  ;;  %v8768_v29 = vld [vmem:[%s11964_s4 + $0x94c] ss:$16 sps:$4 sm:$0xff]   ;;  %v8763_v3 = vld [vmem:[%s11964_s4 + $0x940] ss:$16 sps:$4 sm:$0xff]  }
 0x3bf   :  { %5837 = vmatprep.subr.bf16.mxu1 %v8696_v50  ;;  %v8766_v50 = vld [vmem:[%s11964_s4 + $0x948] ss:$16 sps:$4 sm:$0xff]  }
 0x3c1   :  { %5592 = vmatpush1.bf16.msra.mxu0 %v8691_v19  ;;  %v8771_v19 = vld [vmem:[%s11964_s4 + $0x964] ss:$16 sps:$4 sm:$0xff]  }
 0x3c2   :  { %5838 = vmatpush1.bf16.msra.mxu1 %v8694_v10  ;;  %5593 = vmatprep.subr.bf16.mxu0 %v8699_v31  ;;  %v8774_v10 = vld [vmem:[%s11964_s4 + $0x96c] ss:$16 sps:$4 sm:$0xff]   ;;  %v8769_v31 = vld [vmem:[%s11964_s4 + $0x960] ss:$16 sps:$4 sm:$0xff]  }
 0x3c3   :  { %5839 = vmatprep.subr.bf16.mxu1 %v8702_v42  ;;  %v8772_v42 = vld [vmem:[%s11964_s4 + $0x968] ss:$16 sps:$4 sm:$0xff]  }
 0x3c5   :  { %5594 = vmatpush1.bf16.msra.mxu0 %v8697_v33  ;;  %v8775_v33 = vld [vmem:[%s11964_s4 + $0x980] ss:$16 sps:$4 sm:$0xff]  }
 0x3c6   :  { %5840 = vmatpush1.bf16.msra.mxu1 %v8700_v36  ;;  %5604 = vmatprep.subr.bf16.mxu0 %v8705_v37  ;;  %v8778_v36 = vld [vmem:[%s11964_s4 + $0x988] ss:$16 sps:$4 sm:$0xff]   ;;  %v8783_v37 = vld [vmem:[%s11964_s4 + $0x9a4] ss:$16 sps:$4 sm:$0xff]  }
 0x3c7   :  { %5850 = vmatprep.subr.bf16.mxu1 %v8708_v16  ;;  %v8786_v16 = vld [vmem:[%s11964_s4 + $0x9ac] ss:$16 sps:$4 sm:$0xff]  }
 0x3c8   :  { %5596 = vmatmul.mubr.bf16.vlgmr.msra.gmra.mrb[12].mxu0 %v3108_v39 }
 0x3c9   :  { %5842 = vmatmul.mubr.bf16.vlgmr.msra.gmra.mrb[12].mxu1 %v3108_v39  ;;  %5605 = vmatpush1.bf16.msra.mxu0 %v8703_v38  ;;  %v8784_v38 = vld [vmem:[%s11964_s4 + $0x9a8] ss:$16 sps:$4 sm:$0xff]   ;;  %v8789_v39 = vld [vmem:[%s11964_s4 + $0x9c4] ss:$16 sps:$4 sm:$0xff]  }
 0x3ca   :  { %5636 = vmatprep.mubr.bf16.mxu0 %v3111_v4  ;;  %5851 = vmatpush1.bf16.msra.mxu1 %v8706_v40  ;;  %v8792_v40 = vld [vmem:[%s11964_s4 + $0x9cc] ss:$16 sps:$4 sm:$0xff]  }
 0x3cb   :  { %5882 = vmatprep.mubr.bf16.mxu1 %v3111_v4  ;;  %5606 = vmatprep.subr.bf16.mxu0 %v8711_v41  ;;  %v8787_v41 = vld [vmem:[%s11964_s4 + $0x9c0] ss:$16 sps:$4 sm:$0xff]   ;;  %v8790_v4 = vld [vmem:[%s11964_s4 + $0x9c8] ss:$16 sps:$4 sm:$0xff]  }
 0x3cc   :  { %5852 = vmatprep.subr.bf16.mxu1 %v8714_v47  ;;  %v8795_v47 = vld [vmem:[%s11964_s4 + $0x9e4] ss:$16 sps:$4 sm:$0xff]  }
 0x3cd   :  { %5607 = vmatpush1.bf16.msra.mxu0 %v8709_v62  ;;  %v8798_v62 = vld [vmem:[%s11964_s4 + $0x9ec] ss:$16 sps:$4 sm:$0xff]  }
 0x3ce   :  { %5853 = vmatpush1.bf16.msra.mxu1 %v8712_v48  ;;  %5608 = vmatprep.subr.bf16.mxu0 %v8717_v53  ;;  %v3017_v48 = vmul.f32 %v10638_v14, %v10546_v15  ;;  %v3077_v53 = vcombine.high %v10676_v52, %v10676_v52  ;;  %v8804_v15 = vld [vmem:[%s11964_s4 + $0xa0c] ss:$16 sps:$4 sm:$0xff]   ;;  %v8799_v52 = vld [vmem:[%s11964_s4 + $0xa00] ss:$16 sps:$4 sm:$0xff]  }
 0x3cf   :  { %5854 = vmatprep.subr.bf16.mxu1 %v8720_v54  ;;  %v8793_v54 = vld [vmem:[%s11964_s4 + $0x9e0] ss:$16 sps:$4 sm:$0xff]  }
 0x3d0   :  { %v3101_v14 = vadd.f32 %v3077_v53, %v3017_v48  ;;  %v8879_v48 = vld [vmem:[%s11964_s4 + $0xba4] ss:$16 sps:$4 sm:$0xff]   ;;  %v8882_v53 = vld [vmem:[%s11964_s4 + $0xbac] ss:$16 sps:$4 sm:$0xff]  }
 0x3d1   :  { %5609 = vmatpush1.bf16.msra.mxu0 %v8715_v56  ;;  %v8796_v56 = vld [vmem:[%s11964_s4 + $0x9e8] ss:$16 sps:$4 sm:$0xff]  }
 0x3d2   :  { %5855 = vmatpush1.bf16.msra.mxu1 %v8718_v49  ;;  %5610 = vmatprep.subr.bf16.mxu0 %v8723_v2  ;;  %v8801_v49 = vld [vmem:[%s11964_s4 + $0xa04] ss:$16 sps:$4 sm:$0xff]   ;;  %v3110_v2 = vpack.c.bf16 %v10687_v1, %v10687_v1  ;;  %v8805_v1 = vld [vmem:[%s11964_s4 + $0xa20] ss:$16 sps:$4 sm:$0xff]  }
 0x3d3   :  { %5856 = vmatprep.subr.bf16.mxu1 %v8726_v23  ;;  %v8802_v23 = vld [vmem:[%s11964_s4 + $0xa08] ss:$16 sps:$4 sm:$0xff]  }
 0x3d5   :  { %5611 = vmatpush1.bf16.msra.mxu0 %v8721_v57  ;;  %v8807_v57 = vld [vmem:[%s11964_s4 + $0xa24] ss:$16 sps:$4 sm:$0xff]  }
 0x3d6   :  { %5857 = vmatpush1.bf16.msra.mxu1 %v8724_v58  ;;  %5612 = vmatprep.subr.bf16.mxu0 %v8729_v59  ;;  %v3113_v58 = vpack.c.bf16 %v3101_v14, %v3101_v14  ;;  %v8810_v59 = vld [vmem:[%s11964_s4 + $0xa2c] ss:$16 sps:$4 sm:$0xff]   ;;  %v8883_v14 = vld [vmem:[%s11964_s4 + $0xbc0] ss:$16 sps:$4 sm:$0xff]  }
 0x3d7   :  { %5858 = vmatprep.subr.bf16.mxu1 %v8732_v27  ;;  %v8808_v27 = vld [vmem:[%s11964_s4 + $0xa28] ss:$16 sps:$4 sm:$0xff]  }
 0x3d9   :  { %5613 = vmatpush1.bf16.msra.mxu0 %v8727_v61  ;;  %v8813_v61 = vld [vmem:[%s11964_s4 + $0xa44] ss:$16 sps:$4 sm:$0xff]  }
 0x3da   :  { %5859 = vmatpush1.bf16.msra.mxu1 %v8730_v0  ;;  %5614 = vmatprep.subr.bf16.mxu0 %v8735_v63  ;;  %v8816_v0 = vld [vmem:[%s11964_s4 + $0xa4c] ss:$16 sps:$4 sm:$0xff]   ;;  %v8811_v63 = vld [vmem:[%s11964_s4 + $0xa40] ss:$16 sps:$4 sm:$0xff]  }
 0x3db   :  { %5860 = vmatprep.subr.bf16.mxu1 %v8738_v5  ;;  %v8814_v5 = vld [vmem:[%s11964_s4 + $0xa48] ss:$16 sps:$4 sm:$0xff]  }
 0x3dd   :  { %5615 = vmatpush1.bf16.msra.mxu0 %v8733_v6  ;;  %v8819_v6 = vld [vmem:[%s11964_s4 + $0xa64] ss:$16 sps:$4 sm:$0xff]  }
 0x3de   :  { %5861 = vmatpush1.bf16.msra.mxu1 %v8736_v7  ;;  %5616 = vmatprep.subr.bf16.mxu0 %v8741_v8  ;;  %v8822_v7 = vld [vmem:[%s11964_s4 + $0xa6c] ss:$16 sps:$4 sm:$0xff]   ;;  %v8817_v8 = vld [vmem:[%s11964_s4 + $0xa60] ss:$16 sps:$4 sm:$0xff]  }
 0x3df   :  { %5862 = vmatprep.subr.bf16.mxu1 %v8744_v30  ;;  %v8820_v30 = vld [vmem:[%s11964_s4 + $0xa68] ss:$16 sps:$4 sm:$0xff]  }
 0x3e1   :  { %5617 = vmatpush1.bf16.msra.mxu0 %v8739_v11  ;;  %v8825_v11 = vld [vmem:[%s11964_s4 + $0xa84] ss:$16 sps:$4 sm:$0xff]  }
 0x3e2   :  { %5863 = vmatpush1.bf16.msra.mxu1 %v8742_v12  ;;  %5618 = vmatprep.subr.bf16.mxu0 %v8747_v13  ;;  %v8828_v12 = vld [vmem:[%s11964_s4 + $0xa8c] ss:$16 sps:$4 sm:$0xff]   ;;  %v8823_v13 = vld [vmem:[%s11964_s4 + $0xa80] ss:$16 sps:$4 sm:$0xff]  }
 0x3e3   :  { %5864 = vmatprep.subr.bf16.mxu1 %v8750_v17  ;;  %v8826_v17 = vld [vmem:[%s11964_s4 + $0xa88] ss:$16 sps:$4 sm:$0xff]  }
 0x3e5   :  { %5619 = vmatpush1.bf16.msra.mxu0 %v8745_v18  ;;  %v8831_v18 = vld [vmem:[%s11964_s4 + $0xaa4] ss:$16 sps:$4 sm:$0xff]  }
 0x3e6   :  { %5865 = vmatpush1.bf16.msra.mxu1 %v8748_v22  ;;  %5620 = vmatprep.subr.bf16.mxu0 %v8753_v51  ;;  %v8834_v22 = vld [vmem:[%s11964_s4 + $0xaac] ss:$16 sps:$4 sm:$0xff]   ;;  %v8829_v51 = vld [vmem:[%s11964_s4 + $0xaa0] ss:$16 sps:$4 sm:$0xff]  }
 0x3e7   :  { %5866 = vmatprep.subr.bf16.mxu1 %v8756_v24  ;;  %v8832_v24 = vld [vmem:[%s11964_s4 + $0xaa8] ss:$16 sps:$4 sm:$0xff]  }
 0x3e9   :  { %5621 = vmatpush1.bf16.msra.mxu0 %v8751_v25  ;;  %v8837_v25 = vld [vmem:[%s11964_s4 + $0xac4] ss:$16 sps:$4 sm:$0xff]  }
 0x3ea   :  { %5867 = vmatpush1.bf16.msra.mxu1 %v8754_v26  ;;  %5622 = vmatprep.subr.bf16.mxu0 %v8759_v21  ;;  %v8840_v26 = vld [vmem:[%s11964_s4 + $0xacc] ss:$16 sps:$4 sm:$0xff]   ;;  %v8835_v21 = vld [vmem:[%s11964_s4 + $0xac0] ss:$16 sps:$4 sm:$0xff]  }
 0x3eb   :  { %5868 = vmatprep.subr.bf16.mxu1 %v8762_v43  ;;  %v8838_v43 = vld [vmem:[%s11964_s4 + $0xac8] ss:$16 sps:$4 sm:$0xff]  }
 0x3ed   :  { %5623 = vmatpush1.bf16.msra.mxu0 %v8757_v9  ;;  %v8843_v9 = vld [vmem:[%s11964_s4 + $0xae4] ss:$16 sps:$4 sm:$0xff]  }
 0x3ee   :  { %5869 = vmatpush1.bf16.msra.mxu1 %v8760_v28  ;;  %5624 = vmatprep.subr.bf16.mxu0 %v8765_v20  ;;  %v8846_v28 = vld [vmem:[%s11964_s4 + $0xaec] ss:$16 sps:$4 sm:$0xff]   ;;  %v8841_v20 = vld [vmem:[%s11964_s4 + $0xae0] ss:$16 sps:$4 sm:$0xff]  }
 0x3ef   :  { %5870 = vmatprep.subr.bf16.mxu1 %v8768_v29  ;;  %v8844_v29 = vld [vmem:[%s11964_s4 + $0xae8] ss:$16 sps:$4 sm:$0xff]  }
 0x3f1   :  { %5625 = vmatpush1.bf16.msra.mxu0 %v8763_v3  ;;  %v8849_v3 = vld [vmem:[%s11964_s4 + $0xb04] ss:$16 sps:$4 sm:$0xff]  }
 0x3f2   :  { %5871 = vmatpush1.bf16.msra.mxu1 %v8766_v50  ;;  %5626 = vmatprep.subr.bf16.mxu0 %v8771_v19  ;;  %v8852_v50 = vld [vmem:[%s11964_s4 + $0xb0c] ss:$16 sps:$4 sm:$0xff]   ;;  %v8847_v19 = vld [vmem:[%s11964_s4 + $0xb00] ss:$16 sps:$4 sm:$0xff]  }
 0x3f3   :  { %5872 = vmatprep.subr.bf16.mxu1 %v8774_v10  ;;  %v8850_v10 = vld [vmem:[%s11964_s4 + $0xb08] ss:$16 sps:$4 sm:$0xff]  }
 0x3f5   :  { %5627 = vmatpush1.bf16.msra.mxu0 %v8769_v31  ;;  %v8855_v31 = vld [vmem:[%s11964_s4 + $0xb24] ss:$16 sps:$4 sm:$0xff]  }
 0x3f6   :  { %5873 = vmatpush1.bf16.msra.mxu1 %v8772_v42  ;;  %5628 = vmatprep.subr.bf16.mxu0 %v8777_v35  ;;  %v8858_v42 = vld [vmem:[%s11964_s4 + $0xb2c] ss:$16 sps:$4 sm:$0xff]   ;;  %v8853_v35 = vld [vmem:[%s11964_s4 + $0xb20] ss:$16 sps:$4 sm:$0xff]  }
 0x3f7   :  { %5874 = vmatprep.subr.bf16.mxu1 %v8780_v32  ;;  %v8856_v32 = vld [vmem:[%s11964_s4 + $0xb28] ss:$16 sps:$4 sm:$0xff]  }
 0x3f9   :  { %5629 = vmatpush1.bf16.msra.mxu0 %v8775_v33  ;;  %v8861_v33 = vld [vmem:[%s11964_s4 + $0xb44] ss:$16 sps:$4 sm:$0xff]  }
 0x3fa   :  { %5875 = vmatpush1.bf16.msra.mxu1 %v8778_v36  ;;  %5630 = vmatprep.subr.bf16.mxu0 %v8783_v37  ;;  %v8864_v36 = vld [vmem:[%s11964_s4 + $0xb4c] ss:$16 sps:$4 sm:$0xff]   ;;  %v8859_v37 = vld [vmem:[%s11964_s4 + $0xb40] ss:$16 sps:$4 sm:$0xff]  }
 0x3fb   :  { %5876 = vmatprep.subr.bf16.mxu1 %v8786_v16  ;;  %v8862_v16 = vld [vmem:[%s11964_s4 + $0xb48] ss:$16 sps:$4 sm:$0xff]  }
 0x3fd   :  { %5631 = vmatpush1.bf16.msra.mxu0 %v8781_v34  ;;  %v8867_v34 = vld [vmem:[%s11964_s4 + $0xb64] ss:$16 sps:$4 sm:$0xff]  }
 0x3fe   :  { %5877 = vmatpush1.bf16.msra.mxu1 %v8784_v38  ;;  %5632 = vmatprep.subr.bf16.mxu0 %v8789_v39  ;;  %v8870_v38 = vld [vmem:[%s11964_s4 + $0xb6c] ss:$16 sps:$4 sm:$0xff]   ;;  %v8865_v39 = vld [vmem:[%s11964_s4 + $0xb60] ss:$16 sps:$4 sm:$0xff]  }
 0x3ff   :  { %5878 = vmatprep.subr.bf16.mxu1 %v8792_v40  ;;  %v8868_v40 = vld [vmem:[%s11964_s4 + $0xb68] ss:$16 sps:$4 sm:$0xff]  }
 0x401   :  { %5633 = vmatpush1.bf16.msra.mxu0 %v8787_v41  ;;  %v8873_v41 = vld [vmem:[%s11964_s4 + $0xb84] ss:$16 sps:$4 sm:$0xff]  }
 0x402   :  { %5879 = vmatpush1.bf16.msra.mxu1 %v8790_v4  ;;  %5634 = vmatprep.subr.bf16.mxu0 %v8795_v47  ;;  %v8876_v4 = vld [vmem:[%s11964_s4 + $0xb8c] ss:$16 sps:$4 sm:$0xff]   ;;  %v8871_v47 = vld [vmem:[%s11964_s4 + $0xb80] ss:$16 sps:$4 sm:$0xff]  }
 0x403   :  { %5880 = vmatprep.subr.bf16.mxu1 %v8798_v62  ;;  %v8874_v62 = vld [vmem:[%s11964_s4 + $0xb88] ss:$16 sps:$4 sm:$0xff]  }
 0x405   :  { %5635 = vmatpush1.bf16.msra.mxu0 %v8793_v54  ;;  %v8877_v54 = vld [vmem:[%s11964_s4 + $0xba0] ss:$16 sps:$4 sm:$0xff]  }
 0x406   :  { %5881 = vmatpush1.bf16.msra.mxu1 %v8796_v56  ;;  %5645 = vmatprep.subr.bf16.mxu0 %v8801_v49  ;;  %v8880_v56 = vld [vmem:[%s11964_s4 + $0xba8] ss:$16 sps:$4 sm:$0xff]   ;;  %v8885_v49 = vld [vmem:[%s11964_s4 + $0xbc4] ss:$16 sps:$4 sm:$0xff]  }
 0x407   :  { %5891 = vmatprep.subr.bf16.mxu1 %v8804_v15  ;;  %v8888_v15 = vld [vmem:[%s11964_s4 + $0xbcc] ss:$16 sps:$4 sm:$0xff]  }
 0x408   :  { %5637 = vmatmul.mubr.bf16.vlgmr.msra.gmra.mrb[12].mxu0 %v3110_v2 }
 0x409   :  { %5883 = vmatmul.mubr.bf16.vlgmr.msra.gmra.mrb[12].mxu1 %v3110_v2  ;;  %5646 = vmatpush1.bf16.msra.mxu0 %v8799_v52  ;;  %v8886_v52 = vld [vmem:[%s11964_s4 + $0xbc8] ss:$16 sps:$4 sm:$0xff]   ;;  %v8891_v2 = vld [vmem:[%s11964_s4 + $0xbe4] ss:$16 sps:$4 sm:$0xff]  }
 0x40a   :  { %5677 = vmatprep.mubr.bf16.mxu0 %v3113_v58  ;;  %5892 = vmatpush1.bf16.msra.mxu1 %v8802_v23  ;;  %v8894_v23 = vld [vmem:[%s11964_s4 + $0xbec] ss:$16 sps:$4 sm:$0xff]  }
 0x40b   :  { %5923 = vmatprep.mubr.bf16.mxu1 %v3113_v58  ;;  %5647 = vmatprep.subr.bf16.mxu0 %v8807_v57  ;;  %v8889_v57 = vld [vmem:[%s11964_s4 + $0xbe0] ss:$16 sps:$4 sm:$0xff]   ;;  %v8892_v58 = vld [vmem:[%s11964_s4 + $0xbe8] ss:$16 sps:$4 sm:$0xff]  }
 0x40c   :  { %5893 = vmatprep.subr.bf16.mxu1 %v8810_v59  ;;  %v8897_v59 = vld [vmem:[%s11966_s6 + $0x4] ss:$8 sps:$4 sm:$0xff]  }
 0x40d   :  { %5648 = vmatpush1.bf16.msra.mxu0 %v8805_v1  ;;  %v8895_v1 = vld [vmem:[%s11966_s6] ss:$8 sps:$4 sm:$0xff]  }
 0x40e   :  { %5894 = vmatpush1.bf16.msra.mxu1 %v8808_v27  ;;  %5649 = vmatprep.subr.bf16.mxu0 %v8813_v61  ;;  %v3112_v27 = vpack.c.bf16 %v10696_v46, %v10696_v46  ;;  %v8900_v61 = vld [vmem:[%s11966_s6 + $0x14] ss:$8 sps:$4 sm:$0xff]   ;;  %v8901_v46 = vld [vmem:[%s11966_s6 + $0x20] ss:$8 sps:$4 sm:$0xff]  }
 0x40f   :  { %5895 = vmatprep.subr.bf16.mxu1 %v8816_v0  ;;  %v8898_v0 = vld [vmem:[%s11966_s6 + $0x10] ss:$8 sps:$4 sm:$0xff]  }
 0x411   :  { %5650 = vmatpush1.bf16.msra.mxu0 %v8811_v63  ;;  %v8903_v63 = vld [vmem:[%s11966_s6 + $0x24] ss:$8 sps:$4 sm:$0xff]  }
 0x412   :  { %5896 = vmatpush1.bf16.msra.mxu1 %v8814_v5  ;;  %5651 = vmatprep.subr.bf16.mxu0 %v8819_v6  ;;  %v8906_v5 = vld [vmem:[%s11966_s6 + $0x34] ss:$8 sps:$4 sm:$0xff]   ;;  %v8904_v6 = vld [vmem:[%s11966_s6 + $0x30] ss:$8 sps:$4 sm:$0xff]  }
 0x413   :  { %5897 = vmatprep.subr.bf16.mxu1 %v8822_v7  ;;  %v8909_v7 = vld [vmem:[%s11966_s6 + $0x44] ss:$8 sps:$4 sm:$0xff]  }
 0x415   :  { %5652 = vmatpush1.bf16.msra.mxu0 %v8817_v8  ;;  %v8907_v8 = vld [vmem:[%s11966_s6 + $0x40] ss:$8 sps:$4 sm:$0xff]  }
 0x416   :  { %5898 = vmatpush1.bf16.msra.mxu1 %v8820_v30  ;;  %5653 = vmatprep.subr.bf16.mxu0 %v8825_v11  ;;  %v8912_v30 = vld [vmem:[%s11966_s6 + $0x54] ss:$8 sps:$4 sm:$0xff]   ;;  %v8910_v11 = vld [vmem:[%s11966_s6 + $0x50] ss:$8 sps:$4 sm:$0xff]  }
 0x417   :  { %5899 = vmatprep.subr.bf16.mxu1 %v8828_v12  ;;  %v8915_v12 = vld [vmem:[%s11966_s6 + $0x64] ss:$8 sps:$4 sm:$0xff]  }
 0x419   :  { %5654 = vmatpush1.bf16.msra.mxu0 %v8823_v13  ;;  %v8913_v13 = vld [vmem:[%s11966_s6 + $0x60] ss:$8 sps:$4 sm:$0xff]  }
 0x41a   :  { %5900 = vmatpush1.bf16.msra.mxu1 %v8826_v17  ;;  %5655 = vmatprep.subr.bf16.mxu0 %v8831_v18  ;;  %v8918_v17 = vld [vmem:[%s11966_s6 + $0x74] ss:$8 sps:$4 sm:$0xff]   ;;  %v8916_v18 = vld [vmem:[%s11966_s6 + $0x70] ss:$8 sps:$4 sm:$0xff]  }
 0x41b   :  { %5901 = vmatprep.subr.bf16.mxu1 %v8834_v22  ;;  %v8921_v22 = vld [vmem:[%s11966_s6 + $0x84] ss:$8 sps:$4 sm:$0xff]  }
 0x41d   :  { %5656 = vmatpush1.bf16.msra.mxu0 %v8829_v51  ;;  %v8919_v51 = vld [vmem:[%s11966_s6 + $0x80] ss:$8 sps:$4 sm:$0xff]  }
 0x41e   :  { %5902 = vmatpush1.bf16.msra.mxu1 %v8832_v24  ;;  %5657 = vmatprep.subr.bf16.mxu0 %v8837_v25  ;;  %v8924_v24 = vld [vmem:[%s11966_s6 + $0x94] ss:$8 sps:$4 sm:$0xff]   ;;  %v8922_v25 = vld [vmem:[%s11966_s6 + $0x90] ss:$8 sps:$4 sm:$0xff]  }
 0x41f   :  { %5903 = vmatprep.subr.bf16.mxu1 %v8840_v26  ;;  %v8927_v26 = vld [vmem:[%s11966_s6 + $0xa4] ss:$8 sps:$4 sm:$0xff]  }
 0x421   :  { %5658 = vmatpush1.bf16.msra.mxu0 %v8835_v21  ;;  %v8925_v21 = vld [vmem:[%s11966_s6 + $0xa0] ss:$8 sps:$4 sm:$0xff]  }
 0x422   :  { %5904 = vmatpush1.bf16.msra.mxu1 %v8838_v43  ;;  %5659 = vmatprep.subr.bf16.mxu0 %v8843_v9  ;;  %v8930_v43 = vld [vmem:[%s11966_s6 + $0xb4] ss:$8 sps:$4 sm:$0xff]   ;;  %v8928_v9 = vld [vmem:[%s11966_s6 + $0xb0] ss:$8 sps:$4 sm:$0xff]  }
 0x423   :  { %5905 = vmatprep.subr.bf16.mxu1 %v8846_v28  ;;  %v8933_v28 = vld [vmem:[%s11966_s6 + $0xc4] ss:$8 sps:$4 sm:$0xff]  }
 0x425   :  { %5660 = vmatpush1.bf16.msra.mxu0 %v8841_v20  ;;  %v8931_v20 = vld [vmem:[%s11966_s6 + $0xc0] ss:$8 sps:$4 sm:$0xff]  }
 0x426   :  { %5906 = vmatpush1.bf16.msra.mxu1 %v8844_v29  ;;  %5661 = vmatprep.subr.bf16.mxu0 %v8849_v3  ;;  %v8936_v29 = vld [vmem:[%s11966_s6 + $0xd4] ss:$8 sps:$4 sm:$0xff]   ;;  %v8934_v3 = vld [vmem:[%s11966_s6 + $0xd0] ss:$8 sps:$4 sm:$0xff]  }
 0x427   :  { %5907 = vmatprep.subr.bf16.mxu1 %v8852_v50  ;;  %v8939_v50 = vld [vmem:[%s11966_s6 + $0xe4] ss:$8 sps:$4 sm:$0xff]  }
 0x429   :  { %5662 = vmatpush1.bf16.msra.mxu0 %v8847_v19  ;;  %v8937_v19 = vld [vmem:[%s11966_s6 + $0xe0] ss:$8 sps:$4 sm:$0xff]  }
 0x42a   :  { %5908 = vmatpush1.bf16.msra.mxu1 %v8850_v10  ;;  %5663 = vmatprep.subr.bf16.mxu0 %v8855_v31  ;;  %v8942_v10 = vld [vmem:[%s11966_s6 + $0xf4] ss:$8 sps:$4 sm:$0xff]   ;;  %v8940_v31 = vld [vmem:[%s11966_s6 + $0xf0] ss:$8 sps:$4 sm:$0xff]  }
 0x42b   :  { %5909 = vmatprep.subr.bf16.mxu1 %v8858_v42  ;;  %v8945_v42 = vld [vmem:[%s11966_s6 + $0x104] ss:$8 sps:$4 sm:$0xff]  }
 0x42d   :  { %5664 = vmatpush1.bf16.msra.mxu0 %v8853_v35  ;;  %v8991_v35 = vld [vmem:[%s11968_s8 + $0x40] sm:$0xff]  }
 0x42e   :  { %5910 = vmatpush1.bf16.msra.mxu1 %v8856_v32  ;;  %5665 = vmatprep.subr.bf16.mxu0 %v8861_v33  ;;  %v8992_v32 = vld [vmem:[%s11968_s8] sm:$0xff]   ;;  %v8993_v33 = vld [vmem:[%s11968_s8 + $0x48] sm:$0xff]  }
 0x42f   :  { %5911 = vmatprep.subr.bf16.mxu1 %v8864_v36  ;;  %v8994_v36 = vld [vmem:[%s11968_s8 + $0x8] sm:$0xff]  }
 0x431   :  { %5666 = vmatpush1.bf16.msra.mxu0 %v8859_v37  ;;  %v8995_v37 = vld [vmem:[%s11968_s8 + $0x50] sm:$0xff]  }
 0x432   :  { %5912 = vmatpush1.bf16.msra.mxu1 %v8862_v16  ;;  %5667 = vmatprep.subr.bf16.mxu0 %v8867_v34  ;;  %v8996_v16 = vld [vmem:[%s11968_s8 + $0x10] sm:$0xff]   ;;  %v8997_v34 = vld [vmem:[%s11968_s8 + $0x58] sm:$0xff]  }
 0x433   :  { %5913 = vmatprep.subr.bf16.mxu1 %v8870_v38  ;;  %v8998_v38 = vld [vmem:[%s11968_s8 + $0x18] sm:$0xff]  }
 0x435   :  { %5668 = vmatpush1.bf16.msra.mxu0 %v8865_v39  ;;  %v8999_v39 = vld [vmem:[%s11968_s8 + $0x60] sm:$0xff]  }
 0x436   :  { %5914 = vmatpush1.bf16.msra.mxu1 %v8868_v40  ;;  %5669 = vmatprep.subr.bf16.mxu0 %v8873_v41  ;;  %v9000_v40 = vld [vmem:[%s11968_s8 + $0x20] sm:$0xff]   ;;  %v9001_v41 = vld [vmem:[%s11968_s8 + $0x68] sm:$0xff]  }
 0x437   :  { %5915 = vmatprep.subr.bf16.mxu1 %v8876_v4  ;;  %v9002_v4 = vld [vmem:[%s11968_s8 + $0x28] sm:$0xff]  }
 0x439   :  { %5670 = vmatpush1.bf16.msra.mxu0 %v8871_v47  ;;  %v11795_v47 = vld [vmem:[%s11965_s5] sm:$0xf] }
 0x43a   :  { %5916 = vmatpush1.bf16.msra.mxu1 %v8874_v62  ;;  %5671 = vmatprep.subr.bf16.mxu0 %v8879_v48  ;;  %v3503_v62 = vrot.slane %v11795_v47, %v10459_v44  ;;  %v3507_v48 = vrot.slane %v11795_v47, %v10462_v45 }
 0x43b   :  { %5917 = vmatprep.subr.bf16.mxu1 %v8882_v53  ;;  %v3515_v53 = vrot.slane %v11795_v47, %v10476_v55 }
 0x43d   :  { %5672 = vmatpush1.bf16.msra.mxu0 %v8877_v54 }
 0x43e   :  { %5918 = vmatpush1.bf16.msra.mxu1 %v8880_v56  ;;  %5673 = vmatprep.subr.bf16.mxu0 %v8885_v49 }
 0x43f   :  { %5919 = vmatprep.subr.bf16.mxu1 %v8888_v15 }
 0x441   :  { %5674 = vmatpush1.bf16.msra.mxu0 %v8883_v14 }
 0x442   :  { %5920 = vmatpush1.bf16.msra.mxu1 %v8886_v52  ;;  %5675 = vmatprep.subr.bf16.mxu0 %v8891_v2 }
 0x443   :  { %5921 = vmatprep.subr.bf16.mxu1 %v8894_v23 }
 0x445   :  { %5676 = vmatpush1.bf16.msra.mxu0 %v8889_v57 }
 0x446   :  { %5922 = vmatpush1.bf16.msra.mxu1 %v8892_v58  ;;  %6344 = vmatprep.subr.bf16.mxu0 %v8897_v59 }
 0x447   :  { %7601 = vmatprep.subr.bf16.mxu1 %v8991_v35  ;;  %v8984_v35 = vld [vmem:[%s11966_s6 + $0x1d4] ss:$8 sps:$4 sm:$0xff]  }
 0x448   :  { %5678 = vmatmul.mubr.bf16.vlgmr.msra.gmra.mrb[12].mxu0 %v3112_v27 }
 0x449   :  { %5924 = vmatmul.mubr.bf16.vlgmr.msra.gmra.mrb[12].mxu1 %v3112_v27  ;;  %6345 = vmatpush1.bf16.msra.mxu0 %v8895_v1 }
 0x44a   :  { %6346 = vmatprep.subr.bf16.mxu0 %v8900_v61  ;;  %7602 = vmatpush3.bf16.msra.mxu1 %v8992_v32  ;;  %v3511_v32 = vrot.slane %v11795_v47, %v10470_v60  ;;  %v8990_v60 = vld [vmem:[%s11966_s6 + $0x1f4] ss:$8 sps:$4 sm:$0xff]  }
 0x44b   :  { %7603 = vmatprep.subr.bf16.mxu1 %v8993_v33  ;;  %v8982_v33 = vld [vmem:[%s11966_s6 + $0x1d0] ss:$8 sps:$4 sm:$0xff]  }
 0x44c   :  { %v9005_v47 = vld [vmem:[%s11968_s8 + $0x78] sm:$0xff]  }
 0x44d   :  { %6347 = vmatpush1.bf16.msra.mxu0 %v8898_v0 }
 0x44e   :  { %6348 = vmatprep.subr.bf16.mxu0 %v8903_v63  ;;  %7604 = vmatpush3.bf16.msra.mxu1 %v8994_v36  ;;  %v8987_v36 = vld [vmem:[%s11966_s6 + $0x1e4] ss:$8 sps:$4 sm:$0xff]  }
 0x44f   :  { %7605 = vmatprep.subr.bf16.mxu1 %v8995_v37 }
 0x451   :  { %6349 = vmatpush1.bf16.msra.mxu0 %v8901_v46  ;;  %v8943_v46 = vld [vmem:[%s11966_s6 + $0x100] ss:$8 sps:$4 sm:$0xff]  }
 0x452   :  { %6350 = vmatprep.subr.bf16.mxu0 %v8906_v5  ;;  %7606 = vmatpush3.bf16.msra.mxu1 %v8996_v16  ;;  %v8985_v16 = vld [vmem:[%s11966_s6 + $0x1e0] ss:$8 sps:$4 sm:$0xff]  }
 0x453   :  { %7607 = vmatprep.subr.bf16.mxu1 %v8997_v34 }
 0x455   :  { %6351 = vmatpush1.bf16.msra.mxu0 %v8904_v6 }
 0x456   :  { %6352 = vmatprep.subr.bf16.mxu0 %v8909_v7  ;;  %7608 = vmatpush3.bf16.msra.mxu1 %v8998_v38  ;;  %v8948_v7 = vld [vmem:[%s11966_s6 + $0x114] ss:$8 sps:$4 sm:$0xff]   ;;  %v8988_v38 = vld [vmem:[%s11966_s6 + $0x1f0] ss:$8 sps:$4 sm:$0xff]  }
 0x457   :  { %7609 = vmatprep.subr.bf16.mxu1 %v8999_v39 }
 0x459   :  { %6353 = vmatpush1.bf16.msra.mxu0 %v8907_v8 }
 0x45a   :  { %6354 = vmatprep.subr.bf16.mxu0 %v8912_v30  ;;  %7610 = vmatpush3.bf16.msra.mxu1 %v9000_v40  ;;  %v8946_v30 = vld [vmem:[%s11966_s6 + $0x110] ss:$8 sps:$4 sm:$0xff]  }
 0x45b   :  { %7611 = vmatprep.subr.bf16.mxu1 %v9001_v41  ;;  %v9003_v41 = vld [vmem:[%s11968_s8 + $0x70] sm:$0xff]  }
 0x45d   :  { %6355 = vmatpush1.bf16.msra.mxu0 %v8910_v11  ;;  %v8951_v11 = vld [vmem:[%s11966_s6 + $0x124] ss:$8 sps:$4 sm:$0xff]  }
 0x45e   :  { %6356 = vmatprep.subr.bf16.mxu0 %v8915_v12  ;;  %7612 = vmatpush3.bf16.msra.mxu1 %v9002_v4  ;;  %v8949_v12 = vld [vmem:[%s11966_s6 + $0x120] ss:$8 sps:$4 sm:$0xff]   ;;  %v9004_v4 = vld [vmem:[%s11968_s8 + $0x30] sm:$0xff]  }
 0x45f   :  { %7613 = vmatprep.subr.bf16.mxu1 %v9003_v41 }
 0x461   :  { %6357 = vmatpush1.bf16.msra.mxu0 %v8913_v13  ;;  %v8954_v13 = vld [vmem:[%s11966_s6 + $0x134] ss:$8 sps:$4 sm:$0xff]  }
 0x462   :  { %6358 = vmatprep.subr.bf16.mxu0 %v8918_v17  ;;  %v8952_v17 = vld [vmem:[%s11966_s6 + $0x130] ss:$8 sps:$4 sm:$0xff]   ;;  %7614 = vmatpush3.bf16.msra.mxu1 %v9004_v4 }
 0x463   :  { %7615 = vmatprep.subr.bf16.mxu1 %v9005_v47 }
 0x465   :  { %6359 = vmatpush1.bf16.msra.mxu0 %v8916_v18  ;;  %v8957_v18 = vld [vmem:[%s11966_s6 + $0x144] ss:$8 sps:$4 sm:$0xff]  }
 0x466   :  { %6360 = vmatprep.subr.bf16.mxu0 %v8921_v22  ;;  %v8955_v22 = vld [vmem:[%s11966_s6 + $0x140] ss:$8 sps:$4 sm:$0xff]  }
 0x469   :  { %6361 = vmatpush1.bf16.msra.mxu0 %v8919_v51  ;;  %v8960_v51 = vld [vmem:[%s11966_s6 + $0x154] ss:$8 sps:$4 sm:$0xff]  }
 0x46a   :  { %6362 = vmatprep.subr.bf16.mxu0 %v8924_v24  ;;  %v8958_v24 = vld [vmem:[%s11966_s6 + $0x150] ss:$8 sps:$4 sm:$0xff]  }
 0x46d   :  { %6363 = vmatpush1.bf16.msra.mxu0 %v8922_v25  ;;  %v8963_v25 = vld [vmem:[%s11966_s6 + $0x164] ss:$8 sps:$4 sm:$0xff]  }
 0x46e   :  { %6364 = vmatprep.subr.bf16.mxu0 %v8927_v26  ;;  %v8961_v26 = vld [vmem:[%s11966_s6 + $0x160] ss:$8 sps:$4 sm:$0xff]  }
 0x471   :  { %6365 = vmatpush1.bf16.msra.mxu0 %v8925_v21  ;;  %v8966_v21 = vld [vmem:[%s11966_s6 + $0x174] ss:$8 sps:$4 sm:$0xff]  }
 0x472   :  { %6366 = vmatprep.subr.bf16.mxu0 %v8930_v43  ;;  %v8964_v43 = vld [vmem:[%s11966_s6 + $0x170] ss:$8 sps:$4 sm:$0xff]  }
 0x475   :  { %6367 = vmatpush1.bf16.msra.mxu0 %v8928_v9  ;;  %v8969_v9 = vld [vmem:[%s11966_s6 + $0x184] ss:$8 sps:$4 sm:$0xff]  }
 0x476   :  { %6368 = vmatprep.subr.bf16.mxu0 %v8933_v28  ;;  %v8967_v28 = vld [vmem:[%s11966_s6 + $0x180] ss:$8 sps:$4 sm:$0xff]  }
 0x479   :  { %6369 = vmatpush1.bf16.msra.mxu0 %v8931_v20  ;;  %v8972_v20 = vld [vmem:[%s11966_s6 + $0x194] ss:$8 sps:$4 sm:$0xff]  }
 0x47a   :  { %6370 = vmatprep.subr.bf16.mxu0 %v8936_v29  ;;  %v8970_v29 = vld [vmem:[%s11966_s6 + $0x190] ss:$8 sps:$4 sm:$0xff]  }
 0x47d   :  { %6371 = vmatpush1.bf16.msra.mxu0 %v8934_v3  ;;  %v8975_v3 = vld [vmem:[%s11966_s6 + $0x1a4] ss:$8 sps:$4 sm:$0xff]  }
 0x47e   :  { %6372 = vmatprep.subr.bf16.mxu0 %v8939_v50  ;;  %v8973_v50 = vld [vmem:[%s11966_s6 + $0x1a0] ss:$8 sps:$4 sm:$0xff]  }
 0x481   :  { %6373 = vmatpush1.bf16.msra.mxu0 %v8937_v19  ;;  %v8978_v19 = vld [vmem:[%s11966_s6 + $0x1b4] ss:$8 sps:$4 sm:$0xff]  }
 0x482   :  { %6374 = vmatprep.subr.bf16.mxu0 %v8942_v10  ;;  %v8976_v10 = vld [vmem:[%s11966_s6 + $0x1b0] ss:$8 sps:$4 sm:$0xff]  }
 0x485   :  { %6375 = vmatpush1.bf16.msra.mxu0 %v8940_v31  ;;  %v8981_v31 = vld [vmem:[%s11966_s6 + $0x1c4] ss:$8 sps:$4 sm:$0xff]  }
 0x486   :  { %6385 = vmatprep.subr.bf16.mxu0 %v8945_v42  ;;  %v8979_v42 = vld [vmem:[%s11966_s6 + $0x1c0] ss:$8 sps:$4 sm:$0xff]  }
 0x51b   :  { %v5679_v54 = vpop.f32.mrb[12].mxu0 }
 0x51c   :  { %v7664_v56 = vadd.f32 %v5679_v54, %v3503_v62  ;;  %v11803_v49 = vpop.f32.mrb[12].mxu1  ;;  %v5681_v15 = vpop.f32.mrb[13].mxu0  ;;  %v9006_v62 = vld [vmem:[%s11968_s8 + $0x38] sm:$0xff]  }
 0x51d   :  { %v7665_v14 = vadd.f32 %v5681_v15, %v3507_v48  ;;  %v5927_v52 = vpop.f32.mrb[13].mxu1  ;;  %v5683_v2 = vpop.f32.mrb[14].mxu0  ;;  %v7666_v37 = vadd.f32 %v11803_v49, %v3511_v32  ;;  %7616 = vmatpush3.bf16.msra.mxu1 %v9006_v62  ;;  %v9042_v48 = vmov 0.0  }
 0x51e   :  { %vm5932_vm13 = vcmp.gt.f32.partialorder %v7664_v56, 0.0  ;;  %v5936_v23 = vmul.f32 0.2, %v7664_v56  ;;  %v7667_v57 = vadd.f32 %v5927_v52, %v3515_v53  ;;  %v5929_v58 = vpop.f32.mrb[14].mxu1  ;;  %v5684_v59 = vpop.f32.mrb[15].mxu0  ;;  %7632 = vmatprep.subr.bf16.mxu1 %v9042_v48 }
 0x51f   :  { %vm5933_vm14 = vcmp.gt.f32.partialorder %v7665_v14, 0.0  ;;  %v5937_v1 = vmul.f32 0.2, %v7665_v14  ;;  %v5930_v0 = vpop.f32.mrb[15].mxu1  ;;  %v5938_v34 = vmul.f32 0.2, %v7666_v37 }
 0x520   :  { %v5940_v27 = vsel %vm5932_vm13, %v7664_v56, %v5936_v23  ;;  %vm5935_vm15 = vcmp.gt.f32.partialorder %v7667_v57, 0.0  ;;  %v5939_v61 = vmul.f32 0.2, %v7667_v57  ;;  %vm5934_vm0 = vcmp.gt.f32.partialorder %v7666_v37, 0.0  ;;  %v6012_v53 = vld [vmem:[%s11967_s7] sm:$0x3] }
 0x521   :  { %v5941_v55 = vsel %vm5933_vm14, %v7665_v14, %v5937_v1  ;;  %v5944_v6 = vpack.c.bf16 %v5940_v27, %v5940_v27  ;;  %v5942_v39 = vsel %vm5934_vm0, %v7666_v37, %v5938_v34  ;;  %v6017_v54 = vrot.slane %v6012_v53, %v10459_v44  ;;  %v9009_v0 = vld [vmem:[%s11970_s10 + $0x10] sm:$0xff]  }
 0x522   :  { %v5945_v63 = vpack.c.bf16 %v5941_v55, %v5941_v55  ;;  %v5943_v5 = vsel %vm5935_vm15, %v7667_v57, %v5939_v61  ;;  %v5946_v40 = vpack.c.bf16 %v5942_v39, %v5942_v39  ;;  %v6021_v56 = vrot.slane %v6012_v53, %v10462_v45  ;;  %v9007_v61 = vld [vmem:[%s11970_s10] sm:$0xff]   ;;  %v9008_v45 = vld [vmem:[%s11970_s10 + $0x8] sm:$0xff]   ;;  %v9010_v55 = vld [vmem:[%s11970_s10 + $0x18] sm:$0xff]  }
 0x523   :  { %v5947_v8 = vpack.c.bf16 %v5943_v5, %v5943_v5  ;;  %v9013_v5 = vld [vmem:[%s11970_s10 + $0x30] sm:$0xff]  }
 0x524   :  { %6376 = vmatprep.mubr.bf16.mxu0 %v5945_v63  ;;  %v9011_v63 = vld [vmem:[%s11970_s10 + $0x20] sm:$0xff]  }
 0x525   :  { %6377 = vmatmul.mubr.bf16.vlgmr.msra.gmra.mrb[16].mxu0 %v5944_v6  ;;  %v9014_v6 = vld [vmem:[%s11970_s10 + $0x38] sm:$0xff]  }
 0x526   :  { %6386 = vmatpush1.bf16.msra.mxu0 %v8943_v46  ;;  %6417 = vmatprep.mubr.bf16.mxu0 %v5947_v8  ;;  %v9012_v46 = vld [vmem:[%s11970_s10 + $0x28] sm:$0xff]   ;;  %v7575_v8 = vld [vmem:[%s11969_s9] ss:$0 sm:$0xff]  ;;  %s9017_s9 = scalar_lea.vmem %s6736_s27, 32 }
 0x527   :  { %6387 = vmatprep.subr.bf16.mxu0 %v8948_v7  ;;  %p9018_p0 = scmp.ne.s32.totalorder %s6736_s27, %s9017_s9  ;;  %p9023_p2 = scmp.lt.s32.totalorder %s9017_s9, %s9017_s9 }
 0x529   :  { %p9024_p3 = por %p9023_p2, %p9022_p1 }
 0x52a   :  { %6388 = vmatpush1.bf16.msra.mxu0 %v8946_v30 }
 0x52b   :  { %6389 = vmatprep.subr.bf16.mxu0 %v8951_v11  ;;  %p9025_p4 = pnand %p9024_p3, %p9018_p0 }
 0x52e   :  { %6390 = vmatpush1.bf16.msra.mxu0 %v8949_v12 }
 0x52f   :  { %6391 = vmatprep.subr.bf16.mxu0 %v8954_v13 }
 0x532   :  { %6392 = vmatpush1.bf16.msra.mxu0 %v8952_v17 }
 0x533   :  { %6393 = vmatprep.subr.bf16.mxu0 %v8957_v18 }
 0x536   :  { %6394 = vmatpush1.bf16.msra.mxu0 %v8955_v22 }
 0x537   :  { %6395 = vmatprep.subr.bf16.mxu0 %v8960_v51 }
 0x53a   :  { %6396 = vmatpush1.bf16.msra.mxu0 %v8958_v24  ;;  %v7592_v24 = vld [vmem:[%s11971_s11] ss:$0 sm:$0xff] }
 0x53b   :  { %6397 = vmatprep.subr.bf16.mxu0 %v8963_v25 }
 0x53e   :  { %6398 = vmatpush1.bf16.msra.mxu0 %v8961_v26 }
 0x53f   :  { %6399 = vmatprep.subr.bf16.mxu0 %v8966_v21 }
 0x542   :  { %6400 = vmatpush1.bf16.msra.mxu0 %v8964_v43 }
 0x543   :  { %6401 = vmatprep.subr.bf16.mxu0 %v8969_v9 }
 0x546   :  { %6402 = vmatpush1.bf16.msra.mxu0 %v8967_v28 }
 0x547   :  { %6403 = vmatprep.subr.bf16.mxu0 %v8972_v20 }
 0x54a   :  { %6404 = vmatpush1.bf16.msra.mxu0 %v8970_v29 }
 0x54b   :  { %6405 = vmatprep.subr.bf16.mxu0 %v8975_v3 }
 0x54e   :  { %6406 = vmatpush1.bf16.msra.mxu0 %v8973_v50 }
 0x54f   :  { %6407 = vmatprep.subr.bf16.mxu0 %v8978_v19 }
 0x552   :  { %6408 = vmatpush1.bf16.msra.mxu0 %v8976_v10 }
 0x553   :  { %6409 = vmatprep.subr.bf16.mxu0 %v8981_v31 }
 0x556   :  { %6410 = vmatpush1.bf16.msra.mxu0 %v8979_v42 }
 0x557   :  { %6411 = vmatprep.subr.bf16.mxu0 %v8984_v35 }
 0x55a   :  { %6412 = vmatpush1.bf16.msra.mxu0 %v8982_v33 }
 0x55b   :  { %6413 = vmatprep.subr.bf16.mxu0 %v8987_v36 }
 0x55e   :  { %6414 = vmatpush1.bf16.msra.mxu0 %v8985_v16 }
 0x55f   :  { %6415 = vmatprep.subr.bf16.mxu0 %v8990_v60 }
 0x562   :  { %6416 = vmatpush1.bf16.msra.mxu0 %v8988_v38 }
 0x565   :  { %6418 = vmatmul.mubr.bf16.vlgmr.msra.gmra.mrb[16].mxu0 %v5946_v40 }
 0x638   :  { %v6419_v49 = vpop.f32.mrb[16].mxu0 }
 0x639   :  { %v7668_v15 = vadd.f32 %v6419_v49, %v6017_v54  ;;  %v6421_v14 = vpop.f32.mrb[17].mxu0 }
 0x63a   :  { %v7669_v52 = vadd.f32 %v6421_v14, %v6021_v56  ;;  %v6423_v2 = vpop.f32.mrb[18].mxu0 }
 0x63b   :  { %vm6426_vm1 = vcmp.gt.f32.partialorder %v7668_v15, 0.0  ;;  %v6428_v23 = vmul.f32 0.2, %v7668_v15  ;;  %v6424_v57 = vpop.f32.mrb[19].mxu0 }
 0x63c   :  { %vm6427_vm2 = vcmp.gt.f32.partialorder %v7669_v52, 0.0  ;;  %v6429_v58 = vmul.f32 0.2, %v7669_v52 }
 0x63d   :  { %v6430_v59 = vsel %vm6426_vm1, %v7668_v15, %v6428_v23 }
 0x63e   :  { %v6431_v1 = vsel %vm6427_vm2, %v7669_v52, %v6429_v58  ;;  %v6432_v44 = vpack.c.bf16 %v6430_v59, %v6430_v59 }
 0x63f   :  { %v6433_v27 = vpack.c.bf16 %v6431_v1, %v6431_v1 }
 0x641   :  { %6601 = vmatprep.mubr.bf16.mxu1 %v6433_v27 }
 0x642   :  { %6602 = vmatmul.mubr.bf16.vlgmr.msra.gmra.mrb[16].mxu1 %v6432_v44 }
 0x643   :  { %7633 = vmatpush3.bf16.msra.mxu1 %v9007_v61  ;;  %7648 = vmatprep.mubr.msk.bf16.mxu1 %vm9043_vm3, %v9042_v48 }
 0x644   :  { %7634 = vmatprep.subr.bf16.mxu1 %v9042_v48 }
 0x647   :  { %7635 = vmatpush3.bf16.msra.mxu1 %v9008_v45 }
 0x648   :  { %7636 = vmatprep.subr.bf16.mxu1 %v9042_v48 }
 0x64b   :  { %7637 = vmatpush3.bf16.msra.mxu1 %v9009_v0 }
 0x64c   :  { %7638 = vmatprep.subr.bf16.mxu1 %v9042_v48 }
 0x64f   :  { %7639 = vmatpush3.bf16.msra.mxu1 %v9010_v55 }
 0x650   :  { %7640 = vmatprep.subr.bf16.mxu1 %v9042_v48 }
 0x653   :  { %7641 = vmatpush3.bf16.msra.mxu1 %v9011_v63 }
 0x654   :  { %7642 = vmatprep.subr.bf16.mxu1 %v9042_v48 }
 0x657   :  { %7643 = vmatpush3.bf16.msra.mxu1 %v9012_v46 }
 0x658   :  { %7644 = vmatprep.subr.bf16.mxu1 %v9042_v48 }
 0x65b   :  { %7645 = vmatpush3.bf16.msra.mxu1 %v9013_v5 }
 0x65c   :  { %7646 = vmatprep.subr.bf16.mxu1 %v9042_v48 }
 0x65f   :  { %7647 = vmatpush3.bf16.msra.mxu1 %v9014_v6 }
 0x715   :  { %v7617_v7 = vpop.f32.mrb[16].mxu1 }
 0x716   :  { %v7618_v30 = vpop.f32.mrb[17].mxu1 }
 0x717   :  { %v7619_v11 = vadd.f32 %v7618_v30, %v7617_v7  ;;  %v7620_v12 = vpop.f32.mrb[18].mxu1 }
 0x718   :  { %v7621_v13 = vpop.f32.mrb[19].mxu1 }
 0x719   :  { %v6604_v17 = vadd.f32 %v7619_v11, %v7575_v8 }
 0x71b   :  { %vm6609_vm4 = vcmp.gt.f32.partialorder %v6604_v17, 0.0  ;;  %v6610_v18 = vmul.f32 0.2, %v6604_v17 }
 0x71d   :  { %v6611_v22 = vsel %vm6609_vm4, %v6604_v17, %v6610_v18 }
 0x71e   :  { %v6612_v51 = vpack.c.bf16 %v6611_v22, %v6611_v22 }
 0x720   :  { %7649 = vmatmul.mubr.bf16.vlgmr.msra.gmra.mrb[20].mxu1 %v6612_v51 }
 0x7f3   :  { %v6718_v25 = vpop.f32.mrb[20].mxu1 }
 0x7f4   :  { %v6719_v26 = vadd.f32 %v7592_v24, %v6718_v25  ;;  %v7650_v21 = vpop.f32.mrb[21].mxu1 }
 0x7f5   :  { %v6721_v43 = vpop.f32.mrb[22].mxu1 }
 0x7f6   :  { %v6725_v9 = vmul.f32 0.2, %v6719_v26  ;;  %v7651_v28 = vpop.f32.mrb[23].mxu1  ;;  %vm6724_vm5 = vcmp.gt.f32.partialorder %v6719_v26, 0.0 }
 0x7f8   :  { %v6726_v20 = vsel %vm6724_vm5, %v6719_v26, %v6725_v9 }
 0x7f9   :  { %6728 = vst.msk [vmem:[#allocation2] sm:$0x3] %vm6727_vm6, %v6726_v20 }
 0x7fa   :  { %9028 = shalt.err (!%p9025_p4)
}
 0x7fb   :  { %s9029_s28 = scalar_lea.hbm %s11972_s12, 32 }
 0x7fc   :  { %p9030_p5 = scmp.ne.s32.totalorder %s11972_s12, %s9029_s28  ;;  %p9033_p6 = scmp.lt.u32.totalorder %s9029_s28, %s11972_s12 }
 0x7fe   :  { %p9035_p7 = pnand %p9033_p6, %p9030_p5 }
 0x800   :  { %9038 = shalt.err (!%p9035_p7)
}
 0x801   :  { %6738 = dma.vmem_to_hbm [thread:$0]  %s6736_s27, 32, %s11972_s12, [#allocation3]  }
 0x802   :  { %9039 = dma.done.wait [#allocation3], 32  }
 0x803   :  { %9040 = vsyncadd [#allocation3], 4294967264 }
 0x804   :  { %6742 = vsyncpa [#allocation3], 1 }

</bundles_post_ra>
